<compile_context>
chip_gen: v7x
topology: tpu7x:2x2x1
jax: 0.10.0
libtpu: 0.0.40
codegen_flags: <defaults>
</compile_context>

<pallas_src>
import jax
import jax.numpy as jnp
from jax import lax
from jax.experimental import pallas as pl
from jax.experimental.pallas import tpu as pltpu

S = 7            # grid cells per side
C = 30           # channels
NCELL = S * S    # 49


# --------------------------------------------------------------------------
# In-kernel rotated-box geometry (pure jnp, traced inside the Pallas kernel).
# Per-cell quantities are (1, 49); per-corner / per-plane quantities are
# (4, 49) with the corner/plane index on the sublane axis.
# --------------------------------------------------------------------------
def _corner_sign_patterns():
    """(4,1) f32 corner sign patterns and edge-delta patterns, built from an
    iota (no dense vector constants).  Corner order matches the reference
    rotate_box(): (x1,y1), (x2,y1), (x2,y2), (x1,y2)."""
    ci = lax.broadcasted_iota(jnp.int32, (4, 1), 0).astype(jnp.float32)
    sx = jnp.where((ci >= 1.0) & (ci <= 2.0), 1.0, -1.0)    # [-1,  1,  1, -1]
    sy = jnp.where(ci >= 2.0, 1.0, -1.0)                    # [-1, -1,  1,  1]
    sx_next = jnp.where(ci <= 1.0, 1.0, -1.0)               # sx of corner i+1
    dsx = sx_next - sx                                      # [ 2,  0, -2,  0]
    dsy = sx - sy                                           # [ 0,  2,  0, -2]
    return sx, sy, dsx, dsy


def _make_box(pxc, pyc, pw, ph, theta, m, n, signs):
    """Rotated box in the reference convention.  Returns:
      xs, ys   : (4, N) packed corner coordinates (sublane = corner index)
      px, py   : 4 individual (1, N) corner coordinates
      sex, sey : (4, N) orientation-corrected edge vectors (the clip planes)
      sign     : (1, N) +/-1 orientation of the corner loop
      area     : (1, N) |w*h|  (rotation preserves area)"""
    sx, sy, dsx, dsy = signs
    cx = (pxc + m) / 7.0
    cy = (pyc + n) / 7.0
    hw = 0.5 * pw
    hh = 0.5 * ph
    cth = jnp.cos(theta)          # EUP
    sth = jnp.sin(theta)
    # cv2.getRotationMatrix2D((cx,cy), theta*180/pi, 1):
    #   x' = cx + c*(x-cx) + s*(y-cy) ;  y' = cy - s*(x-cx) + c*(y-cy)
    ox = sx * hw                  # (4, N) pre-rotation corner offsets
    oy = sy * hh
    xs = cx + cth * ox + sth * oy
    ys = cy - sth * ox + cth * oy
    dox = dsx * hw                # pre-rotation edge vectors
    doy = dsy * hh
    ex = cth * dox + sth * doy    # rotated edge vectors (corner i -> i+1)
    ey = cth * doy - sth * dox
    px = [xs[k:k + 1, :] for k in range(4)]
    py = [ys[k:k + 1, :] for k in range(4)]
    wh = pw * ph                  # signed shoelace area of the corner loop
    sign = jnp.where(wh >= 0.0, 1.0, -1.0)
    area = jnp.abs(wh)
    sex = sign * ex               # hoisted orientation-sign multiply
    sey = sign * ey
    return xs, ys, px, py, sex, sey, sign, area


def _dist_to_planes(px, py, q):
    """D[j] = (4,N) signed distances of P-corner j to Q's 4 orientation-
    corrected half-planes (>= 0 means inside).  d_b of edge j is D[j+1], so
    the matrix is computed once and reused."""
    qxs, qys, _, _, sex, sey, _, _ = q
    return [sex * (py[j] - qys) - sey * (px[j] - qxs) for j in range(4)]


def _clipped_boundary_integral(d_mat, px, py, sign):
    """Sum over P's 4 edges of the line integral of (x dy - y dx) along the
    part of the edge inside Q.  Liang-Barsky clipping batched over Q's 4
    planes on the sublane axis; CCW orientation enforced via `sign`."""
    tot = None
    for j in range(4):
        k = (j + 1) % 4
        d_a = d_mat[j]                       # (4, N)
        d_b = d_mat[k]                       # reuse: d_b(edge j) = d_a(edge j+1)
        denom = d_a - d_b
        zero = denom == 0.0
        rden = pl.reciprocal(jnp.where(zero, 1.0, denom), approx=True)   # EUP
        t_x = d_a * rden
        lo_c = jnp.where(denom < 0.0, t_x,                       # entering
                         jnp.where(zero & (d_a < 0.0), 2.0, 0.0))  # fully out
        hi_c = jnp.where(denom > 0.0, t_x, 1.0)                  # exiting
        t_lo = jnp.maximum(jnp.max(lo_c, axis=0, keepdims=True), 0.0)
        t_hi = jnp.minimum(jnp.min(hi_c, axis=0, keepdims=True), 1.0)
        ax, ay, bx, by = px[j], py[j], px[k], py[k]
        dx = bx - ax
        dy = by - ay
        cax = ax + t_lo * dx
        cay = ay + t_lo * dy
        cbx = ax + t_hi * dx
        cby = ay + t_hi * dy
        c = jnp.where(t_lo < t_hi, cax * cby - cbx * cay, 0.0)
        tot = c if tot is None else tot + c
    return sign * tot


def _skew_iou(p, q):
    """IoU of two rotated rectangles via Green's-theorem convex clipping."""
    # TODO(synk): exactly coincident shared boundary segments (a measure-zero
    # degenerate case that shapely resolves exactly) are double counted here.
    _, _, p_px, p_py, _, _, p_sign, p_area = p
    _, _, q_px, q_py, _, _, q_sign, q_area = q
    d_pq = _dist_to_planes(p_px, p_py, q)     # P corners vs Q planes
    d_qp = _dist_to_planes(q_px, q_py, p)     # Q corners vs P planes
    boundary = (_clipped_boundary_integral(d_pq, p_px, p_py, p_sign)
                + _clipped_boundary_integral(d_qp, q_px, q_py, q_sign))
    inter = jnp.maximum(0.5 * boundary, 0.0)
    union = p_area + q_area - inter
    r_union = pl.reciprocal(jnp.where(union > 0.0, union, 1.0), approx=True)
    valid = (p_area > 0.0) & (q_area > 0.0) & (union > 0.0)
    return jnp.where(valid, inter * r_union, 0.0)


# --------------------------------------------------------------------------
# Pallas kernel: skew IoU + masked per-cell loss terms + global reduction.
# --------------------------------------------------------------------------
def _yolo_loss_kernel(pred_ref, lab_ref, out_ref):
    # pred_ref / lab_ref : (B, 30, 49) f32 VMEM, grid cells flattened on lanes
    # out_ref            : (1, 1) f32 SMEM, loss already divided by 6
    nb = pred_ref.shape[0]

    # (m, n) grid-cell offsets generated in-kernel (lane iota, no extra DMA).
    # NOTE: like the reference, x uses m (the size(-2) index) and y uses n.
    j = lax.broadcasted_iota(jnp.int32, (1, NCELL), 1).astype(jnp.float32)
    m = jnp.floor(j * (1.0 / 7.0))        # exact for 0 <= j < 49
    n = j - 7.0 * m

    signs = _corner_sign_patterns()
    sq = lambda x: x * x

    total = jnp.float32(0.0)
    for b in range(nb):                   # static unroll; B is tiny for a loss
        # Grouped slab loads; channel rows are register slices of the slab.
        pbox = pred_ref[b, 0:12, :]       # (12, 49)
        lbox = lab_ref[b, 0:12, :]
        P = [pbox[c:c + 1, :] for c in range(12)]
        L = [lbox[c:c + 1, :] for c in range(12)]

        gt = _make_box(L[0], L[1], L[2], L[3], L[4], m, n, signs)
        b1 = _make_box(P[0], P[1], P[2], P[3], P[4], m, n, signs)
        b2 = _make_box(P[6], P[7], P[8], P[9], P[10], m, n, signs)
        iou1 = _skew_iou(b1, gt)
        iou2 = _skew_iou(b2, gt)

        # In-kernel sqrt (EUP slot).  Like the reference, negative raw w/h
        # predictions would NaN (no clamp).
        coor1 = (5.0 * (sq(P[0] - L[0]) + sq(P[1] - L[1])
                        + sq(jnp.sqrt(P[2]) - jnp.sqrt(L[2]))
                        + sq(jnp.sqrt(P[3]) - jnp.sqrt(L[3])))
                 + 5.0 * sq(P[4] - L[4]))
        coor2 = (5.0 * (sq(P[6] - L[6]) + sq(P[7] - L[7])
                        + sq(jnp.sqrt(P[8]) - jnp.sqrt(L[8]))
                        + sq(jnp.sqrt(P[9]) - jnp.sqrt(L[9])))
                 + 5.0 * sq(P[10] - L[10]))
        conf1 = sq(P[5] - iou1)           # bbox1 confidence error vs skew IoU
        conf2 = sq(P[11] - iou2)          # bbox2 confidence error vs skew IoU

        obj_cell = jnp.where(iou1 >= iou2,
                             coor1 + conf1 + 0.5 * conf2,
                             coor2 + conf2 + 0.5 * conf1)

        # Class term on a narrow (18, 49) slab; sublane-dense VPU + XLU reduce.
        dcls = pred_ref[b, 12:C, :] - lab_ref[b, 12:C, :]
        obj_cell = obj_cell + jnp.sum(dcls * dcls, axis=0, keepdims=True)

        noobj_cell = 0.5 * (sq(P[5]) + sq(P[11]))

        cell = jnp.where(L[5] == 1.0, obj_cell, noobj_cell)   # exact ==1 mask
        total = total + jnp.sum(cell)

    # Reference divides by 6, not the batch size (inner loop shadows n).
    out_ref[0, 0] = total / 6.0


# --------------------------------------------------------------------------
# Wrapper (jit-able; the only HLO besides the pallas_call is a free reshape).
# --------------------------------------------------------------------------
def _loss_yolov1_impl(pred, labels):
    """pred, labels: (B, 30, 7, 7) float32 (NCHW, same as the PyTorch module)."""
    pred = jnp.asarray(pred, jnp.float32)
    labels = jnp.asarray(labels, jnp.float32)
    B = pred.shape[0]
    p3 = pred.reshape(B, C, NCELL)        # free bitcast, no transpose HLO
    l3 = labels.reshape(B, C, NCELL)

    total = pl.pallas_call(
        _yolo_loss_kernel,
        out_shape=jax.ShapeDtypeStruct((1, 1), jnp.float32),
        in_specs=[pl.BlockSpec(memory_space=pltpu.MemorySpace.VMEM)] * 2,
        out_specs=pl.BlockSpec(memory_space=pltpu.MemorySpace.SMEM),
    )(p3, l3)
    return total[0, 0]


loss_yolov1 = jax.jit(_loss_yolov1_impl)


if __name__ == "__main__":
    key = jax.random.PRNGKey(0)
    k_pred, k_lab, k_obj = jax.random.split(key, 3)

    B = 2
    # Keep values in (0.05, 0.95) so sqrt() terms stay real (trained-net regime).
    pred = jax.random.uniform(k_pred, (B, C, S, S), jnp.float32, 0.05, 0.95)
    labels = jax.random.uniform(k_lab, (B, C, S, S), jnp.float32, 0.05, 0.95)
    # Object-presence channel must be exactly 1.0 / 0.0 (reference tests ==1).
    obj_mask = jax.random.bernoulli(k_obj, 0.3, (B, S, S)).astype(jnp.float32)
    labels = labels.at[:, 5, :, :].set(obj_mask)

    loss = loss_yolov1(pred, labels)
    jax.block_until_ready(loss)
    print("KERNEL_OK")
</pallas_src>

<mosaic_0001>
module attributes {stable_mosaic.version = 11 : i64} {
  func.func @_yolo_loss_kernel(%arg0: memref<2x30x49xf32, #tpu.memory_space<vmem>>, %arg1: memref<2x30x49xf32, #tpu.memory_space<vmem>>, %arg2: memref<1x1xf32, #tpu.memory_space<smem>>) attributes {dimension_semantics = [], scalar_prefetch = 0 : i64, scratch_operands = 0 : i64, tpu.core_type = #tpu.core_type<tc>} {
    %0 = tpu.iota {dimensions = array<i32: 1>} : vector<1x49xi32>
    %1 = arith.sitofp %0 : vector<1x49xi32> to vector<1x49xf32>
    %cst = arith.constant 0.142857149 : f32
    %2 = vector.broadcast %cst : f32 to vector<1x49xf32>
    %3 = arith.mulf %1, %2 : vector<1x49xf32>
    %4 = math.floor %3 : vector<1x49xf32>
    %cst_0 = arith.constant 7.000000e+00 : f32
    %5 = vector.broadcast %cst_0 : f32 to vector<1x49xf32>
    %6 = arith.mulf %5, %4 : vector<1x49xf32>
    %7 = arith.subf %1, %6 : vector<1x49xf32>
    %8 = tpu.iota {dimensions = array<i32: 0>} : vector<4x1xi32>
    %9 = arith.sitofp %8 : vector<4x1xi32> to vector<4x1xf32>
    %cst_1 = arith.constant 1.000000e+00 : f32
    %10 = vector.broadcast %cst_1 : f32 to vector<4x1xf32>
    %11 = arith.cmpf oge, %9, %10 : vector<4x1xf32>
    %cst_2 = arith.constant 2.000000e+00 : f32
    %12 = vector.broadcast %cst_2 : f32 to vector<4x1xf32>
    %13 = arith.cmpf ole, %9, %12 : vector<4x1xf32>
    %14 = arith.andi %11, %13 : vector<4x1xi1>
    %cst_3 = arith.constant 1.000000e+00 : f32
    %cst_4 = arith.constant -1.000000e+00 : f32
    %15 = vector.broadcast %cst_3 : f32 to vector<4x1xf32>
    %16 = vector.broadcast %cst_4 : f32 to vector<4x1xf32>
    %17 = arith.select %14, %15, %16 : vector<4x1xi1>, vector<4x1xf32>
    %cst_5 = arith.constant 2.000000e+00 : f32
    %18 = vector.broadcast %cst_5 : f32 to vector<4x1xf32>
    %19 = arith.cmpf oge, %9, %18 : vector<4x1xf32>
    %cst_6 = arith.constant 1.000000e+00 : f32
    %cst_7 = arith.constant -1.000000e+00 : f32
    %20 = vector.broadcast %cst_6 : f32 to vector<4x1xf32>
    %21 = vector.broadcast %cst_7 : f32 to vector<4x1xf32>
    %22 = arith.select %19, %20, %21 : vector<4x1xi1>, vector<4x1xf32>
    %cst_8 = arith.constant 1.000000e+00 : f32
    %23 = vector.broadcast %cst_8 : f32 to vector<4x1xf32>
    %24 = arith.cmpf ole, %9, %23 : vector<4x1xf32>
    %cst_9 = arith.constant 1.000000e+00 : f32
    %cst_10 = arith.constant -1.000000e+00 : f32
    %25 = vector.broadcast %cst_9 : f32 to vector<4x1xf32>
    %26 = vector.broadcast %cst_10 : f32 to vector<4x1xf32>
    %27 = arith.select %24, %25, %26 : vector<4x1xi1>, vector<4x1xf32>
    %28 = arith.subf %27, %17 : vector<4x1xf32>
    %29 = arith.subf %17, %22 : vector<4x1xf32>
    %c0 = arith.constant 0 : index
    %c0_11 = arith.constant 0 : index
    %c0_12 = arith.constant 0 : index
    %30 = vector.load %arg0[%c0, %c0_11, %c0_12] : memref<2x30x49xf32, #tpu.memory_space<vmem>>, vector<1x12x49xf32>
    %31 = vector.shape_cast %30 : vector<1x12x49xf32> to vector<12x49xf32>
    %c0_13 = arith.constant 0 : index
    %c0_14 = arith.constant 0 : index
    %c0_15 = arith.constant 0 : index
    %32 = vector.load %arg1[%c0_13, %c0_14, %c0_15] : memref<2x30x49xf32, #tpu.memory_space<vmem>>, vector<1x12x49xf32>
    %33 = vector.shape_cast %32 : vector<1x12x49xf32> to vector<12x49xf32>
    %34 = vector.extract_strided_slice %31 {offsets = [0, 0], sizes = [1, 49], strides = [1, 1]} : vector<12x49xf32> to vector<1x49xf32>
    %35 = vector.extract_strided_slice %31 {offsets = [1, 0], sizes = [1, 49], strides = [1, 1]} : vector<12x49xf32> to vector<1x49xf32>
    %36 = vector.extract_strided_slice %31 {offsets = [2, 0], sizes = [1, 49], strides = [1, 1]} : vector<12x49xf32> to vector<1x49xf32>
    %37 = vector.extract_strided_slice %31 {offsets = [3, 0], sizes = [1, 49], strides = [1, 1]} : vector<12x49xf32> to vector<1x49xf32>
    %38 = vector.extract_strided_slice %31 {offsets = [4, 0], sizes = [1, 49], strides = [1, 1]} : vector<12x49xf32> to vector<1x49xf32>
    %39 = vector.extract_strided_slice %31 {offsets = [5, 0], sizes = [1, 49], strides = [1, 1]} : vector<12x49xf32> to vector<1x49xf32>
    %40 = vector.extract_strided_slice %31 {offsets = [6, 0], sizes = [1, 49], strides = [1, 1]} : vector<12x49xf32> to vector<1x49xf32>
    %41 = vector.extract_strided_slice %31 {offsets = [7, 0], sizes = [1, 49], strides = [1, 1]} : vector<12x49xf32> to vector<1x49xf32>
    %42 = vector.extract_strided_slice %31 {offsets = [8, 0], sizes = [1, 49], strides = [1, 1]} : vector<12x49xf32> to vector<1x49xf32>
    %43 = vector.extract_strided_slice %31 {offsets = [9, 0], sizes = [1, 49], strides = [1, 1]} : vector<12x49xf32> to vector<1x49xf32>
    %44 = vector.extract_strided_slice %31 {offsets = [10, 0], sizes = [1, 49], strides = [1, 1]} : vector<12x49xf32> to vector<1x49xf32>
    %45 = vector.extract_strided_slice %31 {offsets = [11, 0], sizes = [1, 49], strides = [1, 1]} : vector<12x49xf32> to vector<1x49xf32>
    %46 = vector.extract_strided_slice %33 {offsets = [0, 0], sizes = [1, 49], strides = [1, 1]} : vector<12x49xf32> to vector<1x49xf32>
    %47 = vector.extract_strided_slice %33 {offsets = [1, 0], sizes = [1, 49], strides = [1, 1]} : vector<12x49xf32> to vector<1x49xf32>
    %48 = vector.extract_strided_slice %33 {offsets = [2, 0], sizes = [1, 49], strides = [1, 1]} : vector<12x49xf32> to vector<1x49xf32>
    %49 = vector.extract_strided_slice %33 {offsets = [3, 0], sizes = [1, 49], strides = [1, 1]} : vector<12x49xf32> to vector<1x49xf32>
    %50 = vector.extract_strided_slice %33 {offsets = [4, 0], sizes = [1, 49], strides = [1, 1]} : vector<12x49xf32> to vector<1x49xf32>
    %51 = vector.extract_strided_slice %33 {offsets = [5, 0], sizes = [1, 49], strides = [1, 1]} : vector<12x49xf32> to vector<1x49xf32>
    %52 = vector.extract_strided_slice %33 {offsets = [6, 0], sizes = [1, 49], strides = [1, 1]} : vector<12x49xf32> to vector<1x49xf32>
    %53 = vector.extract_strided_slice %33 {offsets = [7, 0], sizes = [1, 49], strides = [1, 1]} : vector<12x49xf32> to vector<1x49xf32>
    %54 = vector.extract_strided_slice %33 {offsets = [8, 0], sizes = [1, 49], strides = [1, 1]} : vector<12x49xf32> to vector<1x49xf32>
    %55 = vector.extract_strided_slice %33 {offsets = [9, 0], sizes = [1, 49], strides = [1, 1]} : vector<12x49xf32> to vector<1x49xf32>
    %56 = vector.extract_strided_slice %33 {offsets = [10, 0], sizes = [1, 49], strides = [1, 1]} : vector<12x49xf32> to vector<1x49xf32>
    %57 = arith.addf %46, %4 : vector<1x49xf32>
    %cst_16 = arith.constant 7.000000e+00 : f32
    %58 = vector.broadcast %cst_16 : f32 to vector<1x49xf32>
    %59 = arith.divf %57, %58 : vector<1x49xf32>
    %60 = arith.addf %47, %7 : vector<1x49xf32>
    %cst_17 = arith.constant 7.000000e+00 : f32
    %61 = vector.broadcast %cst_17 : f32 to vector<1x49xf32>
    %62 = arith.divf %60, %61 : vector<1x49xf32>
    %cst_18 = arith.constant 5.000000e-01 : f32
    %63 = vector.broadcast %cst_18 : f32 to vector<1x49xf32>
    %64 = arith.mulf %63, %48 : vector<1x49xf32>
    %cst_19 = arith.constant 5.000000e-01 : f32
    %65 = vector.broadcast %cst_19 : f32 to vector<1x49xf32>
    %66 = arith.mulf %65, %49 : vector<1x49xf32>
    %67 = math.cos %50 : vector<1x49xf32>
    %68 = math.sin %50 : vector<1x49xf32>
    %69 = vector.broadcast %17 : vector<4x1xf32> to vector<4x49xf32>
    %70 = vector.broadcast %64 : vector<1x49xf32> to vector<4x49xf32>
    %71 = arith.mulf %69, %70 : vector<4x49xf32>
    %72 = vector.broadcast %22 : vector<4x1xf32> to vector<4x49xf32>
    %73 = vector.broadcast %66 : vector<1x49xf32> to vector<4x49xf32>
    %74 = arith.mulf %72, %73 : vector<4x49xf32>
    %75 = vector.broadcast %67 : vector<1x49xf32> to vector<4x49xf32>
    %76 = arith.mulf %75, %71 : vector<4x49xf32>
    %77 = vector.broadcast %59 : vector<1x49xf32> to vector<4x49xf32>
    %78 = arith.addf %77, %76 : vector<4x49xf32>
    %79 = vector.broadcast %68 : vector<1x49xf32> to vector<4x49xf32>
    %80 = arith.mulf %79, %74 : vector<4x49xf32>
    %81 = arith.addf %78, %80 : vector<4x49xf32>
    %82 = vector.broadcast %68 : vector<1x49xf32> to vector<4x49xf32>
    %83 = arith.mulf %82, %71 : vector<4x49xf32>
    %84 = vector.broadcast %62 : vector<1x49xf32> to vector<4x49xf32>
    %85 = arith.subf %84, %83 : vector<4x49xf32>
    %86 = vector.broadcast %67 : vector<1x49xf32> to vector<4x49xf32>
    %87 = arith.mulf %86, %74 : vector<4x49xf32>
    %88 = arith.addf %85, %87 : vector<4x49xf32>
    %89 = vector.broadcast %28 : vector<4x1xf32> to vector<4x49xf32>
    %90 = vector.broadcast %64 : vector<1x49xf32> to vector<4x49xf32>
    %91 = arith.mulf %89, %90 : vector<4x49xf32>
    %92 = vector.broadcast %29 : vector<4x1xf32> to vector<4x49xf32>
    %93 = vector.broadcast %66 : vector<1x49xf32> to vector<4x49xf32>
    %94 = arith.mulf %92, %93 : vector<4x49xf32>
    %95 = vector.broadcast %67 : vector<1x49xf32> to vector<4x49xf32>
    %96 = arith.mulf %95, %91 : vector<4x49xf32>
    %97 = vector.broadcast %68 : vector<1x49xf32> to vector<4x49xf32>
    %98 = arith.mulf %97, %94 : vector<4x49xf32>
    %99 = arith.addf %96, %98 : vector<4x49xf32>
    %100 = vector.broadcast %67 : vector<1x49xf32> to vector<4x49xf32>
    %101 = arith.mulf %100, %94 : vector<4x49xf32>
    %102 = vector.broadcast %68 : vector<1x49xf32> to vector<4x49xf32>
    %103 = arith.mulf %102, %91 : vector<4x49xf32>
    %104 = arith.subf %101, %103 : vector<4x49xf32>
    %105 = vector.extract_strided_slice %81 {offsets = [0, 0], sizes = [1, 49], strides = [1, 1]} : vector<4x49xf32> to vector<1x49xf32>
    %106 = vector.extract_strided_slice %81 {offsets = [1, 0], sizes = [1, 49], strides = [1, 1]} : vector<4x49xf32> to vector<1x49xf32>
    %107 = vector.extract_strided_slice %81 {offsets = [2, 0], sizes = [1, 49], strides = [1, 1]} : vector<4x49xf32> to vector<1x49xf32>
    %108 = vector.extract_strided_slice %81 {offsets = [3, 0], sizes = [1, 49], strides = [1, 1]} : vector<4x49xf32> to vector<1x49xf32>
    %109 = vector.extract_strided_slice %88 {offsets = [0, 0], sizes = [1, 49], strides = [1, 1]} : vector<4x49xf32> to vector<1x49xf32>
    %110 = vector.extract_strided_slice %88 {offsets = [1, 0], sizes = [1, 49], strides = [1, 1]} : vector<4x49xf32> to vector<1x49xf32>
    %111 = vector.extract_strided_slice %88 {offsets = [2, 0], sizes = [1, 49], strides = [1, 1]} : vector<4x49xf32> to vector<1x49xf32>
    %112 = vector.extract_strided_slice %88 {offsets = [3, 0], sizes = [1, 49], strides = [1, 1]} : vector<4x49xf32> to vector<1x49xf32>
    %113 = arith.mulf %48, %49 : vector<1x49xf32>
    %cst_20 = arith.constant 0.000000e+00 : f32
    %114 = vector.broadcast %cst_20 : f32 to vector<1x49xf32>
    %115 = arith.cmpf oge, %113, %114 : vector<1x49xf32>
    %cst_21 = arith.constant 1.000000e+00 : f32
    %cst_22 = arith.constant -1.000000e+00 : f32
    %116 = vector.broadcast %cst_21 : f32 to vector<1x49xf32>
    %117 = vector.broadcast %cst_22 : f32 to vector<1x49xf32>
    %118 = arith.select %115, %116, %117 : vector<1x49xi1>, vector<1x49xf32>
    %119 = math.absf %113 : vector<1x49xf32>
    %120 = vector.broadcast %118 : vector<1x49xf32> to vector<4x49xf32>
    %121 = arith.mulf %120, %99 : vector<4x49xf32>
    %122 = vector.broadcast %118 : vector<1x49xf32> to vector<4x49xf32>
    %123 = arith.mulf %122, %104 : vector<4x49xf32>
    %124 = arith.addf %34, %4 : vector<1x49xf32>
    %cst_23 = arith.constant 7.000000e+00 : f32
    %125 = vector.broadcast %cst_23 : f32 to vector<1x49xf32>
    %126 = arith.divf %124, %125 : vector<1x49xf32>
    %127 = arith.addf %35, %7 : vector<1x49xf32>
    %cst_24 = arith.constant 7.000000e+00 : f32
    %128 = vector.broadcast %cst_24 : f32 to vector<1x49xf32>
    %129 = arith.divf %127, %128 : vector<1x49xf32>
    %cst_25 = arith.constant 5.000000e-01 : f32
    %130 = vector.broadcast %cst_25 : f32 to vector<1x49xf32>
    %131 = arith.mulf %130, %36 : vector<1x49xf32>
    %cst_26 = arith.constant 5.000000e-01 : f32
    %132 = vector.broadcast %cst_26 : f32 to vector<1x49xf32>
    %133 = arith.mulf %132, %37 : vector<1x49xf32>
    %134 = math.cos %38 : vector<1x49xf32>
    %135 = math.sin %38 : vector<1x49xf32>
    %136 = vector.broadcast %17 : vector<4x1xf32> to vector<4x49xf32>
    %137 = vector.broadcast %131 : vector<1x49xf32> to vector<4x49xf32>
    %138 = arith.mulf %136, %137 : vector<4x49xf32>
    %139 = vector.broadcast %22 : vector<4x1xf32> to vector<4x49xf32>
    %140 = vector.broadcast %133 : vector<1x49xf32> to vector<4x49xf32>
    %141 = arith.mulf %139, %140 : vector<4x49xf32>
    %142 = vector.broadcast %134 : vector<1x49xf32> to vector<4x49xf32>
    %143 = arith.mulf %142, %138 : vector<4x49xf32>
    %144 = vector.broadcast %126 : vector<1x49xf32> to vector<4x49xf32>
    %145 = arith.addf %144, %143 : vector<4x49xf32>
    %146 = vector.broadcast %135 : vector<1x49xf32> to vector<4x49xf32>
    %147 = arith.mulf %146, %141 : vector<4x49xf32>
    %148 = arith.addf %145, %147 : vector<4x49xf32>
    %149 = vector.broadcast %135 : vector<1x49xf32> to vector<4x49xf32>
    %150 = arith.mulf %149, %138 : vector<4x49xf32>
    %151 = vector.broadcast %129 : vector<1x49xf32> to vector<4x49xf32>
    %152 = arith.subf %151, %150 : vector<4x49xf32>
    %153 = vector.broadcast %134 : vector<1x49xf32> to vector<4x49xf32>
    %154 = arith.mulf %153, %141 : vector<4x49xf32>
    %155 = arith.addf %152, %154 : vector<4x49xf32>
    %156 = vector.broadcast %28 : vector<4x1xf32> to vector<4x49xf32>
    %157 = vector.broadcast %131 : vector<1x49xf32> to vector<4x49xf32>
    %158 = arith.mulf %156, %157 : vector<4x49xf32>
    %159 = vector.broadcast %29 : vector<4x1xf32> to vector<4x49xf32>
    %160 = vector.broadcast %133 : vector<1x49xf32> to vector<4x49xf32>
    %161 = arith.mulf %159, %160 : vector<4x49xf32>
    %162 = vector.broadcast %134 : vector<1x49xf32> to vector<4x49xf32>
    %163 = arith.mulf %162, %158 : vector<4x49xf32>
    %164 = vector.broadcast %135 : vector<1x49xf32> to vector<4x49xf32>
    %165 = arith.mulf %164, %161 : vector<4x49xf32>
    %166 = arith.addf %163, %165 : vector<4x49xf32>
    %167 = vector.broadcast %134 : vector<1x49xf32> to vector<4x49xf32>
    %168 = arith.mulf %167, %161 : vector<4x49xf32>
    %169 = vector.broadcast %135 : vector<1x49xf32> to vector<4x49xf32>
    %170 = arith.mulf %169, %158 : vector<4x49xf32>
    %171 = arith.subf %168, %170 : vector<4x49xf32>
    %172 = vector.extract_strided_slice %148 {offsets = [0, 0], sizes = [1, 49], strides = [1, 1]} : vector<4x49xf32> to vector<1x49xf32>
    %173 = vector.extract_strided_slice %148 {offsets = [1, 0], sizes = [1, 49], strides = [1, 1]} : vector<4x49xf32> to vector<1x49xf32>
    %174 = vector.extract_strided_slice %148 {offsets = [2, 0], sizes = [1, 49], strides = [1, 1]} : vector<4x49xf32> to vector<1x49xf32>
    %175 = vector.extract_strided_slice %148 {offsets = [3, 0], sizes = [1, 49], strides = [1, 1]} : vector<4x49xf32> to vector<1x49xf32>
    %176 = vector.extract_strided_slice %155 {offsets = [0, 0], sizes = [1, 49], strides = [1, 1]} : vector<4x49xf32> to vector<1x49xf32>
    %177 = vector.extract_strided_slice %155 {offsets = [1, 0], sizes = [1, 49], strides = [1, 1]} : vector<4x49xf32> to vector<1x49xf32>
    %178 = vector.extract_strided_slice %155 {offsets = [2, 0], sizes = [1, 49], strides = [1, 1]} : vector<4x49xf32> to vector<1x49xf32>
    %179 = vector.extract_strided_slice %155 {offsets = [3, 0], sizes = [1, 49], strides = [1, 1]} : vector<4x49xf32> to vector<1x49xf32>
    %180 = arith.mulf %36, %37 : vector<1x49xf32>
    %cst_27 = arith.constant 0.000000e+00 : f32
    %181 = vector.broadcast %cst_27 : f32 to vector<1x49xf32>
    %182 = arith.cmpf oge, %180, %181 : vector<1x49xf32>
    %cst_28 = arith.constant 1.000000e+00 : f32
    %cst_29 = arith.constant -1.000000e+00 : f32
    %183 = vector.broadcast %cst_28 : f32 to vector<1x49xf32>
    %184 = vector.broadcast %cst_29 : f32 to vector<1x49xf32>
    %185 = arith.select %182, %183, %184 : vector<1x49xi1>, vector<1x49xf32>
    %186 = math.absf %180 : vector<1x49xf32>
    %187 = vector.broadcast %185 : vector<1x49xf32> to vector<4x49xf32>
    %188 = arith.mulf %187, %166 : vector<4x49xf32>
    %189 = vector.broadcast %185 : vector<1x49xf32> to vector<4x49xf32>
    %190 = arith.mulf %189, %171 : vector<4x49xf32>
    %191 = arith.addf %40, %4 : vector<1x49xf32>
    %cst_30 = arith.constant 7.000000e+00 : f32
    %192 = vector.broadcast %cst_30 : f32 to vector<1x49xf32>
    %193 = arith.divf %191, %192 : vector<1x49xf32>
    %194 = arith.addf %41, %7 : vector<1x49xf32>
    %cst_31 = arith.constant 7.000000e+00 : f32
    %195 = vector.broadcast %cst_31 : f32 to vector<1x49xf32>
    %196 = arith.divf %194, %195 : vector<1x49xf32>
    %cst_32 = arith.constant 5.000000e-01 : f32
    %197 = vector.broadcast %cst_32 : f32 to vector<1x49xf32>
    %198 = arith.mulf %197, %42 : vector<1x49xf32>
    %cst_33 = arith.constant 5.000000e-01 : f32
    %199 = vector.broadcast %cst_33 : f32 to vector<1x49xf32>
    %200 = arith.mulf %199, %43 : vector<1x49xf32>
    %201 = math.cos %44 : vector<1x49xf32>
    %202 = math.sin %44 : vector<1x49xf32>
    %203 = vector.broadcast %17 : vector<4x1xf32> to vector<4x49xf32>
    %204 = vector.broadcast %198 : vector<1x49xf32> to vector<4x49xf32>
    %205 = arith.mulf %203, %204 : vector<4x49xf32>
    %206 = vector.broadcast %22 : vector<4x1xf32> to vector<4x49xf32>
    %207 = vector.broadcast %200 : vector<1x49xf32> to vector<4x49xf32>
    %208 = arith.mulf %206, %207 : vector<4x49xf32>
    %209 = vector.broadcast %201 : vector<1x49xf32> to vector<4x49xf32>
    %210 = arith.mulf %209, %205 : vector<4x49xf32>
    %211 = vector.broadcast %193 : vector<1x49xf32> to vector<4x49xf32>
    %212 = arith.addf %211, %210 : vector<4x49xf32>
    %213 = vector.broadcast %202 : vector<1x49xf32> to vector<4x49xf32>
    %214 = arith.mulf %213, %208 : vector<4x49xf32>
    %215 = arith.addf %212, %214 : vector<4x49xf32>
    %216 = vector.broadcast %202 : vector<1x49xf32> to vector<4x49xf32>
    %217 = arith.mulf %216, %205 : vector<4x49xf32>
    %218 = vector.broadcast %196 : vector<1x49xf32> to vector<4x49xf32>
    %219 = arith.subf %218, %217 : vector<4x49xf32>
    %220 = vector.broadcast %201 : vector<1x49xf32> to vector<4x49xf32>
    %221 = arith.mulf %220, %208 : vector<4x49xf32>
    %222 = arith.addf %219, %221 : vector<4x49xf32>
    %223 = vector.broadcast %28 : vector<4x1xf32> to vector<4x49xf32>
    %224 = vector.broadcast %198 : vector<1x49xf32> to vector<4x49xf32>
    %225 = arith.mulf %223, %224 : vector<4x49xf32>
    %226 = vector.broadcast %29 : vector<4x1xf32> to vector<4x49xf32>
    %227 = vector.broadcast %200 : vector<1x49xf32> to vector<4x49xf32>
    %228 = arith.mulf %226, %227 : vector<4x49xf32>
    %229 = vector.broadcast %201 : vector<1x49xf32> to vector<4x49xf32>
    %230 = arith.mulf %229, %225 : vector<4x49xf32>
    %231 = vector.broadcast %202 : vector<1x49xf32> to vector<4x49xf32>
    %232 = arith.mulf %231, %228 : vector<4x49xf32>
    %233 = arith.addf %230, %232 : vector<4x49xf32>
    %234 = vector.broadcast %201 : vector<1x49xf32> to vector<4x49xf32>
    %235 = arith.mulf %234, %228 : vector<4x49xf32>
    %236 = vector.broadcast %202 : vector<1x49xf32> to vector<4x49xf32>
    %237 = arith.mulf %236, %225 : vector<4x49xf32>
    %238 = arith.subf %235, %237 : vector<4x49xf32>
    %239 = vector.extract_strided_slice %215 {offsets = [0, 0], sizes = [1, 49], strides = [1, 1]} : vector<4x49xf32> to vector<1x49xf32>
    %240 = vector.extract_strided_slice %215 {offsets = [1, 0], sizes = [1, 49], strides = [1, 1]} : vector<4x49xf32> to vector<1x49xf32>
    %241 = vector.extract_strided_slice %215 {offsets = [2, 0], sizes = [1, 49], strides = [1, 1]} : vector<4x49xf32> to vector<1x49xf32>
    %242 = vector.extract_strided_slice %215 {offsets = [3, 0], sizes = [1, 49], strides = [1, 1]} : vector<4x49xf32> to vector<1x49xf32>
    %243 = vector.extract_strided_slice %222 {offsets = [0, 0], sizes = [1, 49], strides = [1, 1]} : vector<4x49xf32> to vector<1x49xf32>
    %244 = vector.extract_strided_slice %222 {offsets = [1, 0], sizes = [1, 49], strides = [1, 1]} : vector<4x49xf32> to vector<1x49xf32>
    %245 = vector.extract_strided_slice %222 {offsets = [2, 0], sizes = [1, 49], strides = [1, 1]} : vector<4x49xf32> to vector<1x49xf32>
    %246 = vector.extract_strided_slice %222 {offsets = [3, 0], sizes = [1, 49], strides = [1, 1]} : vector<4x49xf32> to vector<1x49xf32>
    %247 = arith.mulf %42, %43 : vector<1x49xf32>
    %cst_34 = arith.constant 0.000000e+00 : f32
    %248 = vector.broadcast %cst_34 : f32 to vector<1x49xf32>
    %249 = arith.cmpf oge, %247, %248 : vector<1x49xf32>
    %cst_35 = arith.constant 1.000000e+00 : f32
    %cst_36 = arith.constant -1.000000e+00 : f32
    %250 = vector.broadcast %cst_35 : f32 to vector<1x49xf32>
    %251 = vector.broadcast %cst_36 : f32 to vector<1x49xf32>
    %252 = arith.select %249, %250, %251 : vector<1x49xi1>, vector<1x49xf32>
    %253 = math.absf %247 : vector<1x49xf32>
    %254 = vector.broadcast %252 : vector<1x49xf32> to vector<4x49xf32>
    %255 = arith.mulf %254, %233 : vector<4x49xf32>
    %256 = vector.broadcast %252 : vector<1x49xf32> to vector<4x49xf32>
    %257 = arith.mulf %256, %238 : vector<4x49xf32>
    %258 = vector.broadcast %176 : vector<1x49xf32> to vector<4x49xf32>
    %259 = arith.subf %258, %88 : vector<4x49xf32>
    %260 = arith.mulf %121, %259 : vector<4x49xf32>
    %261 = vector.broadcast %172 : vector<1x49xf32> to vector<4x49xf32>
    %262 = arith.subf %261, %81 : vector<4x49xf32>
    %263 = arith.mulf %123, %262 : vector<4x49xf32>
    %264 = arith.subf %260, %263 : vector<4x49xf32>
    %265 = vector.broadcast %177 : vector<1x49xf32> to vector<4x49xf32>
    %266 = arith.subf %265, %88 : vector<4x49xf32>
    %267 = arith.mulf %121, %266 : vector<4x49xf32>
    %268 = vector.broadcast %173 : vector<1x49xf32> to vector<4x49xf32>
    %269 = arith.subf %268, %81 : vector<4x49xf32>
    %270 = arith.mulf %123, %269 : vector<4x49xf32>
    %271 = arith.subf %267, %270 : vector<4x49xf32>
    %272 = vector.broadcast %178 : vector<1x49xf32> to vector<4x49xf32>
    %273 = arith.subf %272, %88 : vector<4x49xf32>
    %274 = arith.mulf %121, %273 : vector<4x49xf32>
    %275 = vector.broadcast %174 : vector<1x49xf32> to vector<4x49xf32>
    %276 = arith.subf %275, %81 : vector<4x49xf32>
    %277 = arith.mulf %123, %276 : vector<4x49xf32>
    %278 = arith.subf %274, %277 : vector<4x49xf32>
    %279 = vector.broadcast %179 : vector<1x49xf32> to vector<4x49xf32>
    %280 = arith.subf %279, %88 : vector<4x49xf32>
    %281 = arith.mulf %121, %280 : vector<4x49xf32>
    %282 = vector.broadcast %175 : vector<1x49xf32> to vector<4x49xf32>
    %283 = arith.subf %282, %81 : vector<4x49xf32>
    %284 = arith.mulf %123, %283 : vector<4x49xf32>
    %285 = arith.subf %281, %284 : vector<4x49xf32>
    %286 = vector.broadcast %109 : vector<1x49xf32> to vector<4x49xf32>
    %287 = arith.subf %286, %155 : vector<4x49xf32>
    %288 = arith.mulf %188, %287 : vector<4x49xf32>
    %289 = vector.broadcast %105 : vector<1x49xf32> to vector<4x49xf32>
    %290 = arith.subf %289, %148 : vector<4x49xf32>
    %291 = arith.mulf %190, %290 : vector<4x49xf32>
    %292 = arith.subf %288, %291 : vector<4x49xf32>
    %293 = vector.broadcast %110 : vector<1x49xf32> to vector<4x49xf32>
    %294 = arith.subf %293, %155 : vector<4x49xf32>
    %295 = arith.mulf %188, %294 : vector<4x49xf32>
    %296 = vector.broadcast %106 : vector<1x49xf32> to vector<4x49xf32>
    %297 = arith.subf %296, %148 : vector<4x49xf32>
    %298 = arith.mulf %190, %297 : vector<4x49xf32>
    %299 = arith.subf %295, %298 : vector<4x49xf32>
    %300 = vector.broadcast %111 : vector<1x49xf32> to vector<4x49xf32>
    %301 = arith.subf %300, %155 : vector<4x49xf32>
    %302 = arith.mulf %188, %301 : vector<4x49xf32>
    %303 = vector.broadcast %107 : vector<1x49xf32> to vector<4x49xf32>
    %304 = arith.subf %303, %148 : vector<4x49xf32>
    %305 = arith.mulf %190, %304 : vector<4x49xf32>
    %306 = arith.subf %302, %305 : vector<4x49xf32>
    %307 = vector.broadcast %112 : vector<1x49xf32> to vector<4x49xf32>
    %308 = arith.subf %307, %155 : vector<4x49xf32>
    %309 = arith.mulf %188, %308 : vector<4x49xf32>
    %310 = vector.broadcast %108 : vector<1x49xf32> to vector<4x49xf32>
    %311 = arith.subf %310, %148 : vector<4x49xf32>
    %312 = arith.mulf %190, %311 : vector<4x49xf32>
    %313 = arith.subf %309, %312 : vector<4x49xf32>
    %314 = arith.subf %264, %271 : vector<4x49xf32>
    %cst_37 = arith.constant 0.000000e+00 : f32
    %315 = vector.broadcast %cst_37 : f32 to vector<4x49xf32>
    %316 = arith.cmpf oeq, %314, %315 : vector<4x49xf32>
    %cst_38 = arith.constant 1.000000e+00 : f32
    %317 = vector.broadcast %cst_38 : f32 to vector<4x49xf32>
    %318 = arith.select %316, %317, %314 : vector<4x49xi1>, vector<4x49xf32>
    %319 = tpu.reciprocal %318 {approx = true} : vector<4x49xf32> -> vector<4x49xf32>
    %320 = arith.mulf %264, %319 : vector<4x49xf32>
    %cst_39 = arith.constant 0.000000e+00 : f32
    %321 = vector.broadcast %cst_39 : f32 to vector<4x49xf32>
    %322 = arith.cmpf olt, %314, %321 : vector<4x49xf32>
    %cst_40 = arith.constant 0.000000e+00 : f32
    %323 = vector.broadcast %cst_40 : f32 to vector<4x49xf32>
    %324 = arith.cmpf olt, %264, %323 : vector<4x49xf32>
    %325 = arith.andi %316, %324 : vector<4x49xi1>
    %cst_41 = arith.constant 2.000000e+00 : f32
    %cst_42 = arith.constant 0.000000e+00 : f32
    %326 = vector.broadcast %cst_41 : f32 to vector<4x49xf32>
    %327 = vector.broadcast %cst_42 : f32 to vector<4x49xf32>
    %328 = arith.select %325, %326, %327 : vector<4x49xi1>, vector<4x49xf32>
    %329 = arith.select %322, %320, %328 : vector<4x49xi1>, vector<4x49xf32>
    %cst_43 = arith.constant 0.000000e+00 : f32
    %330 = vector.broadcast %cst_43 : f32 to vector<4x49xf32>
    %331 = arith.cmpf ogt, %314, %330 : vector<4x49xf32>
    %cst_44 = arith.constant 1.000000e+00 : f32
    %332 = vector.broadcast %cst_44 : f32 to vector<4x49xf32>
    %333 = arith.select %331, %320, %332 : vector<4x49xi1>, vector<4x49xf32>
    %cst_45 = arith.constant dense<0xFF800000> : vector<49xf32>
    %334 = vector.multi_reduction <maximumf>, %329, %cst_45 [0] : vector<4x49xf32> to vector<49xf32>
    %335 = vector.shape_cast %334 : vector<49xf32> to vector<1x49xf32>
    %cst_46 = arith.constant 0.000000e+00 : f32
    %336 = vector.broadcast %cst_46 : f32 to vector<1x49xf32>
    %337 = arith.maximumf %335, %336 : vector<1x49xf32>
    %cst_47 = arith.constant dense<0x7F800000> : vector<49xf32>
    %338 = vector.multi_reduction <minimumf>, %333, %cst_47 [0] : vector<4x49xf32> to vector<49xf32>
    %339 = vector.shape_cast %338 : vector<49xf32> to vector<1x49xf32>
    %cst_48 = arith.constant 1.000000e+00 : f32
    %340 = vector.broadcast %cst_48 : f32 to vector<1x49xf32>
    %341 = arith.minimumf %339, %340 : vector<1x49xf32>
    %342 = arith.subf %173, %172 : vector<1x49xf32>
    %343 = arith.subf %177, %176 : vector<1x49xf32>
    %344 = arith.mulf %337, %342 : vector<1x49xf32>
    %345 = arith.addf %172, %344 : vector<1x49xf32>
    %346 = arith.mulf %337, %343 : vector<1x49xf32>
    %347 = arith.addf %176, %346 : vector<1x49xf32>
    %348 = arith.mulf %341, %342 : vector<1x49xf32>
    %349 = arith.addf %172, %348 : vector<1x49xf32>
    %350 = arith.mulf %341, %343 : vector<1x49xf32>
    %351 = arith.addf %176, %350 : vector<1x49xf32>
    %352 = arith.cmpf olt, %337, %341 : vector<1x49xf32>
    %353 = arith.mulf %345, %351 : vector<1x49xf32>
    %354 = arith.mulf %349, %347 : vector<1x49xf32>
    %355 = arith.subf %353, %354 : vector<1x49xf32>
    %cst_49 = arith.constant 0.000000e+00 : f32
    %356 = vector.broadcast %cst_49 : f32 to vector<1x49xf32>
    %357 = arith.select %352, %355, %356 : vector<1x49xi1>, vector<1x49xf32>
    %358 = arith.subf %271, %278 : vector<4x49xf32>
    %cst_50 = arith.constant 0.000000e+00 : f32
    %359 = vector.broadcast %cst_50 : f32 to vector<4x49xf32>
    %360 = arith.cmpf oeq, %358, %359 : vector<4x49xf32>
    %cst_51 = arith.constant 1.000000e+00 : f32
    %361 = vector.broadcast %cst_51 : f32 to vector<4x49xf32>
    %362 = arith.select %360, %361, %358 : vector<4x49xi1>, vector<4x49xf32>
    %363 = tpu.reciprocal %362 {approx = true} : vector<4x49xf32> -> vector<4x49xf32>
    %364 = arith.mulf %271, %363 : vector<4x49xf32>
    %cst_52 = arith.constant 0.000000e+00 : f32
    %365 = vector.broadcast %cst_52 : f32 to vector<4x49xf32>
    %366 = arith.cmpf olt, %358, %365 : vector<4x49xf32>
    %cst_53 = arith.constant 0.000000e+00 : f32
    %367 = vector.broadcast %cst_53 : f32 to vector<4x49xf32>
    %368 = arith.cmpf olt, %271, %367 : vector<4x49xf32>
    %369 = arith.andi %360, %368 : vector<4x49xi1>
    %cst_54 = arith.constant 2.000000e+00 : f32
    %cst_55 = arith.constant 0.000000e+00 : f32
    %370 = vector.broadcast %cst_54 : f32 to vector<4x49xf32>
    %371 = vector.broadcast %cst_55 : f32 to vector<4x49xf32>
    %372 = arith.select %369, %370, %371 : vector<4x49xi1>, vector<4x49xf32>
    %373 = arith.select %366, %364, %372 : vector<4x49xi1>, vector<4x49xf32>
    %cst_56 = arith.constant 0.000000e+00 : f32
    %374 = vector.broadcast %cst_56 : f32 to vector<4x49xf32>
    %375 = arith.cmpf ogt, %358, %374 : vector<4x49xf32>
    %cst_57 = arith.constant 1.000000e+00 : f32
    %376 = vector.broadcast %cst_57 : f32 to vector<4x49xf32>
    %377 = arith.select %375, %364, %376 : vector<4x49xi1>, vector<4x49xf32>
    %cst_58 = arith.constant dense<0xFF800000> : vector<49xf32>
    %378 = vector.multi_reduction <maximumf>, %373, %cst_58 [0] : vector<4x49xf32> to vector<49xf32>
    %379 = vector.shape_cast %378 : vector<49xf32> to vector<1x49xf32>
    %cst_59 = arith.constant 0.000000e+00 : f32
    %380 = vector.broadcast %cst_59 : f32 to vector<1x49xf32>
    %381 = arith.maximumf %379, %380 : vector<1x49xf32>
    %cst_60 = arith.constant dense<0x7F800000> : vector<49xf32>
    %382 = vector.multi_reduction <minimumf>, %377, %cst_60 [0] : vector<4x49xf32> to vector<49xf32>
    %383 = vector.shape_cast %382 : vector<49xf32> to vector<1x49xf32>
    %cst_61 = arith.constant 1.000000e+00 : f32
    %384 = vector.broadcast %cst_61 : f32 to vector<1x49xf32>
    %385 = arith.minimumf %383, %384 : vector<1x49xf32>
    %386 = arith.subf %174, %173 : vector<1x49xf32>
    %387 = arith.subf %178, %177 : vector<1x49xf32>
    %388 = arith.mulf %381, %386 : vector<1x49xf32>
    %389 = arith.addf %173, %388 : vector<1x49xf32>
    %390 = arith.mulf %381, %387 : vector<1x49xf32>
    %391 = arith.addf %177, %390 : vector<1x49xf32>
    %392 = arith.mulf %385, %386 : vector<1x49xf32>
    %393 = arith.addf %173, %392 : vector<1x49xf32>
    %394 = arith.mulf %385, %387 : vector<1x49xf32>
    %395 = arith.addf %177, %394 : vector<1x49xf32>
    %396 = arith.cmpf olt, %381, %385 : vector<1x49xf32>
    %397 = arith.mulf %389, %395 : vector<1x49xf32>
    %398 = arith.mulf %393, %391 : vector<1x49xf32>
    %399 = arith.subf %397, %398 : vector<1x49xf32>
    %cst_62 = arith.constant 0.000000e+00 : f32
    %400 = vector.broadcast %cst_62 : f32 to vector<1x49xf32>
    %401 = arith.select %396, %399, %400 : vector<1x49xi1>, vector<1x49xf32>
    %402 = arith.addf %357, %401 : vector<1x49xf32>
    %403 = arith.subf %278, %285 : vector<4x49xf32>
    %cst_63 = arith.constant 0.000000e+00 : f32
    %404 = vector.broadcast %cst_63 : f32 to vector<4x49xf32>
    %405 = arith.cmpf oeq, %403, %404 : vector<4x49xf32>
    %cst_64 = arith.constant 1.000000e+00 : f32
    %406 = vector.broadcast %cst_64 : f32 to vector<4x49xf32>
    %407 = arith.select %405, %406, %403 : vector<4x49xi1>, vector<4x49xf32>
    %408 = tpu.reciprocal %407 {approx = true} : vector<4x49xf32> -> vector<4x49xf32>
    %409 = arith.mulf %278, %408 : vector<4x49xf32>
    %cst_65 = arith.constant 0.000000e+00 : f32
    %410 = vector.broadcast %cst_65 : f32 to vector<4x49xf32>
    %411 = arith.cmpf olt, %403, %410 : vector<4x49xf32>
    %cst_66 = arith.constant 0.000000e+00 : f32
    %412 = vector.broadcast %cst_66 : f32 to vector<4x49xf32>
    %413 = arith.cmpf olt, %278, %412 : vector<4x49xf32>
    %414 = arith.andi %405, %413 : vector<4x49xi1>
    %cst_67 = arith.constant 2.000000e+00 : f32
    %cst_68 = arith.constant 0.000000e+00 : f32
    %415 = vector.broadcast %cst_67 : f32 to vector<4x49xf32>
    %416 = vector.broadcast %cst_68 : f32 to vector<4x49xf32>
    %417 = arith.select %414, %415, %416 : vector<4x49xi1>, vector<4x49xf32>
    %418 = arith.select %411, %409, %417 : vector<4x49xi1>, vector<4x49xf32>
    %cst_69 = arith.constant 0.000000e+00 : f32
    %419 = vector.broadcast %cst_69 : f32 to vector<4x49xf32>
    %420 = arith.cmpf ogt, %403, %419 : vector<4x49xf32>
    %cst_70 = arith.constant 1.000000e+00 : f32
    %421 = vector.broadcast %cst_70 : f32 to vector<4x49xf32>
    %422 = arith.select %420, %409, %421 : vector<4x49xi1>, vector<4x49xf32>
    %cst_71 = arith.constant dense<0xFF800000> : vector<49xf32>
    %423 = vector.multi_reduction <maximumf>, %418, %cst_71 [0] : vector<4x49xf32> to vector<49xf32>
    %424 = vector.shape_cast %423 : vector<49xf32> to vector<1x49xf32>
    %cst_72 = arith.constant 0.000000e+00 : f32
    %425 = vector.broadcast %cst_72 : f32 to vector<1x49xf32>
    %426 = arith.maximumf %424, %425 : vector<1x49xf32>
    %cst_73 = arith.constant dense<0x7F800000> : vector<49xf32>
    %427 = vector.multi_reduction <minimumf>, %422, %cst_73 [0] : vector<4x49xf32> to vector<49xf32>
    %428 = vector.shape_cast %427 : vector<49xf32> to vector<1x49xf32>
    %cst_74 = arith.constant 1.000000e+00 : f32
    %429 = vector.broadcast %cst_74 : f32 to vector<1x49xf32>
    %430 = arith.minimumf %428, %429 : vector<1x49xf32>
    %431 = arith.subf %175, %174 : vector<1x49xf32>
    %432 = arith.subf %179, %178 : vector<1x49xf32>
    %433 = arith.mulf %426, %431 : vector<1x49xf32>
    %434 = arith.addf %174, %433 : vector<1x49xf32>
    %435 = arith.mulf %426, %432 : vector<1x49xf32>
    %436 = arith.addf %178, %435 : vector<1x49xf32>
    %437 = arith.mulf %430, %431 : vector<1x49xf32>
    %438 = arith.addf %174, %437 : vector<1x49xf32>
    %439 = arith.mulf %430, %432 : vector<1x49xf32>
    %440 = arith.addf %178, %439 : vector<1x49xf32>
    %441 = arith.cmpf olt, %426, %430 : vector<1x49xf32>
    %442 = arith.mulf %434, %440 : vector<1x49xf32>
    %443 = arith.mulf %438, %436 : vector<1x49xf32>
    %444 = arith.subf %442, %443 : vector<1x49xf32>
    %cst_75 = arith.constant 0.000000e+00 : f32
    %445 = vector.broadcast %cst_75 : f32 to vector<1x49xf32>
    %446 = arith.select %441, %444, %445 : vector<1x49xi1>, vector<1x49xf32>
    %447 = arith.addf %402, %446 : vector<1x49xf32>
    %448 = arith.subf %285, %264 : vector<4x49xf32>
    %cst_76 = arith.constant 0.000000e+00 : f32
    %449 = vector.broadcast %cst_76 : f32 to vector<4x49xf32>
    %450 = arith.cmpf oeq, %448, %449 : vector<4x49xf32>
    %cst_77 = arith.constant 1.000000e+00 : f32
    %451 = vector.broadcast %cst_77 : f32 to vector<4x49xf32>
    %452 = arith.select %450, %451, %448 : vector<4x49xi1>, vector<4x49xf32>
    %453 = tpu.reciprocal %452 {approx = true} : vector<4x49xf32> -> vector<4x49xf32>
    %454 = arith.mulf %285, %453 : vector<4x49xf32>
    %cst_78 = arith.constant 0.000000e+00 : f32
    %455 = vector.broadcast %cst_78 : f32 to vector<4x49xf32>
    %456 = arith.cmpf olt, %448, %455 : vector<4x49xf32>
    %cst_79 = arith.constant 0.000000e+00 : f32
    %457 = vector.broadcast %cst_79 : f32 to vector<4x49xf32>
    %458 = arith.cmpf olt, %285, %457 : vector<4x49xf32>
    %459 = arith.andi %450, %458 : vector<4x49xi1>
    %cst_80 = arith.constant 2.000000e+00 : f32
    %cst_81 = arith.constant 0.000000e+00 : f32
    %460 = vector.broadcast %cst_80 : f32 to vector<4x49xf32>
    %461 = vector.broadcast %cst_81 : f32 to vector<4x49xf32>
    %462 = arith.select %459, %460, %461 : vector<4x49xi1>, vector<4x49xf32>
    %463 = arith.select %456, %454, %462 : vector<4x49xi1>, vector<4x49xf32>
    %cst_82 = arith.constant 0.000000e+00 : f32
    %464 = vector.broadcast %cst_82 : f32 to vector<4x49xf32>
    %465 = arith.cmpf ogt, %448, %464 : vector<4x49xf32>
    %cst_83 = arith.constant 1.000000e+00 : f32
    %466 = vector.broadcast %cst_83 : f32 to vector<4x49xf32>
    %467 = arith.select %465, %454, %466 : vector<4x49xi1>, vector<4x49xf32>
    %cst_84 = arith.constant dense<0xFF800000> : vector<49xf32>
    %468 = vector.multi_reduction <maximumf>, %463, %cst_84 [0] : vector<4x49xf32> to vector<49xf32>
    %469 = vector.shape_cast %468 : vector<49xf32> to vector<1x49xf32>
    %cst_85 = arith.constant 0.000000e+00 : f32
    %470 = vector.broadcast %cst_85 : f32 to vector<1x49xf32>
    %471 = arith.maximumf %469, %470 : vector<1x49xf32>
    %cst_86 = arith.constant dense<0x7F800000> : vector<49xf32>
    %472 = vector.multi_reduction <minimumf>, %467, %cst_86 [0] : vector<4x49xf32> to vector<49xf32>
    %473 = vector.shape_cast %472 : vector<49xf32> to vector<1x49xf32>
    %cst_87 = arith.constant 1.000000e+00 : f32
    %474 = vector.broadcast %cst_87 : f32 to vector<1x49xf32>
    %475 = arith.minimumf %473, %474 : vector<1x49xf32>
    %476 = arith.subf %172, %175 : vector<1x49xf32>
    %477 = arith.subf %176, %179 : vector<1x49xf32>
    %478 = arith.mulf %471, %476 : vector<1x49xf32>
    %479 = arith.addf %175, %478 : vector<1x49xf32>
    %480 = arith.mulf %471, %477 : vector<1x49xf32>
    %481 = arith.addf %179, %480 : vector<1x49xf32>
    %482 = arith.mulf %475, %476 : vector<1x49xf32>
    %483 = arith.addf %175, %482 : vector<1x49xf32>
    %484 = arith.mulf %475, %477 : vector<1x49xf32>
    %485 = arith.addf %179, %484 : vector<1x49xf32>
    %486 = arith.cmpf olt, %471, %475 : vector<1x49xf32>
    %487 = arith.mulf %479, %485 : vector<1x49xf32>
    %488 = arith.mulf %483, %481 : vector<1x49xf32>
    %489 = arith.subf %487, %488 : vector<1x49xf32>
    %cst_88 = arith.constant 0.000000e+00 : f32
    %490 = vector.broadcast %cst_88 : f32 to vector<1x49xf32>
    %491 = arith.select %486, %489, %490 : vector<1x49xi1>, vector<1x49xf32>
    %492 = arith.addf %447, %491 : vector<1x49xf32>
    %493 = arith.mulf %185, %492 : vector<1x49xf32>
    %494 = arith.subf %292, %299 : vector<4x49xf32>
    %cst_89 = arith.constant 0.000000e+00 : f32
    %495 = vector.broadcast %cst_89 : f32 to vector<4x49xf32>
    %496 = arith.cmpf oeq, %494, %495 : vector<4x49xf32>
    %cst_90 = arith.constant 1.000000e+00 : f32
    %497 = vector.broadcast %cst_90 : f32 to vector<4x49xf32>
    %498 = arith.select %496, %497, %494 : vector<4x49xi1>, vector<4x49xf32>
    %499 = tpu.reciprocal %498 {approx = true} : vector<4x49xf32> -> vector<4x49xf32>
    %500 = arith.mulf %292, %499 : vector<4x49xf32>
    %cst_91 = arith.constant 0.000000e+00 : f32
    %501 = vector.broadcast %cst_91 : f32 to vector<4x49xf32>
    %502 = arith.cmpf olt, %494, %501 : vector<4x49xf32>
    %cst_92 = arith.constant 0.000000e+00 : f32
    %503 = vector.broadcast %cst_92 : f32 to vector<4x49xf32>
    %504 = arith.cmpf olt, %292, %503 : vector<4x49xf32>
    %505 = arith.andi %496, %504 : vector<4x49xi1>
    %cst_93 = arith.constant 2.000000e+00 : f32
    %cst_94 = arith.constant 0.000000e+00 : f32
    %506 = vector.broadcast %cst_93 : f32 to vector<4x49xf32>
    %507 = vector.broadcast %cst_94 : f32 to vector<4x49xf32>
    %508 = arith.select %505, %506, %507 : vector<4x49xi1>, vector<4x49xf32>
    %509 = arith.select %502, %500, %508 : vector<4x49xi1>, vector<4x49xf32>
    %cst_95 = arith.constant 0.000000e+00 : f32
    %510 = vector.broadcast %cst_95 : f32 to vector<4x49xf32>
    %511 = arith.cmpf ogt, %494, %510 : vector<4x49xf32>
    %cst_96 = arith.constant 1.000000e+00 : f32
    %512 = vector.broadcast %cst_96 : f32 to vector<4x49xf32>
    %513 = arith.select %511, %500, %512 : vector<4x49xi1>, vector<4x49xf32>
    %cst_97 = arith.constant dense<0xFF800000> : vector<49xf32>
    %514 = vector.multi_reduction <maximumf>, %509, %cst_97 [0] : vector<4x49xf32> to vector<49xf32>
    %515 = vector.shape_cast %514 : vector<49xf32> to vector<1x49xf32>
    %cst_98 = arith.constant 0.000000e+00 : f32
    %516 = vector.broadcast %cst_98 : f32 to vector<1x49xf32>
    %517 = arith.maximumf %515, %516 : vector<1x49xf32>
    %cst_99 = arith.constant dense<0x7F800000> : vector<49xf32>
    %518 = vector.multi_reduction <minimumf>, %513, %cst_99 [0] : vector<4x49xf32> to vector<49xf32>
    %519 = vector.shape_cast %518 : vector<49xf32> to vector<1x49xf32>
    %cst_100 = arith.constant 1.000000e+00 : f32
    %520 = vector.broadcast %cst_100 : f32 to vector<1x49xf32>
    %521 = arith.minimumf %519, %520 : vector<1x49xf32>
    %522 = arith.subf %106, %105 : vector<1x49xf32>
    %523 = arith.subf %110, %109 : vector<1x49xf32>
    %524 = arith.mulf %517, %522 : vector<1x49xf32>
    %525 = arith.addf %105, %524 : vector<1x49xf32>
    %526 = arith.mulf %517, %523 : vector<1x49xf32>
    %527 = arith.addf %109, %526 : vector<1x49xf32>
    %528 = arith.mulf %521, %522 : vector<1x49xf32>
    %529 = arith.addf %105, %528 : vector<1x49xf32>
    %530 = arith.mulf %521, %523 : vector<1x49xf32>
    %531 = arith.addf %109, %530 : vector<1x49xf32>
    %532 = arith.cmpf olt, %517, %521 : vector<1x49xf32>
    %533 = arith.mulf %525, %531 : vector<1x49xf32>
    %534 = arith.mulf %529, %527 : vector<1x49xf32>
    %535 = arith.subf %533, %534 : vector<1x49xf32>
    %cst_101 = arith.constant 0.000000e+00 : f32
    %536 = vector.broadcast %cst_101 : f32 to vector<1x49xf32>
    %537 = arith.select %532, %535, %536 : vector<1x49xi1>, vector<1x49xf32>
    %538 = arith.subf %299, %306 : vector<4x49xf32>
    %cst_102 = arith.constant 0.000000e+00 : f32
    %539 = vector.broadcast %cst_102 : f32 to vector<4x49xf32>
    %540 = arith.cmpf oeq, %538, %539 : vector<4x49xf32>
    %cst_103 = arith.constant 1.000000e+00 : f32
    %541 = vector.broadcast %cst_103 : f32 to vector<4x49xf32>
    %542 = arith.select %540, %541, %538 : vector<4x49xi1>, vector<4x49xf32>
    %543 = tpu.reciprocal %542 {approx = true} : vector<4x49xf32> -> vector<4x49xf32>
    %544 = arith.mulf %299, %543 : vector<4x49xf32>
    %cst_104 = arith.constant 0.000000e+00 : f32
    %545 = vector.broadcast %cst_104 : f32 to vector<4x49xf32>
    %546 = arith.cmpf olt, %538, %545 : vector<4x49xf32>
    %cst_105 = arith.constant 0.000000e+00 : f32
    %547 = vector.broadcast %cst_105 : f32 to vector<4x49xf32>
    %548 = arith.cmpf olt, %299, %547 : vector<4x49xf32>
    %549 = arith.andi %540, %548 : vector<4x49xi1>
    %cst_106 = arith.constant 2.000000e+00 : f32
    %cst_107 = arith.constant 0.000000e+00 : f32
    %550 = vector.broadcast %cst_106 : f32 to vector<4x49xf32>
    %551 = vector.broadcast %cst_107 : f32 to vector<4x49xf32>
    %552 = arith.select %549, %550, %551 : vector<4x49xi1>, vector<4x49xf32>
    %553 = arith.select %546, %544, %552 : vector<4x49xi1>, vector<4x49xf32>
    %cst_108 = arith.constant 0.000000e+00 : f32
    %554 = vector.broadcast %cst_108 : f32 to vector<4x49xf32>
    %555 = arith.cmpf ogt, %538, %554 : vector<4x49xf32>
    %cst_109 = arith.constant 1.000000e+00 : f32
    %556 = vector.broadcast %cst_109 : f32 to vector<4x49xf32>
    %557 = arith.select %555, %544, %556 : vector<4x49xi1>, vector<4x49xf32>
    %cst_110 = arith.constant dense<0xFF800000> : vector<49xf32>
    %558 = vector.multi_reduction <maximumf>, %553, %cst_110 [0] : vector<4x49xf32> to vector<49xf32>
    %559 = vector.shape_cast %558 : vector<49xf32> to vector<1x49xf32>
    %cst_111 = arith.constant 0.000000e+00 : f32
    %560 = vector.broadcast %cst_111 : f32 to vector<1x49xf32>
    %561 = arith.maximumf %559, %560 : vector<1x49xf32>
    %cst_112 = arith.constant dense<0x7F800000> : vector<49xf32>
    %562 = vector.multi_reduction <minimumf>, %557, %cst_112 [0] : vector<4x49xf32> to vector<49xf32>
    %563 = vector.shape_cast %562 : vector<49xf32> to vector<1x49xf32>
    %cst_113 = arith.constant 1.000000e+00 : f32
    %564 = vector.broadcast %cst_113 : f32 to vector<1x49xf32>
    %565 = arith.minimumf %563, %564 : vector<1x49xf32>
    %566 = arith.subf %107, %106 : vector<1x49xf32>
    %567 = arith.subf %111, %110 : vector<1x49xf32>
    %568 = arith.mulf %561, %566 : vector<1x49xf32>
    %569 = arith.addf %106, %568 : vector<1x49xf32>
    %570 = arith.mulf %561, %567 : vector<1x49xf32>
    %571 = arith.addf %110, %570 : vector<1x49xf32>
    %572 = arith.mulf %565, %566 : vector<1x49xf32>
    %573 = arith.addf %106, %572 : vector<1x49xf32>
    %574 = arith.mulf %565, %567 : vector<1x49xf32>
    %575 = arith.addf %110, %574 : vector<1x49xf32>
    %576 = arith.cmpf olt, %561, %565 : vector<1x49xf32>
    %577 = arith.mulf %569, %575 : vector<1x49xf32>
    %578 = arith.mulf %573, %571 : vector<1x49xf32>
    %579 = arith.subf %577, %578 : vector<1x49xf32>
    %cst_114 = arith.constant 0.000000e+00 : f32
    %580 = vector.broadcast %cst_114 : f32 to vector<1x49xf32>
    %581 = arith.select %576, %579, %580 : vector<1x49xi1>, vector<1x49xf32>
    %582 = arith.addf %537, %581 : vector<1x49xf32>
    %583 = arith.subf %306, %313 : vector<4x49xf32>
    %cst_115 = arith.constant 0.000000e+00 : f32
    %584 = vector.broadcast %cst_115 : f32 to vector<4x49xf32>
    %585 = arith.cmpf oeq, %583, %584 : vector<4x49xf32>
    %cst_116 = arith.constant 1.000000e+00 : f32
    %586 = vector.broadcast %cst_116 : f32 to vector<4x49xf32>
    %587 = arith.select %585, %586, %583 : vector<4x49xi1>, vector<4x49xf32>
    %588 = tpu.reciprocal %587 {approx = true} : vector<4x49xf32> -> vector<4x49xf32>
    %589 = arith.mulf %306, %588 : vector<4x49xf32>
    %cst_117 = arith.constant 0.000000e+00 : f32
    %590 = vector.broadcast %cst_117 : f32 to vector<4x49xf32>
    %591 = arith.cmpf olt, %583, %590 : vector<4x49xf32>
    %cst_118 = arith.constant 0.000000e+00 : f32
    %592 = vector.broadcast %cst_118 : f32 to vector<4x49xf32>
    %593 = arith.cmpf olt, %306, %592 : vector<4x49xf32>
    %594 = arith.andi %585, %593 : vector<4x49xi1>
    %cst_119 = arith.constant 2.000000e+00 : f32
    %cst_120 = arith.constant 0.000000e+00 : f32
    %595 = vector.broadcast %cst_119 : f32 to vector<4x49xf32>
    %596 = vector.broadcast %cst_120 : f32 to vector<4x49xf32>
    %597 = arith.select %594, %595, %596 : vector<4x49xi1>, vector<4x49xf32>
    %598 = arith.select %591, %589, %597 : vector<4x49xi1>, vector<4x49xf32>
    %cst_121 = arith.constant 0.000000e+00 : f32
    %599 = vector.broadcast %cst_121 : f32 to vector<4x49xf32>
    %600 = arith.cmpf ogt, %583, %599 : vector<4x49xf32>
    %cst_122 = arith.constant 1.000000e+00 : f32
    %601 = vector.broadcast %cst_122 : f32 to vector<4x49xf32>
    %602 = arith.select %600, %589, %601 : vector<4x49xi1>, vector<4x49xf32>
    %cst_123 = arith.constant dense<0xFF800000> : vector<49xf32>
    %603 = vector.multi_reduction <maximumf>, %598, %cst_123 [0] : vector<4x49xf32> to vector<49xf32>
    %604 = vector.shape_cast %603 : vector<49xf32> to vector<1x49xf32>
    %cst_124 = arith.constant 0.000000e+00 : f32
    %605 = vector.broadcast %cst_124 : f32 to vector<1x49xf32>
    %606 = arith.maximumf %604, %605 : vector<1x49xf32>
    %cst_125 = arith.constant dense<0x7F800000> : vector<49xf32>
    %607 = vector.multi_reduction <minimumf>, %602, %cst_125 [0] : vector<4x49xf32> to vector<49xf32>
    %608 = vector.shape_cast %607 : vector<49xf32> to vector<1x49xf32>
    %cst_126 = arith.constant 1.000000e+00 : f32
    %609 = vector.broadcast %cst_126 : f32 to vector<1x49xf32>
    %610 = arith.minimumf %608, %609 : vector<1x49xf32>
    %611 = arith.subf %108, %107 : vector<1x49xf32>
    %612 = arith.subf %112, %111 : vector<1x49xf32>
    %613 = arith.mulf %606, %611 : vector<1x49xf32>
    %614 = arith.addf %107, %613 : vector<1x49xf32>
    %615 = arith.mulf %606, %612 : vector<1x49xf32>
    %616 = arith.addf %111, %615 : vector<1x49xf32>
    %617 = arith.mulf %610, %611 : vector<1x49xf32>
    %618 = arith.addf %107, %617 : vector<1x49xf32>
    %619 = arith.mulf %610, %612 : vector<1x49xf32>
    %620 = arith.addf %111, %619 : vector<1x49xf32>
    %621 = arith.cmpf olt, %606, %610 : vector<1x49xf32>
    %622 = arith.mulf %614, %620 : vector<1x49xf32>
    %623 = arith.mulf %618, %616 : vector<1x49xf32>
    %624 = arith.subf %622, %623 : vector<1x49xf32>
    %cst_127 = arith.constant 0.000000e+00 : f32
    %625 = vector.broadcast %cst_127 : f32 to vector<1x49xf32>
    %626 = arith.select %621, %624, %625 : vector<1x49xi1>, vector<1x49xf32>
    %627 = arith.addf %582, %626 : vector<1x49xf32>
    %628 = arith.subf %313, %292 : vector<4x49xf32>
    %cst_128 = arith.constant 0.000000e+00 : f32
    %629 = vector.broadcast %cst_128 : f32 to vector<4x49xf32>
    %630 = arith.cmpf oeq, %628, %629 : vector<4x49xf32>
    %cst_129 = arith.constant 1.000000e+00 : f32
    %631 = vector.broadcast %cst_129 : f32 to vector<4x49xf32>
    %632 = arith.select %630, %631, %628 : vector<4x49xi1>, vector<4x49xf32>
    %633 = tpu.reciprocal %632 {approx = true} : vector<4x49xf32> -> vector<4x49xf32>
    %634 = arith.mulf %313, %633 : vector<4x49xf32>
    %cst_130 = arith.constant 0.000000e+00 : f32
    %635 = vector.broadcast %cst_130 : f32 to vector<4x49xf32>
    %636 = arith.cmpf olt, %628, %635 : vector<4x49xf32>
    %cst_131 = arith.constant 0.000000e+00 : f32
    %637 = vector.broadcast %cst_131 : f32 to vector<4x49xf32>
    %638 = arith.cmpf olt, %313, %637 : vector<4x49xf32>
    %639 = arith.andi %630, %638 : vector<4x49xi1>
    %cst_132 = arith.constant 2.000000e+00 : f32
    %cst_133 = arith.constant 0.000000e+00 : f32
    %640 = vector.broadcast %cst_132 : f32 to vector<4x49xf32>
    %641 = vector.broadcast %cst_133 : f32 to vector<4x49xf32>
    %642 = arith.select %639, %640, %641 : vector<4x49xi1>, vector<4x49xf32>
    %643 = arith.select %636, %634, %642 : vector<4x49xi1>, vector<4x49xf32>
    %cst_134 = arith.constant 0.000000e+00 : f32
    %644 = vector.broadcast %cst_134 : f32 to vector<4x49xf32>
    %645 = arith.cmpf ogt, %628, %644 : vector<4x49xf32>
    %cst_135 = arith.constant 1.000000e+00 : f32
    %646 = vector.broadcast %cst_135 : f32 to vector<4x49xf32>
    %647 = arith.select %645, %634, %646 : vector<4x49xi1>, vector<4x49xf32>
    %cst_136 = arith.constant dense<0xFF800000> : vector<49xf32>
    %648 = vector.multi_reduction <maximumf>, %643, %cst_136 [0] : vector<4x49xf32> to vector<49xf32>
    %649 = vector.shape_cast %648 : vector<49xf32> to vector<1x49xf32>
    %cst_137 = arith.constant 0.000000e+00 : f32
    %650 = vector.broadcast %cst_137 : f32 to vector<1x49xf32>
    %651 = arith.maximumf %649, %650 : vector<1x49xf32>
    %cst_138 = arith.constant dense<0x7F800000> : vector<49xf32>
    %652 = vector.multi_reduction <minimumf>, %647, %cst_138 [0] : vector<4x49xf32> to vector<49xf32>
    %653 = vector.shape_cast %652 : vector<49xf32> to vector<1x49xf32>
    %cst_139 = arith.constant 1.000000e+00 : f32
    %654 = vector.broadcast %cst_139 : f32 to vector<1x49xf32>
    %655 = arith.minimumf %653, %654 : vector<1x49xf32>
    %656 = arith.subf %105, %108 : vector<1x49xf32>
    %657 = arith.subf %109, %112 : vector<1x49xf32>
    %658 = arith.mulf %651, %656 : vector<1x49xf32>
    %659 = arith.addf %108, %658 : vector<1x49xf32>
    %660 = arith.mulf %651, %657 : vector<1x49xf32>
    %661 = arith.addf %112, %660 : vector<1x49xf32>
    %662 = arith.mulf %655, %656 : vector<1x49xf32>
    %663 = arith.addf %108, %662 : vector<1x49xf32>
    %664 = arith.mulf %655, %657 : vector<1x49xf32>
    %665 = arith.addf %112, %664 : vector<1x49xf32>
    %666 = arith.cmpf olt, %651, %655 : vector<1x49xf32>
    %667 = arith.mulf %659, %665 : vector<1x49xf32>
    %668 = arith.mulf %663, %661 : vector<1x49xf32>
    %669 = arith.subf %667, %668 : vector<1x49xf32>
    %cst_140 = arith.constant 0.000000e+00 : f32
    %670 = vector.broadcast %cst_140 : f32 to vector<1x49xf32>
    %671 = arith.select %666, %669, %670 : vector<1x49xi1>, vector<1x49xf32>
    %672 = arith.addf %627, %671 : vector<1x49xf32>
    %673 = arith.mulf %118, %672 : vector<1x49xf32>
    %674 = arith.addf %493, %673 : vector<1x49xf32>
    %cst_141 = arith.constant 5.000000e-01 : f32
    %675 = vector.broadcast %cst_141 : f32 to vector<1x49xf32>
    %676 = arith.mulf %675, %674 : vector<1x49xf32>
    %cst_142 = arith.constant 0.000000e+00 : f32
    %677 = vector.broadcast %cst_142 : f32 to vector<1x49xf32>
    %678 = arith.maximumf %676, %677 : vector<1x49xf32>
    %679 = arith.addf %186, %119 : vector<1x49xf32>
    %680 = arith.subf %679, %678 : vector<1x49xf32>
    %cst_143 = arith.constant 0.000000e+00 : f32
    %681 = vector.broadcast %cst_143 : f32 to vector<1x49xf32>
    %682 = arith.cmpf ogt, %680, %681 : vector<1x49xf32>
    %cst_144 = arith.constant 1.000000e+00 : f32
    %683 = vector.broadcast %cst_144 : f32 to vector<1x49xf32>
    %684 = arith.select %682, %680, %683 : vector<1x49xi1>, vector<1x49xf32>
    %685 = tpu.reciprocal %684 {approx = true} : vector<1x49xf32> -> vector<1x49xf32>
    %cst_145 = arith.constant 0.000000e+00 : f32
    %686 = vector.broadcast %cst_145 : f32 to vector<1x49xf32>
    %687 = arith.cmpf ogt, %186, %686 : vector<1x49xf32>
    %cst_146 = arith.constant 0.000000e+00 : f32
    %688 = vector.broadcast %cst_146 : f32 to vector<1x49xf32>
    %689 = arith.cmpf ogt, %119, %688 : vector<1x49xf32>
    %690 = arith.andi %687, %689 : vector<1x49xi1>
    %cst_147 = arith.constant 0.000000e+00 : f32
    %691 = vector.broadcast %cst_147 : f32 to vector<1x49xf32>
    %692 = arith.cmpf ogt, %680, %691 : vector<1x49xf32>
    %693 = arith.andi %690, %692 : vector<1x49xi1>
    %694 = arith.mulf %678, %685 : vector<1x49xf32>
    %cst_148 = arith.constant 0.000000e+00 : f32
    %695 = vector.broadcast %cst_148 : f32 to vector<1x49xf32>
    %696 = arith.select %693, %694, %695 : vector<1x49xi1>, vector<1x49xf32>
    %697 = vector.broadcast %243 : vector<1x49xf32> to vector<4x49xf32>
    %698 = arith.subf %697, %88 : vector<4x49xf32>
    %699 = arith.mulf %121, %698 : vector<4x49xf32>
    %700 = vector.broadcast %239 : vector<1x49xf32> to vector<4x49xf32>
    %701 = arith.subf %700, %81 : vector<4x49xf32>
    %702 = arith.mulf %123, %701 : vector<4x49xf32>
    %703 = arith.subf %699, %702 : vector<4x49xf32>
    %704 = vector.broadcast %244 : vector<1x49xf32> to vector<4x49xf32>
    %705 = arith.subf %704, %88 : vector<4x49xf32>
    %706 = arith.mulf %121, %705 : vector<4x49xf32>
    %707 = vector.broadcast %240 : vector<1x49xf32> to vector<4x49xf32>
    %708 = arith.subf %707, %81 : vector<4x49xf32>
    %709 = arith.mulf %123, %708 : vector<4x49xf32>
    %710 = arith.subf %706, %709 : vector<4x49xf32>
    %711 = vector.broadcast %245 : vector<1x49xf32> to vector<4x49xf32>
    %712 = arith.subf %711, %88 : vector<4x49xf32>
    %713 = arith.mulf %121, %712 : vector<4x49xf32>
    %714 = vector.broadcast %241 : vector<1x49xf32> to vector<4x49xf32>
    %715 = arith.subf %714, %81 : vector<4x49xf32>
    %716 = arith.mulf %123, %715 : vector<4x49xf32>
    %717 = arith.subf %713, %716 : vector<4x49xf32>
    %718 = vector.broadcast %246 : vector<1x49xf32> to vector<4x49xf32>
    %719 = arith.subf %718, %88 : vector<4x49xf32>
    %720 = arith.mulf %121, %719 : vector<4x49xf32>
    %721 = vector.broadcast %242 : vector<1x49xf32> to vector<4x49xf32>
    %722 = arith.subf %721, %81 : vector<4x49xf32>
    %723 = arith.mulf %123, %722 : vector<4x49xf32>
    %724 = arith.subf %720, %723 : vector<4x49xf32>
    %725 = vector.broadcast %109 : vector<1x49xf32> to vector<4x49xf32>
    %726 = arith.subf %725, %222 : vector<4x49xf32>
    %727 = arith.mulf %255, %726 : vector<4x49xf32>
    %728 = vector.broadcast %105 : vector<1x49xf32> to vector<4x49xf32>
    %729 = arith.subf %728, %215 : vector<4x49xf32>
    %730 = arith.mulf %257, %729 : vector<4x49xf32>
    %731 = arith.subf %727, %730 : vector<4x49xf32>
    %732 = vector.broadcast %110 : vector<1x49xf32> to vector<4x49xf32>
    %733 = arith.subf %732, %222 : vector<4x49xf32>
    %734 = arith.mulf %255, %733 : vector<4x49xf32>
    %735 = vector.broadcast %106 : vector<1x49xf32> to vector<4x49xf32>
    %736 = arith.subf %735, %215 : vector<4x49xf32>
    %737 = arith.mulf %257, %736 : vector<4x49xf32>
    %738 = arith.subf %734, %737 : vector<4x49xf32>
    %739 = vector.broadcast %111 : vector<1x49xf32> to vector<4x49xf32>
    %740 = arith.subf %739, %222 : vector<4x49xf32>
    %741 = arith.mulf %255, %740 : vector<4x49xf32>
    %742 = vector.broadcast %107 : vector<1x49xf32> to vector<4x49xf32>
    %743 = arith.subf %742, %215 : vector<4x49xf32>
    %744 = arith.mulf %257, %743 : vector<4x49xf32>
    %745 = arith.subf %741, %744 : vector<4x49xf32>
    %746 = vector.broadcast %112 : vector<1x49xf32> to vector<4x49xf32>
    %747 = arith.subf %746, %222 : vector<4x49xf32>
    %748 = arith.mulf %255, %747 : vector<4x49xf32>
    %749 = vector.broadcast %108 : vector<1x49xf32> to vector<4x49xf32>
    %750 = arith.subf %749, %215 : vector<4x49xf32>
    %751 = arith.mulf %257, %750 : vector<4x49xf32>
    %752 = arith.subf %748, %751 : vector<4x49xf32>
    %753 = arith.subf %703, %710 : vector<4x49xf32>
    %cst_149 = arith.constant 0.000000e+00 : f32
    %754 = vector.broadcast %cst_149 : f32 to vector<4x49xf32>
    %755 = arith.cmpf oeq, %753, %754 : vector<4x49xf32>
    %cst_150 = arith.constant 1.000000e+00 : f32
    %756 = vector.broadcast %cst_150 : f32 to vector<4x49xf32>
    %757 = arith.select %755, %756, %753 : vector<4x49xi1>, vector<4x49xf32>
    %758 = tpu.reciprocal %757 {approx = true} : vector<4x49xf32> -> vector<4x49xf32>
    %759 = arith.mulf %703, %758 : vector<4x49xf32>
    %cst_151 = arith.constant 0.000000e+00 : f32
    %760 = vector.broadcast %cst_151 : f32 to vector<4x49xf32>
    %761 = arith.cmpf olt, %753, %760 : vector<4x49xf32>
    %cst_152 = arith.constant 0.000000e+00 : f32
    %762 = vector.broadcast %cst_152 : f32 to vector<4x49xf32>
    %763 = arith.cmpf olt, %703, %762 : vector<4x49xf32>
    %764 = arith.andi %755, %763 : vector<4x49xi1>
    %cst_153 = arith.constant 2.000000e+00 : f32
    %cst_154 = arith.constant 0.000000e+00 : f32
    %765 = vector.broadcast %cst_153 : f32 to vector<4x49xf32>
    %766 = vector.broadcast %cst_154 : f32 to vector<4x49xf32>
    %767 = arith.select %764, %765, %766 : vector<4x49xi1>, vector<4x49xf32>
    %768 = arith.select %761, %759, %767 : vector<4x49xi1>, vector<4x49xf32>
    %cst_155 = arith.constant 0.000000e+00 : f32
    %769 = vector.broadcast %cst_155 : f32 to vector<4x49xf32>
    %770 = arith.cmpf ogt, %753, %769 : vector<4x49xf32>
    %cst_156 = arith.constant 1.000000e+00 : f32
    %771 = vector.broadcast %cst_156 : f32 to vector<4x49xf32>
    %772 = arith.select %770, %759, %771 : vector<4x49xi1>, vector<4x49xf32>
    %cst_157 = arith.constant dense<0xFF800000> : vector<49xf32>
    %773 = vector.multi_reduction <maximumf>, %768, %cst_157 [0] : vector<4x49xf32> to vector<49xf32>
    %774 = vector.shape_cast %773 : vector<49xf32> to vector<1x49xf32>
    %cst_158 = arith.constant 0.000000e+00 : f32
    %775 = vector.broadcast %cst_158 : f32 to vector<1x49xf32>
    %776 = arith.maximumf %774, %775 : vector<1x49xf32>
    %cst_159 = arith.constant dense<0x7F800000> : vector<49xf32>
    %777 = vector.multi_reduction <minimumf>, %772, %cst_159 [0] : vector<4x49xf32> to vector<49xf32>
    %778 = vector.shape_cast %777 : vector<49xf32> to vector<1x49xf32>
    %cst_160 = arith.constant 1.000000e+00 : f32
    %779 = vector.broadcast %cst_160 : f32 to vector<1x49xf32>
    %780 = arith.minimumf %778, %779 : vector<1x49xf32>
    %781 = arith.subf %240, %239 : vector<1x49xf32>
    %782 = arith.subf %244, %243 : vector<1x49xf32>
    %783 = arith.mulf %776, %781 : vector<1x49xf32>
    %784 = arith.addf %239, %783 : vector<1x49xf32>
    %785 = arith.mulf %776, %782 : vector<1x49xf32>
    %786 = arith.addf %243, %785 : vector<1x49xf32>
    %787 = arith.mulf %780, %781 : vector<1x49xf32>
    %788 = arith.addf %239, %787 : vector<1x49xf32>
    %789 = arith.mulf %780, %782 : vector<1x49xf32>
    %790 = arith.addf %243, %789 : vector<1x49xf32>
    %791 = arith.cmpf olt, %776, %780 : vector<1x49xf32>
    %792 = arith.mulf %784, %790 : vector<1x49xf32>
    %793 = arith.mulf %788, %786 : vector<1x49xf32>
    %794 = arith.subf %792, %793 : vector<1x49xf32>
    %cst_161 = arith.constant 0.000000e+00 : f32
    %795 = vector.broadcast %cst_161 : f32 to vector<1x49xf32>
    %796 = arith.select %791, %794, %795 : vector<1x49xi1>, vector<1x49xf32>
    %797 = arith.subf %710, %717 : vector<4x49xf32>
    %cst_162 = arith.constant 0.000000e+00 : f32
    %798 = vector.broadcast %cst_162 : f32 to vector<4x49xf32>
    %799 = arith.cmpf oeq, %797, %798 : vector<4x49xf32>
    %cst_163 = arith.constant 1.000000e+00 : f32
    %800 = vector.broadcast %cst_163 : f32 to vector<4x49xf32>
    %801 = arith.select %799, %800, %797 : vector<4x49xi1>, vector<4x49xf32>
    %802 = tpu.reciprocal %801 {approx = true} : vector<4x49xf32> -> vector<4x49xf32>
    %803 = arith.mulf %710, %802 : vector<4x49xf32>
    %cst_164 = arith.constant 0.000000e+00 : f32
    %804 = vector.broadcast %cst_164 : f32 to vector<4x49xf32>
    %805 = arith.cmpf olt, %797, %804 : vector<4x49xf32>
    %cst_165 = arith.constant 0.000000e+00 : f32
    %806 = vector.broadcast %cst_165 : f32 to vector<4x49xf32>
    %807 = arith.cmpf olt, %710, %806 : vector<4x49xf32>
    %808 = arith.andi %799, %807 : vector<4x49xi1>
    %cst_166 = arith.constant 2.000000e+00 : f32
    %cst_167 = arith.constant 0.000000e+00 : f32
    %809 = vector.broadcast %cst_166 : f32 to vector<4x49xf32>
    %810 = vector.broadcast %cst_167 : f32 to vector<4x49xf32>
    %811 = arith.select %808, %809, %810 : vector<4x49xi1>, vector<4x49xf32>
    %812 = arith.select %805, %803, %811 : vector<4x49xi1>, vector<4x49xf32>
    %cst_168 = arith.constant 0.000000e+00 : f32
    %813 = vector.broadcast %cst_168 : f32 to vector<4x49xf32>
    %814 = arith.cmpf ogt, %797, %813 : vector<4x49xf32>
    %cst_169 = arith.constant 1.000000e+00 : f32
    %815 = vector.broadcast %cst_169 : f32 to vector<4x49xf32>
    %816 = arith.select %814, %803, %815 : vector<4x49xi1>, vector<4x49xf32>
    %cst_170 = arith.constant dense<0xFF800000> : vector<49xf32>
    %817 = vector.multi_reduction <maximumf>, %812, %cst_170 [0] : vector<4x49xf32> to vector<49xf32>
    %818 = vector.shape_cast %817 : vector<49xf32> to vector<1x49xf32>
    %cst_171 = arith.constant 0.000000e+00 : f32
    %819 = vector.broadcast %cst_171 : f32 to vector<1x49xf32>
    %820 = arith.maximumf %818, %819 : vector<1x49xf32>
    %cst_172 = arith.constant dense<0x7F800000> : vector<49xf32>
    %821 = vector.multi_reduction <minimumf>, %816, %cst_172 [0] : vector<4x49xf32> to vector<49xf32>
    %822 = vector.shape_cast %821 : vector<49xf32> to vector<1x49xf32>
    %cst_173 = arith.constant 1.000000e+00 : f32
    %823 = vector.broadcast %cst_173 : f32 to vector<1x49xf32>
    %824 = arith.minimumf %822, %823 : vector<1x49xf32>
    %825 = arith.subf %241, %240 : vector<1x49xf32>
    %826 = arith.subf %245, %244 : vector<1x49xf32>
    %827 = arith.mulf %820, %825 : vector<1x49xf32>
    %828 = arith.addf %240, %827 : vector<1x49xf32>
    %829 = arith.mulf %820, %826 : vector<1x49xf32>
    %830 = arith.addf %244, %829 : vector<1x49xf32>
    %831 = arith.mulf %824, %825 : vector<1x49xf32>
    %832 = arith.addf %240, %831 : vector<1x49xf32>
    %833 = arith.mulf %824, %826 : vector<1x49xf32>
    %834 = arith.addf %244, %833 : vector<1x49xf32>
    %835 = arith.cmpf olt, %820, %824 : vector<1x49xf32>
    %836 = arith.mulf %828, %834 : vector<1x49xf32>
    %837 = arith.mulf %832, %830 : vector<1x49xf32>
    %838 = arith.subf %836, %837 : vector<1x49xf32>
    %cst_174 = arith.constant 0.000000e+00 : f32
    %839 = vector.broadcast %cst_174 : f32 to vector<1x49xf32>
    %840 = arith.select %835, %838, %839 : vector<1x49xi1>, vector<1x49xf32>
    %841 = arith.addf %796, %840 : vector<1x49xf32>
    %842 = arith.subf %717, %724 : vector<4x49xf32>
    %cst_175 = arith.constant 0.000000e+00 : f32
    %843 = vector.broadcast %cst_175 : f32 to vector<4x49xf32>
    %844 = arith.cmpf oeq, %842, %843 : vector<4x49xf32>
    %cst_176 = arith.constant 1.000000e+00 : f32
    %845 = vector.broadcast %cst_176 : f32 to vector<4x49xf32>
    %846 = arith.select %844, %845, %842 : vector<4x49xi1>, vector<4x49xf32>
    %847 = tpu.reciprocal %846 {approx = true} : vector<4x49xf32> -> vector<4x49xf32>
    %848 = arith.mulf %717, %847 : vector<4x49xf32>
    %cst_177 = arith.constant 0.000000e+00 : f32
    %849 = vector.broadcast %cst_177 : f32 to vector<4x49xf32>
    %850 = arith.cmpf olt, %842, %849 : vector<4x49xf32>
    %cst_178 = arith.constant 0.000000e+00 : f32
    %851 = vector.broadcast %cst_178 : f32 to vector<4x49xf32>
    %852 = arith.cmpf olt, %717, %851 : vector<4x49xf32>
    %853 = arith.andi %844, %852 : vector<4x49xi1>
    %cst_179 = arith.constant 2.000000e+00 : f32
    %cst_180 = arith.constant 0.000000e+00 : f32
    %854 = vector.broadcast %cst_179 : f32 to vector<4x49xf32>
    %855 = vector.broadcast %cst_180 : f32 to vector<4x49xf32>
    %856 = arith.select %853, %854, %855 : vector<4x49xi1>, vector<4x49xf32>
    %857 = arith.select %850, %848, %856 : vector<4x49xi1>, vector<4x49xf32>
    %cst_181 = arith.constant 0.000000e+00 : f32
    %858 = vector.broadcast %cst_181 : f32 to vector<4x49xf32>
    %859 = arith.cmpf ogt, %842, %858 : vector<4x49xf32>
    %cst_182 = arith.constant 1.000000e+00 : f32
    %860 = vector.broadcast %cst_182 : f32 to vector<4x49xf32>
    %861 = arith.select %859, %848, %860 : vector<4x49xi1>, vector<4x49xf32>
    %cst_183 = arith.constant dense<0xFF800000> : vector<49xf32>
    %862 = vector.multi_reduction <maximumf>, %857, %cst_183 [0] : vector<4x49xf32> to vector<49xf32>
    %863 = vector.shape_cast %862 : vector<49xf32> to vector<1x49xf32>
    %cst_184 = arith.constant 0.000000e+00 : f32
    %864 = vector.broadcast %cst_184 : f32 to vector<1x49xf32>
    %865 = arith.maximumf %863, %864 : vector<1x49xf32>
    %cst_185 = arith.constant dense<0x7F800000> : vector<49xf32>
    %866 = vector.multi_reduction <minimumf>, %861, %cst_185 [0] : vector<4x49xf32> to vector<49xf32>
    %867 = vector.shape_cast %866 : vector<49xf32> to vector<1x49xf32>
    %cst_186 = arith.constant 1.000000e+00 : f32
    %868 = vector.broadcast %cst_186 : f32 to vector<1x49xf32>
    %869 = arith.minimumf %867, %868 : vector<1x49xf32>
    %870 = arith.subf %242, %241 : vector<1x49xf32>
    %871 = arith.subf %246, %245 : vector<1x49xf32>
    %872 = arith.mulf %865, %870 : vector<1x49xf32>
    %873 = arith.addf %241, %872 : vector<1x49xf32>
    %874 = arith.mulf %865, %871 : vector<1x49xf32>
    %875 = arith.addf %245, %874 : vector<1x49xf32>
    %876 = arith.mulf %869, %870 : vector<1x49xf32>
    %877 = arith.addf %241, %876 : vector<1x49xf32>
    %878 = arith.mulf %869, %871 : vector<1x49xf32>
    %879 = arith.addf %245, %878 : vector<1x49xf32>
    %880 = arith.cmpf olt, %865, %869 : vector<1x49xf32>
    %881 = arith.mulf %873, %879 : vector<1x49xf32>
    %882 = arith.mulf %877, %875 : vector<1x49xf32>
    %883 = arith.subf %881, %882 : vector<1x49xf32>
    %cst_187 = arith.constant 0.000000e+00 : f32
    %884 = vector.broadcast %cst_187 : f32 to vector<1x49xf32>
    %885 = arith.select %880, %883, %884 : vector<1x49xi1>, vector<1x49xf32>
    %886 = arith.addf %841, %885 : vector<1x49xf32>
    %887 = arith.subf %724, %703 : vector<4x49xf32>
    %cst_188 = arith.constant 0.000000e+00 : f32
    %888 = vector.broadcast %cst_188 : f32 to vector<4x49xf32>
    %889 = arith.cmpf oeq, %887, %888 : vector<4x49xf32>
    %cst_189 = arith.constant 1.000000e+00 : f32
    %890 = vector.broadcast %cst_189 : f32 to vector<4x49xf32>
    %891 = arith.select %889, %890, %887 : vector<4x49xi1>, vector<4x49xf32>
    %892 = tpu.reciprocal %891 {approx = true} : vector<4x49xf32> -> vector<4x49xf32>
    %893 = arith.mulf %724, %892 : vector<4x49xf32>
    %cst_190 = arith.constant 0.000000e+00 : f32
    %894 = vector.broadcast %cst_190 : f32 to vector<4x49xf32>
    %895 = arith.cmpf olt, %887, %894 : vector<4x49xf32>
    %cst_191 = arith.constant 0.000000e+00 : f32
    %896 = vector.broadcast %cst_191 : f32 to vector<4x49xf32>
    %897 = arith.cmpf olt, %724, %896 : vector<4x49xf32>
    %898 = arith.andi %889, %897 : vector<4x49xi1>
    %cst_192 = arith.constant 2.000000e+00 : f32
    %cst_193 = arith.constant 0.000000e+00 : f32
    %899 = vector.broadcast %cst_192 : f32 to vector<4x49xf32>
    %900 = vector.broadcast %cst_193 : f32 to vector<4x49xf32>
    %901 = arith.select %898, %899, %900 : vector<4x49xi1>, vector<4x49xf32>
    %902 = arith.select %895, %893, %901 : vector<4x49xi1>, vector<4x49xf32>
    %cst_194 = arith.constant 0.000000e+00 : f32
    %903 = vector.broadcast %cst_194 : f32 to vector<4x49xf32>
    %904 = arith.cmpf ogt, %887, %903 : vector<4x49xf32>
    %cst_195 = arith.constant 1.000000e+00 : f32
    %905 = vector.broadcast %cst_195 : f32 to vector<4x49xf32>
    %906 = arith.select %904, %893, %905 : vector<4x49xi1>, vector<4x49xf32>
    %cst_196 = arith.constant dense<0xFF800000> : vector<49xf32>
    %907 = vector.multi_reduction <maximumf>, %902, %cst_196 [0] : vector<4x49xf32> to vector<49xf32>
    %908 = vector.shape_cast %907 : vector<49xf32> to vector<1x49xf32>
    %cst_197 = arith.constant 0.000000e+00 : f32
    %909 = vector.broadcast %cst_197 : f32 to vector<1x49xf32>
    %910 = arith.maximumf %908, %909 : vector<1x49xf32>
    %cst_198 = arith.constant dense<0x7F800000> : vector<49xf32>
    %911 = vector.multi_reduction <minimumf>, %906, %cst_198 [0] : vector<4x49xf32> to vector<49xf32>
    %912 = vector.shape_cast %911 : vector<49xf32> to vector<1x49xf32>
    %cst_199 = arith.constant 1.000000e+00 : f32
    %913 = vector.broadcast %cst_199 : f32 to vector<1x49xf32>
    %914 = arith.minimumf %912, %913 : vector<1x49xf32>
    %915 = arith.subf %239, %242 : vector<1x49xf32>
    %916 = arith.subf %243, %246 : vector<1x49xf32>
    %917 = arith.mulf %910, %915 : vector<1x49xf32>
    %918 = arith.addf %242, %917 : vector<1x49xf32>
    %919 = arith.mulf %910, %916 : vector<1x49xf32>
    %920 = arith.addf %246, %919 : vector<1x49xf32>
    %921 = arith.mulf %914, %915 : vector<1x49xf32>
    %922 = arith.addf %242, %921 : vector<1x49xf32>
    %923 = arith.mulf %914, %916 : vector<1x49xf32>
    %924 = arith.addf %246, %923 : vector<1x49xf32>
    %925 = arith.cmpf olt, %910, %914 : vector<1x49xf32>
    %926 = arith.mulf %918, %924 : vector<1x49xf32>
    %927 = arith.mulf %922, %920 : vector<1x49xf32>
    %928 = arith.subf %926, %927 : vector<1x49xf32>
    %cst_200 = arith.constant 0.000000e+00 : f32
    %929 = vector.broadcast %cst_200 : f32 to vector<1x49xf32>
    %930 = arith.select %925, %928, %929 : vector<1x49xi1>, vector<1x49xf32>
    %931 = arith.addf %886, %930 : vector<1x49xf32>
    %932 = arith.mulf %252, %931 : vector<1x49xf32>
    %933 = arith.subf %731, %738 : vector<4x49xf32>
    %cst_201 = arith.constant 0.000000e+00 : f32
    %934 = vector.broadcast %cst_201 : f32 to vector<4x49xf32>
    %935 = arith.cmpf oeq, %933, %934 : vector<4x49xf32>
    %cst_202 = arith.constant 1.000000e+00 : f32
    %936 = vector.broadcast %cst_202 : f32 to vector<4x49xf32>
    %937 = arith.select %935, %936, %933 : vector<4x49xi1>, vector<4x49xf32>
    %938 = tpu.reciprocal %937 {approx = true} : vector<4x49xf32> -> vector<4x49xf32>
    %939 = arith.mulf %731, %938 : vector<4x49xf32>
    %cst_203 = arith.constant 0.000000e+00 : f32
    %940 = vector.broadcast %cst_203 : f32 to vector<4x49xf32>
    %941 = arith.cmpf olt, %933, %940 : vector<4x49xf32>
    %cst_204 = arith.constant 0.000000e+00 : f32
    %942 = vector.broadcast %cst_204 : f32 to vector<4x49xf32>
    %943 = arith.cmpf olt, %731, %942 : vector<4x49xf32>
    %944 = arith.andi %935, %943 : vector<4x49xi1>
    %cst_205 = arith.constant 2.000000e+00 : f32
    %cst_206 = arith.constant 0.000000e+00 : f32
    %945 = vector.broadcast %cst_205 : f32 to vector<4x49xf32>
    %946 = vector.broadcast %cst_206 : f32 to vector<4x49xf32>
    %947 = arith.select %944, %945, %946 : vector<4x49xi1>, vector<4x49xf32>
    %948 = arith.select %941, %939, %947 : vector<4x49xi1>, vector<4x49xf32>
    %cst_207 = arith.constant 0.000000e+00 : f32
    %949 = vector.broadcast %cst_207 : f32 to vector<4x49xf32>
    %950 = arith.cmpf ogt, %933, %949 : vector<4x49xf32>
    %cst_208 = arith.constant 1.000000e+00 : f32
    %951 = vector.broadcast %cst_208 : f32 to vector<4x49xf32>
    %952 = arith.select %950, %939, %951 : vector<4x49xi1>, vector<4x49xf32>
    %cst_209 = arith.constant dense<0xFF800000> : vector<49xf32>
    %953 = vector.multi_reduction <maximumf>, %948, %cst_209 [0] : vector<4x49xf32> to vector<49xf32>
    %954 = vector.shape_cast %953 : vector<49xf32> to vector<1x49xf32>
    %cst_210 = arith.constant 0.000000e+00 : f32
    %955 = vector.broadcast %cst_210 : f32 to vector<1x49xf32>
    %956 = arith.maximumf %954, %955 : vector<1x49xf32>
    %cst_211 = arith.constant dense<0x7F800000> : vector<49xf32>
    %957 = vector.multi_reduction <minimumf>, %952, %cst_211 [0] : vector<4x49xf32> to vector<49xf32>
    %958 = vector.shape_cast %957 : vector<49xf32> to vector<1x49xf32>
    %cst_212 = arith.constant 1.000000e+00 : f32
    %959 = vector.broadcast %cst_212 : f32 to vector<1x49xf32>
    %960 = arith.minimumf %958, %959 : vector<1x49xf32>
    %961 = arith.subf %106, %105 : vector<1x49xf32>
    %962 = arith.subf %110, %109 : vector<1x49xf32>
    %963 = arith.mulf %956, %961 : vector<1x49xf32>
    %964 = arith.addf %105, %963 : vector<1x49xf32>
    %965 = arith.mulf %956, %962 : vector<1x49xf32>
    %966 = arith.addf %109, %965 : vector<1x49xf32>
    %967 = arith.mulf %960, %961 : vector<1x49xf32>
    %968 = arith.addf %105, %967 : vector<1x49xf32>
    %969 = arith.mulf %960, %962 : vector<1x49xf32>
    %970 = arith.addf %109, %969 : vector<1x49xf32>
    %971 = arith.cmpf olt, %956, %960 : vector<1x49xf32>
    %972 = arith.mulf %964, %970 : vector<1x49xf32>
    %973 = arith.mulf %968, %966 : vector<1x49xf32>
    %974 = arith.subf %972, %973 : vector<1x49xf32>
    %cst_213 = arith.constant 0.000000e+00 : f32
    %975 = vector.broadcast %cst_213 : f32 to vector<1x49xf32>
    %976 = arith.select %971, %974, %975 : vector<1x49xi1>, vector<1x49xf32>
    %977 = arith.subf %738, %745 : vector<4x49xf32>
    %cst_214 = arith.constant 0.000000e+00 : f32
    %978 = vector.broadcast %cst_214 : f32 to vector<4x49xf32>
    %979 = arith.cmpf oeq, %977, %978 : vector<4x49xf32>
    %cst_215 = arith.constant 1.000000e+00 : f32
    %980 = vector.broadcast %cst_215 : f32 to vector<4x49xf32>
    %981 = arith.select %979, %980, %977 : vector<4x49xi1>, vector<4x49xf32>
    %982 = tpu.reciprocal %981 {approx = true} : vector<4x49xf32> -> vector<4x49xf32>
    %983 = arith.mulf %738, %982 : vector<4x49xf32>
    %cst_216 = arith.constant 0.000000e+00 : f32
    %984 = vector.broadcast %cst_216 : f32 to vector<4x49xf32>
    %985 = arith.cmpf olt, %977, %984 : vector<4x49xf32>
    %cst_217 = arith.constant 0.000000e+00 : f32
    %986 = vector.broadcast %cst_217 : f32 to vector<4x49xf32>
    %987 = arith.cmpf olt, %738, %986 : vector<4x49xf32>
    %988 = arith.andi %979, %987 : vector<4x49xi1>
    %cst_218 = arith.constant 2.000000e+00 : f32
    %cst_219 = arith.constant 0.000000e+00 : f32
    %989 = vector.broadcast %cst_218 : f32 to vector<4x49xf32>
    %990 = vector.broadcast %cst_219 : f32 to vector<4x49xf32>
    %991 = arith.select %988, %989, %990 : vector<4x49xi1>, vector<4x49xf32>
    %992 = arith.select %985, %983, %991 : vector<4x49xi1>, vector<4x49xf32>
    %cst_220 = arith.constant 0.000000e+00 : f32
    %993 = vector.broadcast %cst_220 : f32 to vector<4x49xf32>
    %994 = arith.cmpf ogt, %977, %993 : vector<4x49xf32>
    %cst_221 = arith.constant 1.000000e+00 : f32
    %995 = vector.broadcast %cst_221 : f32 to vector<4x49xf32>
    %996 = arith.select %994, %983, %995 : vector<4x49xi1>, vector<4x49xf32>
    %cst_222 = arith.constant dense<0xFF800000> : vector<49xf32>
    %997 = vector.multi_reduction <maximumf>, %992, %cst_222 [0] : vector<4x49xf32> to vector<49xf32>
    %998 = vector.shape_cast %997 : vector<49xf32> to vector<1x49xf32>
    %cst_223 = arith.constant 0.000000e+00 : f32
    %999 = vector.broadcast %cst_223 : f32 to vector<1x49xf32>
    %1000 = arith.maximumf %998, %999 : vector<1x49xf32>
    %cst_224 = arith.constant dense<0x7F800000> : vector<49xf32>
    %1001 = vector.multi_reduction <minimumf>, %996, %cst_224 [0] : vector<4x49xf32> to vector<49xf32>
    %1002 = vector.shape_cast %1001 : vector<49xf32> to vector<1x49xf32>
    %cst_225 = arith.constant 1.000000e+00 : f32
    %1003 = vector.broadcast %cst_225 : f32 to vector<1x49xf32>
    %1004 = arith.minimumf %1002, %1003 : vector<1x49xf32>
    %1005 = arith.subf %107, %106 : vector<1x49xf32>
    %1006 = arith.subf %111, %110 : vector<1x49xf32>
    %1007 = arith.mulf %1000, %1005 : vector<1x49xf32>
    %1008 = arith.addf %106, %1007 : vector<1x49xf32>
    %1009 = arith.mulf %1000, %1006 : vector<1x49xf32>
    %1010 = arith.addf %110, %1009 : vector<1x49xf32>
    %1011 = arith.mulf %1004, %1005 : vector<1x49xf32>
    %1012 = arith.addf %106, %1011 : vector<1x49xf32>
    %1013 = arith.mulf %1004, %1006 : vector<1x49xf32>
    %1014 = arith.addf %110, %1013 : vector<1x49xf32>
    %1015 = arith.cmpf olt, %1000, %1004 : vector<1x49xf32>
    %1016 = arith.mulf %1008, %1014 : vector<1x49xf32>
    %1017 = arith.mulf %1012, %1010 : vector<1x49xf32>
    %1018 = arith.subf %1016, %1017 : vector<1x49xf32>
    %cst_226 = arith.constant 0.000000e+00 : f32
    %1019 = vector.broadcast %cst_226 : f32 to vector<1x49xf32>
    %1020 = arith.select %1015, %1018, %1019 : vector<1x49xi1>, vector<1x49xf32>
    %1021 = arith.addf %976, %1020 : vector<1x49xf32>
    %1022 = arith.subf %745, %752 : vector<4x49xf32>
    %cst_227 = arith.constant 0.000000e+00 : f32
    %1023 = vector.broadcast %cst_227 : f32 to vector<4x49xf32>
    %1024 = arith.cmpf oeq, %1022, %1023 : vector<4x49xf32>
    %cst_228 = arith.constant 1.000000e+00 : f32
    %1025 = vector.broadcast %cst_228 : f32 to vector<4x49xf32>
    %1026 = arith.select %1024, %1025, %1022 : vector<4x49xi1>, vector<4x49xf32>
    %1027 = tpu.reciprocal %1026 {approx = true} : vector<4x49xf32> -> vector<4x49xf32>
    %1028 = arith.mulf %745, %1027 : vector<4x49xf32>
    %cst_229 = arith.constant 0.000000e+00 : f32
    %1029 = vector.broadcast %cst_229 : f32 to vector<4x49xf32>
    %1030 = arith.cmpf olt, %1022, %1029 : vector<4x49xf32>
    %cst_230 = arith.constant 0.000000e+00 : f32
    %1031 = vector.broadcast %cst_230 : f32 to vector<4x49xf32>
    %1032 = arith.cmpf olt, %745, %1031 : vector<4x49xf32>
    %1033 = arith.andi %1024, %1032 : vector<4x49xi1>
    %cst_231 = arith.constant 2.000000e+00 : f32
    %cst_232 = arith.constant 0.000000e+00 : f32
    %1034 = vector.broadcast %cst_231 : f32 to vector<4x49xf32>
    %1035 = vector.broadcast %cst_232 : f32 to vector<4x49xf32>
    %1036 = arith.select %1033, %1034, %1035 : vector<4x49xi1>, vector<4x49xf32>
    %1037 = arith.select %1030, %1028, %1036 : vector<4x49xi1>, vector<4x49xf32>
    %cst_233 = arith.constant 0.000000e+00 : f32
    %1038 = vector.broadcast %cst_233 : f32 to vector<4x49xf32>
    %1039 = arith.cmpf ogt, %1022, %1038 : vector<4x49xf32>
    %cst_234 = arith.constant 1.000000e+00 : f32
    %1040 = vector.broadcast %cst_234 : f32 to vector<4x49xf32>
    %1041 = arith.select %1039, %1028, %1040 : vector<4x49xi1>, vector<4x49xf32>
    %cst_235 = arith.constant dense<0xFF800000> : vector<49xf32>
    %1042 = vector.multi_reduction <maximumf>, %1037, %cst_235 [0] : vector<4x49xf32> to vector<49xf32>
    %1043 = vector.shape_cast %1042 : vector<49xf32> to vector<1x49xf32>
    %cst_236 = arith.constant 0.000000e+00 : f32
    %1044 = vector.broadcast %cst_236 : f32 to vector<1x49xf32>
    %1045 = arith.maximumf %1043, %1044 : vector<1x49xf32>
    %cst_237 = arith.constant dense<0x7F800000> : vector<49xf32>
    %1046 = vector.multi_reduction <minimumf>, %1041, %cst_237 [0] : vector<4x49xf32> to vector<49xf32>
    %1047 = vector.shape_cast %1046 : vector<49xf32> to vector<1x49xf32>
    %cst_238 = arith.constant 1.000000e+00 : f32
    %1048 = vector.broadcast %cst_238 : f32 to vector<1x49xf32>
    %1049 = arith.minimumf %1047, %1048 : vector<1x49xf32>
    %1050 = arith.subf %108, %107 : vector<1x49xf32>
    %1051 = arith.subf %112, %111 : vector<1x49xf32>
    %1052 = arith.mulf %1045, %1050 : vector<1x49xf32>
    %1053 = arith.addf %107, %1052 : vector<1x49xf32>
    %1054 = arith.mulf %1045, %1051 : vector<1x49xf32>
    %1055 = arith.addf %111, %1054 : vector<1x49xf32>
    %1056 = arith.mulf %1049, %1050 : vector<1x49xf32>
    %1057 = arith.addf %107, %1056 : vector<1x49xf32>
    %1058 = arith.mulf %1049, %1051 : vector<1x49xf32>
    %1059 = arith.addf %111, %1058 : vector<1x49xf32>
    %1060 = arith.cmpf olt, %1045, %1049 : vector<1x49xf32>
    %1061 = arith.mulf %1053, %1059 : vector<1x49xf32>
    %1062 = arith.mulf %1057, %1055 : vector<1x49xf32>
    %1063 = arith.subf %1061, %1062 : vector<1x49xf32>
    %cst_239 = arith.constant 0.000000e+00 : f32
    %1064 = vector.broadcast %cst_239 : f32 to vector<1x49xf32>
    %1065 = arith.select %1060, %1063, %1064 : vector<1x49xi1>, vector<1x49xf32>
    %1066 = arith.addf %1021, %1065 : vector<1x49xf32>
    %1067 = arith.subf %752, %731 : vector<4x49xf32>
    %cst_240 = arith.constant 0.000000e+00 : f32
    %1068 = vector.broadcast %cst_240 : f32 to vector<4x49xf32>
    %1069 = arith.cmpf oeq, %1067, %1068 : vector<4x49xf32>
    %cst_241 = arith.constant 1.000000e+00 : f32
    %1070 = vector.broadcast %cst_241 : f32 to vector<4x49xf32>
    %1071 = arith.select %1069, %1070, %1067 : vector<4x49xi1>, vector<4x49xf32>
    %1072 = tpu.reciprocal %1071 {approx = true} : vector<4x49xf32> -> vector<4x49xf32>
    %1073 = arith.mulf %752, %1072 : vector<4x49xf32>
    %cst_242 = arith.constant 0.000000e+00 : f32
    %1074 = vector.broadcast %cst_242 : f32 to vector<4x49xf32>
    %1075 = arith.cmpf olt, %1067, %1074 : vector<4x49xf32>
    %cst_243 = arith.constant 0.000000e+00 : f32
    %1076 = vector.broadcast %cst_243 : f32 to vector<4x49xf32>
    %1077 = arith.cmpf olt, %752, %1076 : vector<4x49xf32>
    %1078 = arith.andi %1069, %1077 : vector<4x49xi1>
    %cst_244 = arith.constant 2.000000e+00 : f32
    %cst_245 = arith.constant 0.000000e+00 : f32
    %1079 = vector.broadcast %cst_244 : f32 to vector<4x49xf32>
    %1080 = vector.broadcast %cst_245 : f32 to vector<4x49xf32>
    %1081 = arith.select %1078, %1079, %1080 : vector<4x49xi1>, vector<4x49xf32>
    %1082 = arith.select %1075, %1073, %1081 : vector<4x49xi1>, vector<4x49xf32>
    %cst_246 = arith.constant 0.000000e+00 : f32
    %1083 = vector.broadcast %cst_246 : f32 to vector<4x49xf32>
    %1084 = arith.cmpf ogt, %1067, %1083 : vector<4x49xf32>
    %cst_247 = arith.constant 1.000000e+00 : f32
    %1085 = vector.broadcast %cst_247 : f32 to vector<4x49xf32>
    %1086 = arith.select %1084, %1073, %1085 : vector<4x49xi1>, vector<4x49xf32>
    %cst_248 = arith.constant dense<0xFF800000> : vector<49xf32>
    %1087 = vector.multi_reduction <maximumf>, %1082, %cst_248 [0] : vector<4x49xf32> to vector<49xf32>
    %1088 = vector.shape_cast %1087 : vector<49xf32> to vector<1x49xf32>
    %cst_249 = arith.constant 0.000000e+00 : f32
    %1089 = vector.broadcast %cst_249 : f32 to vector<1x49xf32>
    %1090 = arith.maximumf %1088, %1089 : vector<1x49xf32>
    %cst_250 = arith.constant dense<0x7F800000> : vector<49xf32>
    %1091 = vector.multi_reduction <minimumf>, %1086, %cst_250 [0] : vector<4x49xf32> to vector<49xf32>
    %1092 = vector.shape_cast %1091 : vector<49xf32> to vector<1x49xf32>
    %cst_251 = arith.constant 1.000000e+00 : f32
    %1093 = vector.broadcast %cst_251 : f32 to vector<1x49xf32>
    %1094 = arith.minimumf %1092, %1093 : vector<1x49xf32>
    %1095 = arith.subf %105, %108 : vector<1x49xf32>
    %1096 = arith.subf %109, %112 : vector<1x49xf32>
    %1097 = arith.mulf %1090, %1095 : vector<1x49xf32>
    %1098 = arith.addf %108, %1097 : vector<1x49xf32>
    %1099 = arith.mulf %1090, %1096 : vector<1x49xf32>
    %1100 = arith.addf %112, %1099 : vector<1x49xf32>
    %1101 = arith.mulf %1094, %1095 : vector<1x49xf32>
    %1102 = arith.addf %108, %1101 : vector<1x49xf32>
    %1103 = arith.mulf %1094, %1096 : vector<1x49xf32>
    %1104 = arith.addf %112, %1103 : vector<1x49xf32>
    %1105 = arith.cmpf olt, %1090, %1094 : vector<1x49xf32>
    %1106 = arith.mulf %1098, %1104 : vector<1x49xf32>
    %1107 = arith.mulf %1102, %1100 : vector<1x49xf32>
    %1108 = arith.subf %1106, %1107 : vector<1x49xf32>
    %cst_252 = arith.constant 0.000000e+00 : f32
    %1109 = vector.broadcast %cst_252 : f32 to vector<1x49xf32>
    %1110 = arith.select %1105, %1108, %1109 : vector<1x49xi1>, vector<1x49xf32>
    %1111 = arith.addf %1066, %1110 : vector<1x49xf32>
    %1112 = arith.mulf %118, %1111 : vector<1x49xf32>
    %1113 = arith.addf %932, %1112 : vector<1x49xf32>
    %cst_253 = arith.constant 5.000000e-01 : f32
    %1114 = vector.broadcast %cst_253 : f32 to vector<1x49xf32>
    %1115 = arith.mulf %1114, %1113 : vector<1x49xf32>
    %cst_254 = arith.constant 0.000000e+00 : f32
    %1116 = vector.broadcast %cst_254 : f32 to vector<1x49xf32>
    %1117 = arith.maximumf %1115, %1116 : vector<1x49xf32>
    %1118 = arith.addf %253, %119 : vector<1x49xf32>
    %1119 = arith.subf %1118, %1117 : vector<1x49xf32>
    %cst_255 = arith.constant 0.000000e+00 : f32
    %1120 = vector.broadcast %cst_255 : f32 to vector<1x49xf32>
    %1121 = arith.cmpf ogt, %1119, %1120 : vector<1x49xf32>
    %cst_256 = arith.constant 1.000000e+00 : f32
    %1122 = vector.broadcast %cst_256 : f32 to vector<1x49xf32>
    %1123 = arith.select %1121, %1119, %1122 : vector<1x49xi1>, vector<1x49xf32>
    %1124 = tpu.reciprocal %1123 {approx = true} : vector<1x49xf32> -> vector<1x49xf32>
    %cst_257 = arith.constant 0.000000e+00 : f32
    %1125 = vector.broadcast %cst_257 : f32 to vector<1x49xf32>
    %1126 = arith.cmpf ogt, %253, %1125 : vector<1x49xf32>
    %cst_258 = arith.constant 0.000000e+00 : f32
    %1127 = vector.broadcast %cst_258 : f32 to vector<1x49xf32>
    %1128 = arith.cmpf ogt, %119, %1127 : vector<1x49xf32>
    %1129 = arith.andi %1126, %1128 : vector<1x49xi1>
    %cst_259 = arith.constant 0.000000e+00 : f32
    %1130 = vector.broadcast %cst_259 : f32 to vector<1x49xf32>
    %1131 = arith.cmpf ogt, %1119, %1130 : vector<1x49xf32>
    %1132 = arith.andi %1129, %1131 : vector<1x49xi1>
    %1133 = arith.mulf %1117, %1124 : vector<1x49xf32>
    %cst_260 = arith.constant 0.000000e+00 : f32
    %1134 = vector.broadcast %cst_260 : f32 to vector<1x49xf32>
    %1135 = arith.select %1132, %1133, %1134 : vector<1x49xi1>, vector<1x49xf32>
    %1136 = arith.subf %34, %46 : vector<1x49xf32>
    %1137 = arith.mulf %1136, %1136 : vector<1x49xf32>
    %1138 = arith.subf %35, %47 : vector<1x49xf32>
    %1139 = arith.mulf %1138, %1138 : vector<1x49xf32>
    %1140 = arith.addf %1137, %1139 : vector<1x49xf32>
    %1141 = math.sqrt %36 : vector<1x49xf32>
    %1142 = math.sqrt %48 : vector<1x49xf32>
    %1143 = arith.subf %1141, %1142 : vector<1x49xf32>
    %1144 = arith.mulf %1143, %1143 : vector<1x49xf32>
    %1145 = arith.addf %1140, %1144 : vector<1x49xf32>
    %1146 = math.sqrt %37 : vector<1x49xf32>
    %1147 = math.sqrt %49 : vector<1x49xf32>
    %1148 = arith.subf %1146, %1147 : vector<1x49xf32>
    %1149 = arith.mulf %1148, %1148 : vector<1x49xf32>
    %1150 = arith.addf %1145, %1149 : vector<1x49xf32>
    %cst_261 = arith.constant 5.000000e+00 : f32
    %1151 = vector.broadcast %cst_261 : f32 to vector<1x49xf32>
    %1152 = arith.mulf %1151, %1150 : vector<1x49xf32>
    %1153 = arith.subf %38, %50 : vector<1x49xf32>
    %1154 = arith.mulf %1153, %1153 : vector<1x49xf32>
    %cst_262 = arith.constant 5.000000e+00 : f32
    %1155 = vector.broadcast %cst_262 : f32 to vector<1x49xf32>
    %1156 = arith.mulf %1155, %1154 : vector<1x49xf32>
    %1157 = arith.addf %1152, %1156 : vector<1x49xf32>
    %1158 = arith.subf %40, %52 : vector<1x49xf32>
    %1159 = arith.mulf %1158, %1158 : vector<1x49xf32>
    %1160 = arith.subf %41, %53 : vector<1x49xf32>
    %1161 = arith.mulf %1160, %1160 : vector<1x49xf32>
    %1162 = arith.addf %1159, %1161 : vector<1x49xf32>
    %1163 = math.sqrt %42 : vector<1x49xf32>
    %1164 = math.sqrt %54 : vector<1x49xf32>
    %1165 = arith.subf %1163, %1164 : vector<1x49xf32>
    %1166 = arith.mulf %1165, %1165 : vector<1x49xf32>
    %1167 = arith.addf %1162, %1166 : vector<1x49xf32>
    %1168 = math.sqrt %43 : vector<1x49xf32>
    %1169 = math.sqrt %55 : vector<1x49xf32>
    %1170 = arith.subf %1168, %1169 : vector<1x49xf32>
    %1171 = arith.mulf %1170, %1170 : vector<1x49xf32>
    %1172 = arith.addf %1167, %1171 : vector<1x49xf32>
    %cst_263 = arith.constant 5.000000e+00 : f32
    %1173 = vector.broadcast %cst_263 : f32 to vector<1x49xf32>
    %1174 = arith.mulf %1173, %1172 : vector<1x49xf32>
    %1175 = arith.subf %44, %56 : vector<1x49xf32>
    %1176 = arith.mulf %1175, %1175 : vector<1x49xf32>
    %cst_264 = arith.constant 5.000000e+00 : f32
    %1177 = vector.broadcast %cst_264 : f32 to vector<1x49xf32>
    %1178 = arith.mulf %1177, %1176 : vector<1x49xf32>
    %1179 = arith.addf %1174, %1178 : vector<1x49xf32>
    %1180 = arith.subf %39, %696 : vector<1x49xf32>
    %1181 = arith.mulf %1180, %1180 : vector<1x49xf32>
    %1182 = arith.subf %45, %1135 : vector<1x49xf32>
    %1183 = arith.mulf %1182, %1182 : vector<1x49xf32>
    %1184 = arith.cmpf oge, %696, %1135 : vector<1x49xf32>
    %1185 = arith.addf %1157, %1181 : vector<1x49xf32>
    %cst_265 = arith.constant 5.000000e-01 : f32
    %1186 = vector.broadcast %cst_265 : f32 to vector<1x49xf32>
    %1187 = arith.mulf %1186, %1183 : vector<1x49xf32>
    %1188 = arith.addf %1185, %1187 : vector<1x49xf32>
    %1189 = arith.addf %1179, %1183 : vector<1x49xf32>
    %cst_266 = arith.constant 5.000000e-01 : f32
    %1190 = vector.broadcast %cst_266 : f32 to vector<1x49xf32>
    %1191 = arith.mulf %1190, %1181 : vector<1x49xf32>
    %1192 = arith.addf %1189, %1191 : vector<1x49xf32>
    %1193 = arith.select %1184, %1188, %1192 : vector<1x49xi1>, vector<1x49xf32>
    %c0_267 = arith.constant 0 : index
    %c12 = arith.constant 12 : index
    %c0_268 = arith.constant 0 : index
    %1194 = vector.load %arg0[%c0_267, %c12, %c0_268] : memref<2x30x49xf32, #tpu.memory_space<vmem>>, vector<1x18x49xf32>
    %1195 = vector.shape_cast %1194 : vector<1x18x49xf32> to vector<18x49xf32>
    %c0_269 = arith.constant 0 : index
    %c12_270 = arith.constant 12 : index
    %c0_271 = arith.constant 0 : index
    %1196 = vector.load %arg1[%c0_269, %c12_270, %c0_271] : memref<2x30x49xf32, #tpu.memory_space<vmem>>, vector<1x18x49xf32>
    %1197 = vector.shape_cast %1196 : vector<1x18x49xf32> to vector<18x49xf32>
    %1198 = arith.subf %1195, %1197 : vector<18x49xf32>
    %1199 = arith.mulf %1198, %1198 : vector<18x49xf32>
    %cst_272 = arith.constant dense<0.000000e+00> : vector<49xf32>
    %1200 = vector.multi_reduction <add>, %1199, %cst_272 [0] : vector<18x49xf32> to vector<49xf32>
    %1201 = vector.shape_cast %1200 : vector<49xf32> to vector<1x49xf32>
    %1202 = arith.addf %1193, %1201 : vector<1x49xf32>
    %1203 = arith.mulf %39, %39 : vector<1x49xf32>
    %1204 = arith.mulf %45, %45 : vector<1x49xf32>
    %1205 = arith.addf %1203, %1204 : vector<1x49xf32>
    %cst_273 = arith.constant 5.000000e-01 : f32
    %1206 = vector.broadcast %cst_273 : f32 to vector<1x49xf32>
    %1207 = arith.mulf %1206, %1205 : vector<1x49xf32>
    %cst_274 = arith.constant 1.000000e+00 : f32
    %1208 = vector.broadcast %cst_274 : f32 to vector<1x49xf32>
    %1209 = arith.cmpf oeq, %51, %1208 : vector<1x49xf32>
    %1210 = arith.select %1209, %1202, %1207 : vector<1x49xi1>, vector<1x49xf32>
    %1211 = vector.shape_cast %1210 : vector<1x49xf32> to vector<1x1x49xf32>
    %cst_275 = arith.constant dense<0.000000e+00> : vector<1xf32>
    %1212 = vector.multi_reduction <add>, %1211, %cst_275 [1, 2] : vector<1x1x49xf32> to vector<1xf32>
    %1213 = vector.shape_cast %1212 : vector<1xf32> to vector<1x1x1xf32>
    %1214 = vector.extract %1213[0, 0, 0] : f32 from vector<1x1x1xf32>
    %cst_276 = arith.constant 0.000000e+00 : f32
    %1215 = arith.addf %cst_276, %1214 : f32
    %c1 = arith.constant 1 : index
    %c0_277 = arith.constant 0 : index
    %c0_278 = arith.constant 0 : index
    %1216 = vector.load %arg0[%c1, %c0_277, %c0_278] : memref<2x30x49xf32, #tpu.memory_space<vmem>>, vector<1x12x49xf32>
    %1217 = vector.shape_cast %1216 : vector<1x12x49xf32> to vector<12x49xf32>
    %c1_279 = arith.constant 1 : index
    %c0_280 = arith.constant 0 : index
    %c0_281 = arith.constant 0 : index
    %1218 = vector.load %arg1[%c1_279, %c0_280, %c0_281] : memref<2x30x49xf32, #tpu.memory_space<vmem>>, vector<1x12x49xf32>
    %1219 = vector.shape_cast %1218 : vector<1x12x49xf32> to vector<12x49xf32>
    %1220 = vector.extract_strided_slice %1217 {offsets = [0, 0], sizes = [1, 49], strides = [1, 1]} : vector<12x49xf32> to vector<1x49xf32>
    %1221 = vector.extract_strided_slice %1217 {offsets = [1, 0], sizes = [1, 49], strides = [1, 1]} : vector<12x49xf32> to vector<1x49xf32>
    %1222 = vector.extract_strided_slice %1217 {offsets = [2, 0], sizes = [1, 49], strides = [1, 1]} : vector<12x49xf32> to vector<1x49xf32>
    %1223 = vector.extract_strided_slice %1217 {offsets = [3, 0], sizes = [1, 49], strides = [1, 1]} : vector<12x49xf32> to vector<1x49xf32>
    %1224 = vector.extract_strided_slice %1217 {offsets = [4, 0], sizes = [1, 49], strides = [1, 1]} : vector<12x49xf32> to vector<1x49xf32>
    %1225 = vector.extract_strided_slice %1217 {offsets = [5, 0], sizes = [1, 49], strides = [1, 1]} : vector<12x49xf32> to vector<1x49xf32>
    %1226 = vector.extract_strided_slice %1217 {offsets = [6, 0], sizes = [1, 49], strides = [1, 1]} : vector<12x49xf32> to vector<1x49xf32>
    %1227 = vector.extract_strided_slice %1217 {offsets = [7, 0], sizes = [1, 49], strides = [1, 1]} : vector<12x49xf32> to vector<1x49xf32>
    %1228 = vector.extract_strided_slice %1217 {offsets = [8, 0], sizes = [1, 49], strides = [1, 1]} : vector<12x49xf32> to vector<1x49xf32>
    %1229 = vector.extract_strided_slice %1217 {offsets = [9, 0], sizes = [1, 49], strides = [1, 1]} : vector<12x49xf32> to vector<1x49xf32>
    %1230 = vector.extract_strided_slice %1217 {offsets = [10, 0], sizes = [1, 49], strides = [1, 1]} : vector<12x49xf32> to vector<1x49xf32>
    %1231 = vector.extract_strided_slice %1217 {offsets = [11, 0], sizes = [1, 49], strides = [1, 1]} : vector<12x49xf32> to vector<1x49xf32>
    %1232 = vector.extract_strided_slice %1219 {offsets = [0, 0], sizes = [1, 49], strides = [1, 1]} : vector<12x49xf32> to vector<1x49xf32>
    %1233 = vector.extract_strided_slice %1219 {offsets = [1, 0], sizes = [1, 49], strides = [1, 1]} : vector<12x49xf32> to vector<1x49xf32>
    %1234 = vector.extract_strided_slice %1219 {offsets = [2, 0], sizes = [1, 49], strides = [1, 1]} : vector<12x49xf32> to vector<1x49xf32>
    %1235 = vector.extract_strided_slice %1219 {offsets = [3, 0], sizes = [1, 49], strides = [1, 1]} : vector<12x49xf32> to vector<1x49xf32>
    %1236 = vector.extract_strided_slice %1219 {offsets = [4, 0], sizes = [1, 49], strides = [1, 1]} : vector<12x49xf32> to vector<1x49xf32>
    %1237 = vector.extract_strided_slice %1219 {offsets = [5, 0], sizes = [1, 49], strides = [1, 1]} : vector<12x49xf32> to vector<1x49xf32>
    %1238 = vector.extract_strided_slice %1219 {offsets = [6, 0], sizes = [1, 49], strides = [1, 1]} : vector<12x49xf32> to vector<1x49xf32>
    %1239 = vector.extract_strided_slice %1219 {offsets = [7, 0], sizes = [1, 49], strides = [1, 1]} : vector<12x49xf32> to vector<1x49xf32>
    %1240 = vector.extract_strided_slice %1219 {offsets = [8, 0], sizes = [1, 49], strides = [1, 1]} : vector<12x49xf32> to vector<1x49xf32>
    %1241 = vector.extract_strided_slice %1219 {offsets = [9, 0], sizes = [1, 49], strides = [1, 1]} : vector<12x49xf32> to vector<1x49xf32>
    %1242 = vector.extract_strided_slice %1219 {offsets = [10, 0], sizes = [1, 49], strides = [1, 1]} : vector<12x49xf32> to vector<1x49xf32>
    %1243 = arith.addf %1232, %4 : vector<1x49xf32>
    %cst_282 = arith.constant 7.000000e+00 : f32
    %1244 = vector.broadcast %cst_282 : f32 to vector<1x49xf32>
    %1245 = arith.divf %1243, %1244 : vector<1x49xf32>
    %1246 = arith.addf %1233, %7 : vector<1x49xf32>
    %cst_283 = arith.constant 7.000000e+00 : f32
    %1247 = vector.broadcast %cst_283 : f32 to vector<1x49xf32>
    %1248 = arith.divf %1246, %1247 : vector<1x49xf32>
    %cst_284 = arith.constant 5.000000e-01 : f32
    %1249 = vector.broadcast %cst_284 : f32 to vector<1x49xf32>
    %1250 = arith.mulf %1249, %1234 : vector<1x49xf32>
    %cst_285 = arith.constant 5.000000e-01 : f32
    %1251 = vector.broadcast %cst_285 : f32 to vector<1x49xf32>
    %1252 = arith.mulf %1251, %1235 : vector<1x49xf32>
    %1253 = math.cos %1236 : vector<1x49xf32>
    %1254 = math.sin %1236 : vector<1x49xf32>
    %1255 = vector.broadcast %17 : vector<4x1xf32> to vector<4x49xf32>
    %1256 = vector.broadcast %1250 : vector<1x49xf32> to vector<4x49xf32>
    %1257 = arith.mulf %1255, %1256 : vector<4x49xf32>
    %1258 = vector.broadcast %22 : vector<4x1xf32> to vector<4x49xf32>
    %1259 = vector.broadcast %1252 : vector<1x49xf32> to vector<4x49xf32>
    %1260 = arith.mulf %1258, %1259 : vector<4x49xf32>
    %1261 = vector.broadcast %1253 : vector<1x49xf32> to vector<4x49xf32>
    %1262 = arith.mulf %1261, %1257 : vector<4x49xf32>
    %1263 = vector.broadcast %1245 : vector<1x49xf32> to vector<4x49xf32>
    %1264 = arith.addf %1263, %1262 : vector<4x49xf32>
    %1265 = vector.broadcast %1254 : vector<1x49xf32> to vector<4x49xf32>
    %1266 = arith.mulf %1265, %1260 : vector<4x49xf32>
    %1267 = arith.addf %1264, %1266 : vector<4x49xf32>
    %1268 = vector.broadcast %1254 : vector<1x49xf32> to vector<4x49xf32>
    %1269 = arith.mulf %1268, %1257 : vector<4x49xf32>
    %1270 = vector.broadcast %1248 : vector<1x49xf32> to vector<4x49xf32>
    %1271 = arith.subf %1270, %1269 : vector<4x49xf32>
    %1272 = vector.broadcast %1253 : vector<1x49xf32> to vector<4x49xf32>
    %1273 = arith.mulf %1272, %1260 : vector<4x49xf32>
    %1274 = arith.addf %1271, %1273 : vector<4x49xf32>
    %1275 = vector.broadcast %28 : vector<4x1xf32> to vector<4x49xf32>
    %1276 = vector.broadcast %1250 : vector<1x49xf32> to vector<4x49xf32>
    %1277 = arith.mulf %1275, %1276 : vector<4x49xf32>
    %1278 = vector.broadcast %29 : vector<4x1xf32> to vector<4x49xf32>
    %1279 = vector.broadcast %1252 : vector<1x49xf32> to vector<4x49xf32>
    %1280 = arith.mulf %1278, %1279 : vector<4x49xf32>
    %1281 = vector.broadcast %1253 : vector<1x49xf32> to vector<4x49xf32>
    %1282 = arith.mulf %1281, %1277 : vector<4x49xf32>
    %1283 = vector.broadcast %1254 : vector<1x49xf32> to vector<4x49xf32>
    %1284 = arith.mulf %1283, %1280 : vector<4x49xf32>
    %1285 = arith.addf %1282, %1284 : vector<4x49xf32>
    %1286 = vector.broadcast %1253 : vector<1x49xf32> to vector<4x49xf32>
    %1287 = arith.mulf %1286, %1280 : vector<4x49xf32>
    %1288 = vector.broadcast %1254 : vector<1x49xf32> to vector<4x49xf32>
    %1289 = arith.mulf %1288, %1277 : vector<4x49xf32>
    %1290 = arith.subf %1287, %1289 : vector<4x49xf32>
    %1291 = vector.extract_strided_slice %1267 {offsets = [0, 0], sizes = [1, 49], strides = [1, 1]} : vector<4x49xf32> to vector<1x49xf32>
    %1292 = vector.extract_strided_slice %1267 {offsets = [1, 0], sizes = [1, 49], strides = [1, 1]} : vector<4x49xf32> to vector<1x49xf32>
    %1293 = vector.extract_strided_slice %1267 {offsets = [2, 0], sizes = [1, 49], strides = [1, 1]} : vector<4x49xf32> to vector<1x49xf32>
    %1294 = vector.extract_strided_slice %1267 {offsets = [3, 0], sizes = [1, 49], strides = [1, 1]} : vector<4x49xf32> to vector<1x49xf32>
    %1295 = vector.extract_strided_slice %1274 {offsets = [0, 0], sizes = [1, 49], strides = [1, 1]} : vector<4x49xf32> to vector<1x49xf32>
    %1296 = vector.extract_strided_slice %1274 {offsets = [1, 0], sizes = [1, 49], strides = [1, 1]} : vector<4x49xf32> to vector<1x49xf32>
    %1297 = vector.extract_strided_slice %1274 {offsets = [2, 0], sizes = [1, 49], strides = [1, 1]} : vector<4x49xf32> to vector<1x49xf32>
    %1298 = vector.extract_strided_slice %1274 {offsets = [3, 0], sizes = [1, 49], strides = [1, 1]} : vector<4x49xf32> to vector<1x49xf32>
    %1299 = arith.mulf %1234, %1235 : vector<1x49xf32>
    %cst_286 = arith.constant 0.000000e+00 : f32
    %1300 = vector.broadcast %cst_286 : f32 to vector<1x49xf32>
    %1301 = arith.cmpf oge, %1299, %1300 : vector<1x49xf32>
    %cst_287 = arith.constant 1.000000e+00 : f32
    %cst_288 = arith.constant -1.000000e+00 : f32
    %1302 = vector.broadcast %cst_287 : f32 to vector<1x49xf32>
    %1303 = vector.broadcast %cst_288 : f32 to vector<1x49xf32>
    %1304 = arith.select %1301, %1302, %1303 : vector<1x49xi1>, vector<1x49xf32>
    %1305 = math.absf %1299 : vector<1x49xf32>
    %1306 = vector.broadcast %1304 : vector<1x49xf32> to vector<4x49xf32>
    %1307 = arith.mulf %1306, %1285 : vector<4x49xf32>
    %1308 = vector.broadcast %1304 : vector<1x49xf32> to vector<4x49xf32>
    %1309 = arith.mulf %1308, %1290 : vector<4x49xf32>
    %1310 = arith.addf %1220, %4 : vector<1x49xf32>
    %cst_289 = arith.constant 7.000000e+00 : f32
    %1311 = vector.broadcast %cst_289 : f32 to vector<1x49xf32>
    %1312 = arith.divf %1310, %1311 : vector<1x49xf32>
    %1313 = arith.addf %1221, %7 : vector<1x49xf32>
    %cst_290 = arith.constant 7.000000e+00 : f32
    %1314 = vector.broadcast %cst_290 : f32 to vector<1x49xf32>
    %1315 = arith.divf %1313, %1314 : vector<1x49xf32>
    %cst_291 = arith.constant 5.000000e-01 : f32
    %1316 = vector.broadcast %cst_291 : f32 to vector<1x49xf32>
    %1317 = arith.mulf %1316, %1222 : vector<1x49xf32>
    %cst_292 = arith.constant 5.000000e-01 : f32
    %1318 = vector.broadcast %cst_292 : f32 to vector<1x49xf32>
    %1319 = arith.mulf %1318, %1223 : vector<1x49xf32>
    %1320 = math.cos %1224 : vector<1x49xf32>
    %1321 = math.sin %1224 : vector<1x49xf32>
    %1322 = vector.broadcast %17 : vector<4x1xf32> to vector<4x49xf32>
    %1323 = vector.broadcast %1317 : vector<1x49xf32> to vector<4x49xf32>
    %1324 = arith.mulf %1322, %1323 : vector<4x49xf32>
    %1325 = vector.broadcast %22 : vector<4x1xf32> to vector<4x49xf32>
    %1326 = vector.broadcast %1319 : vector<1x49xf32> to vector<4x49xf32>
    %1327 = arith.mulf %1325, %1326 : vector<4x49xf32>
    %1328 = vector.broadcast %1320 : vector<1x49xf32> to vector<4x49xf32>
    %1329 = arith.mulf %1328, %1324 : vector<4x49xf32>
    %1330 = vector.broadcast %1312 : vector<1x49xf32> to vector<4x49xf32>
    %1331 = arith.addf %1330, %1329 : vector<4x49xf32>
    %1332 = vector.broadcast %1321 : vector<1x49xf32> to vector<4x49xf32>
    %1333 = arith.mulf %1332, %1327 : vector<4x49xf32>
    %1334 = arith.addf %1331, %1333 : vector<4x49xf32>
    %1335 = vector.broadcast %1321 : vector<1x49xf32> to vector<4x49xf32>
    %1336 = arith.mulf %1335, %1324 : vector<4x49xf32>
    %1337 = vector.broadcast %1315 : vector<1x49xf32> to vector<4x49xf32>
    %1338 = arith.subf %1337, %1336 : vector<4x49xf32>
    %1339 = vector.broadcast %1320 : vector<1x49xf32> to vector<4x49xf32>
    %1340 = arith.mulf %1339, %1327 : vector<4x49xf32>
    %1341 = arith.addf %1338, %1340 : vector<4x49xf32>
    %1342 = vector.broadcast %28 : vector<4x1xf32> to vector<4x49xf32>
    %1343 = vector.broadcast %1317 : vector<1x49xf32> to vector<4x49xf32>
    %1344 = arith.mulf %1342, %1343 : vector<4x49xf32>
    %1345 = vector.broadcast %29 : vector<4x1xf32> to vector<4x49xf32>
    %1346 = vector.broadcast %1319 : vector<1x49xf32> to vector<4x49xf32>
    %1347 = arith.mulf %1345, %1346 : vector<4x49xf32>
    %1348 = vector.broadcast %1320 : vector<1x49xf32> to vector<4x49xf32>
    %1349 = arith.mulf %1348, %1344 : vector<4x49xf32>
    %1350 = vector.broadcast %1321 : vector<1x49xf32> to vector<4x49xf32>
    %1351 = arith.mulf %1350, %1347 : vector<4x49xf32>
    %1352 = arith.addf %1349, %1351 : vector<4x49xf32>
    %1353 = vector.broadcast %1320 : vector<1x49xf32> to vector<4x49xf32>
    %1354 = arith.mulf %1353, %1347 : vector<4x49xf32>
    %1355 = vector.broadcast %1321 : vector<1x49xf32> to vector<4x49xf32>
    %1356 = arith.mulf %1355, %1344 : vector<4x49xf32>
    %1357 = arith.subf %1354, %1356 : vector<4x49xf32>
    %1358 = vector.extract_strided_slice %1334 {offsets = [0, 0], sizes = [1, 49], strides = [1, 1]} : vector<4x49xf32> to vector<1x49xf32>
    %1359 = vector.extract_strided_slice %1334 {offsets = [1, 0], sizes = [1, 49], strides = [1, 1]} : vector<4x49xf32> to vector<1x49xf32>
    %1360 = vector.extract_strided_slice %1334 {offsets = [2, 0], sizes = [1, 49], strides = [1, 1]} : vector<4x49xf32> to vector<1x49xf32>
    %1361 = vector.extract_strided_slice %1334 {offsets = [3, 0], sizes = [1, 49], strides = [1, 1]} : vector<4x49xf32> to vector<1x49xf32>
    %1362 = vector.extract_strided_slice %1341 {offsets = [0, 0], sizes = [1, 49], strides = [1, 1]} : vector<4x49xf32> to vector<1x49xf32>
    %1363 = vector.extract_strided_slice %1341 {offsets = [1, 0], sizes = [1, 49], strides = [1, 1]} : vector<4x49xf32> to vector<1x49xf32>
    %1364 = vector.extract_strided_slice %1341 {offsets = [2, 0], sizes = [1, 49], strides = [1, 1]} : vector<4x49xf32> to vector<1x49xf32>
    %1365 = vector.extract_strided_slice %1341 {offsets = [3, 0], sizes = [1, 49], strides = [1, 1]} : vector<4x49xf32> to vector<1x49xf32>
    %1366 = arith.mulf %1222, %1223 : vector<1x49xf32>
    %cst_293 = arith.constant 0.000000e+00 : f32
    %1367 = vector.broadcast %cst_293 : f32 to vector<1x49xf32>
    %1368 = arith.cmpf oge, %1366, %1367 : vector<1x49xf32>
    %cst_294 = arith.constant 1.000000e+00 : f32
    %cst_295 = arith.constant -1.000000e+00 : f32
    %1369 = vector.broadcast %cst_294 : f32 to vector<1x49xf32>
    %1370 = vector.broadcast %cst_295 : f32 to vector<1x49xf32>
    %1371 = arith.select %1368, %1369, %1370 : vector<1x49xi1>, vector<1x49xf32>
    %1372 = math.absf %1366 : vector<1x49xf32>
    %1373 = vector.broadcast %1371 : vector<1x49xf32> to vector<4x49xf32>
    %1374 = arith.mulf %1373, %1352 : vector<4x49xf32>
    %1375 = vector.broadcast %1371 : vector<1x49xf32> to vector<4x49xf32>
    %1376 = arith.mulf %1375, %1357 : vector<4x49xf32>
    %1377 = arith.addf %1226, %4 : vector<1x49xf32>
    %cst_296 = arith.constant 7.000000e+00 : f32
    %1378 = vector.broadcast %cst_296 : f32 to vector<1x49xf32>
    %1379 = arith.divf %1377, %1378 : vector<1x49xf32>
    %1380 = arith.addf %1227, %7 : vector<1x49xf32>
    %cst_297 = arith.constant 7.000000e+00 : f32
    %1381 = vector.broadcast %cst_297 : f32 to vector<1x49xf32>
    %1382 = arith.divf %1380, %1381 : vector<1x49xf32>
    %cst_298 = arith.constant 5.000000e-01 : f32
    %1383 = vector.broadcast %cst_298 : f32 to vector<1x49xf32>
    %1384 = arith.mulf %1383, %1228 : vector<1x49xf32>
    %cst_299 = arith.constant 5.000000e-01 : f32
    %1385 = vector.broadcast %cst_299 : f32 to vector<1x49xf32>
    %1386 = arith.mulf %1385, %1229 : vector<1x49xf32>
    %1387 = math.cos %1230 : vector<1x49xf32>
    %1388 = math.sin %1230 : vector<1x49xf32>
    %1389 = vector.broadcast %17 : vector<4x1xf32> to vector<4x49xf32>
    %1390 = vector.broadcast %1384 : vector<1x49xf32> to vector<4x49xf32>
    %1391 = arith.mulf %1389, %1390 : vector<4x49xf32>
    %1392 = vector.broadcast %22 : vector<4x1xf32> to vector<4x49xf32>
    %1393 = vector.broadcast %1386 : vector<1x49xf32> to vector<4x49xf32>
    %1394 = arith.mulf %1392, %1393 : vector<4x49xf32>
    %1395 = vector.broadcast %1387 : vector<1x49xf32> to vector<4x49xf32>
    %1396 = arith.mulf %1395, %1391 : vector<4x49xf32>
    %1397 = vector.broadcast %1379 : vector<1x49xf32> to vector<4x49xf32>
    %1398 = arith.addf %1397, %1396 : vector<4x49xf32>
    %1399 = vector.broadcast %1388 : vector<1x49xf32> to vector<4x49xf32>
    %1400 = arith.mulf %1399, %1394 : vector<4x49xf32>
    %1401 = arith.addf %1398, %1400 : vector<4x49xf32>
    %1402 = vector.broadcast %1388 : vector<1x49xf32> to vector<4x49xf32>
    %1403 = arith.mulf %1402, %1391 : vector<4x49xf32>
    %1404 = vector.broadcast %1382 : vector<1x49xf32> to vector<4x49xf32>
    %1405 = arith.subf %1404, %1403 : vector<4x49xf32>
    %1406 = vector.broadcast %1387 : vector<1x49xf32> to vector<4x49xf32>
    %1407 = arith.mulf %1406, %1394 : vector<4x49xf32>
    %1408 = arith.addf %1405, %1407 : vector<4x49xf32>
    %1409 = vector.broadcast %28 : vector<4x1xf32> to vector<4x49xf32>
    %1410 = vector.broadcast %1384 : vector<1x49xf32> to vector<4x49xf32>
    %1411 = arith.mulf %1409, %1410 : vector<4x49xf32>
    %1412 = vector.broadcast %29 : vector<4x1xf32> to vector<4x49xf32>
    %1413 = vector.broadcast %1386 : vector<1x49xf32> to vector<4x49xf32>
    %1414 = arith.mulf %1412, %1413 : vector<4x49xf32>
    %1415 = vector.broadcast %1387 : vector<1x49xf32> to vector<4x49xf32>
    %1416 = arith.mulf %1415, %1411 : vector<4x49xf32>
    %1417 = vector.broadcast %1388 : vector<1x49xf32> to vector<4x49xf32>
    %1418 = arith.mulf %1417, %1414 : vector<4x49xf32>
    %1419 = arith.addf %1416, %1418 : vector<4x49xf32>
    %1420 = vector.broadcast %1387 : vector<1x49xf32> to vector<4x49xf32>
    %1421 = arith.mulf %1420, %1414 : vector<4x49xf32>
    %1422 = vector.broadcast %1388 : vector<1x49xf32> to vector<4x49xf32>
    %1423 = arith.mulf %1422, %1411 : vector<4x49xf32>
    %1424 = arith.subf %1421, %1423 : vector<4x49xf32>
    %1425 = vector.extract_strided_slice %1401 {offsets = [0, 0], sizes = [1, 49], strides = [1, 1]} : vector<4x49xf32> to vector<1x49xf32>
    %1426 = vector.extract_strided_slice %1401 {offsets = [1, 0], sizes = [1, 49], strides = [1, 1]} : vector<4x49xf32> to vector<1x49xf32>
    %1427 = vector.extract_strided_slice %1401 {offsets = [2, 0], sizes = [1, 49], strides = [1, 1]} : vector<4x49xf32> to vector<1x49xf32>
    %1428 = vector.extract_strided_slice %1401 {offsets = [3, 0], sizes = [1, 49], strides = [1, 1]} : vector<4x49xf32> to vector<1x49xf32>
    %1429 = vector.extract_strided_slice %1408 {offsets = [0, 0], sizes = [1, 49], strides = [1, 1]} : vector<4x49xf32> to vector<1x49xf32>
    %1430 = vector.extract_strided_slice %1408 {offsets = [1, 0], sizes = [1, 49], strides = [1, 1]} : vector<4x49xf32> to vector<1x49xf32>
    %1431 = vector.extract_strided_slice %1408 {offsets = [2, 0], sizes = [1, 49], strides = [1, 1]} : vector<4x49xf32> to vector<1x49xf32>
    %1432 = vector.extract_strided_slice %1408 {offsets = [3, 0], sizes = [1, 49], strides = [1, 1]} : vector<4x49xf32> to vector<1x49xf32>
    %1433 = arith.mulf %1228, %1229 : vector<1x49xf32>
    %cst_300 = arith.constant 0.000000e+00 : f32
    %1434 = vector.broadcast %cst_300 : f32 to vector<1x49xf32>
    %1435 = arith.cmpf oge, %1433, %1434 : vector<1x49xf32>
    %cst_301 = arith.constant 1.000000e+00 : f32
    %cst_302 = arith.constant -1.000000e+00 : f32
    %1436 = vector.broadcast %cst_301 : f32 to vector<1x49xf32>
    %1437 = vector.broadcast %cst_302 : f32 to vector<1x49xf32>
    %1438 = arith.select %1435, %1436, %1437 : vector<1x49xi1>, vector<1x49xf32>
    %1439 = math.absf %1433 : vector<1x49xf32>
    %1440 = vector.broadcast %1438 : vector<1x49xf32> to vector<4x49xf32>
    %1441 = arith.mulf %1440, %1419 : vector<4x49xf32>
    %1442 = vector.broadcast %1438 : vector<1x49xf32> to vector<4x49xf32>
    %1443 = arith.mulf %1442, %1424 : vector<4x49xf32>
    %1444 = vector.broadcast %1362 : vector<1x49xf32> to vector<4x49xf32>
    %1445 = arith.subf %1444, %1274 : vector<4x49xf32>
    %1446 = arith.mulf %1307, %1445 : vector<4x49xf32>
    %1447 = vector.broadcast %1358 : vector<1x49xf32> to vector<4x49xf32>
    %1448 = arith.subf %1447, %1267 : vector<4x49xf32>
    %1449 = arith.mulf %1309, %1448 : vector<4x49xf32>
    %1450 = arith.subf %1446, %1449 : vector<4x49xf32>
    %1451 = vector.broadcast %1363 : vector<1x49xf32> to vector<4x49xf32>
    %1452 = arith.subf %1451, %1274 : vector<4x49xf32>
    %1453 = arith.mulf %1307, %1452 : vector<4x49xf32>
    %1454 = vector.broadcast %1359 : vector<1x49xf32> to vector<4x49xf32>
    %1455 = arith.subf %1454, %1267 : vector<4x49xf32>
    %1456 = arith.mulf %1309, %1455 : vector<4x49xf32>
    %1457 = arith.subf %1453, %1456 : vector<4x49xf32>
    %1458 = vector.broadcast %1364 : vector<1x49xf32> to vector<4x49xf32>
    %1459 = arith.subf %1458, %1274 : vector<4x49xf32>
    %1460 = arith.mulf %1307, %1459 : vector<4x49xf32>
    %1461 = vector.broadcast %1360 : vector<1x49xf32> to vector<4x49xf32>
    %1462 = arith.subf %1461, %1267 : vector<4x49xf32>
    %1463 = arith.mulf %1309, %1462 : vector<4x49xf32>
    %1464 = arith.subf %1460, %1463 : vector<4x49xf32>
    %1465 = vector.broadcast %1365 : vector<1x49xf32> to vector<4x49xf32>
    %1466 = arith.subf %1465, %1274 : vector<4x49xf32>
    %1467 = arith.mulf %1307, %1466 : vector<4x49xf32>
    %1468 = vector.broadcast %1361 : vector<1x49xf32> to vector<4x49xf32>
    %1469 = arith.subf %1468, %1267 : vector<4x49xf32>
    %1470 = arith.mulf %1309, %1469 : vector<4x49xf32>
    %1471 = arith.subf %1467, %1470 : vector<4x49xf32>
    %1472 = vector.broadcast %1295 : vector<1x49xf32> to vector<4x49xf32>
    %1473 = arith.subf %1472, %1341 : vector<4x49xf32>
    %1474 = arith.mulf %1374, %1473 : vector<4x49xf32>
    %1475 = vector.broadcast %1291 : vector<1x49xf32> to vector<4x49xf32>
    %1476 = arith.subf %1475, %1334 : vector<4x49xf32>
    %1477 = arith.mulf %1376, %1476 : vector<4x49xf32>
    %1478 = arith.subf %1474, %1477 : vector<4x49xf32>
    %1479 = vector.broadcast %1296 : vector<1x49xf32> to vector<4x49xf32>
    %1480 = arith.subf %1479, %1341 : vector<4x49xf32>
    %1481 = arith.mulf %1374, %1480 : vector<4x49xf32>
    %1482 = vector.broadcast %1292 : vector<1x49xf32> to vector<4x49xf32>
    %1483 = arith.subf %1482, %1334 : vector<4x49xf32>
    %1484 = arith.mulf %1376, %1483 : vector<4x49xf32>
    %1485 = arith.subf %1481, %1484 : vector<4x49xf32>
    %1486 = vector.broadcast %1297 : vector<1x49xf32> to vector<4x49xf32>
    %1487 = arith.subf %1486, %1341 : vector<4x49xf32>
    %1488 = arith.mulf %1374, %1487 : vector<4x49xf32>
    %1489 = vector.broadcast %1293 : vector<1x49xf32> to vector<4x49xf32>
    %1490 = arith.subf %1489, %1334 : vector<4x49xf32>
    %1491 = arith.mulf %1376, %1490 : vector<4x49xf32>
    %1492 = arith.subf %1488, %1491 : vector<4x49xf32>
    %1493 = vector.broadcast %1298 : vector<1x49xf32> to vector<4x49xf32>
    %1494 = arith.subf %1493, %1341 : vector<4x49xf32>
    %1495 = arith.mulf %1374, %1494 : vector<4x49xf32>
    %1496 = vector.broadcast %1294 : vector<1x49xf32> to vector<4x49xf32>
    %1497 = arith.subf %1496, %1334 : vector<4x49xf32>
    %1498 = arith.mulf %1376, %1497 : vector<4x49xf32>
    %1499 = arith.subf %1495, %1498 : vector<4x49xf32>
    %1500 = arith.subf %1450, %1457 : vector<4x49xf32>
    %cst_303 = arith.constant 0.000000e+00 : f32
    %1501 = vector.broadcast %cst_303 : f32 to vector<4x49xf32>
    %1502 = arith.cmpf oeq, %1500, %1501 : vector<4x49xf32>
    %cst_304 = arith.constant 1.000000e+00 : f32
    %1503 = vector.broadcast %cst_304 : f32 to vector<4x49xf32>
    %1504 = arith.select %1502, %1503, %1500 : vector<4x49xi1>, vector<4x49xf32>
    %1505 = tpu.reciprocal %1504 {approx = true} : vector<4x49xf32> -> vector<4x49xf32>
    %1506 = arith.mulf %1450, %1505 : vector<4x49xf32>
    %cst_305 = arith.constant 0.000000e+00 : f32
    %1507 = vector.broadcast %cst_305 : f32 to vector<4x49xf32>
    %1508 = arith.cmpf olt, %1500, %1507 : vector<4x49xf32>
    %cst_306 = arith.constant 0.000000e+00 : f32
    %1509 = vector.broadcast %cst_306 : f32 to vector<4x49xf32>
    %1510 = arith.cmpf olt, %1450, %1509 : vector<4x49xf32>
    %1511 = arith.andi %1502, %1510 : vector<4x49xi1>
    %cst_307 = arith.constant 2.000000e+00 : f32
    %cst_308 = arith.constant 0.000000e+00 : f32
    %1512 = vector.broadcast %cst_307 : f32 to vector<4x49xf32>
    %1513 = vector.broadcast %cst_308 : f32 to vector<4x49xf32>
    %1514 = arith.select %1511, %1512, %1513 : vector<4x49xi1>, vector<4x49xf32>
    %1515 = arith.select %1508, %1506, %1514 : vector<4x49xi1>, vector<4x49xf32>
    %cst_309 = arith.constant 0.000000e+00 : f32
    %1516 = vector.broadcast %cst_309 : f32 to vector<4x49xf32>
    %1517 = arith.cmpf ogt, %1500, %1516 : vector<4x49xf32>
    %cst_310 = arith.constant 1.000000e+00 : f32
    %1518 = vector.broadcast %cst_310 : f32 to vector<4x49xf32>
    %1519 = arith.select %1517, %1506, %1518 : vector<4x49xi1>, vector<4x49xf32>
    %cst_311 = arith.constant dense<0xFF800000> : vector<49xf32>
    %1520 = vector.multi_reduction <maximumf>, %1515, %cst_311 [0] : vector<4x49xf32> to vector<49xf32>
    %1521 = vector.shape_cast %1520 : vector<49xf32> to vector<1x49xf32>
    %cst_312 = arith.constant 0.000000e+00 : f32
    %1522 = vector.broadcast %cst_312 : f32 to vector<1x49xf32>
    %1523 = arith.maximumf %1521, %1522 : vector<1x49xf32>
    %cst_313 = arith.constant dense<0x7F800000> : vector<49xf32>
    %1524 = vector.multi_reduction <minimumf>, %1519, %cst_313 [0] : vector<4x49xf32> to vector<49xf32>
    %1525 = vector.shape_cast %1524 : vector<49xf32> to vector<1x49xf32>
    %cst_314 = arith.constant 1.000000e+00 : f32
    %1526 = vector.broadcast %cst_314 : f32 to vector<1x49xf32>
    %1527 = arith.minimumf %1525, %1526 : vector<1x49xf32>
    %1528 = arith.subf %1359, %1358 : vector<1x49xf32>
    %1529 = arith.subf %1363, %1362 : vector<1x49xf32>
    %1530 = arith.mulf %1523, %1528 : vector<1x49xf32>
    %1531 = arith.addf %1358, %1530 : vector<1x49xf32>
    %1532 = arith.mulf %1523, %1529 : vector<1x49xf32>
    %1533 = arith.addf %1362, %1532 : vector<1x49xf32>
    %1534 = arith.mulf %1527, %1528 : vector<1x49xf32>
    %1535 = arith.addf %1358, %1534 : vector<1x49xf32>
    %1536 = arith.mulf %1527, %1529 : vector<1x49xf32>
    %1537 = arith.addf %1362, %1536 : vector<1x49xf32>
    %1538 = arith.cmpf olt, %1523, %1527 : vector<1x49xf32>
    %1539 = arith.mulf %1531, %1537 : vector<1x49xf32>
    %1540 = arith.mulf %1535, %1533 : vector<1x49xf32>
    %1541 = arith.subf %1539, %1540 : vector<1x49xf32>
    %cst_315 = arith.constant 0.000000e+00 : f32
    %1542 = vector.broadcast %cst_315 : f32 to vector<1x49xf32>
    %1543 = arith.select %1538, %1541, %1542 : vector<1x49xi1>, vector<1x49xf32>
    %1544 = arith.subf %1457, %1464 : vector<4x49xf32>
    %cst_316 = arith.constant 0.000000e+00 : f32
    %1545 = vector.broadcast %cst_316 : f32 to vector<4x49xf32>
    %1546 = arith.cmpf oeq, %1544, %1545 : vector<4x49xf32>
    %cst_317 = arith.constant 1.000000e+00 : f32
    %1547 = vector.broadcast %cst_317 : f32 to vector<4x49xf32>
    %1548 = arith.select %1546, %1547, %1544 : vector<4x49xi1>, vector<4x49xf32>
    %1549 = tpu.reciprocal %1548 {approx = true} : vector<4x49xf32> -> vector<4x49xf32>
    %1550 = arith.mulf %1457, %1549 : vector<4x49xf32>
    %cst_318 = arith.constant 0.000000e+00 : f32
    %1551 = vector.broadcast %cst_318 : f32 to vector<4x49xf32>
    %1552 = arith.cmpf olt, %1544, %1551 : vector<4x49xf32>
    %cst_319 = arith.constant 0.000000e+00 : f32
    %1553 = vector.broadcast %cst_319 : f32 to vector<4x49xf32>
    %1554 = arith.cmpf olt, %1457, %1553 : vector<4x49xf32>
    %1555 = arith.andi %1546, %1554 : vector<4x49xi1>
    %cst_320 = arith.constant 2.000000e+00 : f32
    %cst_321 = arith.constant 0.000000e+00 : f32
    %1556 = vector.broadcast %cst_320 : f32 to vector<4x49xf32>
    %1557 = vector.broadcast %cst_321 : f32 to vector<4x49xf32>
    %1558 = arith.select %1555, %1556, %1557 : vector<4x49xi1>, vector<4x49xf32>
    %1559 = arith.select %1552, %1550, %1558 : vector<4x49xi1>, vector<4x49xf32>
    %cst_322 = arith.constant 0.000000e+00 : f32
    %1560 = vector.broadcast %cst_322 : f32 to vector<4x49xf32>
    %1561 = arith.cmpf ogt, %1544, %1560 : vector<4x49xf32>
    %cst_323 = arith.constant 1.000000e+00 : f32
    %1562 = vector.broadcast %cst_323 : f32 to vector<4x49xf32>
    %1563 = arith.select %1561, %1550, %1562 : vector<4x49xi1>, vector<4x49xf32>
    %cst_324 = arith.constant dense<0xFF800000> : vector<49xf32>
    %1564 = vector.multi_reduction <maximumf>, %1559, %cst_324 [0] : vector<4x49xf32> to vector<49xf32>
    %1565 = vector.shape_cast %1564 : vector<49xf32> to vector<1x49xf32>
    %cst_325 = arith.constant 0.000000e+00 : f32
    %1566 = vector.broadcast %cst_325 : f32 to vector<1x49xf32>
    %1567 = arith.maximumf %1565, %1566 : vector<1x49xf32>
    %cst_326 = arith.constant dense<0x7F800000> : vector<49xf32>
    %1568 = vector.multi_reduction <minimumf>, %1563, %cst_326 [0] : vector<4x49xf32> to vector<49xf32>
    %1569 = vector.shape_cast %1568 : vector<49xf32> to vector<1x49xf32>
    %cst_327 = arith.constant 1.000000e+00 : f32
    %1570 = vector.broadcast %cst_327 : f32 to vector<1x49xf32>
    %1571 = arith.minimumf %1569, %1570 : vector<1x49xf32>
    %1572 = arith.subf %1360, %1359 : vector<1x49xf32>
    %1573 = arith.subf %1364, %1363 : vector<1x49xf32>
    %1574 = arith.mulf %1567, %1572 : vector<1x49xf32>
    %1575 = arith.addf %1359, %1574 : vector<1x49xf32>
    %1576 = arith.mulf %1567, %1573 : vector<1x49xf32>
    %1577 = arith.addf %1363, %1576 : vector<1x49xf32>
    %1578 = arith.mulf %1571, %1572 : vector<1x49xf32>
    %1579 = arith.addf %1359, %1578 : vector<1x49xf32>
    %1580 = arith.mulf %1571, %1573 : vector<1x49xf32>
    %1581 = arith.addf %1363, %1580 : vector<1x49xf32>
    %1582 = arith.cmpf olt, %1567, %1571 : vector<1x49xf32>
    %1583 = arith.mulf %1575, %1581 : vector<1x49xf32>
    %1584 = arith.mulf %1579, %1577 : vector<1x49xf32>
    %1585 = arith.subf %1583, %1584 : vector<1x49xf32>
    %cst_328 = arith.constant 0.000000e+00 : f32
    %1586 = vector.broadcast %cst_328 : f32 to vector<1x49xf32>
    %1587 = arith.select %1582, %1585, %1586 : vector<1x49xi1>, vector<1x49xf32>
    %1588 = arith.addf %1543, %1587 : vector<1x49xf32>
    %1589 = arith.subf %1464, %1471 : vector<4x49xf32>
    %cst_329 = arith.constant 0.000000e+00 : f32
    %1590 = vector.broadcast %cst_329 : f32 to vector<4x49xf32>
    %1591 = arith.cmpf oeq, %1589, %1590 : vector<4x49xf32>
    %cst_330 = arith.constant 1.000000e+00 : f32
    %1592 = vector.broadcast %cst_330 : f32 to vector<4x49xf32>
    %1593 = arith.select %1591, %1592, %1589 : vector<4x49xi1>, vector<4x49xf32>
    %1594 = tpu.reciprocal %1593 {approx = true} : vector<4x49xf32> -> vector<4x49xf32>
    %1595 = arith.mulf %1464, %1594 : vector<4x49xf32>
    %cst_331 = arith.constant 0.000000e+00 : f32
    %1596 = vector.broadcast %cst_331 : f32 to vector<4x49xf32>
    %1597 = arith.cmpf olt, %1589, %1596 : vector<4x49xf32>
    %cst_332 = arith.constant 0.000000e+00 : f32
    %1598 = vector.broadcast %cst_332 : f32 to vector<4x49xf32>
    %1599 = arith.cmpf olt, %1464, %1598 : vector<4x49xf32>
    %1600 = arith.andi %1591, %1599 : vector<4x49xi1>
    %cst_333 = arith.constant 2.000000e+00 : f32
    %cst_334 = arith.constant 0.000000e+00 : f32
    %1601 = vector.broadcast %cst_333 : f32 to vector<4x49xf32>
    %1602 = vector.broadcast %cst_334 : f32 to vector<4x49xf32>
    %1603 = arith.select %1600, %1601, %1602 : vector<4x49xi1>, vector<4x49xf32>
    %1604 = arith.select %1597, %1595, %1603 : vector<4x49xi1>, vector<4x49xf32>
    %cst_335 = arith.constant 0.000000e+00 : f32
    %1605 = vector.broadcast %cst_335 : f32 to vector<4x49xf32>
    %1606 = arith.cmpf ogt, %1589, %1605 : vector<4x49xf32>
    %cst_336 = arith.constant 1.000000e+00 : f32
    %1607 = vector.broadcast %cst_336 : f32 to vector<4x49xf32>
    %1608 = arith.select %1606, %1595, %1607 : vector<4x49xi1>, vector<4x49xf32>
    %cst_337 = arith.constant dense<0xFF800000> : vector<49xf32>
    %1609 = vector.multi_reduction <maximumf>, %1604, %cst_337 [0] : vector<4x49xf32> to vector<49xf32>
    %1610 = vector.shape_cast %1609 : vector<49xf32> to vector<1x49xf32>
    %cst_338 = arith.constant 0.000000e+00 : f32
    %1611 = vector.broadcast %cst_338 : f32 to vector<1x49xf32>
    %1612 = arith.maximumf %1610, %1611 : vector<1x49xf32>
    %cst_339 = arith.constant dense<0x7F800000> : vector<49xf32>
    %1613 = vector.multi_reduction <minimumf>, %1608, %cst_339 [0] : vector<4x49xf32> to vector<49xf32>
    %1614 = vector.shape_cast %1613 : vector<49xf32> to vector<1x49xf32>
    %cst_340 = arith.constant 1.000000e+00 : f32
    %1615 = vector.broadcast %cst_340 : f32 to vector<1x49xf32>
    %1616 = arith.minimumf %1614, %1615 : vector<1x49xf32>
    %1617 = arith.subf %1361, %1360 : vector<1x49xf32>
    %1618 = arith.subf %1365, %1364 : vector<1x49xf32>
    %1619 = arith.mulf %1612, %1617 : vector<1x49xf32>
    %1620 = arith.addf %1360, %1619 : vector<1x49xf32>
    %1621 = arith.mulf %1612, %1618 : vector<1x49xf32>
    %1622 = arith.addf %1364, %1621 : vector<1x49xf32>
    %1623 = arith.mulf %1616, %1617 : vector<1x49xf32>
    %1624 = arith.addf %1360, %1623 : vector<1x49xf32>
    %1625 = arith.mulf %1616, %1618 : vector<1x49xf32>
    %1626 = arith.addf %1364, %1625 : vector<1x49xf32>
    %1627 = arith.cmpf olt, %1612, %1616 : vector<1x49xf32>
    %1628 = arith.mulf %1620, %1626 : vector<1x49xf32>
    %1629 = arith.mulf %1624, %1622 : vector<1x49xf32>
    %1630 = arith.subf %1628, %1629 : vector<1x49xf32>
    %cst_341 = arith.constant 0.000000e+00 : f32
    %1631 = vector.broadcast %cst_341 : f32 to vector<1x49xf32>
    %1632 = arith.select %1627, %1630, %1631 : vector<1x49xi1>, vector<1x49xf32>
    %1633 = arith.addf %1588, %1632 : vector<1x49xf32>
    %1634 = arith.subf %1471, %1450 : vector<4x49xf32>
    %cst_342 = arith.constant 0.000000e+00 : f32
    %1635 = vector.broadcast %cst_342 : f32 to vector<4x49xf32>
    %1636 = arith.cmpf oeq, %1634, %1635 : vector<4x49xf32>
    %cst_343 = arith.constant 1.000000e+00 : f32
    %1637 = vector.broadcast %cst_343 : f32 to vector<4x49xf32>
    %1638 = arith.select %1636, %1637, %1634 : vector<4x49xi1>, vector<4x49xf32>
    %1639 = tpu.reciprocal %1638 {approx = true} : vector<4x49xf32> -> vector<4x49xf32>
    %1640 = arith.mulf %1471, %1639 : vector<4x49xf32>
    %cst_344 = arith.constant 0.000000e+00 : f32
    %1641 = vector.broadcast %cst_344 : f32 to vector<4x49xf32>
    %1642 = arith.cmpf olt, %1634, %1641 : vector<4x49xf32>
    %cst_345 = arith.constant 0.000000e+00 : f32
    %1643 = vector.broadcast %cst_345 : f32 to vector<4x49xf32>
    %1644 = arith.cmpf olt, %1471, %1643 : vector<4x49xf32>
    %1645 = arith.andi %1636, %1644 : vector<4x49xi1>
    %cst_346 = arith.constant 2.000000e+00 : f32
    %cst_347 = arith.constant 0.000000e+00 : f32
    %1646 = vector.broadcast %cst_346 : f32 to vector<4x49xf32>
    %1647 = vector.broadcast %cst_347 : f32 to vector<4x49xf32>
    %1648 = arith.select %1645, %1646, %1647 : vector<4x49xi1>, vector<4x49xf32>
    %1649 = arith.select %1642, %1640, %1648 : vector<4x49xi1>, vector<4x49xf32>
    %cst_348 = arith.constant 0.000000e+00 : f32
    %1650 = vector.broadcast %cst_348 : f32 to vector<4x49xf32>
    %1651 = arith.cmpf ogt, %1634, %1650 : vector<4x49xf32>
    %cst_349 = arith.constant 1.000000e+00 : f32
    %1652 = vector.broadcast %cst_349 : f32 to vector<4x49xf32>
    %1653 = arith.select %1651, %1640, %1652 : vector<4x49xi1>, vector<4x49xf32>
    %cst_350 = arith.constant dense<0xFF800000> : vector<49xf32>
    %1654 = vector.multi_reduction <maximumf>, %1649, %cst_350 [0] : vector<4x49xf32> to vector<49xf32>
    %1655 = vector.shape_cast %1654 : vector<49xf32> to vector<1x49xf32>
    %cst_351 = arith.constant 0.000000e+00 : f32
    %1656 = vector.broadcast %cst_351 : f32 to vector<1x49xf32>
    %1657 = arith.maximumf %1655, %1656 : vector<1x49xf32>
    %cst_352 = arith.constant dense<0x7F800000> : vector<49xf32>
    %1658 = vector.multi_reduction <minimumf>, %1653, %cst_352 [0] : vector<4x49xf32> to vector<49xf32>
    %1659 = vector.shape_cast %1658 : vector<49xf32> to vector<1x49xf32>
    %cst_353 = arith.constant 1.000000e+00 : f32
    %1660 = vector.broadcast %cst_353 : f32 to vector<1x49xf32>
    %1661 = arith.minimumf %1659, %1660 : vector<1x49xf32>
    %1662 = arith.subf %1358, %1361 : vector<1x49xf32>
    %1663 = arith.subf %1362, %1365 : vector<1x49xf32>
    %1664 = arith.mulf %1657, %1662 : vector<1x49xf32>
    %1665 = arith.addf %1361, %1664 : vector<1x49xf32>
    %1666 = arith.mulf %1657, %1663 : vector<1x49xf32>
    %1667 = arith.addf %1365, %1666 : vector<1x49xf32>
    %1668 = arith.mulf %1661, %1662 : vector<1x49xf32>
    %1669 = arith.addf %1361, %1668 : vector<1x49xf32>
    %1670 = arith.mulf %1661, %1663 : vector<1x49xf32>
    %1671 = arith.addf %1365, %1670 : vector<1x49xf32>
    %1672 = arith.cmpf olt, %1657, %1661 : vector<1x49xf32>
    %1673 = arith.mulf %1665, %1671 : vector<1x49xf32>
    %1674 = arith.mulf %1669, %1667 : vector<1x49xf32>
    %1675 = arith.subf %1673, %1674 : vector<1x49xf32>
    %cst_354 = arith.constant 0.000000e+00 : f32
    %1676 = vector.broadcast %cst_354 : f32 to vector<1x49xf32>
    %1677 = arith.select %1672, %1675, %1676 : vector<1x49xi1>, vector<1x49xf32>
    %1678 = arith.addf %1633, %1677 : vector<1x49xf32>
    %1679 = arith.mulf %1371, %1678 : vector<1x49xf32>
    %1680 = arith.subf %1478, %1485 : vector<4x49xf32>
    %cst_355 = arith.constant 0.000000e+00 : f32
    %1681 = vector.broadcast %cst_355 : f32 to vector<4x49xf32>
    %1682 = arith.cmpf oeq, %1680, %1681 : vector<4x49xf32>
    %cst_356 = arith.constant 1.000000e+00 : f32
    %1683 = vector.broadcast %cst_356 : f32 to vector<4x49xf32>
    %1684 = arith.select %1682, %1683, %1680 : vector<4x49xi1>, vector<4x49xf32>
    %1685 = tpu.reciprocal %1684 {approx = true} : vector<4x49xf32> -> vector<4x49xf32>
    %1686 = arith.mulf %1478, %1685 : vector<4x49xf32>
    %cst_357 = arith.constant 0.000000e+00 : f32
    %1687 = vector.broadcast %cst_357 : f32 to vector<4x49xf32>
    %1688 = arith.cmpf olt, %1680, %1687 : vector<4x49xf32>
    %cst_358 = arith.constant 0.000000e+00 : f32
    %1689 = vector.broadcast %cst_358 : f32 to vector<4x49xf32>
    %1690 = arith.cmpf olt, %1478, %1689 : vector<4x49xf32>
    %1691 = arith.andi %1682, %1690 : vector<4x49xi1>
    %cst_359 = arith.constant 2.000000e+00 : f32
    %cst_360 = arith.constant 0.000000e+00 : f32
    %1692 = vector.broadcast %cst_359 : f32 to vector<4x49xf32>
    %1693 = vector.broadcast %cst_360 : f32 to vector<4x49xf32>
    %1694 = arith.select %1691, %1692, %1693 : vector<4x49xi1>, vector<4x49xf32>
    %1695 = arith.select %1688, %1686, %1694 : vector<4x49xi1>, vector<4x49xf32>
    %cst_361 = arith.constant 0.000000e+00 : f32
    %1696 = vector.broadcast %cst_361 : f32 to vector<4x49xf32>
    %1697 = arith.cmpf ogt, %1680, %1696 : vector<4x49xf32>
    %cst_362 = arith.constant 1.000000e+00 : f32
    %1698 = vector.broadcast %cst_362 : f32 to vector<4x49xf32>
    %1699 = arith.select %1697, %1686, %1698 : vector<4x49xi1>, vector<4x49xf32>
    %cst_363 = arith.constant dense<0xFF800000> : vector<49xf32>
    %1700 = vector.multi_reduction <maximumf>, %1695, %cst_363 [0] : vector<4x49xf32> to vector<49xf32>
    %1701 = vector.shape_cast %1700 : vector<49xf32> to vector<1x49xf32>
    %cst_364 = arith.constant 0.000000e+00 : f32
    %1702 = vector.broadcast %cst_364 : f32 to vector<1x49xf32>
    %1703 = arith.maximumf %1701, %1702 : vector<1x49xf32>
    %cst_365 = arith.constant dense<0x7F800000> : vector<49xf32>
    %1704 = vector.multi_reduction <minimumf>, %1699, %cst_365 [0] : vector<4x49xf32> to vector<49xf32>
    %1705 = vector.shape_cast %1704 : vector<49xf32> to vector<1x49xf32>
    %cst_366 = arith.constant 1.000000e+00 : f32
    %1706 = vector.broadcast %cst_366 : f32 to vector<1x49xf32>
    %1707 = arith.minimumf %1705, %1706 : vector<1x49xf32>
    %1708 = arith.subf %1292, %1291 : vector<1x49xf32>
    %1709 = arith.subf %1296, %1295 : vector<1x49xf32>
    %1710 = arith.mulf %1703, %1708 : vector<1x49xf32>
    %1711 = arith.addf %1291, %1710 : vector<1x49xf32>
    %1712 = arith.mulf %1703, %1709 : vector<1x49xf32>
    %1713 = arith.addf %1295, %1712 : vector<1x49xf32>
    %1714 = arith.mulf %1707, %1708 : vector<1x49xf32>
    %1715 = arith.addf %1291, %1714 : vector<1x49xf32>
    %1716 = arith.mulf %1707, %1709 : vector<1x49xf32>
    %1717 = arith.addf %1295, %1716 : vector<1x49xf32>
    %1718 = arith.cmpf olt, %1703, %1707 : vector<1x49xf32>
    %1719 = arith.mulf %1711, %1717 : vector<1x49xf32>
    %1720 = arith.mulf %1715, %1713 : vector<1x49xf32>
    %1721 = arith.subf %1719, %1720 : vector<1x49xf32>
    %cst_367 = arith.constant 0.000000e+00 : f32
    %1722 = vector.broadcast %cst_367 : f32 to vector<1x49xf32>
    %1723 = arith.select %1718, %1721, %1722 : vector<1x49xi1>, vector<1x49xf32>
    %1724 = arith.subf %1485, %1492 : vector<4x49xf32>
    %cst_368 = arith.constant 0.000000e+00 : f32
    %1725 = vector.broadcast %cst_368 : f32 to vector<4x49xf32>
    %1726 = arith.cmpf oeq, %1724, %1725 : vector<4x49xf32>
    %cst_369 = arith.constant 1.000000e+00 : f32
    %1727 = vector.broadcast %cst_369 : f32 to vector<4x49xf32>
    %1728 = arith.select %1726, %1727, %1724 : vector<4x49xi1>, vector<4x49xf32>
    %1729 = tpu.reciprocal %1728 {approx = true} : vector<4x49xf32> -> vector<4x49xf32>
    %1730 = arith.mulf %1485, %1729 : vector<4x49xf32>
    %cst_370 = arith.constant 0.000000e+00 : f32
    %1731 = vector.broadcast %cst_370 : f32 to vector<4x49xf32>
    %1732 = arith.cmpf olt, %1724, %1731 : vector<4x49xf32>
    %cst_371 = arith.constant 0.000000e+00 : f32
    %1733 = vector.broadcast %cst_371 : f32 to vector<4x49xf32>
    %1734 = arith.cmpf olt, %1485, %1733 : vector<4x49xf32>
    %1735 = arith.andi %1726, %1734 : vector<4x49xi1>
    %cst_372 = arith.constant 2.000000e+00 : f32
    %cst_373 = arith.constant 0.000000e+00 : f32
    %1736 = vector.broadcast %cst_372 : f32 to vector<4x49xf32>
    %1737 = vector.broadcast %cst_373 : f32 to vector<4x49xf32>
    %1738 = arith.select %1735, %1736, %1737 : vector<4x49xi1>, vector<4x49xf32>
    %1739 = arith.select %1732, %1730, %1738 : vector<4x49xi1>, vector<4x49xf32>
    %cst_374 = arith.constant 0.000000e+00 : f32
    %1740 = vector.broadcast %cst_374 : f32 to vector<4x49xf32>
    %1741 = arith.cmpf ogt, %1724, %1740 : vector<4x49xf32>
    %cst_375 = arith.constant 1.000000e+00 : f32
    %1742 = vector.broadcast %cst_375 : f32 to vector<4x49xf32>
    %1743 = arith.select %1741, %1730, %1742 : vector<4x49xi1>, vector<4x49xf32>
    %cst_376 = arith.constant dense<0xFF800000> : vector<49xf32>
    %1744 = vector.multi_reduction <maximumf>, %1739, %cst_376 [0] : vector<4x49xf32> to vector<49xf32>
    %1745 = vector.shape_cast %1744 : vector<49xf32> to vector<1x49xf32>
    %cst_377 = arith.constant 0.000000e+00 : f32
    %1746 = vector.broadcast %cst_377 : f32 to vector<1x49xf32>
    %1747 = arith.maximumf %1745, %1746 : vector<1x49xf32>
    %cst_378 = arith.constant dense<0x7F800000> : vector<49xf32>
    %1748 = vector.multi_reduction <minimumf>, %1743, %cst_378 [0] : vector<4x49xf32> to vector<49xf32>
    %1749 = vector.shape_cast %1748 : vector<49xf32> to vector<1x49xf32>
    %cst_379 = arith.constant 1.000000e+00 : f32
    %1750 = vector.broadcast %cst_379 : f32 to vector<1x49xf32>
    %1751 = arith.minimumf %1749, %1750 : vector<1x49xf32>
    %1752 = arith.subf %1293, %1292 : vector<1x49xf32>
    %1753 = arith.subf %1297, %1296 : vector<1x49xf32>
    %1754 = arith.mulf %1747, %1752 : vector<1x49xf32>
    %1755 = arith.addf %1292, %1754 : vector<1x49xf32>
    %1756 = arith.mulf %1747, %1753 : vector<1x49xf32>
    %1757 = arith.addf %1296, %1756 : vector<1x49xf32>
    %1758 = arith.mulf %1751, %1752 : vector<1x49xf32>
    %1759 = arith.addf %1292, %1758 : vector<1x49xf32>
    %1760 = arith.mulf %1751, %1753 : vector<1x49xf32>
    %1761 = arith.addf %1296, %1760 : vector<1x49xf32>
    %1762 = arith.cmpf olt, %1747, %1751 : vector<1x49xf32>
    %1763 = arith.mulf %1755, %1761 : vector<1x49xf32>
    %1764 = arith.mulf %1759, %1757 : vector<1x49xf32>
    %1765 = arith.subf %1763, %1764 : vector<1x49xf32>
    %cst_380 = arith.constant 0.000000e+00 : f32
    %1766 = vector.broadcast %cst_380 : f32 to vector<1x49xf32>
    %1767 = arith.select %1762, %1765, %1766 : vector<1x49xi1>, vector<1x49xf32>
    %1768 = arith.addf %1723, %1767 : vector<1x49xf32>
    %1769 = arith.subf %1492, %1499 : vector<4x49xf32>
    %cst_381 = arith.constant 0.000000e+00 : f32
    %1770 = vector.broadcast %cst_381 : f32 to vector<4x49xf32>
    %1771 = arith.cmpf oeq, %1769, %1770 : vector<4x49xf32>
    %cst_382 = arith.constant 1.000000e+00 : f32
    %1772 = vector.broadcast %cst_382 : f32 to vector<4x49xf32>
    %1773 = arith.select %1771, %1772, %1769 : vector<4x49xi1>, vector<4x49xf32>
    %1774 = tpu.reciprocal %1773 {approx = true} : vector<4x49xf32> -> vector<4x49xf32>
    %1775 = arith.mulf %1492, %1774 : vector<4x49xf32>
    %cst_383 = arith.constant 0.000000e+00 : f32
    %1776 = vector.broadcast %cst_383 : f32 to vector<4x49xf32>
    %1777 = arith.cmpf olt, %1769, %1776 : vector<4x49xf32>
    %cst_384 = arith.constant 0.000000e+00 : f32
    %1778 = vector.broadcast %cst_384 : f32 to vector<4x49xf32>
    %1779 = arith.cmpf olt, %1492, %1778 : vector<4x49xf32>
    %1780 = arith.andi %1771, %1779 : vector<4x49xi1>
    %cst_385 = arith.constant 2.000000e+00 : f32
    %cst_386 = arith.constant 0.000000e+00 : f32
    %1781 = vector.broadcast %cst_385 : f32 to vector<4x49xf32>
    %1782 = vector.broadcast %cst_386 : f32 to vector<4x49xf32>
    %1783 = arith.select %1780, %1781, %1782 : vector<4x49xi1>, vector<4x49xf32>
    %1784 = arith.select %1777, %1775, %1783 : vector<4x49xi1>, vector<4x49xf32>
    %cst_387 = arith.constant 0.000000e+00 : f32
    %1785 = vector.broadcast %cst_387 : f32 to vector<4x49xf32>
    %1786 = arith.cmpf ogt, %1769, %1785 : vector<4x49xf32>
    %cst_388 = arith.constant 1.000000e+00 : f32
    %1787 = vector.broadcast %cst_388 : f32 to vector<4x49xf32>
    %1788 = arith.select %1786, %1775, %1787 : vector<4x49xi1>, vector<4x49xf32>
    %cst_389 = arith.constant dense<0xFF800000> : vector<49xf32>
    %1789 = vector.multi_reduction <maximumf>, %1784, %cst_389 [0] : vector<4x49xf32> to vector<49xf32>
    %1790 = vector.shape_cast %1789 : vector<49xf32> to vector<1x49xf32>
    %cst_390 = arith.constant 0.000000e+00 : f32
    %1791 = vector.broadcast %cst_390 : f32 to vector<1x49xf32>
    %1792 = arith.maximumf %1790, %1791 : vector<1x49xf32>
    %cst_391 = arith.constant dense<0x7F800000> : vector<49xf32>
    %1793 = vector.multi_reduction <minimumf>, %1788, %cst_391 [0] : vector<4x49xf32> to vector<49xf32>
    %1794 = vector.shape_cast %1793 : vector<49xf32> to vector<1x49xf32>
    %cst_392 = arith.constant 1.000000e+00 : f32
    %1795 = vector.broadcast %cst_392 : f32 to vector<1x49xf32>
    %1796 = arith.minimumf %1794, %1795 : vector<1x49xf32>
    %1797 = arith.subf %1294, %1293 : vector<1x49xf32>
    %1798 = arith.subf %1298, %1297 : vector<1x49xf32>
    %1799 = arith.mulf %1792, %1797 : vector<1x49xf32>
    %1800 = arith.addf %1293, %1799 : vector<1x49xf32>
    %1801 = arith.mulf %1792, %1798 : vector<1x49xf32>
    %1802 = arith.addf %1297, %1801 : vector<1x49xf32>
    %1803 = arith.mulf %1796, %1797 : vector<1x49xf32>
    %1804 = arith.addf %1293, %1803 : vector<1x49xf32>
    %1805 = arith.mulf %1796, %1798 : vector<1x49xf32>
    %1806 = arith.addf %1297, %1805 : vector<1x49xf32>
    %1807 = arith.cmpf olt, %1792, %1796 : vector<1x49xf32>
    %1808 = arith.mulf %1800, %1806 : vector<1x49xf32>
    %1809 = arith.mulf %1804, %1802 : vector<1x49xf32>
    %1810 = arith.subf %1808, %1809 : vector<1x49xf32>
    %cst_393 = arith.constant 0.000000e+00 : f32
    %1811 = vector.broadcast %cst_393 : f32 to vector<1x49xf32>
    %1812 = arith.select %1807, %1810, %1811 : vector<1x49xi1>, vector<1x49xf32>
    %1813 = arith.addf %1768, %1812 : vector<1x49xf32>
    %1814 = arith.subf %1499, %1478 : vector<4x49xf32>
    %cst_394 = arith.constant 0.000000e+00 : f32
    %1815 = vector.broadcast %cst_394 : f32 to vector<4x49xf32>
    %1816 = arith.cmpf oeq, %1814, %1815 : vector<4x49xf32>
    %cst_395 = arith.constant 1.000000e+00 : f32
    %1817 = vector.broadcast %cst_395 : f32 to vector<4x49xf32>
    %1818 = arith.select %1816, %1817, %1814 : vector<4x49xi1>, vector<4x49xf32>
    %1819 = tpu.reciprocal %1818 {approx = true} : vector<4x49xf32> -> vector<4x49xf32>
    %1820 = arith.mulf %1499, %1819 : vector<4x49xf32>
    %cst_396 = arith.constant 0.000000e+00 : f32
    %1821 = vector.broadcast %cst_396 : f32 to vector<4x49xf32>
    %1822 = arith.cmpf olt, %1814, %1821 : vector<4x49xf32>
    %cst_397 = arith.constant 0.000000e+00 : f32
    %1823 = vector.broadcast %cst_397 : f32 to vector<4x49xf32>
    %1824 = arith.cmpf olt, %1499, %1823 : vector<4x49xf32>
    %1825 = arith.andi %1816, %1824 : vector<4x49xi1>
    %cst_398 = arith.constant 2.000000e+00 : f32
    %cst_399 = arith.constant 0.000000e+00 : f32
    %1826 = vector.broadcast %cst_398 : f32 to vector<4x49xf32>
    %1827 = vector.broadcast %cst_399 : f32 to vector<4x49xf32>
    %1828 = arith.select %1825, %1826, %1827 : vector<4x49xi1>, vector<4x49xf32>
    %1829 = arith.select %1822, %1820, %1828 : vector<4x49xi1>, vector<4x49xf32>
    %cst_400 = arith.constant 0.000000e+00 : f32
    %1830 = vector.broadcast %cst_400 : f32 to vector<4x49xf32>
    %1831 = arith.cmpf ogt, %1814, %1830 : vector<4x49xf32>
    %cst_401 = arith.constant 1.000000e+00 : f32
    %1832 = vector.broadcast %cst_401 : f32 to vector<4x49xf32>
    %1833 = arith.select %1831, %1820, %1832 : vector<4x49xi1>, vector<4x49xf32>
    %cst_402 = arith.constant dense<0xFF800000> : vector<49xf32>
    %1834 = vector.multi_reduction <maximumf>, %1829, %cst_402 [0] : vector<4x49xf32> to vector<49xf32>
    %1835 = vector.shape_cast %1834 : vector<49xf32> to vector<1x49xf32>
    %cst_403 = arith.constant 0.000000e+00 : f32
    %1836 = vector.broadcast %cst_403 : f32 to vector<1x49xf32>
    %1837 = arith.maximumf %1835, %1836 : vector<1x49xf32>
    %cst_404 = arith.constant dense<0x7F800000> : vector<49xf32>
    %1838 = vector.multi_reduction <minimumf>, %1833, %cst_404 [0] : vector<4x49xf32> to vector<49xf32>
    %1839 = vector.shape_cast %1838 : vector<49xf32> to vector<1x49xf32>
    %cst_405 = arith.constant 1.000000e+00 : f32
    %1840 = vector.broadcast %cst_405 : f32 to vector<1x49xf32>
    %1841 = arith.minimumf %1839, %1840 : vector<1x49xf32>
    %1842 = arith.subf %1291, %1294 : vector<1x49xf32>
    %1843 = arith.subf %1295, %1298 : vector<1x49xf32>
    %1844 = arith.mulf %1837, %1842 : vector<1x49xf32>
    %1845 = arith.addf %1294, %1844 : vector<1x49xf32>
    %1846 = arith.mulf %1837, %1843 : vector<1x49xf32>
    %1847 = arith.addf %1298, %1846 : vector<1x49xf32>
    %1848 = arith.mulf %1841, %1842 : vector<1x49xf32>
    %1849 = arith.addf %1294, %1848 : vector<1x49xf32>
    %1850 = arith.mulf %1841, %1843 : vector<1x49xf32>
    %1851 = arith.addf %1298, %1850 : vector<1x49xf32>
    %1852 = arith.cmpf olt, %1837, %1841 : vector<1x49xf32>
    %1853 = arith.mulf %1845, %1851 : vector<1x49xf32>
    %1854 = arith.mulf %1849, %1847 : vector<1x49xf32>
    %1855 = arith.subf %1853, %1854 : vector<1x49xf32>
    %cst_406 = arith.constant 0.000000e+00 : f32
    %1856 = vector.broadcast %cst_406 : f32 to vector<1x49xf32>
    %1857 = arith.select %1852, %1855, %1856 : vector<1x49xi1>, vector<1x49xf32>
    %1858 = arith.addf %1813, %1857 : vector<1x49xf32>
    %1859 = arith.mulf %1304, %1858 : vector<1x49xf32>
    %1860 = arith.addf %1679, %1859 : vector<1x49xf32>
    %cst_407 = arith.constant 5.000000e-01 : f32
    %1861 = vector.broadcast %cst_407 : f32 to vector<1x49xf32>
    %1862 = arith.mulf %1861, %1860 : vector<1x49xf32>
    %cst_408 = arith.constant 0.000000e+00 : f32
    %1863 = vector.broadcast %cst_408 : f32 to vector<1x49xf32>
    %1864 = arith.maximumf %1862, %1863 : vector<1x49xf32>
    %1865 = arith.addf %1372, %1305 : vector<1x49xf32>
    %1866 = arith.subf %1865, %1864 : vector<1x49xf32>
    %cst_409 = arith.constant 0.000000e+00 : f32
    %1867 = vector.broadcast %cst_409 : f32 to vector<1x49xf32>
    %1868 = arith.cmpf ogt, %1866, %1867 : vector<1x49xf32>
    %cst_410 = arith.constant 1.000000e+00 : f32
    %1869 = vector.broadcast %cst_410 : f32 to vector<1x49xf32>
    %1870 = arith.select %1868, %1866, %1869 : vector<1x49xi1>, vector<1x49xf32>
    %1871 = tpu.reciprocal %1870 {approx = true} : vector<1x49xf32> -> vector<1x49xf32>
    %cst_411 = arith.constant 0.000000e+00 : f32
    %1872 = vector.broadcast %cst_411 : f32 to vector<1x49xf32>
    %1873 = arith.cmpf ogt, %1372, %1872 : vector<1x49xf32>
    %cst_412 = arith.constant 0.000000e+00 : f32
    %1874 = vector.broadcast %cst_412 : f32 to vector<1x49xf32>
    %1875 = arith.cmpf ogt, %1305, %1874 : vector<1x49xf32>
    %1876 = arith.andi %1873, %1875 : vector<1x49xi1>
    %cst_413 = arith.constant 0.000000e+00 : f32
    %1877 = vector.broadcast %cst_413 : f32 to vector<1x49xf32>
    %1878 = arith.cmpf ogt, %1866, %1877 : vector<1x49xf32>
    %1879 = arith.andi %1876, %1878 : vector<1x49xi1>
    %1880 = arith.mulf %1864, %1871 : vector<1x49xf32>
    %cst_414 = arith.constant 0.000000e+00 : f32
    %1881 = vector.broadcast %cst_414 : f32 to vector<1x49xf32>
    %1882 = arith.select %1879, %1880, %1881 : vector<1x49xi1>, vector<1x49xf32>
    %1883 = vector.broadcast %1429 : vector<1x49xf32> to vector<4x49xf32>
    %1884 = arith.subf %1883, %1274 : vector<4x49xf32>
    %1885 = arith.mulf %1307, %1884 : vector<4x49xf32>
    %1886 = vector.broadcast %1425 : vector<1x49xf32> to vector<4x49xf32>
    %1887 = arith.subf %1886, %1267 : vector<4x49xf32>
    %1888 = arith.mulf %1309, %1887 : vector<4x49xf32>
    %1889 = arith.subf %1885, %1888 : vector<4x49xf32>
    %1890 = vector.broadcast %1430 : vector<1x49xf32> to vector<4x49xf32>
    %1891 = arith.subf %1890, %1274 : vector<4x49xf32>
    %1892 = arith.mulf %1307, %1891 : vector<4x49xf32>
    %1893 = vector.broadcast %1426 : vector<1x49xf32> to vector<4x49xf32>
    %1894 = arith.subf %1893, %1267 : vector<4x49xf32>
    %1895 = arith.mulf %1309, %1894 : vector<4x49xf32>
    %1896 = arith.subf %1892, %1895 : vector<4x49xf32>
    %1897 = vector.broadcast %1431 : vector<1x49xf32> to vector<4x49xf32>
    %1898 = arith.subf %1897, %1274 : vector<4x49xf32>
    %1899 = arith.mulf %1307, %1898 : vector<4x49xf32>
    %1900 = vector.broadcast %1427 : vector<1x49xf32> to vector<4x49xf32>
    %1901 = arith.subf %1900, %1267 : vector<4x49xf32>
    %1902 = arith.mulf %1309, %1901 : vector<4x49xf32>
    %1903 = arith.subf %1899, %1902 : vector<4x49xf32>
    %1904 = vector.broadcast %1432 : vector<1x49xf32> to vector<4x49xf32>
    %1905 = arith.subf %1904, %1274 : vector<4x49xf32>
    %1906 = arith.mulf %1307, %1905 : vector<4x49xf32>
    %1907 = vector.broadcast %1428 : vector<1x49xf32> to vector<4x49xf32>
    %1908 = arith.subf %1907, %1267 : vector<4x49xf32>
    %1909 = arith.mulf %1309, %1908 : vector<4x49xf32>
    %1910 = arith.subf %1906, %1909 : vector<4x49xf32>
    %1911 = vector.broadcast %1295 : vector<1x49xf32> to vector<4x49xf32>
    %1912 = arith.subf %1911, %1408 : vector<4x49xf32>
    %1913 = arith.mulf %1441, %1912 : vector<4x49xf32>
    %1914 = vector.broadcast %1291 : vector<1x49xf32> to vector<4x49xf32>
    %1915 = arith.subf %1914, %1401 : vector<4x49xf32>
    %1916 = arith.mulf %1443, %1915 : vector<4x49xf32>
    %1917 = arith.subf %1913, %1916 : vector<4x49xf32>
    %1918 = vector.broadcast %1296 : vector<1x49xf32> to vector<4x49xf32>
    %1919 = arith.subf %1918, %1408 : vector<4x49xf32>
    %1920 = arith.mulf %1441, %1919 : vector<4x49xf32>
    %1921 = vector.broadcast %1292 : vector<1x49xf32> to vector<4x49xf32>
    %1922 = arith.subf %1921, %1401 : vector<4x49xf32>
    %1923 = arith.mulf %1443, %1922 : vector<4x49xf32>
    %1924 = arith.subf %1920, %1923 : vector<4x49xf32>
    %1925 = vector.broadcast %1297 : vector<1x49xf32> to vector<4x49xf32>
    %1926 = arith.subf %1925, %1408 : vector<4x49xf32>
    %1927 = arith.mulf %1441, %1926 : vector<4x49xf32>
    %1928 = vector.broadcast %1293 : vector<1x49xf32> to vector<4x49xf32>
    %1929 = arith.subf %1928, %1401 : vector<4x49xf32>
    %1930 = arith.mulf %1443, %1929 : vector<4x49xf32>
    %1931 = arith.subf %1927, %1930 : vector<4x49xf32>
    %1932 = vector.broadcast %1298 : vector<1x49xf32> to vector<4x49xf32>
    %1933 = arith.subf %1932, %1408 : vector<4x49xf32>
    %1934 = arith.mulf %1441, %1933 : vector<4x49xf32>
    %1935 = vector.broadcast %1294 : vector<1x49xf32> to vector<4x49xf32>
    %1936 = arith.subf %1935, %1401 : vector<4x49xf32>
    %1937 = arith.mulf %1443, %1936 : vector<4x49xf32>
    %1938 = arith.subf %1934, %1937 : vector<4x49xf32>
    %1939 = arith.subf %1889, %1896 : vector<4x49xf32>
    %cst_415 = arith.constant 0.000000e+00 : f32
    %1940 = vector.broadcast %cst_415 : f32 to vector<4x49xf32>
    %1941 = arith.cmpf oeq, %1939, %1940 : vector<4x49xf32>
    %cst_416 = arith.constant 1.000000e+00 : f32
    %1942 = vector.broadcast %cst_416 : f32 to vector<4x49xf32>
    %1943 = arith.select %1941, %1942, %1939 : vector<4x49xi1>, vector<4x49xf32>
    %1944 = tpu.reciprocal %1943 {approx = true} : vector<4x49xf32> -> vector<4x49xf32>
    %1945 = arith.mulf %1889, %1944 : vector<4x49xf32>
    %cst_417 = arith.constant 0.000000e+00 : f32
    %1946 = vector.broadcast %cst_417 : f32 to vector<4x49xf32>
    %1947 = arith.cmpf olt, %1939, %1946 : vector<4x49xf32>
    %cst_418 = arith.constant 0.000000e+00 : f32
    %1948 = vector.broadcast %cst_418 : f32 to vector<4x49xf32>
    %1949 = arith.cmpf olt, %1889, %1948 : vector<4x49xf32>
    %1950 = arith.andi %1941, %1949 : vector<4x49xi1>
    %cst_419 = arith.constant 2.000000e+00 : f32
    %cst_420 = arith.constant 0.000000e+00 : f32
    %1951 = vector.broadcast %cst_419 : f32 to vector<4x49xf32>
    %1952 = vector.broadcast %cst_420 : f32 to vector<4x49xf32>
    %1953 = arith.select %1950, %1951, %1952 : vector<4x49xi1>, vector<4x49xf32>
    %1954 = arith.select %1947, %1945, %1953 : vector<4x49xi1>, vector<4x49xf32>
    %cst_421 = arith.constant 0.000000e+00 : f32
    %1955 = vector.broadcast %cst_421 : f32 to vector<4x49xf32>
    %1956 = arith.cmpf ogt, %1939, %1955 : vector<4x49xf32>
    %cst_422 = arith.constant 1.000000e+00 : f32
    %1957 = vector.broadcast %cst_422 : f32 to vector<4x49xf32>
    %1958 = arith.select %1956, %1945, %1957 : vector<4x49xi1>, vector<4x49xf32>
    %cst_423 = arith.constant dense<0xFF800000> : vector<49xf32>
    %1959 = vector.multi_reduction <maximumf>, %1954, %cst_423 [0] : vector<4x49xf32> to vector<49xf32>
    %1960 = vector.shape_cast %1959 : vector<49xf32> to vector<1x49xf32>
    %cst_424 = arith.constant 0.000000e+00 : f32
    %1961 = vector.broadcast %cst_424 : f32 to vector<1x49xf32>
    %1962 = arith.maximumf %1960, %1961 : vector<1x49xf32>
    %cst_425 = arith.constant dense<0x7F800000> : vector<49xf32>
    %1963 = vector.multi_reduction <minimumf>, %1958, %cst_425 [0] : vector<4x49xf32> to vector<49xf32>
    %1964 = vector.shape_cast %1963 : vector<49xf32> to vector<1x49xf32>
    %cst_426 = arith.constant 1.000000e+00 : f32
    %1965 = vector.broadcast %cst_426 : f32 to vector<1x49xf32>
    %1966 = arith.minimumf %1964, %1965 : vector<1x49xf32>
    %1967 = arith.subf %1426, %1425 : vector<1x49xf32>
    %1968 = arith.subf %1430, %1429 : vector<1x49xf32>
    %1969 = arith.mulf %1962, %1967 : vector<1x49xf32>
    %1970 = arith.addf %1425, %1969 : vector<1x49xf32>
    %1971 = arith.mulf %1962, %1968 : vector<1x49xf32>
    %1972 = arith.addf %1429, %1971 : vector<1x49xf32>
    %1973 = arith.mulf %1966, %1967 : vector<1x49xf32>
    %1974 = arith.addf %1425, %1973 : vector<1x49xf32>
    %1975 = arith.mulf %1966, %1968 : vector<1x49xf32>
    %1976 = arith.addf %1429, %1975 : vector<1x49xf32>
    %1977 = arith.cmpf olt, %1962, %1966 : vector<1x49xf32>
    %1978 = arith.mulf %1970, %1976 : vector<1x49xf32>
    %1979 = arith.mulf %1974, %1972 : vector<1x49xf32>
    %1980 = arith.subf %1978, %1979 : vector<1x49xf32>
    %cst_427 = arith.constant 0.000000e+00 : f32
    %1981 = vector.broadcast %cst_427 : f32 to vector<1x49xf32>
    %1982 = arith.select %1977, %1980, %1981 : vector<1x49xi1>, vector<1x49xf32>
    %1983 = arith.subf %1896, %1903 : vector<4x49xf32>
    %cst_428 = arith.constant 0.000000e+00 : f32
    %1984 = vector.broadcast %cst_428 : f32 to vector<4x49xf32>
    %1985 = arith.cmpf oeq, %1983, %1984 : vector<4x49xf32>
    %cst_429 = arith.constant 1.000000e+00 : f32
    %1986 = vector.broadcast %cst_429 : f32 to vector<4x49xf32>
    %1987 = arith.select %1985, %1986, %1983 : vector<4x49xi1>, vector<4x49xf32>
    %1988 = tpu.reciprocal %1987 {approx = true} : vector<4x49xf32> -> vector<4x49xf32>
    %1989 = arith.mulf %1896, %1988 : vector<4x49xf32>
    %cst_430 = arith.constant 0.000000e+00 : f32
    %1990 = vector.broadcast %cst_430 : f32 to vector<4x49xf32>
    %1991 = arith.cmpf olt, %1983, %1990 : vector<4x49xf32>
    %cst_431 = arith.constant 0.000000e+00 : f32
    %1992 = vector.broadcast %cst_431 : f32 to vector<4x49xf32>
    %1993 = arith.cmpf olt, %1896, %1992 : vector<4x49xf32>
    %1994 = arith.andi %1985, %1993 : vector<4x49xi1>
    %cst_432 = arith.constant 2.000000e+00 : f32
    %cst_433 = arith.constant 0.000000e+00 : f32
    %1995 = vector.broadcast %cst_432 : f32 to vector<4x49xf32>
    %1996 = vector.broadcast %cst_433 : f32 to vector<4x49xf32>
    %1997 = arith.select %1994, %1995, %1996 : vector<4x49xi1>, vector<4x49xf32>
    %1998 = arith.select %1991, %1989, %1997 : vector<4x49xi1>, vector<4x49xf32>
    %cst_434 = arith.constant 0.000000e+00 : f32
    %1999 = vector.broadcast %cst_434 : f32 to vector<4x49xf32>
    %2000 = arith.cmpf ogt, %1983, %1999 : vector<4x49xf32>
    %cst_435 = arith.constant 1.000000e+00 : f32
    %2001 = vector.broadcast %cst_435 : f32 to vector<4x49xf32>
    %2002 = arith.select %2000, %1989, %2001 : vector<4x49xi1>, vector<4x49xf32>
    %cst_436 = arith.constant dense<0xFF800000> : vector<49xf32>
    %2003 = vector.multi_reduction <maximumf>, %1998, %cst_436 [0] : vector<4x49xf32> to vector<49xf32>
    %2004 = vector.shape_cast %2003 : vector<49xf32> to vector<1x49xf32>
    %cst_437 = arith.constant 0.000000e+00 : f32
    %2005 = vector.broadcast %cst_437 : f32 to vector<1x49xf32>
    %2006 = arith.maximumf %2004, %2005 : vector<1x49xf32>
    %cst_438 = arith.constant dense<0x7F800000> : vector<49xf32>
    %2007 = vector.multi_reduction <minimumf>, %2002, %cst_438 [0] : vector<4x49xf32> to vector<49xf32>
    %2008 = vector.shape_cast %2007 : vector<49xf32> to vector<1x49xf32>
    %cst_439 = arith.constant 1.000000e+00 : f32
    %2009 = vector.broadcast %cst_439 : f32 to vector<1x49xf32>
    %2010 = arith.minimumf %2008, %2009 : vector<1x49xf32>
    %2011 = arith.subf %1427, %1426 : vector<1x49xf32>
    %2012 = arith.subf %1431, %1430 : vector<1x49xf32>
    %2013 = arith.mulf %2006, %2011 : vector<1x49xf32>
    %2014 = arith.addf %1426, %2013 : vector<1x49xf32>
    %2015 = arith.mulf %2006, %2012 : vector<1x49xf32>
    %2016 = arith.addf %1430, %2015 : vector<1x49xf32>
    %2017 = arith.mulf %2010, %2011 : vector<1x49xf32>
    %2018 = arith.addf %1426, %2017 : vector<1x49xf32>
    %2019 = arith.mulf %2010, %2012 : vector<1x49xf32>
    %2020 = arith.addf %1430, %2019 : vector<1x49xf32>
    %2021 = arith.cmpf olt, %2006, %2010 : vector<1x49xf32>
    %2022 = arith.mulf %2014, %2020 : vector<1x49xf32>
    %2023 = arith.mulf %2018, %2016 : vector<1x49xf32>
    %2024 = arith.subf %2022, %2023 : vector<1x49xf32>
    %cst_440 = arith.constant 0.000000e+00 : f32
    %2025 = vector.broadcast %cst_440 : f32 to vector<1x49xf32>
    %2026 = arith.select %2021, %2024, %2025 : vector<1x49xi1>, vector<1x49xf32>
    %2027 = arith.addf %1982, %2026 : vector<1x49xf32>
    %2028 = arith.subf %1903, %1910 : vector<4x49xf32>
    %cst_441 = arith.constant 0.000000e+00 : f32
    %2029 = vector.broadcast %cst_441 : f32 to vector<4x49xf32>
    %2030 = arith.cmpf oeq, %2028, %2029 : vector<4x49xf32>
    %cst_442 = arith.constant 1.000000e+00 : f32
    %2031 = vector.broadcast %cst_442 : f32 to vector<4x49xf32>
    %2032 = arith.select %2030, %2031, %2028 : vector<4x49xi1>, vector<4x49xf32>
    %2033 = tpu.reciprocal %2032 {approx = true} : vector<4x49xf32> -> vector<4x49xf32>
    %2034 = arith.mulf %1903, %2033 : vector<4x49xf32>
    %cst_443 = arith.constant 0.000000e+00 : f32
    %2035 = vector.broadcast %cst_443 : f32 to vector<4x49xf32>
    %2036 = arith.cmpf olt, %2028, %2035 : vector<4x49xf32>
    %cst_444 = arith.constant 0.000000e+00 : f32
    %2037 = vector.broadcast %cst_444 : f32 to vector<4x49xf32>
    %2038 = arith.cmpf olt, %1903, %2037 : vector<4x49xf32>
    %2039 = arith.andi %2030, %2038 : vector<4x49xi1>
    %cst_445 = arith.constant 2.000000e+00 : f32
    %cst_446 = arith.constant 0.000000e+00 : f32
    %2040 = vector.broadcast %cst_445 : f32 to vector<4x49xf32>
    %2041 = vector.broadcast %cst_446 : f32 to vector<4x49xf32>
    %2042 = arith.select %2039, %2040, %2041 : vector<4x49xi1>, vector<4x49xf32>
    %2043 = arith.select %2036, %2034, %2042 : vector<4x49xi1>, vector<4x49xf32>
    %cst_447 = arith.constant 0.000000e+00 : f32
    %2044 = vector.broadcast %cst_447 : f32 to vector<4x49xf32>
    %2045 = arith.cmpf ogt, %2028, %2044 : vector<4x49xf32>
    %cst_448 = arith.constant 1.000000e+00 : f32
    %2046 = vector.broadcast %cst_448 : f32 to vector<4x49xf32>
    %2047 = arith.select %2045, %2034, %2046 : vector<4x49xi1>, vector<4x49xf32>
    %cst_449 = arith.constant dense<0xFF800000> : vector<49xf32>
    %2048 = vector.multi_reduction <maximumf>, %2043, %cst_449 [0] : vector<4x49xf32> to vector<49xf32>
    %2049 = vector.shape_cast %2048 : vector<49xf32> to vector<1x49xf32>
    %cst_450 = arith.constant 0.000000e+00 : f32
    %2050 = vector.broadcast %cst_450 : f32 to vector<1x49xf32>
    %2051 = arith.maximumf %2049, %2050 : vector<1x49xf32>
    %cst_451 = arith.constant dense<0x7F800000> : vector<49xf32>
    %2052 = vector.multi_reduction <minimumf>, %2047, %cst_451 [0] : vector<4x49xf32> to vector<49xf32>
    %2053 = vector.shape_cast %2052 : vector<49xf32> to vector<1x49xf32>
    %cst_452 = arith.constant 1.000000e+00 : f32
    %2054 = vector.broadcast %cst_452 : f32 to vector<1x49xf32>
    %2055 = arith.minimumf %2053, %2054 : vector<1x49xf32>
    %2056 = arith.subf %1428, %1427 : vector<1x49xf32>
    %2057 = arith.subf %1432, %1431 : vector<1x49xf32>
    %2058 = arith.mulf %2051, %2056 : vector<1x49xf32>
    %2059 = arith.addf %1427, %2058 : vector<1x49xf32>
    %2060 = arith.mulf %2051, %2057 : vector<1x49xf32>
    %2061 = arith.addf %1431, %2060 : vector<1x49xf32>
    %2062 = arith.mulf %2055, %2056 : vector<1x49xf32>
    %2063 = arith.addf %1427, %2062 : vector<1x49xf32>
    %2064 = arith.mulf %2055, %2057 : vector<1x49xf32>
    %2065 = arith.addf %1431, %2064 : vector<1x49xf32>
    %2066 = arith.cmpf olt, %2051, %2055 : vector<1x49xf32>
    %2067 = arith.mulf %2059, %2065 : vector<1x49xf32>
    %2068 = arith.mulf %2063, %2061 : vector<1x49xf32>
    %2069 = arith.subf %2067, %2068 : vector<1x49xf32>
    %cst_453 = arith.constant 0.000000e+00 : f32
    %2070 = vector.broadcast %cst_453 : f32 to vector<1x49xf32>
    %2071 = arith.select %2066, %2069, %2070 : vector<1x49xi1>, vector<1x49xf32>
    %2072 = arith.addf %2027, %2071 : vector<1x49xf32>
    %2073 = arith.subf %1910, %1889 : vector<4x49xf32>
    %cst_454 = arith.constant 0.000000e+00 : f32
    %2074 = vector.broadcast %cst_454 : f32 to vector<4x49xf32>
    %2075 = arith.cmpf oeq, %2073, %2074 : vector<4x49xf32>
    %cst_455 = arith.constant 1.000000e+00 : f32
    %2076 = vector.broadcast %cst_455 : f32 to vector<4x49xf32>
    %2077 = arith.select %2075, %2076, %2073 : vector<4x49xi1>, vector<4x49xf32>
    %2078 = tpu.reciprocal %2077 {approx = true} : vector<4x49xf32> -> vector<4x49xf32>
    %2079 = arith.mulf %1910, %2078 : vector<4x49xf32>
    %cst_456 = arith.constant 0.000000e+00 : f32
    %2080 = vector.broadcast %cst_456 : f32 to vector<4x49xf32>
    %2081 = arith.cmpf olt, %2073, %2080 : vector<4x49xf32>
    %cst_457 = arith.constant 0.000000e+00 : f32
    %2082 = vector.broadcast %cst_457 : f32 to vector<4x49xf32>
    %2083 = arith.cmpf olt, %1910, %2082 : vector<4x49xf32>
    %2084 = arith.andi %2075, %2083 : vector<4x49xi1>
    %cst_458 = arith.constant 2.000000e+00 : f32
    %cst_459 = arith.constant 0.000000e+00 : f32
    %2085 = vector.broadcast %cst_458 : f32 to vector<4x49xf32>
    %2086 = vector.broadcast %cst_459 : f32 to vector<4x49xf32>
    %2087 = arith.select %2084, %2085, %2086 : vector<4x49xi1>, vector<4x49xf32>
    %2088 = arith.select %2081, %2079, %2087 : vector<4x49xi1>, vector<4x49xf32>
    %cst_460 = arith.constant 0.000000e+00 : f32
    %2089 = vector.broadcast %cst_460 : f32 to vector<4x49xf32>
    %2090 = arith.cmpf ogt, %2073, %2089 : vector<4x49xf32>
    %cst_461 = arith.constant 1.000000e+00 : f32
    %2091 = vector.broadcast %cst_461 : f32 to vector<4x49xf32>
    %2092 = arith.select %2090, %2079, %2091 : vector<4x49xi1>, vector<4x49xf32>
    %cst_462 = arith.constant dense<0xFF800000> : vector<49xf32>
    %2093 = vector.multi_reduction <maximumf>, %2088, %cst_462 [0] : vector<4x49xf32> to vector<49xf32>
    %2094 = vector.shape_cast %2093 : vector<49xf32> to vector<1x49xf32>
    %cst_463 = arith.constant 0.000000e+00 : f32
    %2095 = vector.broadcast %cst_463 : f32 to vector<1x49xf32>
    %2096 = arith.maximumf %2094, %2095 : vector<1x49xf32>
    %cst_464 = arith.constant dense<0x7F800000> : vector<49xf32>
    %2097 = vector.multi_reduction <minimumf>, %2092, %cst_464 [0] : vector<4x49xf32> to vector<49xf32>
    %2098 = vector.shape_cast %2097 : vector<49xf32> to vector<1x49xf32>
    %cst_465 = arith.constant 1.000000e+00 : f32
    %2099 = vector.broadcast %cst_465 : f32 to vector<1x49xf32>
    %2100 = arith.minimumf %2098, %2099 : vector<1x49xf32>
    %2101 = arith.subf %1425, %1428 : vector<1x49xf32>
    %2102 = arith.subf %1429, %1432 : vector<1x49xf32>
    %2103 = arith.mulf %2096, %2101 : vector<1x49xf32>
    %2104 = arith.addf %1428, %2103 : vector<1x49xf32>
    %2105 = arith.mulf %2096, %2102 : vector<1x49xf32>
    %2106 = arith.addf %1432, %2105 : vector<1x49xf32>
    %2107 = arith.mulf %2100, %2101 : vector<1x49xf32>
    %2108 = arith.addf %1428, %2107 : vector<1x49xf32>
    %2109 = arith.mulf %2100, %2102 : vector<1x49xf32>
    %2110 = arith.addf %1432, %2109 : vector<1x49xf32>
    %2111 = arith.cmpf olt, %2096, %2100 : vector<1x49xf32>
    %2112 = arith.mulf %2104, %2110 : vector<1x49xf32>
    %2113 = arith.mulf %2108, %2106 : vector<1x49xf32>
    %2114 = arith.subf %2112, %2113 : vector<1x49xf32>
    %cst_466 = arith.constant 0.000000e+00 : f32
    %2115 = vector.broadcast %cst_466 : f32 to vector<1x49xf32>
    %2116 = arith.select %2111, %2114, %2115 : vector<1x49xi1>, vector<1x49xf32>
    %2117 = arith.addf %2072, %2116 : vector<1x49xf32>
    %2118 = arith.mulf %1438, %2117 : vector<1x49xf32>
    %2119 = arith.subf %1917, %1924 : vector<4x49xf32>
    %cst_467 = arith.constant 0.000000e+00 : f32
    %2120 = vector.broadcast %cst_467 : f32 to vector<4x49xf32>
    %2121 = arith.cmpf oeq, %2119, %2120 : vector<4x49xf32>
    %cst_468 = arith.constant 1.000000e+00 : f32
    %2122 = vector.broadcast %cst_468 : f32 to vector<4x49xf32>
    %2123 = arith.select %2121, %2122, %2119 : vector<4x49xi1>, vector<4x49xf32>
    %2124 = tpu.reciprocal %2123 {approx = true} : vector<4x49xf32> -> vector<4x49xf32>
    %2125 = arith.mulf %1917, %2124 : vector<4x49xf32>
    %cst_469 = arith.constant 0.000000e+00 : f32
    %2126 = vector.broadcast %cst_469 : f32 to vector<4x49xf32>
    %2127 = arith.cmpf olt, %2119, %2126 : vector<4x49xf32>
    %cst_470 = arith.constant 0.000000e+00 : f32
    %2128 = vector.broadcast %cst_470 : f32 to vector<4x49xf32>
    %2129 = arith.cmpf olt, %1917, %2128 : vector<4x49xf32>
    %2130 = arith.andi %2121, %2129 : vector<4x49xi1>
    %cst_471 = arith.constant 2.000000e+00 : f32
    %cst_472 = arith.constant 0.000000e+00 : f32
    %2131 = vector.broadcast %cst_471 : f32 to vector<4x49xf32>
    %2132 = vector.broadcast %cst_472 : f32 to vector<4x49xf32>
    %2133 = arith.select %2130, %2131, %2132 : vector<4x49xi1>, vector<4x49xf32>
    %2134 = arith.select %2127, %2125, %2133 : vector<4x49xi1>, vector<4x49xf32>
    %cst_473 = arith.constant 0.000000e+00 : f32
    %2135 = vector.broadcast %cst_473 : f32 to vector<4x49xf32>
    %2136 = arith.cmpf ogt, %2119, %2135 : vector<4x49xf32>
    %cst_474 = arith.constant 1.000000e+00 : f32
    %2137 = vector.broadcast %cst_474 : f32 to vector<4x49xf32>
    %2138 = arith.select %2136, %2125, %2137 : vector<4x49xi1>, vector<4x49xf32>
    %cst_475 = arith.constant dense<0xFF800000> : vector<49xf32>
    %2139 = vector.multi_reduction <maximumf>, %2134, %cst_475 [0] : vector<4x49xf32> to vector<49xf32>
    %2140 = vector.shape_cast %2139 : vector<49xf32> to vector<1x49xf32>
    %cst_476 = arith.constant 0.000000e+00 : f32
    %2141 = vector.broadcast %cst_476 : f32 to vector<1x49xf32>
    %2142 = arith.maximumf %2140, %2141 : vector<1x49xf32>
    %cst_477 = arith.constant dense<0x7F800000> : vector<49xf32>
    %2143 = vector.multi_reduction <minimumf>, %2138, %cst_477 [0] : vector<4x49xf32> to vector<49xf32>
    %2144 = vector.shape_cast %2143 : vector<49xf32> to vector<1x49xf32>
    %cst_478 = arith.constant 1.000000e+00 : f32
    %2145 = vector.broadcast %cst_478 : f32 to vector<1x49xf32>
    %2146 = arith.minimumf %2144, %2145 : vector<1x49xf32>
    %2147 = arith.subf %1292, %1291 : vector<1x49xf32>
    %2148 = arith.subf %1296, %1295 : vector<1x49xf32>
    %2149 = arith.mulf %2142, %2147 : vector<1x49xf32>
    %2150 = arith.addf %1291, %2149 : vector<1x49xf32>
    %2151 = arith.mulf %2142, %2148 : vector<1x49xf32>
    %2152 = arith.addf %1295, %2151 : vector<1x49xf32>
    %2153 = arith.mulf %2146, %2147 : vector<1x49xf32>
    %2154 = arith.addf %1291, %2153 : vector<1x49xf32>
    %2155 = arith.mulf %2146, %2148 : vector<1x49xf32>
    %2156 = arith.addf %1295, %2155 : vector<1x49xf32>
    %2157 = arith.cmpf olt, %2142, %2146 : vector<1x49xf32>
    %2158 = arith.mulf %2150, %2156 : vector<1x49xf32>
    %2159 = arith.mulf %2154, %2152 : vector<1x49xf32>
    %2160 = arith.subf %2158, %2159 : vector<1x49xf32>
    %cst_479 = arith.constant 0.000000e+00 : f32
    %2161 = vector.broadcast %cst_479 : f32 to vector<1x49xf32>
    %2162 = arith.select %2157, %2160, %2161 : vector<1x49xi1>, vector<1x49xf32>
    %2163 = arith.subf %1924, %1931 : vector<4x49xf32>
    %cst_480 = arith.constant 0.000000e+00 : f32
    %2164 = vector.broadcast %cst_480 : f32 to vector<4x49xf32>
    %2165 = arith.cmpf oeq, %2163, %2164 : vector<4x49xf32>
    %cst_481 = arith.constant 1.000000e+00 : f32
    %2166 = vector.broadcast %cst_481 : f32 to vector<4x49xf32>
    %2167 = arith.select %2165, %2166, %2163 : vector<4x49xi1>, vector<4x49xf32>
    %2168 = tpu.reciprocal %2167 {approx = true} : vector<4x49xf32> -> vector<4x49xf32>
    %2169 = arith.mulf %1924, %2168 : vector<4x49xf32>
    %cst_482 = arith.constant 0.000000e+00 : f32
    %2170 = vector.broadcast %cst_482 : f32 to vector<4x49xf32>
    %2171 = arith.cmpf olt, %2163, %2170 : vector<4x49xf32>
    %cst_483 = arith.constant 0.000000e+00 : f32
    %2172 = vector.broadcast %cst_483 : f32 to vector<4x49xf32>
    %2173 = arith.cmpf olt, %1924, %2172 : vector<4x49xf32>
    %2174 = arith.andi %2165, %2173 : vector<4x49xi1>
    %cst_484 = arith.constant 2.000000e+00 : f32
    %cst_485 = arith.constant 0.000000e+00 : f32
    %2175 = vector.broadcast %cst_484 : f32 to vector<4x49xf32>
    %2176 = vector.broadcast %cst_485 : f32 to vector<4x49xf32>
    %2177 = arith.select %2174, %2175, %2176 : vector<4x49xi1>, vector<4x49xf32>
    %2178 = arith.select %2171, %2169, %2177 : vector<4x49xi1>, vector<4x49xf32>
    %cst_486 = arith.constant 0.000000e+00 : f32
    %2179 = vector.broadcast %cst_486 : f32 to vector<4x49xf32>
    %2180 = arith.cmpf ogt, %2163, %2179 : vector<4x49xf32>
    %cst_487 = arith.constant 1.000000e+00 : f32
    %2181 = vector.broadcast %cst_487 : f32 to vector<4x49xf32>
    %2182 = arith.select %2180, %2169, %2181 : vector<4x49xi1>, vector<4x49xf32>
    %cst_488 = arith.constant dense<0xFF800000> : vector<49xf32>
    %2183 = vector.multi_reduction <maximumf>, %2178, %cst_488 [0] : vector<4x49xf32> to vector<49xf32>
    %2184 = vector.shape_cast %2183 : vector<49xf32> to vector<1x49xf32>
    %cst_489 = arith.constant 0.000000e+00 : f32
    %2185 = vector.broadcast %cst_489 : f32 to vector<1x49xf32>
    %2186 = arith.maximumf %2184, %2185 : vector<1x49xf32>
    %cst_490 = arith.constant dense<0x7F800000> : vector<49xf32>
    %2187 = vector.multi_reduction <minimumf>, %2182, %cst_490 [0] : vector<4x49xf32> to vector<49xf32>
    %2188 = vector.shape_cast %2187 : vector<49xf32> to vector<1x49xf32>
    %cst_491 = arith.constant 1.000000e+00 : f32
    %2189 = vector.broadcast %cst_491 : f32 to vector<1x49xf32>
    %2190 = arith.minimumf %2188, %2189 : vector<1x49xf32>
    %2191 = arith.subf %1293, %1292 : vector<1x49xf32>
    %2192 = arith.subf %1297, %1296 : vector<1x49xf32>
    %2193 = arith.mulf %2186, %2191 : vector<1x49xf32>
    %2194 = arith.addf %1292, %2193 : vector<1x49xf32>
    %2195 = arith.mulf %2186, %2192 : vector<1x49xf32>
    %2196 = arith.addf %1296, %2195 : vector<1x49xf32>
    %2197 = arith.mulf %2190, %2191 : vector<1x49xf32>
    %2198 = arith.addf %1292, %2197 : vector<1x49xf32>
    %2199 = arith.mulf %2190, %2192 : vector<1x49xf32>
    %2200 = arith.addf %1296, %2199 : vector<1x49xf32>
    %2201 = arith.cmpf olt, %2186, %2190 : vector<1x49xf32>
    %2202 = arith.mulf %2194, %2200 : vector<1x49xf32>
    %2203 = arith.mulf %2198, %2196 : vector<1x49xf32>
    %2204 = arith.subf %2202, %2203 : vector<1x49xf32>
    %cst_492 = arith.constant 0.000000e+00 : f32
    %2205 = vector.broadcast %cst_492 : f32 to vector<1x49xf32>
    %2206 = arith.select %2201, %2204, %2205 : vector<1x49xi1>, vector<1x49xf32>
    %2207 = arith.addf %2162, %2206 : vector<1x49xf32>
    %2208 = arith.subf %1931, %1938 : vector<4x49xf32>
    %cst_493 = arith.constant 0.000000e+00 : f32
    %2209 = vector.broadcast %cst_493 : f32 to vector<4x49xf32>
    %2210 = arith.cmpf oeq, %2208, %2209 : vector<4x49xf32>
    %cst_494 = arith.constant 1.000000e+00 : f32
    %2211 = vector.broadcast %cst_494 : f32 to vector<4x49xf32>
    %2212 = arith.select %2210, %2211, %2208 : vector<4x49xi1>, vector<4x49xf32>
    %2213 = tpu.reciprocal %2212 {approx = true} : vector<4x49xf32> -> vector<4x49xf32>
    %2214 = arith.mulf %1931, %2213 : vector<4x49xf32>
    %cst_495 = arith.constant 0.000000e+00 : f32
    %2215 = vector.broadcast %cst_495 : f32 to vector<4x49xf32>
    %2216 = arith.cmpf olt, %2208, %2215 : vector<4x49xf32>
    %cst_496 = arith.constant 0.000000e+00 : f32
    %2217 = vector.broadcast %cst_496 : f32 to vector<4x49xf32>
    %2218 = arith.cmpf olt, %1931, %2217 : vector<4x49xf32>
    %2219 = arith.andi %2210, %2218 : vector<4x49xi1>
    %cst_497 = arith.constant 2.000000e+00 : f32
    %cst_498 = arith.constant 0.000000e+00 : f32
    %2220 = vector.broadcast %cst_497 : f32 to vector<4x49xf32>
    %2221 = vector.broadcast %cst_498 : f32 to vector<4x49xf32>
    %2222 = arith.select %2219, %2220, %2221 : vector<4x49xi1>, vector<4x49xf32>
    %2223 = arith.select %2216, %2214, %2222 : vector<4x49xi1>, vector<4x49xf32>
    %cst_499 = arith.constant 0.000000e+00 : f32
    %2224 = vector.broadcast %cst_499 : f32 to vector<4x49xf32>
    %2225 = arith.cmpf ogt, %2208, %2224 : vector<4x49xf32>
    %cst_500 = arith.constant 1.000000e+00 : f32
    %2226 = vector.broadcast %cst_500 : f32 to vector<4x49xf32>
    %2227 = arith.select %2225, %2214, %2226 : vector<4x49xi1>, vector<4x49xf32>
    %cst_501 = arith.constant dense<0xFF800000> : vector<49xf32>
    %2228 = vector.multi_reduction <maximumf>, %2223, %cst_501 [0] : vector<4x49xf32> to vector<49xf32>
    %2229 = vector.shape_cast %2228 : vector<49xf32> to vector<1x49xf32>
    %cst_502 = arith.constant 0.000000e+00 : f32
    %2230 = vector.broadcast %cst_502 : f32 to vector<1x49xf32>
    %2231 = arith.maximumf %2229, %2230 : vector<1x49xf32>
    %cst_503 = arith.constant dense<0x7F800000> : vector<49xf32>
    %2232 = vector.multi_reduction <minimumf>, %2227, %cst_503 [0] : vector<4x49xf32> to vector<49xf32>
    %2233 = vector.shape_cast %2232 : vector<49xf32> to vector<1x49xf32>
    %cst_504 = arith.constant 1.000000e+00 : f32
    %2234 = vector.broadcast %cst_504 : f32 to vector<1x49xf32>
    %2235 = arith.minimumf %2233, %2234 : vector<1x49xf32>
    %2236 = arith.subf %1294, %1293 : vector<1x49xf32>
    %2237 = arith.subf %1298, %1297 : vector<1x49xf32>
    %2238 = arith.mulf %2231, %2236 : vector<1x49xf32>
    %2239 = arith.addf %1293, %2238 : vector<1x49xf32>
    %2240 = arith.mulf %2231, %2237 : vector<1x49xf32>
    %2241 = arith.addf %1297, %2240 : vector<1x49xf32>
    %2242 = arith.mulf %2235, %2236 : vector<1x49xf32>
    %2243 = arith.addf %1293, %2242 : vector<1x49xf32>
    %2244 = arith.mulf %2235, %2237 : vector<1x49xf32>
    %2245 = arith.addf %1297, %2244 : vector<1x49xf32>
    %2246 = arith.cmpf olt, %2231, %2235 : vector<1x49xf32>
    %2247 = arith.mulf %2239, %2245 : vector<1x49xf32>
    %2248 = arith.mulf %2243, %2241 : vector<1x49xf32>
    %2249 = arith.subf %2247, %2248 : vector<1x49xf32>
    %cst_505 = arith.constant 0.000000e+00 : f32
    %2250 = vector.broadcast %cst_505 : f32 to vector<1x49xf32>
    %2251 = arith.select %2246, %2249, %2250 : vector<1x49xi1>, vector<1x49xf32>
    %2252 = arith.addf %2207, %2251 : vector<1x49xf32>
    %2253 = arith.subf %1938, %1917 : vector<4x49xf32>
    %cst_506 = arith.constant 0.000000e+00 : f32
    %2254 = vector.broadcast %cst_506 : f32 to vector<4x49xf32>
    %2255 = arith.cmpf oeq, %2253, %2254 : vector<4x49xf32>
    %cst_507 = arith.constant 1.000000e+00 : f32
    %2256 = vector.broadcast %cst_507 : f32 to vector<4x49xf32>
    %2257 = arith.select %2255, %2256, %2253 : vector<4x49xi1>, vector<4x49xf32>
    %2258 = tpu.reciprocal %2257 {approx = true} : vector<4x49xf32> -> vector<4x49xf32>
    %2259 = arith.mulf %1938, %2258 : vector<4x49xf32>
    %cst_508 = arith.constant 0.000000e+00 : f32
    %2260 = vector.broadcast %cst_508 : f32 to vector<4x49xf32>
    %2261 = arith.cmpf olt, %2253, %2260 : vector<4x49xf32>
    %cst_509 = arith.constant 0.000000e+00 : f32
    %2262 = vector.broadcast %cst_509 : f32 to vector<4x49xf32>
    %2263 = arith.cmpf olt, %1938, %2262 : vector<4x49xf32>
    %2264 = arith.andi %2255, %2263 : vector<4x49xi1>
    %cst_510 = arith.constant 2.000000e+00 : f32
    %cst_511 = arith.constant 0.000000e+00 : f32
    %2265 = vector.broadcast %cst_510 : f32 to vector<4x49xf32>
    %2266 = vector.broadcast %cst_511 : f32 to vector<4x49xf32>
    %2267 = arith.select %2264, %2265, %2266 : vector<4x49xi1>, vector<4x49xf32>
    %2268 = arith.select %2261, %2259, %2267 : vector<4x49xi1>, vector<4x49xf32>
    %cst_512 = arith.constant 0.000000e+00 : f32
    %2269 = vector.broadcast %cst_512 : f32 to vector<4x49xf32>
    %2270 = arith.cmpf ogt, %2253, %2269 : vector<4x49xf32>
    %cst_513 = arith.constant 1.000000e+00 : f32
    %2271 = vector.broadcast %cst_513 : f32 to vector<4x49xf32>
    %2272 = arith.select %2270, %2259, %2271 : vector<4x49xi1>, vector<4x49xf32>
    %cst_514 = arith.constant dense<0xFF800000> : vector<49xf32>
    %2273 = vector.multi_reduction <maximumf>, %2268, %cst_514 [0] : vector<4x49xf32> to vector<49xf32>
    %2274 = vector.shape_cast %2273 : vector<49xf32> to vector<1x49xf32>
    %cst_515 = arith.constant 0.000000e+00 : f32
    %2275 = vector.broadcast %cst_515 : f32 to vector<1x49xf32>
    %2276 = arith.maximumf %2274, %2275 : vector<1x49xf32>
    %cst_516 = arith.constant dense<0x7F800000> : vector<49xf32>
    %2277 = vector.multi_reduction <minimumf>, %2272, %cst_516 [0] : vector<4x49xf32> to vector<49xf32>
    %2278 = vector.shape_cast %2277 : vector<49xf32> to vector<1x49xf32>
    %cst_517 = arith.constant 1.000000e+00 : f32
    %2279 = vector.broadcast %cst_517 : f32 to vector<1x49xf32>
    %2280 = arith.minimumf %2278, %2279 : vector<1x49xf32>
    %2281 = arith.subf %1291, %1294 : vector<1x49xf32>
    %2282 = arith.subf %1295, %1298 : vector<1x49xf32>
    %2283 = arith.mulf %2276, %2281 : vector<1x49xf32>
    %2284 = arith.addf %1294, %2283 : vector<1x49xf32>
    %2285 = arith.mulf %2276, %2282 : vector<1x49xf32>
    %2286 = arith.addf %1298, %2285 : vector<1x49xf32>
    %2287 = arith.mulf %2280, %2281 : vector<1x49xf32>
    %2288 = arith.addf %1294, %2287 : vector<1x49xf32>
    %2289 = arith.mulf %2280, %2282 : vector<1x49xf32>
    %2290 = arith.addf %1298, %2289 : vector<1x49xf32>
    %2291 = arith.cmpf olt, %2276, %2280 : vector<1x49xf32>
    %2292 = arith.mulf %2284, %2290 : vector<1x49xf32>
    %2293 = arith.mulf %2288, %2286 : vector<1x49xf32>
    %2294 = arith.subf %2292, %2293 : vector<1x49xf32>
    %cst_518 = arith.constant 0.000000e+00 : f32
    %2295 = vector.broadcast %cst_518 : f32 to vector<1x49xf32>
    %2296 = arith.select %2291, %2294, %2295 : vector<1x49xi1>, vector<1x49xf32>
    %2297 = arith.addf %2252, %2296 : vector<1x49xf32>
    %2298 = arith.mulf %1304, %2297 : vector<1x49xf32>
    %2299 = arith.addf %2118, %2298 : vector<1x49xf32>
    %cst_519 = arith.constant 5.000000e-01 : f32
    %2300 = vector.broadcast %cst_519 : f32 to vector<1x49xf32>
    %2301 = arith.mulf %2300, %2299 : vector<1x49xf32>
    %cst_520 = arith.constant 0.000000e+00 : f32
    %2302 = vector.broadcast %cst_520 : f32 to vector<1x49xf32>
    %2303 = arith.maximumf %2301, %2302 : vector<1x49xf32>
    %2304 = arith.addf %1439, %1305 : vector<1x49xf32>
    %2305 = arith.subf %2304, %2303 : vector<1x49xf32>
    %cst_521 = arith.constant 0.000000e+00 : f32
    %2306 = vector.broadcast %cst_521 : f32 to vector<1x49xf32>
    %2307 = arith.cmpf ogt, %2305, %2306 : vector<1x49xf32>
    %cst_522 = arith.constant 1.000000e+00 : f32
    %2308 = vector.broadcast %cst_522 : f32 to vector<1x49xf32>
    %2309 = arith.select %2307, %2305, %2308 : vector<1x49xi1>, vector<1x49xf32>
    %2310 = tpu.reciprocal %2309 {approx = true} : vector<1x49xf32> -> vector<1x49xf32>
    %cst_523 = arith.constant 0.000000e+00 : f32
    %2311 = vector.broadcast %cst_523 : f32 to vector<1x49xf32>
    %2312 = arith.cmpf ogt, %1439, %2311 : vector<1x49xf32>
    %cst_524 = arith.constant 0.000000e+00 : f32
    %2313 = vector.broadcast %cst_524 : f32 to vector<1x49xf32>
    %2314 = arith.cmpf ogt, %1305, %2313 : vector<1x49xf32>
    %2315 = arith.andi %2312, %2314 : vector<1x49xi1>
    %cst_525 = arith.constant 0.000000e+00 : f32
    %2316 = vector.broadcast %cst_525 : f32 to vector<1x49xf32>
    %2317 = arith.cmpf ogt, %2305, %2316 : vector<1x49xf32>
    %2318 = arith.andi %2315, %2317 : vector<1x49xi1>
    %2319 = arith.mulf %2303, %2310 : vector<1x49xf32>
    %cst_526 = arith.constant 0.000000e+00 : f32
    %2320 = vector.broadcast %cst_526 : f32 to vector<1x49xf32>
    %2321 = arith.select %2318, %2319, %2320 : vector<1x49xi1>, vector<1x49xf32>
    %2322 = arith.subf %1220, %1232 : vector<1x49xf32>
    %2323 = arith.mulf %2322, %2322 : vector<1x49xf32>
    %2324 = arith.subf %1221, %1233 : vector<1x49xf32>
    %2325 = arith.mulf %2324, %2324 : vector<1x49xf32>
    %2326 = arith.addf %2323, %2325 : vector<1x49xf32>
    %2327 = math.sqrt %1222 : vector<1x49xf32>
    %2328 = math.sqrt %1234 : vector<1x49xf32>
    %2329 = arith.subf %2327, %2328 : vector<1x49xf32>
    %2330 = arith.mulf %2329, %2329 : vector<1x49xf32>
    %2331 = arith.addf %2326, %2330 : vector<1x49xf32>
    %2332 = math.sqrt %1223 : vector<1x49xf32>
    %2333 = math.sqrt %1235 : vector<1x49xf32>
    %2334 = arith.subf %2332, %2333 : vector<1x49xf32>
    %2335 = arith.mulf %2334, %2334 : vector<1x49xf32>
    %2336 = arith.addf %2331, %2335 : vector<1x49xf32>
    %cst_527 = arith.constant 5.000000e+00 : f32
    %2337 = vector.broadcast %cst_527 : f32 to vector<1x49xf32>
    %2338 = arith.mulf %2337, %2336 : vector<1x49xf32>
    %2339 = arith.subf %1224, %1236 : vector<1x49xf32>
    %2340 = arith.mulf %2339, %2339 : vector<1x49xf32>
    %cst_528 = arith.constant 5.000000e+00 : f32
    %2341 = vector.broadcast %cst_528 : f32 to vector<1x49xf32>
    %2342 = arith.mulf %2341, %2340 : vector<1x49xf32>
    %2343 = arith.addf %2338, %2342 : vector<1x49xf32>
    %2344 = arith.subf %1226, %1238 : vector<1x49xf32>
    %2345 = arith.mulf %2344, %2344 : vector<1x49xf32>
    %2346 = arith.subf %1227, %1239 : vector<1x49xf32>
    %2347 = arith.mulf %2346, %2346 : vector<1x49xf32>
    %2348 = arith.addf %2345, %2347 : vector<1x49xf32>
    %2349 = math.sqrt %1228 : vector<1x49xf32>
    %2350 = math.sqrt %1240 : vector<1x49xf32>
    %2351 = arith.subf %2349, %2350 : vector<1x49xf32>
    %2352 = arith.mulf %2351, %2351 : vector<1x49xf32>
    %2353 = arith.addf %2348, %2352 : vector<1x49xf32>
    %2354 = math.sqrt %1229 : vector<1x49xf32>
    %2355 = math.sqrt %1241 : vector<1x49xf32>
    %2356 = arith.subf %2354, %2355 : vector<1x49xf32>
    %2357 = arith.mulf %2356, %2356 : vector<1x49xf32>
    %2358 = arith.addf %2353, %2357 : vector<1x49xf32>
    %cst_529 = arith.constant 5.000000e+00 : f32
    %2359 = vector.broadcast %cst_529 : f32 to vector<1x49xf32>
    %2360 = arith.mulf %2359, %2358 : vector<1x49xf32>
    %2361 = arith.subf %1230, %1242 : vector<1x49xf32>
    %2362 = arith.mulf %2361, %2361 : vector<1x49xf32>
    %cst_530 = arith.constant 5.000000e+00 : f32
    %2363 = vector.broadcast %cst_530 : f32 to vector<1x49xf32>
    %2364 = arith.mulf %2363, %2362 : vector<1x49xf32>
    %2365 = arith.addf %2360, %2364 : vector<1x49xf32>
    %2366 = arith.subf %1225, %1882 : vector<1x49xf32>
    %2367 = arith.mulf %2366, %2366 : vector<1x49xf32>
    %2368 = arith.subf %1231, %2321 : vector<1x49xf32>
    %2369 = arith.mulf %2368, %2368 : vector<1x49xf32>
    %2370 = arith.cmpf oge, %1882, %2321 : vector<1x49xf32>
    %2371 = arith.addf %2343, %2367 : vector<1x49xf32>
    %cst_531 = arith.constant 5.000000e-01 : f32
    %2372 = vector.broadcast %cst_531 : f32 to vector<1x49xf32>
    %2373 = arith.mulf %2372, %2369 : vector<1x49xf32>
    %2374 = arith.addf %2371, %2373 : vector<1x49xf32>
    %2375 = arith.addf %2365, %2369 : vector<1x49xf32>
    %cst_532 = arith.constant 5.000000e-01 : f32
    %2376 = vector.broadcast %cst_532 : f32 to vector<1x49xf32>
    %2377 = arith.mulf %2376, %2367 : vector<1x49xf32>
    %2378 = arith.addf %2375, %2377 : vector<1x49xf32>
    %2379 = arith.select %2370, %2374, %2378 : vector<1x49xi1>, vector<1x49xf32>
    %c1_533 = arith.constant 1 : index
    %c12_534 = arith.constant 12 : index
    %c0_535 = arith.constant 0 : index
    %2380 = vector.load %arg0[%c1_533, %c12_534, %c0_535] : memref<2x30x49xf32, #tpu.memory_space<vmem>>, vector<1x18x49xf32>
    %2381 = vector.shape_cast %2380 : vector<1x18x49xf32> to vector<18x49xf32>
    %c1_536 = arith.constant 1 : index
    %c12_537 = arith.constant 12 : index
    %c0_538 = arith.constant 0 : index
    %2382 = vector.load %arg1[%c1_536, %c12_537, %c0_538] : memref<2x30x49xf32, #tpu.memory_space<vmem>>, vector<1x18x49xf32>
    %2383 = vector.shape_cast %2382 : vector<1x18x49xf32> to vector<18x49xf32>
    %2384 = arith.subf %2381, %2383 : vector<18x49xf32>
    %2385 = arith.mulf %2384, %2384 : vector<18x49xf32>
    %cst_539 = arith.constant dense<0.000000e+00> : vector<49xf32>
    %2386 = vector.multi_reduction <add>, %2385, %cst_539 [0] : vector<18x49xf32> to vector<49xf32>
    %2387 = vector.shape_cast %2386 : vector<49xf32> to vector<1x49xf32>
    %2388 = arith.addf %2379, %2387 : vector<1x49xf32>
    %2389 = arith.mulf %1225, %1225 : vector<1x49xf32>
    %2390 = arith.mulf %1231, %1231 : vector<1x49xf32>
    %2391 = arith.addf %2389, %2390 : vector<1x49xf32>
    %cst_540 = arith.constant 5.000000e-01 : f32
    %2392 = vector.broadcast %cst_540 : f32 to vector<1x49xf32>
    %2393 = arith.mulf %2392, %2391 : vector<1x49xf32>
    %cst_541 = arith.constant 1.000000e+00 : f32
    %2394 = vector.broadcast %cst_541 : f32 to vector<1x49xf32>
    %2395 = arith.cmpf oeq, %1237, %2394 : vector<1x49xf32>
    %2396 = arith.select %2395, %2388, %2393 : vector<1x49xi1>, vector<1x49xf32>
    %2397 = vector.shape_cast %2396 : vector<1x49xf32> to vector<1x1x49xf32>
    %cst_542 = arith.constant dense<0.000000e+00> : vector<1xf32>
    %2398 = vector.multi_reduction <add>, %2397, %cst_542 [1, 2] : vector<1x1x49xf32> to vector<1xf32>
    %2399 = vector.shape_cast %2398 : vector<1xf32> to vector<1x1x1xf32>
    %2400 = vector.extract %2399[0, 0, 0] : f32 from vector<1x1x1xf32>
    %2401 = arith.addf %1215, %2400 : f32
    %cst_543 = arith.constant 6.000000e+00 : f32
    %2402 = arith.divf %2401, %cst_543 : f32
    %c0_544 = arith.constant 0 : index
    %c0_545 = arith.constant 0 : index
    %2403 = memref.load %arg2[%c0_544, %c0_545] : memref<1x1xf32, #tpu.memory_space<smem>>
    memref.store %2402, %arg2[%c0_544, %c0_545] : memref<1x1xf32, #tpu.memory_space<smem>>
    return
  }
}

</mosaic_0001>

<bundles_post_ra>
// kernel: _loss_yolov1_impl.1
= control target key start
LH: loop header
LB: loop body
LE: loop exit
PB: predicated region body
PF: predicated region fallthrough
CT: control target
= control target key end

     0   :  { %s7650_s0 = inlined_call_operand.vmem [shape: f32[2,30,49], index: 0, kind: input, shape index: {}]   ;;  %s7651_s1 = inlined_call_operand.vmem [shape: f32[2,30,49], index: 1, kind: input, shape index: {}]   ;;  %s7652_s2 = inlined_call_operand.hbm [shape: f32[1,1], index: 2, kind: output, shape index: {}]  }
   0x1   :  { %v4547_v0 = vld [vmem:[%s7651_s1] sm:$0xff] }
   0x2   :  { %v45_v1 = vand.u32 2139095040, %v4547_v0 }
   0x4   :  { %v46_v2 = vshrl.u32 %v45_v1, 23 }
   0x5   :  { %7 = vsyncpa [#allocation3], 0  ;;  %v42_v3 = vand.u32 2147483647, %v4547_v0  ;;  %v7663_v12 = vmov 683565275  }
   0x6   :  { %v4293_v4 = vadd.s32 4294967169, %v46_v2  ;;  %v7661_v14 = vmov 2475754826   ;;  %v7659_v16 = vmov 2131351028   ;;  %v4567_v44 = vld [vmem:[%s7650_s0] sm:$0xff] }
   0x7   :  { %v49_v6 = vand.u32 8388607, %v42_v3  ;;  %v7657_v18 = vmov 2102212464   ;;  %v7655_v20 = vmov 920167782  }
   0x8   :  { %v52_v5 = vadd.s32 1, %v4293_v4  ;;  %v7653_v27 = vmov 1326507024   ;;  %v312_v52 = vand.u32 2139095040, %v4567_v44  ;;  %v4584_v59 = vld [vmem:[%s7650_s0 + $0x8] sm:$0xf] }
   0x9   :  { %v50_v9 = vor.u32 8388608, %v49_v6  ;;  %v309_v61 = vand.u32 2147483647, %v4567_v44  ;;  %v575_v1 = vand.u32 2139095040, %v4584_v59  ;;  %s4507_s9 = scalar_lea.hbm %s7652_s2, 16 }
   0xa   :  { %vm53_vm0 = vcmp.gt.s32.totalorder %v52_v5, 0  ;;  %v313_v55 = vshrl.u32 %v312_v52, 23  ;;  %p4508_p0 = scmp.ne.s32.totalorder %s7652_s2, %s4507_s9  ;;  %p4511_p1 = scmp.lt.u32.totalorder %s4507_s9, %s7652_s2 }
   0xb   :  { %v54_v7 = vsel %vm53_vm0, %v52_v5, 0  ;;  %v90_v29 = vshll.u32 %v50_v9, 8  ;;  %v316_v5 = vand.u32 8388607, %v309_v61  ;;  %v576_v9 = vshrl.u32 %v575_v1, 23 }
   0xc   :  { %v56_v8 = vand.u32 31, %v54_v7  ;;  %v55_v10 = vshrl.u32 %v54_v7, 5  ;;  %v4301_v58 = vadd.s32 4294967169, %v313_v55  ;;  %p4513_p2 = pnand %p4511_p1, %p4508_p0 }
   0xe   :  { %v57_v11 = vsub.s32 32, %v56_v8  ;;  %v59_v13 = vshll.u32 %v7663_v12, %v56_v8  ;;  %v62_v15 = vshll.u32 %v7661_v14, %v56_v8  ;;  %v65_v17 = vshll.u32 %v7659_v16, %v56_v8 }
   0xf   :  { %v68_v19 = vshll.u32 %v7657_v18, %v56_v8  ;;  %v71_v21 = vshll.u32 %v7655_v20, %v56_v8  ;;  %vm74_vm1 = vcmp.lt.s32.totalorder %v55_v10, 1  ;;  %vm77_vm2 = vcmp.lt.s32.totalorder %v55_v10, 4 }
  0x10   :  { %v58_v22 = vshrl.u32 %v7663_v12, %v57_v11  ;;  %v60_v23 = vshrl.u32 %v7661_v14, %v57_v11  ;;  %v63_v24 = vshrl.u32 %v7659_v16, %v57_v11  ;;  %v66_v25 = vshrl.u32 %v7657_v18, %v57_v11 }
  0x11   :  { %v69_v26 = vshrl.u32 %v7655_v20, %v57_v11  ;;  %v72_v28 = vshrl.u32 %v7653_v27, %v57_v11  ;;  %vm75_vm3 = vcmp.lt.s32.totalorder %v55_v10, 2  ;;  %vm76_vm4 = vcmp.lt.s32.totalorder %v55_v10, 3 }
  0x12   :  { %v61_v30 = vor.u32 %v60_v23, %v59_v13  ;;  %v64_v31 = vor.u32 %v63_v24, %v62_v15  ;;  %v67_v32 = vor.u32 %v66_v25, %v65_v17  ;;  %v319_v62 = vadd.s32 1, %v4301_v58 }
  0x13   :  { %v70_v33 = vor.u32 %v69_v26, %v68_v19  ;;  %v73_v34 = vor.u32 %v72_v28, %v71_v21  ;;  %v12_v10 = vlaneseq  ;;  %v317_v19 = vor.u32 8388608, %v316_v5 }
  0x14   :  { %v78_v35 = vsel %vm74_vm1, %v58_v22, %v61_v30  ;;  %v79_v36 = vsel %vm77_vm2, %v67_v32, 2102212464  ;;  %v82_v37 = vsel %vm74_vm1, %v61_v30, %v64_v31  ;;  %v86_v38 = vsel %vm74_vm1, %v64_v31, %v67_v32 }
  0x15   :  { %v80_v39 = vsel %vm76_vm4, %v64_v31, %v79_v36  ;;  %v83_v40 = vsel %vm77_vm2, %v70_v33, 920167782  ;;  %v87_v41 = vsel %vm77_vm2, %v73_v34, 1326507024  ;;  %vm320_vm6 = vcmp.gt.s32.totalorder %v319_v62, 0 }
  0x16   :  { %v84_v42 = vsel %vm76_vm4, %v67_v32, %v83_v40  ;;  %v88_v43 = vsel %vm76_vm4, %v70_v33, %v87_v41  ;;  %v81_v45 = vsel %vm75_vm3, %v78_v35, %v80_v39  ;;  %v321_v2 = vsel %vm320_vm6, %v319_v62, 0 }
  0x17   :  { %v85_v46 = vsel %vm75_vm3, %v82_v37, %v84_v42  ;;  %v89_v47 = vsel %vm75_vm3, %v86_v38, %v88_v43  ;;  %v97_v53 = vmul.u32 %v90_v29, %v81_v45  ;;  %v323_v6 = vand.u32 31, %v321_v2 }
  0x18   :  { %v4569_v48 = vmul.u32.u64.low %v90_v29, %v89_v47  ;;  %v4570_v49 = vmul.u32.u64.high %v90_v29, %v89_v47, %v4569_v48  ;;  %v4572_v50 = vmul.u32.u64.low %v90_v29, %v85_v46  ;;  %v4573_v51 = vmul.u32.u64.high %v90_v29, %v85_v46, %v4572_v50 }
  0x19   :  { %v324_v8 = vsub.s32 32, %v323_v6  ;;  %v326_v11 = vshll.u32 %v7663_v12, %v323_v6  ;;  %v329_v13 = vshll.u32 %v7661_v14, %v323_v6  ;;  %v332_v15 = vshll.u32 %v7659_v16, %v323_v6 }
  0x1a   :  { %vm99_vm5 = vc.u32 %v4570_v49, %v4572_v50  ;;  %v100_v54 = vadd.s32 1, %v4573_v51  ;;  %v322_v21 = vshrl.u32 %v321_v2, 5  ;;  %v335_v22 = vshll.u32 %v7657_v18, %v323_v6 }
  0x1b   :  { %v327_v23 = vshrl.u32 %v7661_v14, %v324_v8  ;;  %v330_v24 = vshrl.u32 %v7659_v16, %v324_v8  ;;  %v333_v25 = vshrl.u32 %v7657_v18, %v324_v8  ;;  %v336_v26 = vshrl.u32 %v7655_v20, %v324_v8 }
  0x1c   :  { %v101_v56 = vsel %vm99_vm5, %v100_v54, %v4573_v51  ;;  %v4309_v29 = vadd.s32 4294967169, %v576_v9  ;;  %v325_v30 = vshrl.u32 %v7663_v12, %v324_v8  ;;  %v338_v36 = vshll.u32 %v7655_v20, %v323_v6 }
  0x1d   :  { %v102_v57 = vadd.s32 %v101_v56, %v97_v53  ;;  %v328_v31 = vor.u32 %v327_v23, %v326_v11  ;;  %v331_v32 = vor.u32 %v330_v24, %v329_v13  ;;  %v334_v33 = vor.u32 %v333_v25, %v332_v15 }
  0x1e   :  { %v337_v35 = vor.u32 %v336_v26, %v335_v22  ;;  %v339_v37 = vshrl.u32 %v7653_v27, %v324_v8  ;;  %v4608_v38 = vand.u32 127, %v12_v10  ;;  %vm341_vm7 = vcmp.lt.s32.totalorder %v322_v21, 1 }
  0x1f   :  { %v103_v60 = vadd.s32 536870912, %v102_v57  ;;  %v357_v39 = vshll.u32 %v317_v19, 8  ;;  %vm342_vm8 = vcmp.lt.s32.totalorder %v322_v21, 2  ;;  %vm343_vm9 = vcmp.lt.s32.totalorder %v322_v21, 3 }
  0x20   :  { %v340_v41 = vor.u32 %v339_v37, %v338_v36  ;;  %vm344_vm10 = vcmp.lt.s32.totalorder %v322_v21, 4  ;;  %v345_v42 = vsel %vm341_vm7, %v325_v30, %v328_v31  ;;  %v349_v43 = vsel %vm341_vm7, %v328_v31, %v331_v32 }
  0x21   :  { %v4587_v63 = vshrl.u32 %v103_v60, 30  ;;  %v353_v45 = vsel %vm341_vm7, %v331_v32, %v334_v33  ;;  %v346_v46 = vsel %vm344_vm10, %v334_v33, 2102212464  ;;  %v350_v47 = vsel %vm344_vm10, %v337_v35, 920167782 }
  0x22   :  { %v582_v48 = vadd.s32 1, %v4309_v29  ;;  %v347_v52 = vsel %vm343_vm9, %v331_v32, %v346_v46  ;;  %v351_v53 = vsel %vm343_vm9, %v334_v33, %v350_v47  ;;  %v354_v54 = vsel %vm344_vm10, %v340_v41, 1326507024 }
  0x23   :  { %v105_v4 = vshll.u32 %v4587_v63, 30  ;;  %v14_v55 = vcvt.s32.f32 %v4608_v38  ;;  %v98_v56 = vadd.s32 %v4572_v50, %v4570_v49  ;;  %v572_v58 = vand.u32 2147483647, %v4584_v59 }
  0x24   :  { %v352_v62 = vsel %vm342_vm8, %v349_v43, %v351_v53  ;;  %v355_v1 = vsel %vm343_vm9, %v337_v35, %v354_v54  ;;  %vm583_vm12 = vcmp.gt.s32.totalorder %v582_v48, 0  ;;  %v4629_v15 = vshrl.u32 %v12_v10, 7 }
  0x25   :  { %v4593_v7 = vsub.s32 %v102_v57, %v105_v4  ;;  %v348_v4 = vsel %vm342_vm8, %v345_v42, %v347_v52  ;;  %v356_v5 = vsel %vm342_vm8, %v353_v45, %v355_v1  ;;  %v584_v6 = vsel %vm583_vm12, %v582_v48, 0 }
  0x26   :  { %v4620_v8 = vmul.u32.u64.low %v357_v39, %v356_v5  ;;  %v4621_v9 = vmul.u32.u64.high %v357_v39, %v356_v5, %v4620_v8  ;;  %v4623_v11 = vmul.u32.u64.low %v357_v39, %v352_v62  ;;  %v4624_v49 = vmul.u32.u64.high %v357_v39, %v352_v62, %v4623_v11  ;;  %7754 = vst [vmem:[#allocation5_spill] sm:$0xff] %v4629_v15 }
  0x27   :  { %v108_v17 = vsub.s32 0, %v4593_v7  ;;  %v579_v50 = vand.u32 8388607, %v572_v58  ;;  %v586_v13 = vand.u32 31, %v584_v6  ;;  %v364_v19 = vmul.u32 %v357_v39, %v348_v4 }
  0x28   :  { %v15_v25 = vmul.f32 0.14285715, %v14_v55  ;;  %vm366_vm13 = vc.u32 %v4621_v9, %v4623_v11  ;;  %v367_v26 = vadd.s32 1, %v4624_v49  ;;  %v585_v29 = vshrl.u32 %v584_v6, 5 }
  0x29   :  { %v4294_v28 = vmin.u32 %v108_v17, %v4593_v7  ;;  %v587_v23 = vsub.s32 32, %v586_v13  ;;  %v589_v24 = vshll.u32 %v7663_v12, %v586_v13  ;;  %v580_v10 = vor.u32 8388608, %v579_v50 }
  0x2a   :  { %v368_v31 = vsel %vm366_vm13, %v367_v26, %v4624_v49  ;;  %v595_v32 = vshll.u32 %v7659_v16, %v586_v13  ;;  %v601_v42 = vshll.u32 %v7655_v20, %v586_v13  ;;  %vm604_vm14 = vcmp.lt.s32.totalorder %v585_v29, 1 }
  0x2b   :  { %v110_v34 = vclz %v4294_v28  ;;  %v592_v28 = vshll.u32 %v7661_v14, %v586_v13  ;;  %v593_v30 = vshrl.u32 %v7659_v16, %v587_v23  ;;  %v596_v33 = vshrl.u32 %v7657_v18, %v587_v23 }
  0x2c   :  { %v369_v37 = vadd.s32 %v368_v31, %v364_v19  ;;  %v599_v41 = vshrl.u32 %v7655_v20, %v587_v23  ;;  %v602_v43 = vshrl.u32 %v7653_v27, %v587_v23  ;;  %v588_v46 = vshrl.u32 %v7663_v12, %v587_v23 }
  0x2d   :  { %v4295_v40 = vadd.s32 4294967294, %v110_v34  ;;  %v598_v34 = vshll.u32 %v7657_v18, %v586_v13  ;;  %v620_v47 = vshll.u32 %v580_v10, 8  ;;  %v597_v48 = vor.u32 %v596_v33, %v595_v32 }
  0x2e   :  { %v370_v45 = vadd.s32 536870912, %v369_v37  ;;  %v603_v52 = vor.u32 %v602_v43, %v601_v42  ;;  %vm607_vm15 = vcmp.lt.s32.totalorder %v585_v29, 4  ;;  %vm606_vm0 = vcmp.lt.s32.totalorder %v585_v29, 3 }
  0x2f   :  { %vm4296_vm11 = vcmp.lt.s32.totalorder %v4295_v40, 0  ;;  %vm605_vm1 = vcmp.lt.s32.totalorder %v585_v29, 2  ;;  %v4652_v1 = vfloor.f32 %v15_v25  ;;  %vm44_vm6 = vcmp.lt.s32.totalorder %v4547_v0, 0 }
  0x30   :  { %v113_v51 = vsel %vm4296_vm11, 0, %v4295_v40  ;;  %v594_v40 = vor.u32 %v593_v30, %v592_v28  ;;  %v617_v49 = vsel %vm607_vm15, %v603_v52, 1326507024  ;;  %v41_v29 = vmul.f32 0.5, %v4547_v0 }
  0x31   :  { %v118_v57 = vsub.s32 4294967266, %v113_v51  ;;  %v114_v60 = vsub.s32 32, %v113_v51  ;;  %v115_v17 = vshll.u32 %v4593_v7, %v113_v51  ;;  %v590_v7 = vshrl.u32 %v7661_v14, %v587_v23  ;;  %7755 = vst [vmem:[#allocation6_spill] sm:$0xff] %v4652_v1 }
  0x32   :  { %v600_v51 = vor.u32 %v599_v41, %v598_v34  ;;  %v616_v8 = vsel %vm604_vm14, %v594_v40, %v597_v48  ;;  %v17_v30 = vmul.f32 7.0, %v4652_v1  ;;  %vm4678_vm8 = vcmp.le.f32.partialorder %v42_v3, 0.7853982 }
  0x33   :  { %v119_v2 = vadd.s32 127, %v118_v57  ;;  %v116_v22 = vshrl.u32 %v98_v56, %v114_v60  ;;  %v591_v39 = vor.u32 %v590_v7, %v589_v24  ;;  %v4649_v56 = vshrl.u32 %v370_v45, 30 }
  0x34   :  { %v609_v57 = vsel %vm607_vm15, %v597_v48, 2102212464  ;;  %v613_v62 = vsel %vm607_vm15, %v600_v51, 920167782  ;;  %v618_v19 = vsel %vm606_vm0, %v600_v51, %v617_v49  ;;  %v4693_v42 = vsub.f32 %v14_v55, %v17_v30 }
  0x35   :  { %v120_v21 = vshll.u32 %v119_v2, 23  ;;  %v117_v35 = vor.u32 %v116_v22, %v115_v17  ;;  %v612_v60 = vsel %vm604_vm14, %v591_v39, %v594_v40  ;;  %v21_v2 = vcvt.s32.f32 %v4629_v15 }
  0x36   :  { %v372_v4 = vshll.u32 %v4649_v56, 30  ;;  %v608_v5 = vsel %vm604_vm14, %v588_v46, %v591_v39  ;;  %v614_v6 = vsel %vm606_vm0, %v597_v48, %v613_v62  ;;  %v610_v13 = vsel %vm606_vm0, %v594_v40, %v609_v57  ;;  %7760 = vst [vmem:[#allocation9_spill] sm:$0xff] %v4693_v42 }
  0x37   :  { %v121_v36 = vor.u32 4788187, %v120_v21  ;;  %v124_v54 = vcvt.s32.f32 %v117_v35  ;;  %v615_v17 = vsel %vm605_vm1, %v612_v60, %v614_v6  ;;  %v619_v21 = vsel %vm605_vm1, %v616_v8, %v618_v19 }
  0x38   :  { %v4658_v50 = vsub.s32 %v369_v37, %v372_v4  ;;  %v4662_v23 = vmul.u32.u64.low %v620_v47, %v615_v17  ;;  %v4663_v24 = vmul.u32.u64.high %v620_v47, %v615_v17, %v4662_v23  ;;  %vm22_vm2 = vcmp.ge.f32.partialorder %v21_v2, 1.0 }
  0x39   :  { %v122_v53 = vand.u32 2147483647, %v121_v36  ;;  %vm23_vm3 = vcmp.le.f32.partialorder %v21_v2, 2.0  ;;  %v611_v26 = vsel %vm605_vm1, %v608_v5, %v610_v13  ;;  %vm28_vm5 = vcmp.le.f32.partialorder %v21_v2, 1.0 }
  0x3a   :  { %v375_v25 = vsub.s32 0, %v4658_v50  ;;  %v4668_v28 = vmul.u32.u64.low %v620_v47, %v619_v21  ;;  %v4669_v10 = vmul.u32.u64.high %v620_v47, %v619_v21, %v4668_v28  ;;  %vm24_vm4 = vmand %vm22_vm2, %vm23_vm3  ;;  %v630_v32 = vadd.s32 1, %v4663_v24 }
  0x3b   :  { %v125_v22 = vmul.f32 %v124_v54, %v122_v53  ;;  %v627_v34 = vmul.u32 %v620_v47, %v611_v26  ;;  %vm26_vm7 = vcmp.ge.f32.partialorder %v21_v2, 2.0  ;;  %v4683_v36 = vsub.s32 2, %v4629_v15 }
  0x3c   :  { %v4302_v7 = vmin.u32 %v375_v25, %v4658_v50  ;;  %v7665_v37 = vmov -1.0   ;;  %vm629_vm9 = vc.u32 %v4669_v10, %v4662_v23  ;;  %v4698_v43 = vsub.s32 3, %v4629_v15 }
  0x3d   :  { %v126_v31 = vxor.u32 2147483648, %v125_v22  ;;  %7758 = vst [vmem:[#allocation7_spill] sm:$0xff] %v4683_v36  ;;  %v4686_v39 = vsel %vm24_vm4, 1.0, %v7665_v37  ;;  %v29_v40 = vsel %vm28_vm5, 1.0, %v7665_v37  ;;  %v631_v45 = vsel %vm629_vm9, %v630_v32, %v4663_v24 }
  0x3e   :  { %v377_v33 = vclz %v4302_v7  ;;  %7759 = vst [vmem:[#allocation8_spill] sm:$0xff] %v4686_v39  ;;  %7761 = vst [vmem:[#allocation10_spill] sm:$0xff] %v4698_v43  ;;  %v292_v46 = vrot.slane %v4547_v0, 1  ;;  %v365_v47 = vadd.s32 %v4623_v11, %v4621_v9  ;;  %v632_v48 = vadd.s32 %v631_v45, %v627_v34 }
  0x3f   :  { %v127_v3 = vsel %vm44_vm6, %v126_v31, %v125_v22  ;;  %v4706_v38 = vsel %vm26_vm7, 1.0, %v7665_v37  ;;  %v4709_v55 = vsub.f32 %v29_v40, %v4686_v39  ;;  %v252_v51 = vrot.slane %v41_v29, %v4683_v36 }
  0x40   :  { %v4303_v41 = vadd.s32 4294967294, %v377_v33  ;;  %7762 = vst [vmem:[#allocation11_spill] sm:$0xff] %v4706_v38  ;;  %v36_v53 = vadd.f32 %v4547_v0, %v4652_v1  ;;  %v128_v54 = vsub.s32 4, %v4587_v63  ;;  %v130_v9 = vsel %vm4678_vm8, %v4547_v0, %v127_v3 }
  0x41   :  { %7763 = vst [vmem:[#allocation12_spill] sm:$0xff] %v4709_v55  ;;  %v39_v57 = vadd.f32 %v4547_v0, %v4693_v42  ;;  %v633_v2 = vadd.s32 536870912, %v632_v48  ;;  %v4723_v4 = vsub.f32 %v4686_v39, %v4706_v38  ;;  %v257_v5 = vrot.slane %v41_v29, %v4698_v43 }
  0x42   :  { %vm4304_vm10 = vcmp.lt.s32.totalorder %v4303_v41, 0  ;;  %v294_v6 = vmul.f32 %v292_v46, %v4547_v0  ;;  %4389 = vcosq.f32 %v130_v9  ;;  %v4728_v49 = vmul.f32 %v252_v51, %v4686_v39 }
  0x43   :  { %v380_v52 = vsel %vm4304_vm10, 0, %v4303_v41  ;;  %7764 = vst [vmem:[#allocation13_spill] sm:$0xff] %v4723_v4  ;;  %v4731_v13 = vsub.s32 4, %v4629_v15  ;;  %v129_v19 = vsel %vm44_vm6, %v128_v54, %v4587_v63  ;;  %4391 = vsinq.f32 %v130_v9 }
  0x44   :  { %v381_v11 = vsub.s32 32, %v380_v52  ;;  %v382_v60 = vshll.u32 %v4658_v50, %v380_v52  ;;  %v385_v62 = vsub.s32 4294967266, %v380_v52  ;;  %v4733_v50 = vmul.f32 0.14285715, %v36_v53 }
  0x45   :  { %7765 = vst [vmem:[#allocation14_spill] sm:$0xff] %v4731_v13  ;;  %v4738_v22 = vshrl.u32 %v633_v2, 30  ;;  %v4740_v21 = vmul.f32 0.14285715, %v39_v57  ;;  %v4743_v24 = vsub.s32 0, %v4629_v15  ;;  %v4746_v25 = vsub.s32 1, %v4629_v15 }
  0x46   :  { %v383_v8 = vshrl.u32 %v365_v47, %v381_v11  ;;  %v386_v17 = vadd.s32 127, %v385_v62  ;;  %v4749_v28 = vmul.f32 %v257_v5, %v4706_v38  ;;  %v4752_v7 = vmul.f32 %v252_v51, %v4709_v55 }
  0x47   :  { %7766 = vst [vmem:[#allocation15_spill] sm:$0xff] %v4743_v24  ;;  %7767 = vst [vmem:[#allocation16_spill] sm:$0xff] %v4746_v25  ;;  %vm295_vm11 = vcmp.ge.f32.partialorder %v294_v6, 0.0  ;;  %v308_v63 = vmul.f32 0.5, %v4567_v44  ;;  %v131_v30 = vsel %vm4678_vm8, 0, %v129_v19  ;;  %v304_v31 = vadd.f32 %v4567_v44, %v4652_v1 }
  0x48   :  { %v384_v26 = vor.u32 %v383_v8, %v382_v60  ;;  %v306_v32 = vadd.f32 %v4567_v44, %v4693_v42  ;;  %v387_v33 = vshll.u32 %v386_v17, 23  ;;  %v267_v34 = vrot.slane %v4733_v50, %v4743_v24 }
  0x49   :  { %v4764_v29 = vmul.f32 %v257_v5, %v4723_v4  ;;  %v559_v40 = vrot.slane %v4567_v44, 1  ;;  %v635_v41 = vshll.u32 %v4738_v22, 30  ;;  %v279_v35 = vrot.slane %v4740_v21, %v4746_v25 }
  0x4a   :  { %v4771_v3 = vsel %vm295_vm11, 1.0, %v7665_v37  ;;  %v388_v45 = vor.u32 4788187, %v387_v33  ;;  %v391_v46 = vcvt.s32.f32 %v384_v26  ;;  %v238_v47 = vadd.s32 3, %v131_v30 }
  0x4b   :  { %7768 = vst [vmem:[#allocation17_spill] sm:$0xff] %v4771_v3  ;;  %v395_v51 = vsub.s32 4, %v4649_v56  ;;  %v519_v52 = vrot.slane %v308_v63, %v4683_v36  ;;  %v4775_v53 = vsub.s32 %v632_v48, %v635_v41  ;;  %v4777_v54 = vmul.f32 0.14285715, %v304_v31 }
  0x4c   :  { %v4779_v9 = vmul.f32 0.14285715, %v306_v32  ;;  %v389_v11 = vand.u32 2147483647, %v388_v45  ;;  %v524_v57 = vrot.slane %v308_v63, %v4698_v43  ;;  %v135_v60 = vand.u32 3, %v131_v30  ;;  %v4390_v8 = vpop.eup %4389 }
  0x4d   :  { %v4782_v62 = vand.u32 2147483647, %v294_v6  ;;  %v4785_v2 = vmul.f32 %v559_v40, %v4567_v44  ;;  %v638_v5 = vsub.s32 0, %v4775_v53  ;;  %v4790_v48 = vrot.slane %v4771_v3, %v4683_v36  ;;  %v4392_v19 = vpop.eup %4391 }
  0x4e   :  { %vm4794_vm12 = vcmp.le.f32.partialorder %v309_v61, 0.7853982  ;;  %vm311_vm13 = vcmp.lt.s32.totalorder %v4567_v44, 0  ;;  %v392_v6 = vmul.f32 %v391_v46, %v389_v11  ;;  %v239_v26 = vand.u32 3, %v238_v47 }
  0x4f   :  { %v396_v63 = vsel %vm311_vm13, %v395_v51, %v4649_v56  ;;  %v4803_v30 = vmul.f32 %v519_v52, %v4686_v39  ;;  %v4310_v31 = vmin.u32 %v638_v5, %v4775_v53  ;;  %v4807_v61 = vmul.f32 %v524_v57, %v4706_v38 }
  0x50   :  { %v393_v32 = vxor.u32 2147483648, %v392_v6  ;;  %v534_v33 = vrot.slane %v4777_v54, %v4743_v24  ;;  %v546_v40 = vrot.slane %v4779_v9, %v4746_v25  ;;  %vm134_vm14 = vweird.f32 %v4547_v0 }
  0x51   :  { %vm137_vm15 = vcmp.eq.s32.totalorder %v135_v60, 0  ;;  %vm562_vm0 = vcmp.ge.f32.partialorder %v4785_v2, 0.0  ;;  %v571_v56 = vmul.f32 0.5, %v4584_v59  ;;  %v640_v41 = vclz %v4310_v31 }
  0x52   :  { %v138_v45 = vxor.u32 2147483648, %v4392_v19  ;;  %v141_v46 = vxor.u32 2147483648, %v4390_v8  ;;  %v394_v47 = vsel %vm311_vm13, %v393_v32, %v392_v6  ;;  %v398_v51 = vsel %vm4794_vm12, 0, %v396_v63 }
  0x53   :  { %vm140_vm1 = vcmp.eq.s32.totalorder %v135_v60, 2  ;;  %vm244_vm2 = vcmp.eq.s32.totalorder %v239_v26, 2  ;;  %v397_v11 = vsel %vm4794_vm12, %v4567_v44, %v394_v47  ;;  %v4311_v5 = vadd.s32 4294967294, %v640_v41 }
  0x54   :  { %vm136_vm3 = vcmp.lt.s32.totalorder %v135_v60, 2  ;;  %vm240_vm4 = vcmp.lt.s32.totalorder %v239_v26, 2  ;;  %vm241_vm5 = vcmp.eq.s32.totalorder %v239_v26, 0  ;;  %4393 = vcosq.f32 %v397_v11 }
  0x55   :  { %4395 = vsinq.f32 %v397_v11  ;;  %v505_v31 = vadd.s32 3, %v398_v51  ;;  %v628_v27 = vadd.s32 %v4662_v23, %v4669_v10  ;;  %vm4312_vm6 = vcmp.lt.s32.totalorder %v4311_v5, 0 }
  0x56   :  { %v139_v6 = vsel %vm137_vm15, %v4390_v8, %v138_v45  ;;  %v142_v63 = vsel %vm140_vm1, %v141_v46, %v4392_v19  ;;  %v246_v32 = vsel %vm244_vm2, %v141_v46, %v4392_v19  ;;  %v643_v20 = vsel %vm4312_vm6, 0, %v4311_v5 }
  0x57   :  { %v243_v18 = vsel %vm241_vm5, %v4390_v8, %v138_v45  ;;  %v644_v16 = vsub.s32 32, %v643_v20  ;;  %v645_v17 = vshll.u32 %v4775_v53, %v643_v20  ;;  %v648_v41 = vsub.s32 4294967266, %v643_v20 }
  0x58   :  { %v4828_v47 = vmul.f32 %v519_v52, %v4709_v55  ;;  %v4831_v11 = vmul.f32 %v524_v57, %v4723_v4  ;;  %v4834_v14 = vrot.slane %v571_v56, %v4743_v24  ;;  %v4837_v23 = vrot.slane %v571_v56, %v4746_v25 }
  0x59   :  { %v143_v10 = vsel %vm136_vm3, %v139_v6, %v142_v63  ;;  %vm401_vm7 = vweird.f32 %v4567_v44  ;;  %v4844_v20 = vsel %vm562_vm0, 1.0, %v7665_v37  ;;  %v646_v52 = vshrl.u32 %v628_v27, %v644_v16 }
  0x5a   :  { %7771 = vst [vmem:[#allocation18_spill] sm:$0xff] %v4844_v20  ;;  %v649_v53 = vadd.s32 127, %v648_v41  ;;  %v247_v57 = vsel %vm240_vm4, %v243_v18, %v246_v32  ;;  %v402_v8 = vand.u32 3, %v398_v51  ;;  %v506_v19 = vand.u32 3, %v505_v31 }
  0x5b   :  { %vm574_vm8 = vcmp.lt.s32.totalorder %v4584_v59, 0  ;;  %v822_v56 = vrot.slane %v4584_v59, 1  ;;  %vm4852_vm9 = vcmp.le.f32.partialorder %v572_v58, 0.7853982  ;;  %v647_v46 = vor.u32 %v646_v52, %v645_v17 }
  0x5c   :  { %v650_v5 = vshll.u32 %v649_v53, 23  ;;  %v144_v16 = vsel %vm134_vm14, nan, %v143_v10  ;;  %v4860_v18 = vrot.slane %v4844_v20, %v4683_v36  ;;  %v4864_v27 = vmul.f32 %v4834_v14, %v4686_v39 }
  0x5d   :  { %v4868_v26 = vmul.f32 %v4837_v23, %v4706_v38  ;;  %v248_v58 = vsel %vm134_vm14, nan, %v247_v57  ;;  %v654_v31 = vcvt.s32.f32 %v647_v46  ;;  %v7668_v6 = vsub.s32 6, %v4629_v15 }
  0x5e   :  { %v651_v51 = vor.u32 4788187, %v650_v5  ;;  %v4394_v63 = vpop.eup %4393  ;;  %vm404_vm10 = vcmp.eq.s32.totalorder %v402_v8, 0  ;;  %vm407_vm11 = vcmp.eq.s32.totalorder %v402_v8, 2  ;;  %vm511_vm12 = vcmp.eq.s32.totalorder %v506_v19, 2 }
  0x5f   :  { %v4874_v32 = vmul.f32 %v822_v56, %v4584_v59  ;;  %v4396_v17 = vpop.eup %4395  ;;  %v262_v41 = vrot.slane %v144_v16, %v4731_v13  ;;  %v408_v10 = vxor.u32 2147483648, %v4394_v63  ;;  %vm508_vm13 = vcmp.eq.s32.totalorder %v506_v19, 0 }
  0x60   :  { %v652_v52 = vand.u32 2147483647, %v651_v51  ;;  %v272_v0 = vrot.slane %v248_v58, %v4731_v13  ;;  %vm403_vm14 = vcmp.lt.s32.totalorder %v402_v8, 2  ;;  %v405_v53 = vxor.u32 2147483648, %v4396_v17 }
  0x61   :  { %7774 = vst [vmem:[#allocation19_spill] sm:$0xff] %v4874_v32  ;;  %vm507_vm15 = vcmp.lt.s32.totalorder %v506_v19, 2  ;;  %v409_v57 = vsel %vm407_vm11, %v408_v10, %v4396_v17  ;;  %v513_v46 = vsel %vm511_vm12, %v408_v10, %v4396_v17  ;;  %v7667_v12 = vsub.s32 7, %v4629_v15 }
  0x62   :  { %v655_v5 = vmul.f32 %v654_v31, %v652_v52  ;;  %v406_v60 = vsel %vm404_vm10, %v4394_v63, %v405_v53  ;;  %v510_v56 = vsel %vm508_vm13, %v4394_v63, %v405_v53  ;;  %v4883_v16 = vrot.slane %v4777_v54, %v7668_v6 }
  0x63   :  { %vm825_vm0 = vcmp.ge.f32.partialorder %v4874_v32, 0.0  ;;  %v263_v58 = vmul.f32 %v262_v41, %v4728_v49  ;;  %v410_v51 = vsel %vm403_vm14, %v406_v60, %v409_v57  ;;  %v514_v37 = vsel %vm507_vm15, %v510_v56, %v513_v46 }
  0x64   :  { %v656_v19 = vxor.u32 2147483648, %v655_v5  ;;  %v275_v17 = vmul.f32 %v272_v0, %v4728_v49  ;;  %v285_v31 = vmul.f32 %v4752_v7, %v262_v41  ;;  %v411_v8 = vsel %vm401_vm7, nan, %v410_v51 }
  0x65   :  { %v515_v63 = vsel %vm401_vm7, nan, %v514_v37  ;;  %v4894_v10 = vrot.slane %v411_v8, %v4731_v13  ;;  %v658_v53 = vsub.s32 4, %v4738_v22  ;;  %v286_v49 = vmul.f32 %v4764_v29, %v272_v0 }
  0x66   :  { %v4897_v52 = vrot.slane %v515_v63, %v4731_v13  ;;  %v657_v60 = vsel %vm574_vm8, %v656_v19, %v655_v5  ;;  %v288_v57 = vmul.f32 %v4764_v29, %v262_v41  ;;  %v289_v46 = vmul.f32 %v4752_v7, %v272_v0 }
  0x67   :  { %v660_v44 = vsel %vm4852_vm9, %v4584_v59, %v657_v60  ;;  %v530_v37 = vmul.f32 %v4894_v10, %v4803_v30  ;;  %v548_v51 = vmul.f32 %v4894_v10, %v4807_v61  ;;  %v268_v7 = vadd.f32 %v267_v34, %v263_v58 }
  0x68   :  { %v540_v56 = vmul.f32 %v4897_v52, %v4807_v61  ;;  %v542_v5 = vmul.f32 %v4897_v52, %v4803_v30  ;;  %v273_v29 = vmul.f32 %v272_v0, %v4749_v28  ;;  %v280_v19 = vsub.f32 %v279_v35, %v275_v17 }
  0x69   :  { %v281_v8 = vmul.f32 %v262_v41, %v4749_v28  ;;  %v535_v63 = vadd.f32 %v534_v33, %v530_v37  ;;  %v659_v50 = vsel %vm574_vm8, %v658_v53, %v4738_v22  ;;  %4397 = vcosq.f32 %v660_v44 }
  0x6a   :  { %v547_v30 = vsub.f32 %v546_v40, %v542_v5  ;;  %v287_v34 = vadd.f32 %v286_v49, %v285_v31  ;;  %v290_v61 = vsub.f32 %v288_v57, %v289_v46  ;;  %4399 = vsinq.f32 %v660_v44 }
  0x6b   :  { %v4936_v21 = vrot.slane %v4779_v9, %v7667_v12  ;;  %v4938_v28 = vadd.f32 %v540_v56, %v535_v63  ;;  %v4944_v54 = vmul.f32 %v4834_v14, %v4709_v55  ;;  %v7775_v33 = vmov -1.0  }
  0x6c   :  { %v4940_v35 = vadd.f32 %v548_v51, %v547_v30  ;;  %v4949_v22 = vsel %vm825_vm0, 1.0, %v7775_v33  ;;  %v4951_v40 = vadd.f32 %v273_v29, %v268_v7  ;;  %v4953_v41 = vadd.f32 %v281_v8, %v280_v19 }
  0x6d   :  { %7776 = vst [vmem:[#allocation20_spill] sm:$0xff] %v4949_v22  ;;  %v661_v9 = vsel %vm4852_vm9, 0, %v659_v50  ;;  %v4959_v0 = vmul.f32 %v4837_v23, %v4723_v4  ;;  %v843_v58 = vrot.slane %v4938_v28, %v4743_v24  ;;  %v856_v31 = vrot.slane %v4938_v28, %v4746_v25 }
  0x6e   :  { %7777 = vst [vmem:[#allocation21_spill] sm:$0xff] %v4951_v40  ;;  %7778 = vst [vmem:[#allocation22_spill] sm:$0xff] %v4953_v41  ;;  %v837_v14 = vrot.slane %v4940_v35, %v4743_v24  ;;  %v850_v17 = vrot.slane %v4940_v35, %v4746_v25  ;;  %v4970_v60 = vmul.f32 %v4790_v48, %v287_v34  ;;  %v4979_v53 = vand.u32 3, %v661_v9 }
  0x6f   :  { %v4973_v45 = vmul.f32 %v4790_v48, %v290_v61  ;;  %v4977_v23 = vrot.slane %v4949_v22, %v4743_v24  ;;  %v844_v57 = vsub.f32 %v843_v58, %v4951_v40  ;;  %v4985_v46 = vrot.slane %v4953_v41, %v4743_v24 }
  0x70   :  { %7779 = vst [vmem:[#allocation23_spill] sm:$0xff] %v4970_v60  ;;  %v838_v49 = vsub.f32 %v837_v14, %v4953_v41  ;;  %v768_v44 = vadd.s32 3, %v661_v9  ;;  %v4989_v37 = vrot.slane %v4951_v40, %v4743_v24  ;;  %v4993_v48 = vrot.slane %v4953_v41, %v4746_v25 }
  0x71   :  { %7780 = vst [vmem:[#allocation24_spill] sm:$0xff] %v4973_v45  ;;  %7781 = vst [vmem:[#allocation25_spill] sm:$0xff] %v4977_v23  ;;  %v4997_v56 = vrot.slane %v4951_v40, %v4746_v25  ;;  %v851_v5 = vsub.f32 %v850_v17, %v4953_v41  ;;  %v857_v51 = vsub.f32 %v856_v31, %v4951_v40  ;;  %vm666_vm1 = vcmp.lt.s32.totalorder %v4979_v53, 2 }
  0x72   :  { %7782 = vst [vmem:[#allocation26_spill] sm:$0xff] %v4985_v46  ;;  %7783 = vst [vmem:[#allocation27_spill] sm:$0xff] %v4989_v37  ;;  %v5003_v7 = vrot.slane %v4953_v41, %v4683_v36  ;;  %v5007_v29 = vrot.slane %v4951_v40, %v4683_v36  ;;  %v863_v19 = vrot.slane %v4940_v35, %v4683_v36  ;;  %vm667_vm2 = vcmp.eq.s32.totalorder %v4979_v53, 0 }
  0x73   :  { %7784 = vst [vmem:[#allocation28_spill] sm:$0xff] %v4993_v48  ;;  %7785 = vst [vmem:[#allocation29_spill] sm:$0xff] %v4997_v56  ;;  %v869_v8 = vrot.slane %v4938_v28, %v4683_v36  ;;  %v876_v63 = vrot.slane %v4940_v35, %v4698_v43  ;;  %v882_v30 = vrot.slane %v4938_v28, %v4698_v43  ;;  %v4398_v50 = vpop.eup %4397  ;;  %vm670_vm3 = vcmp.eq.s32.totalorder %v4979_v53, 2 }
  0x74   :  { %7786 = vst [vmem:[#allocation30_spill] sm:$0xff] %v5003_v7  ;;  %7787 = vst [vmem:[#allocation31_spill] sm:$0xff] %v5007_v29  ;;  %v839_v34 = vmul.f32 %v838_v49, %v4970_v60  ;;  %v845_v61 = vmul.f32 %v844_v57, %v4973_v45  ;;  %v4400_v9 = vpop.eup %4399  ;;  %v552_v14 = vmul.f32 %v4828_v47, %v4894_v10  ;;  %v769_v17 = vand.u32 3, %v768_v44 }
  0x75   :  { %v553_v58 = vmul.f32 %v4831_v11, %v4897_v52  ;;  %v555_v31 = vmul.f32 %v4831_v11, %v4894_v10  ;;  %v556_v12 = vmul.f32 %v4828_v47, %v4897_v52  ;;  %v852_v49 = vmul.f32 %v851_v5, %v4970_v60 }
  0x76   :  { %v858_v57 = vmul.f32 %v857_v51, %v4973_v45  ;;  %vm664_vm4 = vweird.f32 %v4584_v59  ;;  %v864_v6 = vsub.f32 %v863_v19, %v4953_v41  ;;  %v870_v15 = vsub.f32 %v869_v8, %v4951_v40 }
  0x77   :  { %v877_v13 = vsub.f32 %v876_v63, %v4953_v41  ;;  %v883_v44 = vsub.f32 %v882_v30, %v4951_v40  ;;  %v668_v33 = vxor.u32 2147483648, %v4400_v9  ;;  %v671_v4 = vxor.u32 2147483648, %v4398_v50 }
  0x78   :  { %v5037_v11 = vsub.f32 %v839_v34, %v845_v61  ;;  %v5041_v47 = vrot.slane %v4953_v41, %v4698_v43  ;;  %vm771_vm5 = vcmp.eq.s32.totalorder %v769_v17, 0  ;;  %v5045_v10 = vrot.slane %v4951_v40, %v4698_v43 }
  0x79   :  { %v1210_v52 = vrot.slane %v4951_v40, 7  ;;  %v1214_v5 = vrot.slane %v4953_v41, 7  ;;  %v554_v51 = vadd.f32 %v553_v58, %v552_v14  ;;  %v557_v19 = vsub.f32 %v555_v31, %v556_v12 }
  0x7a   :  { %7788 = vst [vmem:[#allocation32_spill] sm:$0xff] %v5041_v47  ;;  %7789 = vst [vmem:[#allocation33_spill] sm:$0xff] %v5045_v10  ;;  %vm774_vm6 = vcmp.eq.s32.totalorder %v769_v17, 2  ;;  %v5049_v8 = vsub.f32 %v852_v49, %v858_v57  ;;  %v865_v63 = vmul.f32 %v864_v6, %v4970_v60  ;;  %v871_v30 = vmul.f32 %v870_v15, %v4973_v45 }
  0x7b   :  { %v878_v34 = vmul.f32 %v877_v13, %v4970_v60  ;;  %v884_v61 = vmul.f32 %v883_v44, %v4973_v45  ;;  %v669_v55 = vsel %vm667_vm2, %v4398_v50, %v668_v33  ;;  %v672_v38 = vsel %vm670_vm3, %v671_v4, %v4400_v9 }
  0x7c   :  { %vm770_vm7 = vcmp.lt.s32.totalorder %v769_v17, 2  ;;  %v5061_v12 = vsub.f32 %v5037_v11, %v5049_v8  ;;  %v773_v14 = vsel %vm771_vm5, %v4398_v50, %v668_v33  ;;  %v776_v6 = vsel %vm774_vm6, %v671_v4, %v4400_v9 }
  0x7d   :  { %v5065_v15 = vsub.f32 %v4951_v40, %v1210_v52  ;;  %v1384_v13 = vrot.slane %v4951_v40, 3  ;;  %v569_v58 = vmul.f32 %v4860_v18, %v554_v51  ;;  %v570_v31 = vmul.f32 %v4860_v18, %v557_v19 }
  0x7e   :  { %v890_v49 = vsub.f32 %v4985_v46, %v4940_v35  ;;  %v896_v57 = vsub.f32 %v4989_v37, %v4938_v28  ;;  %v673_v17 = vsel %vm666_vm1, %v669_v55, %v672_v38  ;;  %v5076_v33 = vsub.f32 %v865_v63, %v871_v30 }
  0x7f   :  { %v5078_v4 = vsub.f32 %v878_v34, %v884_v61  ;;  %v903_v50 = vsub.f32 %v4993_v48, %v4940_v35  ;;  %v777_v9 = vsel %vm770_vm7, %v773_v14, %v776_v6  ;;  %v909_v18 = vsub.f32 %v4997_v56, %v4938_v28 }
  0x80   :  { %v916_v44 = vsub.f32 %v5003_v7, %v4940_v35  ;;  %vm939_vm8 = vcmp.eq.f32.partialorder %v5061_v12, 0.0  ;;  %v5091_v55 = vsub.f32 %v4953_v41, %v1214_v5  ;;  %v5094_v53 = vsub.f32 %v4951_v40, %v1384_v13 }
  0x81   :  { %v940_v38 = vsel %vm939_vm8, 1.0, %v5061_v12  ;;  %v1387_v52 = vrot.slane %v4953_v41, 3  ;;  %v674_v51 = vsel %vm664_vm4, nan, %v673_v17  ;;  %v891_v19 = vmul.f32 %v890_v49, %v569_v58 }
  0x82   :  { %7790 = vst [vmem:[#allocation34_spill] sm:$0xff] %v5094_v53  ;;  %v897_v63 = vmul.f32 %v896_v57, %v570_v31  ;;  %4401 = vrcp.f32 %v940_v38  ;;  %v778_v30 = vsel %vm664_vm4, nan, %v777_v9  ;;  %v904_v34 = vmul.f32 %v903_v50, %v569_v58 }
  0x83   :  { %v922_v61 = vsub.f32 %v5007_v29, %v4938_v28  ;;  %v5105_v5 = vsub.f32 %v5049_v8, %v5076_v33  ;;  %v910_v14 = vmul.f32 %v909_v18, %v570_v31  ;;  %v917_v6 = vmul.f32 %v916_v44, %v569_v58 }
  0x84   :  { %v5109_v13 = vsub.f32 %v5076_v33, %v5078_v4  ;;  %v5113_v49 = vsub.f32 %v5078_v4, %v5037_v11  ;;  %v5116_v59 = vrot.slane %v674_v51, %v4683_v36  ;;  %v929_v57 = vsub.f32 %v5041_v47, %v4940_v35 }
  0x85   :  { %v935_v17 = vsub.f32 %v5045_v10, %v4938_v28  ;;  %vm1001_vm9 = vcmp.eq.f32.partialorder %v5105_v5, 0.0  ;;  %v5124_v50 = vrot.slane %v778_v30, %v4683_v36  ;;  %vm944_vm10 = vcmp.lt.f32.partialorder %v5037_v11, 0.0 }
  0x86   :  { %v1002_v9 = vsel %vm1001_vm9, 1.0, %v5105_v5  ;;  %vm1058_vm11 = vcmp.eq.f32.partialorder %v5109_v13, 0.0  ;;  %v923_v18 = vmul.f32 %v922_v61, %v570_v31  ;;  %vm7727_vm12 = vcmask 396288   ;;  %vm945_vm14 = vmand %vm939_vm8, %vm944_vm10 }
  0x87   :  { %4403 = vrcp.f32 %v1002_v9  ;;  %v1059_v44 = vsel %vm1058_vm11, 1.0, %v5109_v13  ;;  %vm1115_vm13 = vcmp.eq.f32.partialorder %v5113_v49, 0.0  ;;  %v5135_v38 = vsub.f32 %v891_v19, %v897_v63 }
  0x88   :  { %v5137_v51 = vsub.f32 %v904_v34, %v910_v14  ;;  %4405 = vrcp.f32 %v1059_v44  ;;  %v5140_v30 = vsub.f32 %v4953_v41, %v1387_v52  ;;  %v930_v39 = vmul.f32 %v929_v57, %v569_v58 }
  0x89   :  { %v936_v42 = vmul.f32 %v935_v17, %v570_v31  ;;  %v968_v61 = vrot.slane %v4938_v28, 7  ;;  %v1116_v9 = vsel %vm1115_vm13, 1.0, %v5113_v49  ;;  %v5150_v19 = vmul.f32 %v5116_v59, %v4864_v27 }
  0x8a   :  { %7791 = vst [vmem:[#allocation35_spill] sm:$0xff] %v5140_v30  ;;  %v5154_v63 = vmul.f32 %v5124_v50, %v4868_v26  ;;  %v972_v58 = vrot.slane %v4940_v35, 7  ;;  %vm1006_vm15 = vcmp.lt.f32.partialorder %v5049_v8, 0.0  ;;  %v5160_v31 = vmul.f32 %v5124_v50, %v4864_v27 }
  0x8b   :  { %v5164_v52 = vmul.f32 %v5116_v59, %v4868_v26  ;;  %v5166_v34 = vsub.f32 %v917_v6, %v923_v18  ;;  %vm1063_vm0 = vcmp.lt.f32.partialorder %v5076_v33, 0.0  ;;  %vm943_vm1 = vcmp.lt.f32.partialorder %v5061_v12, 0.0  ;;  %vm1007_vm3 = vmand %vm1001_vm9, %vm1006_vm15 }
  0x8c   :  { %v4402_v14 = vpop.eup %4401  ;;  %v7694_v57 = vmov 0.0   ;;  %vm948_vm2 = vcmp.gt.f32.partialorder %v5061_v12, 0.0  ;;  %4407 = vrcp.f32 %v1116_v9  ;;  %v5172_v44 = vsub.f32 %v930_v39, %v936_v42  ;;  %vm1064_vm7 = vmand %vm1058_vm11, %vm1063_vm0 }
  0x8d   :  { %v946_v17 = vsel %vm945_vm14, 2.0, %v7694_v57  ;;  %v942_v27 = vmul.f32 %v4402_v14, %v5037_v11  ;;  %vm1120_vm4 = vcmp.lt.f32.partialorder %v5078_v4, 0.0  ;;  %v5180_v26 = vsub.f32 %v5135_v38, %v5137_v51 }
  0x8e   :  { %v5183_v6 = vsub.f32 %v4938_v28, %v968_v61  ;;  %v5186_v18 = vsub.f32 %v4940_v35, %v972_v58  ;;  %vm1005_vm5 = vcmp.lt.f32.partialorder %v5105_v5, 0.0  ;;  %vm1010_vm6 = vcmp.gt.f32.partialorder %v5105_v5, 0.0  ;;  %vm5203_vm10 = vmand %vm1115_vm13, %vm1120_vm4 }
  0x8f   :  { %v947_v39 = vsel %vm943_vm1, %v942_v27, %v946_v17  ;;  %v949_v42 = vsel %vm948_vm2, %v942_v27, 1.0  ;;  %vm1062_vm8 = vcmp.lt.f32.partialorder %v5109_v13, 0.0  ;;  %vm1067_vm9 = vcmp.gt.f32.partialorder %v5109_v13, 0.0 }
  0x90   :  { %v951_v11 = vsel %vm7727_vm12, %v947_v39, -inf  ;;  %v959_v61 = vsel %vm7727_vm12, %v949_v42, inf  ;;  %v1008_v9 = vsel %vm1007_vm3, 2.0, %v7694_v57  ;;  %v1142_v12 = vrot.slane %v4938_v28, 3 }
  0x91   :  { %v4404_v14 = vpop.eup %4403  ;;  %v952_v17 = vrot.slane %v951_v11, 4  ;;  %v960_v27 = vrot.slane %v959_v61, 4  ;;  %v1065_v1 = vsel %vm1064_vm7, 2.0, %v7694_v57  ;;  %vm1182_vm11 = vcmp.eq.f32.partialorder %v5180_v26, 0.0 }
  0x92   :  { %v4406_v39 = vpop.eup %4405  ;;  %v1004_v42 = vmul.f32 %v4404_v14, %v5049_v8  ;;  %v1145_v22 = vrot.slane %v4940_v35, 3  ;;  %vm1187_vm14 = vcmp.lt.f32.partialorder %v5135_v38, 0.0  ;;  %v5215_v32 = vsub.f32 %v5137_v51, %v5166_v34 }
  0x93   :  { %v953_v3 = vmax.f32 %v951_v11, %v952_v17  ;;  %v961_v10 = vmin.f32 %v959_v61, %v960_v27  ;;  %v1061_v47 = vmul.f32 %v4406_v39, %v5076_v33  ;;  %vm1119_vm13 = vcmp.lt.f32.partialorder %v5113_v49, 0.0  ;;  %vm1188_vm2 = vmand %vm1182_vm11, %vm1187_vm14 }
  0x94   :  { %v1122_v20 = vsel %vm5203_vm10, 2.0, %v7694_v57  ;;  %v1009_v8 = vsel %vm1005_vm5, %v1004_v42, %v1008_v9  ;;  %v1011_v14 = vsel %vm1010_vm6, %v1004_v42, 1.0  ;;  %v5227_v29 = vsub.f32 %v4938_v28, %v1142_v12 }
  0x95   :  { %v1183_v11 = vsel %vm1182_vm11, 1.0, %v5180_v26  ;;  %v954_v33 = vrot.slane %v953_v3, 2  ;;  %v962_v61 = vrot.slane %v961_v10, 2  ;;  %v1012_v17 = vsel %vm7727_vm12, %v1009_v8, -inf }
  0x96   :  { %v1020_v58 = vsel %vm7727_vm12, %v1011_v14, inf  ;;  %vm1124_vm15 = vcmp.gt.f32.partialorder %v5113_v49, 0.0  ;;  %v4408_v27 = vpop.eup %4407  ;;  %v1013_v9 = vrot.slane %v1012_v17, 4  ;;  %v1066_v5 = vsel %vm1062_vm8, %v1061_v47, %v1065_v1 }
  0x97   :  { %v1021_v39 = vrot.slane %v1020_v58, 4  ;;  %v1068_v12 = vsel %vm1067_vm9, %v1061_v47, 1.0  ;;  %v955_v42 = vmax.f32 %v953_v3, %v954_v33  ;;  %v963_v57 = vmin.f32 %v961_v10, %v962_v61 }
  0x98   :  { %v1069_v7 = vsel %vm7727_vm12, %v1066_v5, -inf  ;;  %v1077_v56 = vsel %vm7727_vm12, %v1068_v12, inf  ;;  %v1014_v8 = vmax.f32 %v1012_v17, %v1013_v9  ;;  %v1118_v30 = vmul.f32 %v4408_v27, %v5078_v4 }
  0x99   :  { %v1022_v48 = vmin.f32 %v1020_v58, %v1021_v39  ;;  %v1070_v14 = vrot.slane %v1069_v7, 4  ;;  %v1078_v37 = vrot.slane %v1077_v56, 4  ;;  %v956_v46 = vrot.slane %v955_v42, 1 }
  0x9a   :  { %v964_v23 = vrot.slane %v963_v57, 1  ;;  %vm1243_vm0 = vcmp.eq.f32.partialorder %v5215_v32, 0.0  ;;  %v1015_v1 = vrot.slane %v1014_v8, 2  ;;  %vm1248_vm1 = vcmp.lt.f32.partialorder %v5137_v51, 0.0 }
  0x9b   :  { %v1023_v53 = vrot.slane %v1022_v48, 2  ;;  %v1071_v13 = vmax.f32 %v1069_v7, %v1070_v14  ;;  %v1079_v47 = vmin.f32 %v1077_v56, %v1078_v37  ;;  %v957_v3 = vmax.f32 %v955_v42, %v956_v46  ;;  %vm1249_vm6 = vmand %vm1243_vm0, %vm1248_vm1 }
  0x9c   :  { %v965_v10 = vmin.f32 %v963_v57, %v964_v23  ;;  %v5245_v33 = vsub.f32 %v4940_v35, %v1145_v22  ;;  %v5249_v61 = vsub.f32 %v5166_v34, %v5172_v44  ;;  %v1016_v17 = vmax.f32 %v1014_v8, %v1015_v1 }
  0x9d   :  { %v1024_v58 = vmin.f32 %v1022_v48, %v1023_v53  ;;  %v1072_v4 = vrot.slane %v1071_v13, 2  ;;  %v1080_v27 = vrot.slane %v1079_v47, 2  ;;  %v5255_v37 = vmax.f32 %v957_v3, 0.0 }
  0x9e   :  { %v5257_v46 = vmin.f32 %v965_v10, 1.0  ;;  %4409 = vrcp.f32 %v1183_v11  ;;  %v1244_v22 = vsel %vm1243_vm0, 1.0, %v5215_v32  ;;  %v1017_v23 = vrot.slane %v1016_v17, 1 }
  0x9f   :  { %v1025_v56 = vrot.slane %v1024_v58, 1  ;;  %v1073_v7 = vmax.f32 %v1071_v13, %v1072_v4  ;;  %v1123_v48 = vsel %vm1119_vm13, %v1118_v30, %v1122_v20  ;;  %v975_v53 = vmul.f32 %v5183_v6, %v5255_v37 }
  0xa0   :  { %v990_v57 = vmul.f32 %v5186_v18, %v5257_v46  ;;  %v1081_v9 = vmin.f32 %v1079_v47, %v1080_v27  ;;  %v7794_v39 = vmov 0.0   ;;  %v1018_v11 = vmax.f32 %v1016_v17, %v1017_v23 }
  0xa1   :  { %v5269_v5 = vsel %vm1188_vm2, 2.0, %v7794_v39  ;;  %v1026_v12 = vmin.f32 %v1024_v58, %v1025_v56  ;;  %v1074_v42 = vrot.slane %v1073_v7, 1  ;;  %v1125_v8 = vsel %vm1124_vm15, %v1118_v30, 1.0 }
  0xa2   :  { %v980_v14 = vmul.f32 %v5186_v18, %v5255_v37  ;;  %v1126_v20 = vsel %vm7727_vm12, %v1123_v48, -inf  ;;  %4411 = vrcp.f32 %v1244_v22  ;;  %vm1300_vm3 = vcmp.eq.f32.partialorder %v5249_v61, 0.0 }
  0xa3   :  { %v985_v1 = vmul.f32 %v5183_v6, %v5257_v46  ;;  %v5279_v13 = vmax.f32 %v1018_v11, 0.0  ;;  %v5281_v47 = vmin.f32 %v1026_v12, 1.0  ;;  %v1075_v3 = vmax.f32 %v1073_v7, %v1074_v42 }
  0xa4   :  { %v977_v10 = vrot.slane %v975_v53, 1  ;;  %v992_v17 = vrot.slane %v990_v57, 1  ;;  %v1082_v49 = vrot.slane %v1081_v9, 1  ;;  %v1134_v30 = vsel %vm7727_vm12, %v1125_v8, inf }
  0xa5   :  { %v1028_v58 = vmul.f32 %v5279_v13, %v5183_v6  ;;  %v1033_v4 = vmul.f32 %v5279_v13, %v5186_v18  ;;  %v1038_v27 = vmul.f32 %v5281_v47, %v5183_v6  ;;  %v1043_v22 = vmul.f32 %v5281_v47, %v5186_v18 }
  0xa6   :  { %vm1186_vm4 = vcmp.lt.f32.partialorder %v5180_v26, 0.0  ;;  %v982_v23 = vrot.slane %v980_v14, 1  ;;  %v5293_v56 = vmax.f32 %v1075_v3, 0.0  ;;  %vm1191_vm5 = vcmp.gt.f32.partialorder %v5180_v26, 0.0 }
  0xa7   :  { %v1301_v7 = vsel %vm1300_vm3, 1.0, %v5249_v61  ;;  %vm1305_vm7 = vcmp.lt.f32.partialorder %v5166_v34, 0.0  ;;  %v987_v48 = vrot.slane %v985_v1, 1  ;;  %v1030_v53 = vrot.slane %v1028_v58, 1 }
  0xa8   :  { %v1127_v57 = vrot.slane %v1126_v20, 4  ;;  %v1135_v11 = vrot.slane %v1134_v30, 4  ;;  %v4410_v12 = vpop.eup %4409  ;;  %v1035_v42 = vrot.slane %v1033_v4, 1  ;;  %v1040_v8 = vrot.slane %v1038_v27, 1  ;;  %vm1306_vm10 = vmand %vm1300_vm3, %vm1305_vm7 }
  0xa9   :  { %v1045_v14 = vrot.slane %v1043_v22, 1  ;;  %v1083_v3 = vmin.f32 %v1081_v9, %v1082_v49  ;;  %vm1247_vm8 = vcmp.lt.f32.partialorder %v5215_v32, 0.0  ;;  %v979_v45 = vadd.f32 %v977_v10, %v4938_v28 }
  0xaa   :  { %v994_v60 = vadd.f32 %v992_v17, %v4940_v35  ;;  %v1250_v43 = vsel %vm1249_vm6, 2.0, %v7794_v39  ;;  %4413 = vrcp.f32 %v1301_v7  ;;  %v984_v36 = vadd.f32 %v982_v23, %v4940_v35 }
  0xab   :  { %v5309_v1 = vmin.f32 %v1083_v3, 1.0  ;;  %v1085_v58 = vmul.f32 %v5293_v56, %v5183_v6  ;;  %vm1252_vm9 = vcmp.gt.f32.partialorder %v5215_v32, 0.0  ;;  %v5320_v9 = vsub.f32 %v5172_v44, %v5135_v38 }
  0xac   :  { %v989_v10 = vadd.f32 %v987_v48, %v4938_v28  ;;  %v1090_v17 = vmul.f32 %v5293_v56, %v5186_v18  ;;  %v1128_v49 = vmax.f32 %v1126_v20, %v1127_v57  ;;  %v1136_v4 = vmin.f32 %v1134_v30, %v1135_v11  ;;  %v4412_v27 = vpop.eup %4411 }
  0xad   :  { %v1032_v22 = vadd.f32 %v1030_v53, %v4938_v28  ;;  %v1037_v23 = vadd.f32 %v1035_v42, %v4940_v35  ;;  %v1042_v7 = vadd.f32 %v1040_v8, %v4938_v28  ;;  %v1047_v3 = vadd.f32 %v1045_v14, %v4940_v35 }
  0xae   :  { %v5329_v25 = vmul.f32 %v994_v60, %v979_v45  ;;  %v1129_v24 = vrot.slane %v1128_v49, 2  ;;  %v1137_v40 = vrot.slane %v1136_v4, 2  ;;  %v5332_v48 = vsel %vm1306_vm10, 2.0, %v7794_v39 }
  0xaf   :  { %v1087_v41 = vrot.slane %v1085_v58, 1  ;;  %v1095_v20 = vmul.f32 %v5309_v1, %v5183_v6  ;;  %v1100_v30 = vmul.f32 %v5309_v1, %v5186_v18  ;;  %v1185_v53 = vmul.f32 %v4410_v12, %v5135_v38 }
  0xb0   :  { %v5339_v57 = vmul.f32 %v989_v10, %v984_v36  ;;  %v1130_v11 = vmax.f32 %v1128_v49, %v1129_v24  ;;  %v1138_v42 = vmin.f32 %v1136_v4, %v1137_v40  ;;  %v1246_v60 = vmul.f32 %v4412_v27, %v5137_v51 }
  0xb1   :  { %vm1048_vm11 = vcmp.lt.f32.partialorder %v5279_v13, %v5281_v47  ;;  %v1049_v45 = vmul.f32 %v1047_v3, %v1032_v22  ;;  %v1050_v8 = vmul.f32 %v1042_v7, %v1037_v23  ;;  %v1092_v14 = vrot.slane %v1090_v17, 1 }
  0xb2   :  { %v1190_v6 = vsel %vm1186_vm4, %v1185_v53, %v5269_v5  ;;  %v1131_v58 = vrot.slane %v1130_v11, 1  ;;  %v1139_v18 = vrot.slane %v1138_v42, 1  ;;  %v1192_v36 = vsel %vm1191_vm5, %v1185_v53, 1.0 }
  0xb3   :  { %v1193_v24 = vsel %vm7727_vm12, %v1190_v6, -inf  ;;  %v1089_v40 = vadd.f32 %v1087_v41, %v4938_v28  ;;  %v1097_v38 = vrot.slane %v1095_v20, 1  ;;  %v1102_v51 = vrot.slane %v1100_v30, 1 }
  0xb4   :  { %v1194_v12 = vrot.slane %v1193_v24, 4  ;;  %vm1304_vm14 = vcmp.lt.f32.partialorder %v5249_v61, 0.0  ;;  %vm1309_vm13 = vcmp.gt.f32.partialorder %v5249_v61, 0.0  ;;  %v4414_v10 = vpop.eup %4413  ;;  %v1132_v17 = vmax.f32 %v1130_v11, %v1131_v58 }
  0xb5   :  { %v1140_v49 = vmin.f32 %v1138_v42, %v1139_v18  ;;  %v1201_v5 = vsel %vm7727_vm12, %v1192_v36, inf  ;;  %v1251_v26 = vsel %vm1247_vm8, %v1246_v60, %v1250_v43  ;;  %v1051_v4 = vsub.f32 %v1049_v45, %v1050_v8 }
  0xb6   :  { %v1094_v27 = vadd.f32 %v1092_v14, %v4940_v35  ;;  %v1195_v22 = vmax.f32 %v1193_v24, %v1194_v12  ;;  %v1202_v41 = vrot.slane %v1201_v5, 4  ;;  %v5357_v23 = vmax.f32 %v1132_v17, 0.0 }
  0xb7   :  { %v5359_v7 = vmin.f32 %v1140_v49, 1.0  ;;  %v1253_v3 = vsel %vm1252_vm9, %v1246_v60, 1.0  ;;  %v1254_v20 = vsel %vm7727_vm12, %v1251_v26, -inf  ;;  %v1099_v30 = vadd.f32 %v1097_v38, %v4938_v28 }
  0xb8   :  { %v1196_v53 = vrot.slane %v1195_v22, 2  ;;  %v1203_v11 = vmin.f32 %v1201_v5, %v1202_v41  ;;  %v1255_v42 = vrot.slane %v1254_v20, 4  ;;  %v1104_v43 = vadd.f32 %v1102_v51, %v4940_v35 }
  0xb9   :  { %v1148_v45 = vmul.f32 %v5227_v29, %v5357_v23  ;;  %v1153_v8 = vmul.f32 %v5245_v33, %v5357_v23  ;;  %v1158_v14 = vmul.f32 %v5227_v29, %v5359_v7  ;;  %v1163_v32 = vmul.f32 %v5245_v33, %v5359_v7 }
  0xba   :  { %v1197_v60 = vmax.f32 %v1195_v22, %v1196_v53  ;;  %v1204_v6 = vrot.slane %v1203_v11, 2  ;;  %v1262_v58 = vsel %vm7727_vm12, %v1253_v3, inf  ;;  %vm995_vm15 = vcmp.lt.f32.partialorder %v5255_v37, %v5257_v46 }
  0xbb   :  { %v1150_v18 = vrot.slane %v1148_v45, 5  ;;  %v1155_v36 = vrot.slane %v1153_v8, 5  ;;  %v1303_v24 = vmul.f32 %v4414_v10, %v5166_v34  ;;  %v1160_v38 = vrot.slane %v1158_v14, 5 }
  0xbc   :  { %v1165_v51 = vrot.slane %v1163_v32, 5  ;;  %v1205_v12 = vmin.f32 %v1203_v11, %v1204_v6  ;;  %v1256_v17 = vmax.f32 %v1254_v20, %v1255_v42  ;;  %v998_v29 = vsub.f32 %v5329_v25, %v5339_v57 }
  0xbd   :  { %v1052_v33 = vsel %vm1048_vm11, %v1051_v4, 0.0  ;;  %v1198_v49 = vrot.slane %v1197_v60, 1  ;;  %v1263_v5 = vrot.slane %v1262_v58, 4  ;;  %v1106_v26 = vmul.f32 %v1104_v43, %v1089_v40 }
  0xbe   :  { %v1107_v22 = vmul.f32 %v1099_v30, %v1094_v27  ;;  %v1152_v41 = vadd.f32 %v1150_v18, %v4938_v28  ;;  %v1257_v3 = vrot.slane %v1256_v17, 2  ;;  %v1206_v53 = vrot.slane %v1205_v12, 1 }
  0xbf   :  { %v1264_v34 = vmin.f32 %v1262_v58, %v1263_v5  ;;  %v1308_v10 = vsel %vm1304_vm14, %v1303_v24, %v5332_v48  ;;  %v1310_v25 = vsel %vm1309_vm13, %v1303_v24, 1.0  ;;  %v1157_v57 = vadd.f32 %v1155_v36, %v4940_v35 }
  0xc0   :  { %v1162_v13 = vadd.f32 %v1160_v38, %v4938_v28  ;;  %v1167_v47 = vadd.f32 %v1165_v51, %v4940_v35  ;;  %v1258_v40 = vmax.f32 %v1256_v17, %v1257_v3  ;;  %v1199_v4 = vmax.f32 %v1197_v60, %v1198_v49 }
  0xc1   :  { %v1265_v27 = vrot.slane %v1264_v34, 2  ;;  %v1311_v20 = vsel %vm7727_vm12, %v1308_v10, -inf  ;;  %v1319_v30 = vsel %vm7727_vm12, %v1310_v25, inf  ;;  %v1054_v11 = vrot.slane %v1052_v33, 1 }
  0xc2   :  { %vm1105_vm0 = vcmp.lt.f32.partialorder %v5293_v56, %v5309_v1  ;;  %v1108_v48 = vsub.f32 %v1106_v26, %v1107_v22  ;;  %vm1357_vm1 = vcmp.eq.f32.partialorder %v5320_v9, 0.0  ;;  %v1207_v61 = vmin.f32 %v1205_v12, %v1206_v53 }
  0xc3   :  { %v1259_v42 = vrot.slane %v1258_v40, 1  ;;  %v1266_v43 = vmin.f32 %v1264_v34, %v1265_v27  ;;  %v1312_v28 = vrot.slane %v1311_v20, 4  ;;  %v5399_v35 = vmul.f32 %v4944_v54, %v5116_v59 }
  0xc4   :  { %v999_v45 = vsel %vm995_vm15, %v998_v29, 0.0  ;;  %v1170_v8 = vmul.f32 %v1162_v13, %v1157_v57  ;;  %v1320_v14 = vrot.slane %v1319_v30, 4  ;;  %v1169_v32 = vmul.f32 %v1167_v47, %v1152_v41 }
  0xc5   :  { %v5404_v60 = vmax.f32 %v1199_v4, 0.0  ;;  %v1260_v6 = vmax.f32 %v1258_v40, %v1259_v42  ;;  %v1358_v58 = vsel %vm1357_vm1, 1.0, %v5320_v9  ;;  %v798_v18 = vadd.f32 %v4883_v16, %v5150_v19 }
  0xc6   :  { %v5413_v36 = vmul.f32 %v4959_v0, %v5124_v50  ;;  %v1109_v37 = vsel %vm1105_vm0, %v1108_v48, 0.0  ;;  %v1267_v46 = vrot.slane %v1266_v43, 1  ;;  %v810_v24 = vsub.f32 %v4936_v21, %v5160_v31 }
  0xc7   :  { %v1056_v38 = vadd.f32 %v1054_v11, %v999_v45  ;;  %v5420_v51 = vmin.f32 %v1207_v61, 1.0  ;;  %v1313_v12 = vmax.f32 %v1311_v20, %v1312_v28  ;;  %v5422_v17 = vmax.f32 %v1260_v6, 0.0  ;;  %v7799_v6 = vld [vmem:[#allocation22_spill] sm:$0xff] }
  0xc8   :  { %v1268_v29 = vmin.f32 %v1266_v43, %v1267_v46  ;;  %v1321_v16 = vmin.f32 %v1319_v30, %v1320_v14  ;;  %4415 = vrcp.f32 %v1358_v58  ;;  %v1111_v19 = vrot.slane %v1109_v37, 2 }
  0xc9   :  { %vm1168_vm2 = vcmp.lt.f32.partialorder %v5357_v23, %v5359_v7  ;;  %v1171_v33 = vsub.f32 %v1169_v32, %v1170_v8  ;;  %v1217_v56 = vmul.f32 %v5065_v15, %v5404_v60  ;;  %v1222_v21 = vmul.f32 %v5091_v55, %v5404_v60 }
  0xca   :  { %v5430_v31 = vmin.f32 %v1268_v29, 1.0  ;;  %v1314_v1 = vrot.slane %v1313_v12, 2  ;;  %v1322_v49 = vrot.slane %v1321_v16, 2  ;;  %v5433_v5 = vadd.f32 %v5154_v63, %v798_v18  ;;  %v7800_v18 = vld [vmem:[#allocation21_spill] sm:$0xff] }
  0xcb   :  { %v5437_v26 = vmul.f32 %v4959_v0, %v5116_v59  ;;  %v5441_v22 = vmul.f32 %v4944_v54, %v5124_v50  ;;  %v1227_v41 = vmul.f32 %v5065_v15, %v5420_v51  ;;  %v5446_v3 = vadd.f32 %v5164_v52, %v810_v24 }
  0xcc   :  { %v1232_v53 = vmul.f32 %v5091_v55, %v5420_v51  ;;  %v1270_v63 = vmul.f32 %v5422_v17, %v5065_v15  ;;  %v1315_v34 = vmax.f32 %v1313_v12, %v1314_v1  ;;  %v5452_v10 = vadd.f32 %v1111_v19, %v1056_v38 }
  0xcd   :  { %v5457_v54 = vsel %vm1168_vm2, %v1171_v33, 0.0  ;;  %v1275_v0 = vmul.f32 %v5422_v17, %v5091_v55  ;;  %v1323_v59 = vmin.f32 %v1321_v16, %v1322_v49  ;;  %v1219_v50 = vrot.slane %v1217_v56, 1 }
  0xce   :  { %v1224_v52 = vrot.slane %v1222_v21, 1  ;;  %v1280_v25 = vmul.f32 %v5430_v31, %v5065_v15  ;;  %v1316_v57 = vrot.slane %v1315_v34, 1  ;;  %v1229_v13 = vrot.slane %v1227_v41, 1 }
  0xcf   :  { %v1285_v47 = vmul.f32 %v5430_v31, %v5091_v55  ;;  %v1324_v40 = vrot.slane %v1323_v59, 1  ;;  %vm1362_vm3 = vcmp.lt.f32.partialorder %v5172_v44, 0.0  ;;  %v1234_v23 = vrot.slane %v1232_v53, 1 }
  0xd0   :  { %v1272_v7 = vrot.slane %v1270_v63, 1  ;;  %v1317_v4 = vmax.f32 %v1315_v34, %v1316_v57  ;;  %vm1363_vm4 = vmand %vm1357_vm1, %vm1362_vm3  ;;  %v7795_v27 = vand.u32 2147483647, %v4785_v2  ;;  %v1277_v30 = vrot.slane %v1275_v0, 1  ;;  %v7801_v57 = vld [vmem:[#allocation15_spill] sm:$0xff] }
  0xd1   :  { %v1325_v11 = vmin.f32 %v1323_v59, %v1324_v40  ;;  %vm1432_vm6 = vcmp.gt.f32.partialorder %v4782_v62, 0.0  ;;  %v1282_v42 = vrot.slane %v1280_v25, 1  ;;  %vm1361_vm7 = vcmp.lt.f32.partialorder %v5320_v9, 0.0 }
  0xd2   :  { %v5471_v20 = vadd.f32 %v7795_v27, %v4782_v62  ;;  %v7796_v48 = vmov %v7795_v27  ;;  %v4416_v61 = vpop.eup %4415  ;;  %v5476_v43 = vmax.f32 %v1317_v4, 0.0  ;;  %v1364_v28 = vsel %vm1363_vm4, 2.0, %v7794_v39 }
  0xd3   :  { %vm1431_vm5 = vcmp.gt.f32.partialorder %v7796_v48, 0.0  ;;  %v1287_v8 = vrot.slane %v1285_v47, 1  ;;  %v5486_v14 = vmin.f32 %v1325_v11, 1.0  ;;  %v1360_v2 = vmul.f32 %v4416_v61, %v5172_v44  ;;  %v7802_v11 = vld [vmem:[#allocation16_spill] sm:$0xff] }
  0xd4   :  { %vm5482_vm8 = vmand %vm1431_vm5, %vm1432_vm6  ;;  %vm1366_vm9 = vcmp.gt.f32.partialorder %v5320_v9, 0.0  ;;  %v1174_v32 = vrot.slane %v5457_v54, 3  ;;  %v1226_v58 = vadd.f32 %v1224_v52, %v7799_v6  ;;  %v1231_v37 = vadd.f32 %v1229_v13, %v7800_v18  ;;  %v7809_v54 = vld [vmem:[#allocation25_spill] sm:$0xff] }
  0xd5   :  { %v1327_v46 = vmul.f32 %v5476_v43, %v5065_v15  ;;  %v1332_v24 = vmul.f32 %v5476_v43, %v5091_v55  ;;  %v1337_v38 = vmul.f32 %v5486_v14, %v5065_v15  ;;  %v1342_v44 = vmul.f32 %v5486_v14, %v5091_v55 }
  0xd6   :  { %v1365_v12 = vsel %vm1361_vm7, %v1360_v2, %v1364_v28  ;;  %v1221_v9 = vadd.f32 %v1219_v50, %v7800_v18  ;;  %v1236_v29 = vadd.f32 %v1234_v23, %v7799_v6  ;;  %v1274_v16 = vadd.f32 %v1272_v7, %v7800_v18 }
  0xd7   :  { %v1367_v19 = vsel %vm1366_vm9, %v1360_v2, 1.0  ;;  %vm1237_vm10 = vcmp.lt.f32.partialorder %v5404_v60, %v5420_v51  ;;  %v1279_v33 = vadd.f32 %v1277_v30, %v7799_v6  ;;  %v1284_v56 = vadd.f32 %v1282_v42, %v7800_v18 }
  0xd8   :  { %v1289_v21 = vadd.f32 %v1287_v8, %v7799_v6  ;;  %v1368_v1 = vsel %vm7727_vm12, %v1365_v12, -inf  ;;  %v1329_v49 = vrot.slane %v1327_v46, 1  ;;  %v1344_v41 = vrot.slane %v1342_v44, 1  ;;  %v7803_v44 = vld [vmem:[#allocation7_spill] sm:$0xff] }
  0xd9   :  { %v1369_v53 = vrot.slane %v1368_v1, 4  ;;  %v1376_v63 = vsel %vm7727_vm12, %v1367_v19, inf  ;;  %v1239_v34 = vmul.f32 %v1231_v37, %v1226_v58  ;;  %v1334_v0 = vrot.slane %v1332_v24, 1 }
  0xda   :  { %v1339_v59 = vrot.slane %v1337_v38, 1  ;;  %v1377_v50 = vrot.slane %v1376_v63, 4  ;;  %v1238_v52 = vmul.f32 %v1236_v29, %v1221_v9  ;;  %v1440_v13 = vrot.slane %v5446_v3, %v7801_v57 }
  0xdb   :  { %v1370_v25 = vmax.f32 %v1368_v1, %v1369_v53  ;;  %v1446_v47 = vrot.slane %v5433_v5, %v7801_v57  ;;  %vm1290_vm11 = vcmp.lt.f32.partialorder %v5422_v17, %v5430_v31  ;;  %v1291_v40 = vmul.f32 %v1289_v21, %v1274_v16 }
  0xdc   :  { %v1292_v23 = vmul.f32 %v1284_v56, %v1279_v33  ;;  %v1378_v7 = vmin.f32 %v1376_v63, %v1377_v50  ;;  %v1331_v4 = vadd.f32 %v1329_v49, %v7800_v18  ;;  %v1346_v27 = vadd.f32 %v1344_v41, %v7799_v6  ;;  %v7804_v33 = vld [vmem:[#allocation10_spill] sm:$0xff] }
  0xdd   :  { %v1371_v30 = vrot.slane %v1370_v25, 2  ;;  %v1453_v48 = vrot.slane %v5446_v3, %v7802_v11  ;;  %v1336_v61 = vadd.f32 %v1334_v0, %v7799_v6  ;;  %v1341_v42 = vadd.f32 %v1339_v59, %v7800_v18  ;;  %v7806_v59 = vld [vmem:[#allocation24_spill] sm:$0xff] }
  0xde   :  { %v1379_v28 = vrot.slane %v1378_v7, 2  ;;  %v1459_v8 = vrot.slane %v5433_v5, %v7802_v11  ;;  %v1240_v2 = vsub.f32 %v1238_v52, %v1239_v34  ;;  %v1441_v37 = vsub.f32 %v1440_v13, %v7799_v6  ;;  %v7805_v34 = vld [vmem:[#allocation23_spill] sm:$0xff] }
  0xdf   :  { %v1372_v58 = vmax.f32 %v1370_v25, %v1371_v30  ;;  %v1447_v46 = vsub.f32 %v1446_v47, %v7800_v18  ;;  %v1293_v24 = vsub.f32 %v1291_v40, %v1292_v23  ;;  %v1466_v12 = vrot.slane %v5446_v3, %v7803_v44 }
  0xe0   :  { %v1380_v38 = vmin.f32 %v1378_v7, %v1379_v28  ;;  %v1472_v9 = vrot.slane %v5433_v5, %v7803_v44  ;;  %v1348_v29 = vmul.f32 %v1346_v27, %v1331_v4  ;;  %v1454_v19 = vsub.f32 %v1453_v48, %v7799_v6  ;;  %v7807_v27 = vld [vmem:[#allocation34_spill] sm:$0xff]  ;;  %v7808_v48 = vld [vmem:[#allocation35_spill] sm:$0xff] }
  0xe1   :  { %v1373_v16 = vrot.slane %v1372_v58, 1  ;;  %v1479_v56 = vrot.slane %v5446_v3, %v7804_v33  ;;  %v1349_v21 = vmul.f32 %v1341_v42, %v1336_v61  ;;  %v1460_v49 = vsub.f32 %v1459_v8, %v7800_v18 }
  0xe2   :  { %v1381_v1 = vrot.slane %v1380_v38, 1  ;;  %v1485_v41 = vrot.slane %v5433_v5, %v7804_v33  ;;  %v1241_v53 = vsel %vm1237_vm10, %v1240_v2, 0.0  ;;  %v1442_v0 = vmul.f32 %v1441_v37, %v7805_v34 }
  0xe3   :  { %v1374_v63 = vmax.f32 %v1372_v58, %v1373_v16  ;;  %v1448_v50 = vmul.f32 %v1447_v46, %v7806_v59  ;;  %v1294_v52 = vsel %vm1290_vm11, %v1293_v24, 0.0  ;;  %v1467_v13 = vsub.f32 %v1466_v12, %v7799_v6 }
  0xe4   :  { %v1382_v25 = vmin.f32 %v1380_v38, %v1381_v1  ;;  %v1473_v47 = vsub.f32 %v1472_v9, %v7800_v18  ;;  %vm1347_vm14 = vcmp.lt.f32.partialorder %v5476_v43, %v5486_v14  ;;  %v1480_v60 = vsub.f32 %v1479_v56, %v7799_v6 }
  0xe5   :  { %v1375_v40 = vmax.f32 %v1374_v63, 0.0  ;;  %v1486_v51 = vsub.f32 %v1485_v41, %v7800_v18  ;;  %v1350_v23 = vsub.f32 %v1348_v29, %v1349_v21  ;;  %v1455_v4 = vmul.f32 %v1454_v19, %v7805_v34 }
  0xe6   :  { %v1383_v7 = vmin.f32 %v1382_v25, 1.0  ;;  %v1461_v17 = vmul.f32 %v1460_v49, %v7806_v59  ;;  %v1296_v31 = vrot.slane %v1294_v52, 1  ;;  %v5555_v42 = vsub.f32 %v1442_v0, %v1448_v50  ;;  %v7810_v52 = vld [vmem:[#allocation26_spill] sm:$0xff] }
  0xe7   :  { %v1390_v30 = vmul.f32 %v7807_v27, %v1375_v40  ;;  %v1395_v61 = vmul.f32 %v7808_v48, %v1375_v40  ;;  %v1468_v2 = vmul.f32 %v1467_v13, %v7805_v34  ;;  %v1474_v58 = vmul.f32 %v1473_v47, %v7806_v59 }
  0xe8   :  { %v1400_v28 = vmul.f32 %v7807_v27, %v1383_v7  ;;  %v1405_v8 = vmul.f32 %v7808_v48, %v1383_v7  ;;  %v1481_v24 = vmul.f32 %v1480_v60, %v7805_v34  ;;  %v1487_v38 = vmul.f32 %v1486_v51, %v7806_v59  ;;  %v7811_v60 = vld [vmem:[#allocation27_spill] sm:$0xff] }
  0xe9   :  { %v1392_v37 = vrot.slane %v1390_v30, 5  ;;  %v1397_v46 = vrot.slane %v1395_v61, 5  ;;  %v1351_v12 = vsel %vm1347_vm14, %v1350_v23, 0.0  ;;  %v5566_v16 = vsub.f32 %v1455_v4, %v1461_v17  ;;  %v7812_v23 = vld [vmem:[#allocation28_spill] sm:$0xff]  ;;  %v7813_v4 = vld [vmem:[#allocation29_spill] sm:$0xff]  ;;  %v7814_v30 = vld [vmem:[#allocation30_spill] sm:$0xff] }
  0xea   :  { %v1402_v9 = vrot.slane %v1400_v28, 5  ;;  %v1407_v29 = vrot.slane %v1405_v8, 5  ;;  %v817_v19 = vadd.f32 %v5413_v36, %v5399_v35  ;;  %v820_v56 = vsub.f32 %v5437_v26, %v5441_v22  ;;  %v7815_v8 = vld [vmem:[#allocation31_spill] sm:$0xff] }
  0xeb   :  { %v1394_v21 = vadd.f32 %v1392_v37, %v7800_v18  ;;  %v1399_v1 = vadd.f32 %v1397_v46, %v7799_v6  ;;  %v1176_v49 = vadd.f32 %v1174_v32, %v5452_v10  ;;  %v5581_v41 = vsub.f32 %v5555_v42, %v5566_v16 }
  0xec   :  { %v1404_v43 = vadd.f32 %v1402_v9, %v7800_v18  ;;  %v1409_v14 = vadd.f32 %v1407_v29, %v7799_v6  ;;  %v1298_v35 = vadd.f32 %v1296_v31, %v1241_v53  ;;  %v1353_v36 = vrot.slane %v1351_v12, 2 }
  0xed   :  { %v5583_v63 = vsub.f32 %v1468_v2, %v1474_v58  ;;  %v5585_v26 = vsub.f32 %v1481_v24, %v1487_v38  ;;  %vm1510_vm13 = vcmp.eq.f32.partialorder %v5581_v41, 0.0  ;;  %v832_v10 = vmul.f32 %v7809_v54, %v817_v19  ;;  %v7816_v24 = vld [vmem:[#allocation18_spill] sm:$0xff] }
  0xee   :  { %v1411_v22 = vmul.f32 %v1409_v14, %v1394_v21  ;;  %v1412_v34 = vmul.f32 %v1404_v43, %v1399_v1  ;;  %vm1410_vm15 = vcmp.lt.f32.partialorder %v1375_v40, %v1383_v7  ;;  %v1511_v32 = vsel %vm1510_vm13, 1.0, %v5581_v41  ;;  %v7818_v14 = vld [vmem:[#allocation33_spill] sm:$0xff] }
  0xef   :  { %v833_v0 = vmul.f32 %v7809_v54, %v820_v56  ;;  %v1178_v59 = vrot.slane %v1176_v49, 6  ;;  %4417 = vrcp.f32 %v1511_v32  ;;  %v1355_v50 = vadd.f32 %v1353_v36, %v1298_v35  ;;  %v7817_v49 = vld [vmem:[#allocation32_spill] sm:$0xff]  ;;  %v7819_v36 = vld [vmem:[#allocation17_spill] sm:$0xff] }
  0xf0   :  { %v1413_v53 = vsub.f32 %v1411_v22, %v1412_v34  ;;  %v1489_v25 = vsub.f32 %v7810_v52, %v5446_v3  ;;  %v5597_v13 = vsub.f32 %v5566_v16, %v5583_v63  ;;  %v5601_v47 = vsub.f32 %v5583_v63, %v5585_v26 }
  0xf1   :  { %v1491_v51 = vsub.f32 %v7811_v60, %v5433_v5  ;;  %v1494_v7 = vsub.f32 %v7812_v23, %v5446_v3  ;;  %v1496_v17 = vsub.f32 %v7813_v4, %v5433_v5  ;;  %v1499_v61 = vsub.f32 %v7814_v30, %v5446_v3 }
  0xf2   :  { %v1414_v40 = vsel %vm1410_vm15, %v1413_v53, 0.0  ;;  %vm1571_vm0 = vcmp.eq.f32.partialorder %v5597_v13, 0.0  ;;  %v5614_v28 = vsub.f32 %v5585_v26, %v5555_v42  ;;  %v1501_v2 = vsub.f32 %v7815_v8, %v5433_v5 }
  0xf3   :  { %v1416_v31 = vrot.slane %v1414_v40, 3  ;;  %vm1515_vm1 = vcmp.lt.f32.partialorder %v5555_v42, 0.0  ;;  %v1572_v58 = vsel %vm1571_vm0, 1.0, %v5597_v13  ;;  %vm1628_vm2 = vcmp.eq.f32.partialorder %v5601_v47, 0.0 }
  0xf4   :  { %4419 = vrcp.f32 %v1572_v58  ;;  %v1629_v46 = vsel %vm1628_vm2, 1.0, %v5601_v47  ;;  %v1180_v38 = vmul.f32 %v1178_v59, %v7816_v24  ;;  %v1490_v12 = vmul.f32 %v1489_v25, %v832_v10  ;;  %vm1516_vm3 = vmand %vm1510_vm13, %vm1515_vm1 }
  0xf5   :  { %v1418_v37 = vadd.f32 %v1416_v31, %v1355_v50  ;;  %v1492_v9 = vmul.f32 %v1491_v51, %v833_v0  ;;  %4421 = vrcp.f32 %v1629_v46  ;;  %v1495_v19 = vmul.f32 %v1494_v7, %v832_v10 }
  0xf6   :  { %v1497_v56 = vmul.f32 %v1496_v17, %v833_v0  ;;  %vm1685_vm4 = vcmp.eq.f32.partialorder %v5614_v28, 0.0  ;;  %v1500_v21 = vmul.f32 %v1499_v61, %v832_v10  ;;  %v1502_v1 = vmul.f32 %v1501_v2, %v833_v0 }
  0xf7   :  { %v1420_v29 = vrot.slane %v1418_v37, 6  ;;  %v1504_v43 = vsub.f32 %v7817_v49, %v5446_v3  ;;  %v1506_v35 = vsub.f32 %v7818_v14, %v5433_v5  ;;  %vm1514_vm5 = vcmp.lt.f32.partialorder %v5581_v41, 0.0 }
  0xf8   :  { %vm1576_vm7 = vcmp.lt.f32.partialorder %v5566_v16, 0.0  ;;  %v1517_v54 = vsel %vm1516_vm3, 2.0, %v7794_v39  ;;  %vm1519_vm9 = vcmp.gt.f32.partialorder %v5581_v41, 0.0  ;;  %vm1633_vm10 = vcmp.lt.f32.partialorder %v5583_v63, 0.0 }
  0xf9   :  { %v1422_v22 = vmul.f32 %v1420_v29, %v7819_v36  ;;  %v4418_v34 = vpop.eup %4417  ;;  %v1686_v32 = vsel %vm1685_vm4, 1.0, %v5614_v28  ;;  %v5643_v53 = vsub.f32 %v1490_v12, %v1492_v9  ;;  %v5646_v52 = vsub.f32 %v1495_v19, %v1497_v56  ;;  %vm1577_vm11 = vmand %vm1571_vm0, %vm1576_vm7 }
  0xfa   :  { %v1513_v50 = vmul.f32 %v4418_v34, %v5555_v42  ;;  %v5648_v25 = vsub.f32 %v1500_v21, %v1502_v1  ;;  %v5650_v40 = vmul.f32 %v1504_v43, %v832_v10  ;;  %v5652_v60 = vmul.f32 %v1506_v35, %v833_v0  ;;  %vm1634_vm14 = vmand %vm1628_vm2, %vm1633_vm10 }
  0xfb   :  { %v1423_v59 = vadd.f32 %v1422_v22, %v1180_v38  ;;  %4423 = vrcp.f32 %v1686_v32  ;;  %vm1575_vm13 = vcmp.lt.f32.partialorder %v5597_v13, 0.0  ;;  %vm1580_vm15 = vcmp.gt.f32.partialorder %v5597_v13, 0.0 }
  0xfc   :  { %v1518_v23 = vsel %vm1514_vm5, %v1513_v50, %v1517_v54  ;;  %v1520_v7 = vsel %vm1519_vm9, %v1513_v50, 1.0  ;;  %v1578_v41 = vsel %vm1577_vm11, 2.0, %v7794_v39  ;;  %vm1632_vm0 = vcmp.lt.f32.partialorder %v5601_v47, 0.0 }
  0xfd   :  { %v5656_v51 = vmul.f32 0.5, %v1423_v59  ;;  %v1521_v42 = vsel %vm7727_vm12, %v1518_v23, -inf  ;;  %v1529_v10 = vsel %vm7727_vm12, %v1520_v7, inf  ;;  %v1635_v8 = vsel %vm1634_vm14, 2.0, %v7794_v39 }
  0xfe   :  { %v4420_v0 = vpop.eup %4419  ;;  %v1522_v17 = vrot.slane %v1521_v42, 4  ;;  %v1530_v31 = vrot.slane %v1529_v10, 4  ;;  %vm1690_vm1 = vcmp.lt.f32.partialorder %v5585_v26, 0.0  ;;  %vm1637_vm2 = vcmp.gt.f32.partialorder %v5601_v47, 0.0 }
  0xff   :  { %v1425_v4 = vmax.f32 %v5656_v51, 0.0  ;;  %v4422_v30 = vpop.eup %4421  ;;  %v1574_v61 = vmul.f32 %v4420_v0, %v5566_v16  ;;  %v5683_v38 = vsub.f32 %v5643_v53, %v5646_v52  ;;  %v1538_v34 = vrot.slane %v5433_v5, 7  ;;  %vm1691_vm7 = vmand %vm1685_vm4, %vm1690_vm1 }
 0x100   :  { %v1523_v58 = vmax.f32 %v1521_v42, %v1522_v17  ;;  %v1531_v37 = vmin.f32 %v1529_v10, %v1530_v31  ;;  %v1631_v46 = vmul.f32 %v4422_v30, %v5583_v63  ;;  %v1542_v59 = vrot.slane %v5446_v3, 7 }
 0x101   :  { %v1427_v2 = vsub.f32 %v5471_v20, %v1425_v4  ;;  %v1579_v24 = vsel %vm1575_vm13, %v1574_v61, %v1578_v41  ;;  %v1581_v16 = vsel %vm1580_vm15, %v1574_v61, 1.0  ;;  %v5708_v47 = vsub.f32 %v5646_v52, %v5648_v25 }
 0x102   :  { %v1524_v12 = vrot.slane %v1523_v58, 2  ;;  %v1532_v9 = vrot.slane %v1531_v37, 2  ;;  %v1582_v20 = vsel %vm7727_vm12, %v1579_v24, -inf  ;;  %v1590_v19 = vsel %vm7727_vm12, %v1581_v16, inf }
 0x103   :  { %vm1428_vm3 = vcmp.gt.f32.partialorder %v1427_v2, 0.0  ;;  %v1583_v13 = vrot.slane %v1582_v20, 4  ;;  %v1636_v56 = vsel %vm1632_vm0, %v1631_v46, %v1635_v8  ;;  %v1591_v49 = vrot.slane %v1590_v19, 4 }
 0x104   :  { %v1429_v29 = vsel %vm1428_vm3, %v1427_v2, 1.0  ;;  %vm5688_vm5 = vmand %vm5482_vm8, %vm1428_vm3  ;;  %v1525_v21 = vmax.f32 %v1523_v58, %v1524_v12  ;;  %v1533_v1 = vmin.f32 %v1531_v37, %v1532_v9  ;;  %v1638_v14 = vsel %vm1637_vm2, %v1631_v46, 1.0  ;;  %v7822_v2 = vld [vmem:[#allocation19_spill] sm:$0xff] }
 0x105   :  { %4425 = vrcp.f32 %v1429_v29  ;;  %v1584_v43 = vmax.f32 %v1582_v20, %v1583_v13  ;;  %v1639_v45 = vsel %vm7727_vm12, %v1636_v56, -inf  ;;  %vm1749_vm8 = vcmp.eq.f32.partialorder %v5683_v38, 0.0  ;;  %v4424_v35 = vpop.eup %4423 }
 0x106   :  { %v1526_v22 = vrot.slane %v1525_v21, 1  ;;  %v1592_v54 = vmin.f32 %v1590_v19, %v1591_v49  ;;  %v1640_v32 = vrot.slane %v1639_v45, 4  ;;  %v1647_v23 = vsel %vm7727_vm12, %v1638_v14, inf }
 0x107   :  { %v1585_v50 = vrot.slane %v1584_v43, 2  ;;  %v1534_v7 = vrot.slane %v1533_v1, 1  ;;  %v1750_v0 = vsel %vm1749_vm8, 1.0, %v5683_v38  ;;  %v1688_v31 = vmul.f32 %v4424_v35, %v5585_v26 }
 0x108   :  { %v1593_v42 = vrot.slane %v1592_v54, 2  ;;  %v1641_v10 = vmax.f32 %v1639_v45, %v1640_v32  ;;  %vm1689_vm9 = vcmp.lt.f32.partialorder %v5614_v28, 0.0  ;;  %vm1694_vm10 = vcmp.gt.f32.partialorder %v5614_v28, 0.0 }
 0x109   :  { %v1586_v17 = vmax.f32 %v1584_v43, %v1585_v50  ;;  %v1527_v41 = vmax.f32 %v1525_v21, %v1526_v22  ;;  %v1648_v61 = vrot.slane %v1647_v23, 4  ;;  %v1692_v8 = vsel %vm1691_vm7, 2.0, %v7794_v39 }
 0x10a   :  { %v1594_v30 = vmin.f32 %v1592_v54, %v1593_v42  ;;  %v5720_v37 = vsub.f32 %v5650_v40, %v5652_v60  ;;  %4427 = vrcp.f32 %v1750_v0  ;;  %v1535_v24 = vmin.f32 %v1533_v1, %v1534_v7 }
 0x10b   :  { %v1587_v46 = vrot.slane %v1586_v17, 1  ;;  %v5723_v26 = vsub.f32 %v5433_v5, %v1538_v34  ;;  %v1642_v16 = vrot.slane %v1641_v10, 2  ;;  %vm1802_vm4 = vcmp.eq.f32.partialorder %v5708_v47, 0.0 }
 0x10c   :  { %v1595_v28 = vrot.slane %v1594_v30, 1  ;;  %v1693_v12 = vsel %vm1689_vm9, %v1688_v31, %v1692_v8  ;;  %v1695_v9 = vsel %vm1694_vm10, %v1688_v31, 1.0  ;;  %v1712_v20 = vrot.slane %v5433_v5, 3 }
 0x10d   :  { %v5727_v13 = vmax.f32 %v1527_v41, 0.0  ;;  %v5730_v40 = vsub.f32 %v5446_v3, %v1542_v59  ;;  %v1588_v60 = vmax.f32 %v1586_v17, %v1587_v46  ;;  %v1649_v19 = vmin.f32 %v1647_v23, %v1648_v61 }
 0x10e   :  { %vm1754_vm11 = vcmp.lt.f32.partialorder %v5643_v53, 0.0  ;;  %v1803_v21 = vsel %vm1802_vm4, 1.0, %v5708_v47  ;;  %vm1807_vm14 = vcmp.lt.f32.partialorder %v5646_v52, 0.0  ;;  %v5739_v1 = vmin.f32 %v1535_v24, 1.0 }
 0x10f   :  { %v4426_v29 = vpop.eup %4425  ;;  %v1643_v49 = vmax.f32 %v1641_v10, %v1642_v16  ;;  %v1696_v43 = vsel %vm7727_vm12, %v1693_v12, -inf  ;;  %v1704_v14 = vsel %vm7727_vm12, %v1695_v9, inf  ;;  %v1596_v51 = vmin.f32 %v1594_v30, %v1595_v28  ;;  %vm1755_vm13 = vmand %vm1749_vm8, %vm1754_vm11 }
 0x110   :  { %v1435_v56 = vmul.f32 %v4426_v29, %v1425_v4  ;;  %v5748_v4 = vsub.f32 %v5433_v5, %v1712_v20  ;;  %v1715_v35 = vrot.slane %v5446_v3, 3  ;;  %v1545_v22 = vmul.f32 %v5723_v26, %v5727_v13  ;;  %vm1808_vm15 = vmand %vm1802_vm4, %vm1807_vm14 }
 0x111   :  { %v5753_v34 = vmax.f32 %v1588_v60, 0.0  ;;  %v1650_v54 = vrot.slane %v1649_v19, 2  ;;  %v5759_v63 = vsub.f32 %v5648_v25, %v5720_v37  ;;  %v1550_v32 = vmul.f32 %v5730_v40, %v5727_v13 }
 0x112   :  { %v5745_v45 = vsel %vm5688_vm5, %v1435_v56, 0.0  ;;  %v1697_v59 = vrot.slane %v1696_v43, 4  ;;  %v1705_v50 = vrot.slane %v1704_v14, 4  ;;  %4429 = vrcp.f32 %v1803_v21 }
 0x113   :  { %v1555_v23 = vmul.f32 %v5723_v26, %v5739_v1  ;;  %v1560_v7 = vmul.f32 %v5730_v40, %v5739_v1  ;;  %v1644_v42 = vrot.slane %v1643_v49, 1  ;;  %v1651_v10 = vmin.f32 %v1649_v19, %v1650_v54 }
 0x114   :  { %v4428_v0 = vpop.eup %4427  ;;  %v5771_v17 = vmin.f32 %v1596_v51, 1.0  ;;  %vm1753_vm0 = vcmp.lt.f32.partialorder %v5683_v38, 0.0  ;;  %v1756_v31 = vsel %vm1755_vm13, 2.0, %v7794_v39  ;;  %vm1758_vm1 = vcmp.gt.f32.partialorder %v5683_v38, 0.0 }
 0x115   :  { %v1547_v41 = vrot.slane %v1545_v22, 1  ;;  %v1598_v30 = vmul.f32 %v5753_v34, %v5723_v26  ;;  %v1603_v61 = vmul.f32 %v5753_v34, %v5730_v40  ;;  %v1809_v8 = vsel %vm1808_vm15, 2.0, %v7794_v39 }
 0x116   :  { %v1552_v46 = vrot.slane %v1550_v32, 1  ;;  %v1652_v24 = vrot.slane %v1651_v10, 1  ;;  %v1698_v16 = vmax.f32 %v1696_v43, %v1697_v59  ;;  %v1706_v28 = vmin.f32 %v1704_v14, %v1705_v50 }
 0x117   :  { %vm1859_vm2 = vcmp.eq.f32.partialorder %v5759_v63, 0.0  ;;  %v1557_v12 = vrot.slane %v1555_v23, 1  ;;  %v1562_v9 = vrot.slane %v1560_v7, 1  ;;  %v1645_v20 = vmax.f32 %v1643_v49, %v1644_v42 }
 0x118   :  { %v1752_v29 = vmul.f32 %v4428_v0, %v5643_v53  ;;  %vm1806_vm3 = vcmp.lt.f32.partialorder %v5708_v47, 0.0  ;;  %v1608_v60 = vmul.f32 %v5771_v17, %v5723_v26  ;;  %v1613_v19 = vmul.f32 %v5771_v17, %v5730_v40 }
 0x119   :  { %v1699_v56 = vrot.slane %v1698_v16, 2  ;;  %v1707_v21 = vrot.slane %v1706_v28, 2  ;;  %v1549_v43 = vadd.f32 %v1547_v41, %v5433_v5  ;;  %v1600_v14 = vrot.slane %v1598_v30, 1 }
 0x11a   :  { %v1605_v51 = vrot.slane %v1603_v61, 1  ;;  %v1757_v22 = vsel %vm1753_vm0, %v1752_v29, %v1756_v31  ;;  %v1653_v49 = vmin.f32 %v1651_v10, %v1652_v24  ;;  %v1759_v59 = vsel %vm1758_vm1, %v1752_v29, 1.0 }
 0x11b   :  { %v1700_v54 = vmax.f32 %v1698_v16, %v1699_v56  ;;  %v1708_v32 = vmin.f32 %v1706_v28, %v1707_v21  ;;  %v1554_v50 = vadd.f32 %v1552_v46, %v5446_v3  ;;  %v1559_v23 = vadd.f32 %v1557_v12, %v5433_v5 }
 0x11c   :  { %v5795_v7 = vmax.f32 %v1645_v20, 0.0  ;;  %v1760_v42 = vsel %vm7727_vm12, %v1757_v22, -inf  ;;  %v4430_v0 = vpop.eup %4429  ;;  %v1610_v41 = vrot.slane %v1608_v60, 1  ;;  %v1615_v30 = vrot.slane %v1613_v19, 1 }
 0x11d   :  { %v1701_v61 = vrot.slane %v1700_v54, 1  ;;  %v1761_v58 = vrot.slane %v1760_v42, 4  ;;  %v1564_v10 = vadd.f32 %v1562_v9, %v5446_v3  ;;  %v1602_v31 = vadd.f32 %v1600_v14, %v5433_v5 }
 0x11e   :  { %v1709_v24 = vrot.slane %v1708_v32, 1  ;;  %v1768_v38 = vsel %vm7727_vm12, %v1759_v59, inf  ;;  %v1607_v46 = vadd.f32 %v1605_v51, %v5446_v3  ;;  %v5802_v16 = vmin.f32 %v1653_v49, 1.0 }
 0x11f   :  { %v1762_v28 = vmax.f32 %v1760_v42, %v1761_v58  ;;  %v1769_v12 = vrot.slane %v1768_v38, 4  ;;  %v1655_v20 = vmul.f32 %v5795_v7, %v5723_v26  ;;  %v1660_v29 = vmul.f32 %v5795_v7, %v5730_v40 }
 0x120   :  { %v1702_v60 = vmax.f32 %v1700_v54, %v1701_v61  ;;  %v1805_v9 = vmul.f32 %v4430_v0, %v5646_v52  ;;  %v1612_v19 = vadd.f32 %v1610_v41, %v5433_v5  ;;  %v1617_v56 = vadd.f32 %v1615_v30, %v5446_v3 }
 0x121   :  { %v1763_v21 = vrot.slane %v1762_v28, 2  ;;  %v1770_v14 = vmin.f32 %v1768_v38, %v1769_v12  ;;  %v1710_v51 = vmin.f32 %v1708_v32, %v1709_v24  ;;  %v1717_v58 = vsub.f32 %v5446_v3, %v1715_v35 }
 0x122   :  { %vm1811_vm5 = vcmp.gt.f32.partialorder %v5708_v47, 0.0  ;;  %v1860_v22 = vsel %vm1859_vm2, 1.0, %v5759_v63  ;;  %v1566_v49 = vmul.f32 %v1564_v10, %v1549_v43  ;;  %v1567_v54 = vmul.f32 %v1559_v23, %v1554_v50 }
 0x123   :  { %v1670_v52 = vmul.f32 %v5802_v16, %v5730_v40  ;;  %v1810_v59 = vsel %vm1806_vm3, %v1805_v9, %v1809_v8  ;;  %v1665_v32 = vmul.f32 %v5802_v16, %v5723_v26  ;;  %v5824_v42 = vmax.f32 %v1702_v60, 0.0 }
 0x124   :  { %v1764_v35 = vmax.f32 %v1762_v28, %v1763_v21  ;;  %v1771_v0 = vrot.slane %v1770_v14, 2  ;;  %v1619_v41 = vmul.f32 %v1617_v56, %v1602_v31  ;;  %v1620_v30 = vmul.f32 %v1612_v19, %v1607_v46 }
 0x125   :  { %v1657_v61 = vrot.slane %v1655_v20, 1  ;;  %v1662_v24 = vrot.slane %v1660_v29, 1  ;;  %v5826_v38 = vmin.f32 %v1710_v51, 1.0  ;;  %v1812_v40 = vsel %vm1811_vm5, %v1805_v9, 1.0 }
 0x126   :  { %v1772_v43 = vmin.f32 %v1770_v14, %v1771_v0  ;;  %v1813_v50 = vsel %vm7727_vm12, %v1810_v59, -inf  ;;  %vm1565_vm8 = vcmp.lt.f32.partialorder %v5727_v13, %v5739_v1  ;;  %v1568_v26 = vsub.f32 %v1566_v49, %v1567_v54 }
 0x127   :  { %v1672_v8 = vrot.slane %v1670_v52, 1  ;;  %v1765_v23 = vrot.slane %v1764_v35, 1  ;;  %vm1618_vm7 = vcmp.lt.f32.partialorder %v5753_v34, %v5771_v17  ;;  %v1667_v10 = vrot.slane %v1665_v32, 1 }
 0x128   :  { %v1723_v31 = vmul.f32 %v1717_v58, %v5824_v42  ;;  %v1814_v46 = vrot.slane %v1813_v50, 4  ;;  %v1659_v28 = vadd.f32 %v1657_v61, %v5433_v5  ;;  %v1773_v12 = vrot.slane %v1772_v43, 1 }
 0x129   :  { %v1821_v47 = vsel %vm7727_vm12, %v1812_v40, inf  ;;  %4431 = vrcp.f32 %v1860_v22  ;;  %v1621_v20 = vsub.f32 %v1619_v41, %v1620_v30  ;;  %v1664_v29 = vadd.f32 %v1662_v24, %v5446_v3 }
 0x12a   :  { %v1728_v60 = vmul.f32 %v5748_v4, %v5826_v38  ;;  %v1815_v9 = vmax.f32 %v1813_v50, %v1814_v46  ;;  %v1674_v19 = vadd.f32 %v1672_v8, %v5446_v3  ;;  %v1766_v56 = vmax.f32 %v1764_v35, %v1765_v23 }
 0x12b   :  { %v1822_v21 = vrot.slane %v1821_v47, 4  ;;  %v5844_v14 = vsub.f32 %v5720_v37, %v5643_v53  ;;  %v1669_v51 = vadd.f32 %v1667_v10, %v5433_v5  ;;  %v1718_v22 = vmul.f32 %v5748_v4, %v5824_v42 }
 0x12c   :  { %v1725_v49 = vrot.slane %v1723_v31, 5  ;;  %v1733_v54 = vmul.f32 %v1717_v58, %v5826_v38  ;;  %v1774_v52 = vmin.f32 %v1772_v43, %v1773_v12  ;;  %v1816_v59 = vrot.slane %v1815_v9, 2 }
 0x12d   :  { %v1823_v32 = vmin.f32 %v1821_v47, %v1822_v21  ;;  %vm1864_vm9 = vcmp.lt.f32.partialorder %v5648_v25, 0.0  ;;  %v5854_v35 = vsel %vm1565_vm8, %v1568_v26, 0.0  ;;  %v1730_v53 = vrot.slane %v1728_v60, 5 }
 0x12e   :  { %vm1863_vm10 = vcmp.lt.f32.partialorder %v5759_v63, 0.0  ;;  %vm1916_vm4 = vcmp.eq.f32.partialorder %v5844_v14, 0.0  ;;  %v5861_v4 = vsel %vm1618_vm7, %v1621_v20, 0.0  ;;  %v5863_v58 = vmul.f32 %v1674_v19, %v1659_v28  ;;  %vm1865_vm11 = vmand %vm1859_vm2, %vm1864_vm9 }
 0x12f   :  { %v5865_v0 = vmax.f32 %v1766_v56, 0.0  ;;  %v1817_v41 = vmax.f32 %v1815_v9, %v1816_v59  ;;  %v5867_v30 = vmul.f32 %v1669_v51, %v1664_v29  ;;  %v1720_v13 = vrot.slane %v1718_v22, 5 }
 0x130   :  { %v1735_v1 = vrot.slane %v1733_v54, 5  ;;  %v1824_v61 = vrot.slane %v1823_v32, 2  ;;  %v1727_v24 = vadd.f32 %v1725_v49, %v5446_v3  ;;  %v5872_v43 = vmin.f32 %v1774_v52, 1.0 }
 0x131   :  { %v1818_v34 = vrot.slane %v1817_v41, 1  ;;  %v1917_v17 = vsel %vm1916_vm4, 1.0, %v5844_v14  ;;  %v1732_v40 = vadd.f32 %v1730_v53, %v5433_v5  ;;  %vm1868_vm14 = vcmp.gt.f32.partialorder %v5759_v63, 0.0 }
 0x132   :  { %v1825_v50 = vmin.f32 %v1823_v32, %v1824_v61  ;;  %4433 = vrcp.f32 %v1917_v17  ;;  %v5881_v8 = vmul.f32 %v5865_v0, %v5065_v15  ;;  %v1781_v23 = vmul.f32 %v5865_v0, %v5091_v55 }
 0x133   :  { %v4432_v26 = vpop.eup %4431  ;;  %v1819_v10 = vmax.f32 %v1817_v41, %v1818_v34  ;;  %v1866_v31 = vsel %vm1865_vm11, 2.0, %v7794_v39  ;;  %v1678_v46 = vsub.f32 %v5863_v58, %v5867_v30  ;;  %v5889_v28 = vadd.f32 %v1720_v13, %v5433_v5 }
 0x134   :  { %v1826_v12 = vrot.slane %v1825_v50, 1  ;;  %v1862_v47 = vmul.f32 %v4432_v26, %v5648_v25  ;;  %v5893_v20 = vadd.f32 %v1735_v1, %v5446_v3  ;;  %v1786_v29 = vmul.f32 %v5872_v43, %v5065_v15 }
 0x135   :  { %v5897_v60 = vmax.f32 %v1819_v10, 0.0  ;;  %v1983_v9 = vrot.slane %v4782_v62, 2  ;;  %vm1921_vm13 = vcmp.lt.f32.partialorder %v5720_v37, 0.0  ;;  %v5905_v25 = vmul.f32 %v1732_v40, %v1727_v24 }
 0x136   :  { %v1827_v19 = vmin.f32 %v1825_v50, %v1826_v12  ;;  %v1867_v56 = vsel %vm1863_vm10, %v1862_v47, %v1866_v31  ;;  %v1869_v5 = vsel %vm1868_vm14, %v1862_v47, 1.0  ;;  %v1778_v3 = vrot.slane %v5881_v8, 1  ;;  %vm1922_vm15 = vmand %vm1916_vm4, %vm1921_vm13 }
 0x137   :  { %v1783_v21 = vrot.slane %v1781_v23, 1  ;;  %v1870_v51 = vsel %vm7727_vm12, %v1867_v56, -inf  ;;  %v1878_v54 = vsel %vm7727_vm12, %v1869_v5, inf  ;;  %v7823_v52 = vand.u32 2147483647, %v7822_v2 }
 0x138   :  { %v5909_v22 = vmin.f32 %v1827_v19, 1.0  ;;  %v1871_v49 = vrot.slane %v1870_v51, 4  ;;  %v1788_v63 = vrot.slane %v1786_v29, 1  ;;  %v1791_v32 = vmul.f32 %v5872_v43, %v5091_v55 }
 0x139   :  { %v5914_v59 = vadd.f32 %v1983_v9, %v7823_v52  ;;  %v1829_v53 = vmul.f32 %v5897_v60, %v5065_v15  ;;  %v1879_v41 = vrot.slane %v1878_v54, 4  ;;  %v1834_v13 = vmul.f32 %v5897_v60, %v5091_v55 }
 0x13a   :  { %v1839_v1 = vmul.f32 %v5909_v22, %v5065_v15  ;;  %v1844_v61 = vmul.f32 %v5909_v22, %v5091_v55  ;;  %v1872_v24 = vmax.f32 %v1870_v51, %v1871_v49  ;;  %vm1920_vm0 = vcmp.lt.f32.partialorder %v5844_v14, 0.0 }
 0x13b   :  { %v1880_v34 = vmin.f32 %v1878_v54, %v1879_v41  ;;  %vm1925_vm1 = vcmp.gt.f32.partialorder %v5844_v14, 0.0  ;;  %v1923_v50 = vsel %vm1922_vm15, 2.0, %v7794_v39  ;;  %v7824_v26 = vmov %v7823_v52 }
 0x13c   :  { %v4434_v17 = vpop.eup %4433  ;;  %v1873_v40 = vrot.slane %v1872_v24, 2  ;;  %vm5933_vm2 = vcmp.gt.f32.partialorder %v7824_v26, 0.0  ;;  %v7720_v23 = vmov 0   ;;  %v1831_v31 = vrot.slane %v1829_v53, 1 }
 0x13d   :  { %v1991_v10 = vsel %vm1432_vm6, 1, %v7720_v23  ;;  %v1881_v12 = vrot.slane %v1880_v34, 2  ;;  %v1919_v47 = vmul.f32 %v4434_v17, %v5720_v37  ;;  %v1836_v9 = vrot.slane %v1834_v13, 1 }
 0x13e   :  { %v1992_v29 = vrot.slane %v1991_v10, 2  ;;  %v1841_v19 = vrot.slane %v1839_v1, 1  ;;  %v1846_v56 = vrot.slane %v1844_v61, 1  ;;  %v1874_v5 = vmax.f32 %v1872_v24, %v1873_v40 }
 0x13f   :  { %v1882_v51 = vmin.f32 %v1880_v34, %v1881_v12  ;;  %v1924_v2 = vsel %vm1920_vm0, %v1919_v47, %v1923_v50  ;;  %v1926_v49 = vsel %vm1925_vm1, %v1919_v47, 1.0  ;;  %v1785_v62 = vadd.f32 %v1783_v21, %v7799_v6 }
 0x140   :  { %vm5945_vm3 = vcmp.ne.s32.totalorder %v1992_v29, 0  ;;  %v1793_v52 = vrot.slane %v1791_v32, 1  ;;  %v1875_v37 = vrot.slane %v1874_v5, 1  ;;  %v1927_v53 = vsel %vm7727_vm12, %v1924_v2, -inf }
 0x141   :  { %vm1994_vm6 = vmand %vm5933_vm2, %vm5945_vm3  ;;  %vm1675_vm5 = vcmp.lt.f32.partialorder %v5795_v7, %v5802_v16  ;;  %v1790_v14 = vadd.f32 %v1788_v63, %v7800_v18  ;;  %v1883_v41 = vrot.slane %v1882_v51, 1  ;;  %v1928_v13 = vrot.slane %v1927_v53, 4 }
 0x142   :  { %v1935_v1 = vsel %vm7727_vm12, %v1926_v49, inf  ;;  %v1833_v21 = vadd.f32 %v1831_v31, %v7800_v18  ;;  %v1838_v32 = vadd.f32 %v1836_v9, %v7799_v6  ;;  %v1876_v61 = vmax.f32 %v1874_v5, %v1875_v37 }
 0x143   :  { %v1936_v24 = vrot.slane %v1935_v1, 4  ;;  %v1843_v34 = vadd.f32 %v1841_v19, %v7800_v18  ;;  %v1848_v17 = vadd.f32 %v1846_v56, %v7799_v6  ;;  %v1884_v40 = vmin.f32 %v1882_v51, %v1883_v41 }
 0x144   :  { %v1929_v50 = vmax.f32 %v1927_v53, %v1928_v13  ;;  %v5965_v26 = vmul.f32 %v5893_v20, %v5889_v28  ;;  %v1780_v63 = vadd.f32 %v1778_v3, %v7800_v18  ;;  %v5968_v10 = vmax.f32 %v1876_v61, 0.0  ;;  %v5978_v28 = vld [vmem:[%s7650_s0] sm:$0xff] }
 0x145   :  { %v1937_v12 = vmin.f32 %v1935_v1, %v1936_v24  ;;  %v1795_v31 = vadd.f32 %v1793_v52, %v7799_v6  ;;  %v1798_v47 = vmul.f32 %v1790_v14, %v1785_v62  ;;  %v1885_v29 = vmin.f32 %v1884_v40, 1.0  ;;  %v5986_v13 = vld [vmem:[%s7651_s1] sm:$0xff] }
 0x146   :  { %v1930_v9 = vrot.slane %v1929_v50, 2  ;;  %v1886_v19 = vmul.f32 %v5968_v10, %v5065_v15  ;;  %v1891_v56 = vmul.f32 %v5968_v10, %v5091_v55  ;;  %4435 = vrsqrt.f32 %v5978_v28 }
 0x147   :  { %v1938_v5 = vrot.slane %v1937_v12, 2  ;;  %v1850_v20 = vmul.f32 %v1848_v17, %v1833_v21  ;;  %v1851_v3 = vmul.f32 %v1843_v34, %v1838_v32  ;;  %v1896_v51 = vmul.f32 %v1885_v29, %v5065_v15  ;;  %v5997_v17 = vld [vmem:[%s7651_s1 + $0x8] sm:$0xf] }
 0x148   :  { %v1901_v2 = vmul.f32 %v1885_v29, %v5091_v55  ;;  %v1888_v49 = vrot.slane %v1886_v19, 1  ;;  %v1893_v62 = vrot.slane %v1891_v56, 1  ;;  %v1931_v52 = vmax.f32 %v1929_v50, %v1930_v9  ;;  %v6012_v9 = vld [vmem:[%s7650_s0 + $0x8] sm:$0xf] }
 0x149   :  { %v1939_v37 = vmin.f32 %v1937_v12, %v1938_v5  ;;  %v1797_v53 = vmul.f32 %v1795_v31, %v1780_v63  ;;  %v1898_v14 = vrot.slane %v1896_v51, 1  ;;  %4437 = vrsqrt.f32 %v5986_v13 }
 0x14a   :  { %v1903_v41 = vrot.slane %v1901_v2, 1  ;;  %v1890_v1 = vadd.f32 %v1888_v49, %v7800_v18  ;;  %v1895_v15 = vadd.f32 %v1893_v62, %v7799_v6  ;;  %v1932_v21 = vrot.slane %v1931_v52, 1 }
 0x14b   :  { %v1940_v55 = vrot.slane %v1939_v37, 1  ;;  %v1624_v32 = vrot.slane %v5861_v4, 1  ;;  %v1852_v61 = vsub.f32 %v1850_v20, %v1851_v3  ;;  %v1900_v24 = vadd.f32 %v1898_v14, %v7800_v18 }
 0x14c   :  { %v1905_v34 = vadd.f32 %v1903_v41, %v7799_v6  ;;  %v1679_v40 = vsel %vm1675_vm5, %v1678_v46, 0.0  ;;  %vm1849_vm8 = vcmp.lt.f32.partialorder %v5897_v60, %v5909_v22  ;;  %v1933_v4 = vmax.f32 %v1931_v52, %v1932_v21 }
 0x14d   :  { %v1941_v50 = vmin.f32 %v1939_v37, %v1940_v55  ;;  %v1741_v63 = vsub.f32 %v5965_v26, %v5905_v25  ;;  %v1908_v31 = vmul.f32 %v1900_v24, %v1895_v15  ;;  %4439 = vrsqrt.f32 %v6012_v9 }
 0x14e   :  { %v1907_v12 = vmul.f32 %v1905_v34, %v1890_v1  ;;  %vm1796_vm7 = vcmp.lt.f32.partialorder %v5865_v0, %v5872_v43  ;;  %v1799_v7 = vsub.f32 %v1797_v53, %v1798_v47  ;;  %v1934_v16 = vmax.f32 %v1933_v4, 0.0 }
 0x14f   :  { %v1942_v58 = vmin.f32 %v1941_v50, 1.0  ;;  %v1853_v30 = vsel %vm1849_vm8, %v1852_v61, 0.0  ;;  %vm1906_vm9 = vcmp.lt.f32.partialorder %v5968_v10, %v1885_v29  ;;  %4441 = vrsqrt.f32 %v5997_v17 }
 0x150   :  { %v1909_v46 = vsub.f32 %v1907_v12, %v1908_v31  ;;  %v4436_v60 = vpop.eup %4435  ;;  %v1943_v25 = vmul.f32 %v1934_v16, %v7807_v27  ;;  %v1948_v22 = vmul.f32 %v1934_v16, %v7808_v48  ;;  %v1626_v56 = vadd.f32 %v1624_v32, %v5854_v35  ;;  %v2102_v31 = vld [vmem:[%s7650_s0 + $0xc] sm:$0xff] }
 0x151   :  { %v1953_v26 = vmul.f32 %v1942_v58, %v7807_v27  ;;  %v1958_v19 = vmul.f32 %v1942_v58, %v7808_v48  ;;  %vm1738_vm10 = vcmp.lt.f32.partialorder %v5824_v42, %v5826_v38  ;;  %v1855_v47 = vrot.slane %v1853_v30, 1  ;;  %v2103_v30 = vld [vmem:[%s7650_s0 + $0x14] sm:$0xff] }
 0x152   :  { %v1945_v5 = vrot.slane %v1943_v25, 5  ;;  %v1950_v20 = vrot.slane %v1948_v22, 5  ;;  %v1681_v2 = vrot.slane %v1679_v40, 2  ;;  %v1800_v49 = vsel %vm1796_vm7, %v1799_v7, 0.0  ;;  %v2105_v7 = vld [vmem:[%s7651_s1 + $0xc] sm:$0xff] }
 0x153   :  { %v1955_v3 = vrot.slane %v1953_v26, 5  ;;  %v4438_v51 = vpop.eup %4437  ;;  %v1910_v27 = vsel %vm1906_vm9, %v1909_v46, 0.0  ;;  %v1960_v62 = vrot.slane %v1958_v19, 5  ;;  %v1742_v48 = vsel %vm1738_vm10, %v1741_v63, 0.0  ;;  %v2106_v46 = vld [vmem:[%s7651_s1 + $0x14] sm:$0xff] }
 0x154   :  { %v1947_v35 = vadd.f32 %v1945_v5, %v7800_v18  ;;  %v1952_v52 = vadd.f32 %v1950_v20, %v7799_v6  ;;  %v2005_v37 = vmul.f32 %v5978_v28, %v4436_v60  ;;  %v1857_v53 = vadd.f32 %v1855_v47, %v1800_v49  ;;  %v2104_v5 = vld [vmem:[%s7650_s0 + $0x1c] sm:$0x3] }
 0x155   :  { %v1957_v42 = vadd.f32 %v1955_v3, %v7800_v18  ;;  %v1962_v38 = vadd.f32 %v1960_v62, %v7799_v6  ;;  %v1912_v14 = vrot.slane %v1910_v27, 2  ;;  %vm2006_vm4 = vcmp.eq.f32.partialorder %v5978_v28, inf  ;;  %v2107_v20 = vld [vmem:[%s7651_s1 + $0x1c] sm:$0x3] }
 0x156   :  { %v1683_v43 = vadd.f32 %v1681_v2, %v1626_v56  ;;  %v1744_v10 = vrot.slane %v1742_v48, 3  ;;  %v2012_v1 = vmul.f32 %v5986_v13, %v4438_v51  ;;  %vm1963_vm11 = vcmp.lt.f32.partialorder %v1934_v16, %v1942_v58  ;;  %v7829_v27 = vld [vmem:[#allocation20_spill] sm:$0xff] }
 0x157   :  { %v1965_v41 = vmul.f32 %v1957_v42, %v1952_v52  ;;  %v4440_v0 = vpop.eup %4439  ;;  %v1964_v29 = vmul.f32 %v1962_v38, %v1947_v35  ;;  %v1998_v15 = vsub.f32 %v5978_v28, %v5986_v13  ;;  %v2009_v18 = vand.u32 2147483648, %v5978_v28  ;;  %v6086_v38 = vld [vmem:[%s7651_s1 + $0x20] sm:$0xff] }
 0x158   :  { %vm2013_vm14 = vcmp.eq.f32.partialorder %v5986_v13, inf  ;;  %v2007_v55 = vsel %vm2006_vm4, %v5978_v28, %v2005_v37  ;;  %vm2008_vm13 = vcmp.eq.f32.partialorder %v5978_v28, 0.0  ;;  %vm2015_vm15 = vcmp.eq.f32.partialorder %v5986_v13, 0.0 }
 0x159   :  { %v4442_v6 = vpop.eup %4441  ;;  %v1966_v21 = vsub.f32 %v1964_v29, %v1965_v41  ;;  %v1914_v32 = vadd.f32 %v1912_v14, %v1857_v53  ;;  %v2016_v61 = vand.u32 2147483648, %v5986_v13  ;;  %v2034_v24 = vmul.f32 %v6012_v9, %v4440_v0 }
 0x15a   :  { %v2041_v34 = vmul.f32 %v4442_v6, %v5997_v17  ;;  %v2014_v4 = vsel %vm2013_vm14, %v5986_v13, %v2012_v1  ;;  %vm2035_vm0 = vcmp.eq.f32.partialorder %v6012_v9, inf  ;;  %vm2042_vm1 = vcmp.eq.f32.partialorder %v5997_v17, inf }
 0x15b   :  { %v1967_v40 = vsel %vm1963_vm11, %v1966_v21, 0.0  ;;  %v1746_v50 = vadd.f32 %v1744_v10, %v1683_v43  ;;  %v2010_v12 = vsel %vm2008_vm13, %v2009_v18, %v2007_v55  ;;  %vm2037_vm5 = vcmp.eq.f32.partialorder %v6012_v9, 0.0 }
 0x15c   :  { %v1969_v63 = vrot.slane %v1967_v40, 3  ;;  %v2038_v16 = vand.u32 2147483648, %v6012_v9  ;;  %vm2044_vm8 = vcmp.eq.f32.partialorder %v5997_v17, 0.0  ;;  %v2045_v58 = vand.u32 2147483648, %v5997_v17 }
 0x15d   :  { %v2017_v25 = vsel %vm2015_vm15, %v2016_v61, %v2014_v4  ;;  %v2036_v22 = vsel %vm2035_vm0, %v6012_v9, %v2034_v24  ;;  %v2043_v26 = vsel %vm2042_vm1, %v5997_v17, %v2041_v34  ;;  %v1999_v19 = vmul.f32 %v1998_v15, %v1998_v15 }
 0x15e   :  { %v1971_v60 = vadd.f32 %v1969_v63, %v1914_v32  ;;  %v2108_v56 = vsub.f32 %v2102_v31, %v2105_v7  ;;  %v2109_v3 = vsub.f32 %v2103_v30, %v2106_v46  ;;  %v2018_v51 = vsub.f32 %v2010_v12, %v2017_v25 }
 0x15f   :  { %v2039_v2 = vsel %vm2037_vm5, %v2038_v16, %v2036_v22  ;;  %v2046_v49 = vsel %vm2044_vm8, %v2045_v58, %v2043_v26  ;;  %v1747_v62 = vmul.f32 %v1746_v50, %v7829_v27  ;;  %v2001_v35 = vrot.slane %v1999_v19, 1 }
 0x160   :  { %v1973_v47 = vrot.slane %v1971_v60, 6  ;;  %v2110_v52 = vsub.f32 %v2104_v5, %v2107_v20  ;;  %v2111_v42 = vmul.f32 %v2108_v56, %v2108_v56  ;;  %v2047_v53 = vsub.f32 %v2039_v2, %v2046_v49 }
 0x161   :  { %v2112_v14 = vmul.f32 %v2109_v3, %v2109_v3  ;;  %vm7726_vm7 = vcmask 400384   ;;  %v2019_v41 = vmul.f32 %v2018_v51, %v2018_v51  ;;  %v2057_v0 = vsub.f32 %v6012_v9, %v5997_v17 }
 0x162   :  { %v1975_v48 = vmul.f32 %v1973_v47, %v7819_v36  ;;  %v2169_v10 = vand.u32 2139095040, %v6086_v38  ;;  %v2003_v36 = vadd.f32 %v2001_v35, %v1999_v19  ;;  %v2113_v29 = vmul.f32 %v2110_v52, %v2110_v52 }
 0x163   :  { %v2115_v1 = vsel %vm7726_vm7, %v2111_v42, 0.0  ;;  %v2048_v18 = vmul.f32 %v2047_v53, %v2047_v53  ;;  %v2116_v6 = vsel %vm7726_vm7, %v2112_v14, 0.0  ;;  %v2021_v55 = vrot.slane %v2019_v41, 2 }
 0x164   :  { %v1977_v37 = vrot.slane %v1975_v48, 2  ;;  %v2170_v21 = vshrl.u32 %v2169_v10, 23  ;;  %v2058_v32 = vmul.f32 %v2057_v0, %v2057_v0  ;;  %v2065_v61 = vrot.slane %v5745_v45, 5 }
 0x165   :  { %vm7725_vm9 = vcmask 394240   ;;  %v6097_v24 = vmul.f32 5.0, %v1999_v19  ;;  %v2117_v40 = vadd.f32 %v2116_v6, %v2115_v1  ;;  %v2166_v4 = vand.u32 2147483647, %v6086_v38  ;;  %v6136_v6 = vld [vmem:[%s7650_s0 + $0x20] sm:$0xff] }
 0x166   :  { %v1979_v43 = vadd.f32 %v1977_v37, %v1747_v62  ;;  %v4321_v34 = vadd.s32 4294967169, %v2170_v21  ;;  %v2050_v63 = vrot.slane %v2048_v18, 2  ;;  %v2119_v12 = vsel %vm7725_vm9, %v2113_v29, 0.0 }
 0x167   :  { %v2023_v7 = vadd.f32 %v2021_v55, %v2003_v36  ;;  %v2024_v16 = vrot.slane %v2019_v41, 3  ;;  %v6104_v58 = vmul.f32 5.0, %v2058_v32  ;;  %v2067_v30 = vsub.f32 %v5978_v28, %v2065_v61 }
 0x168   :  { %v6092_v15 = vmul.f32 0.5, %v1979_v43  ;;  %v2176_v31 = vadd.s32 1, %v4321_v34  ;;  %v2030_v46 = vrot.slane %v6097_v24, 4  ;;  %v2120_v25 = vadd.f32 %v2119_v12, %v2117_v40 }
 0x169   :  { %v2173_v22 = vand.u32 8388607, %v2166_v4  ;;  %v2052_v19 = vadd.f32 %v2050_v63, %v2003_v36  ;;  %v2053_v56 = vrot.slane %v2048_v18, 3  ;;  %v2026_v5 = vadd.f32 %v2024_v16, %v2023_v7 }
 0x16a   :  { %v1981_v17 = vmax.f32 %v6092_v15, 0.0  ;;  %vm2177_vm4 = vcmp.gt.s32.totalorder %v2176_v31, 0  ;;  %v2061_v20 = vrot.slane %v6104_v58, 4  ;;  %v6120_v8 = vmul.f32 %v2067_v30, %v2067_v30 }
 0x16b   :  { %v2178_v26 = vsel %vm2177_vm4, %v2176_v31, 0  ;;  %v7832_v51 = vmov 683565275   ;;  %v7833_v49 = vmov 2475754826   ;;  %v2121_v35 = vrot.slane %v2120_v25, 4 }
 0x16c   :  { %v1986_v50 = vsub.f32 %v5914_v59, %v1981_v17  ;;  %v2180_v47 = vand.u32 31, %v2178_v26  ;;  %v2179_v54 = vshrl.u32 %v2178_v26, 5  ;;  %v7834_v62 = vmov 2131351028  }
 0x16d   :  { %v2174_v52 = vor.u32 8388608, %v2173_v22  ;;  %v7835_v42 = vmov 2102212464   ;;  %v7836_v53 = vmov 920167782   ;;  %v2055_v41 = vadd.f32 %v2053_v56, %v2052_v19 }
 0x16e   :  { %vm1987_vm10 = vcmp.gt.f32.partialorder %v1986_v50, 0.0  ;;  %v2181_v3 = vsub.s32 32, %v2180_v47  ;;  %v2183_v2 = vshll.u32 %v7832_v51, %v2180_v47  ;;  %v2186_v27 = vshll.u32 %v7833_v49, %v2180_v47 }
 0x16f   :  { %v1988_v60 = vsel %vm1987_vm10, %v1986_v50, 1.0  ;;  %vm6113_vm11 = vmand %vm1994_vm6, %vm1987_vm10  ;;  %v2189_v48 = vshll.u32 %v7834_v62, %v2180_v47  ;;  %v2192_v37 = vshll.u32 %v7835_v42, %v2180_v47  ;;  %v2195_v14 = vshll.u32 %v7836_v53, %v2180_v47 }
 0x170   :  { %4443 = vrcp.f32 %v1988_v60  ;;  %v2184_v0 = vshrl.u32 %v7833_v49, %v2181_v3  ;;  %v2187_v43 = vshrl.u32 %v7834_v62, %v2181_v3  ;;  %v2190_v10 = vshrl.u32 %v7835_v42, %v2181_v3 }
 0x171   :  { %v2182_v36 = vshrl.u32 %v7832_v51, %v2181_v3  ;;  %v2193_v29 = vshrl.u32 %v7836_v53, %v2181_v3  ;;  %v7837_v1 = vmov 1326507024   ;;  %vm2198_vm2 = vcmp.lt.s32.totalorder %v2179_v54, 1 }
 0x172   :  { %v2196_v18 = vshrl.u32 %v7837_v1, %v2181_v3  ;;  %v2185_v21 = vor.u32 %v2184_v0, %v2183_v2  ;;  %v2188_v55 = vor.u32 %v2187_v43, %v2186_v27  ;;  %v2191_v32 = vor.u32 %v2190_v10, %v2189_v48 }
 0x173   :  { %vm2201_vm3 = vcmp.lt.s32.totalorder %v2179_v54, 4  ;;  %v2194_v61 = vor.u32 %v2193_v29, %v2192_v37  ;;  %vm2200_vm6 = vcmp.lt.s32.totalorder %v2179_v54, 3  ;;  %v2214_v40 = vshll.u32 %v2174_v52, 8 }
 0x174   :  { %v2197_v34 = vor.u32 %v2196_v18, %v2195_v14  ;;  %vm2199_vm14 = vcmp.lt.s32.totalorder %v2179_v54, 2  ;;  %v2203_v50 = vsel %vm2201_vm3, %v2191_v32, 2102212464  ;;  %v2206_v63 = vsel %vm2198_vm2, %v2185_v21, %v2188_v55 }
 0x175   :  { %v2210_v12 = vsel %vm2198_vm2, %v2188_v55, %v2191_v32  ;;  %v2122_v31 = vadd.f32 %v2121_v35, %v2120_v25  ;;  %v2207_v7 = vsel %vm2201_vm3, %v2194_v61, 920167782  ;;  %v2436_v30 = vand.u32 2139095040, %v6136_v6 }
 0x176   :  { %v2211_v16 = vsel %vm2201_vm3, %v2197_v34, 1326507024  ;;  %v2202_v22 = vsel %vm2198_vm2, %v2182_v36, %v2185_v21  ;;  %v2204_v26 = vsel %vm2200_vm6, %v2188_v55, %v2203_v50  ;;  %v2208_v19 = vsel %vm2200_vm6, %v2191_v32, %v2207_v7 }
 0x177   :  { %v2212_v56 = vsel %vm2200_vm6, %v2194_v61, %v2211_v16  ;;  %v2027_v3 = vmul.f32 5.0, %v2026_v5  ;;  %v2209_v2 = vsel %vm2199_vm14, %v2206_v63, %v2208_v19  ;;  %v2123_v14 = vrot.slane %v2122_v31, 2 }
 0x178   :  { %v2213_v27 = vsel %vm2199_vm14, %v2210_v12, %v2212_v56  ;;  %v6149_v35 = vmul.u32.u64.low %v2214_v40, %v2209_v2  ;;  %v6150_v52 = vmul.u32.u64.high %v2214_v40, %v2209_v2, %v6149_v35  ;;  %v2205_v0 = vsel %vm2199_vm14, %v2202_v22, %v2204_v26 }
 0x179   :  { %v6146_v48 = vmul.u32.u64.low %v2214_v40, %v2213_v27  ;;  %v6147_v25 = vmul.u32.u64.high %v2214_v40, %v2213_v27, %v6146_v48  ;;  %v2437_v15 = vshrl.u32 %v2436_v30, 23  ;;  %v2090_v10 = vmul.f32 0.5, %v6120_v8 }
 0x17a   :  { %v4444_v60 = vpop.eup %4443  ;;  %v2032_v36 = vadd.f32 %v2030_v46, %v2027_v3  ;;  %v2078_v29 = vrot.slane %v6120_v8, 5  ;;  %v2129_v18 = vmul.f32 %v6012_v9, %v6012_v9  ;;  %v2124_v55 = vadd.f32 %v2123_v14, %v2122_v31 }
 0x17b   :  { %v1996_v47 = vmul.f32 %v4444_v60, %v1981_v17  ;;  %v2056_v17 = vmul.f32 5.0, %v2055_v41  ;;  %v4329_v21 = vadd.s32 4294967169, %v2437_v15  ;;  %v2221_v41 = vmul.u32 %v2214_v40, %v2205_v0 }
 0x17c   :  { %vm2223_vm15 = vc.u32 %v6147_v25, %v6149_v35  ;;  %v2224_v24 = vadd.s32 1, %v6150_v52  ;;  %v2092_v61 = vrot.slane %v2090_v10, 7  ;;  %v2131_v34 = vrot.slane %v2129_v18, 6 }
 0x17d   :  { %v1997_v37 = vsel %vm6113_vm11, %v1996_v47, 0.0  ;;  %v2443_v46 = vadd.s32 1, %v4329_v21  ;;  %v2063_v8 = vadd.f32 %v2061_v20, %v2056_v17  ;;  %v2125_v7 = vrot.slane %v2124_v55, 1 }
 0x17e   :  { %v2070_v5 = vrot.slane %v1997_v37, 5  ;;  %v2074_v43 = vrot.slane %v1997_v37, 6  ;;  %v2225_v50 = vsel %vm2223_vm15, %v2224_v24, %v6150_v52  ;;  %v2433_v16 = vand.u32 2147483647, %v6136_v6 }
 0x17f   :  { %vm2444_vm0 = vcmp.gt.s32.totalorder %v2443_v46, 0  ;;  %v2226_v12 = vadd.s32 %v2225_v50, %v2221_v41  ;;  %v2126_v47 = vadd.f32 %v2125_v7, %v2124_v55  ;;  %vm2135_vm1 = vcmp.eq.f32.partialorder %v5986_v13, 1.0 }
 0x180   :  { %v2072_v59 = vsub.f32 %v6012_v9, %v2070_v5  ;;  %vm6164_vm13 = vcmp.ge.f32.partialorder %v5745_v45, %v2074_v43  ;;  %v2128_v9 = vmul.f32 %v5978_v28, %v5978_v28  ;;  %v2080_v45 = vadd.f32 %v2078_v29, %v2032_v36 }
 0x181   :  { %v2445_v31 = vsel %vm2444_vm0, %v2443_v46, 0  ;;  %v2227_v60 = vadd.s32 536870912, %v2226_v12  ;;  %v2440_v3 = vand.u32 8388607, %v2433_v16  ;;  %vm7722_vm8 = vcmask 393216  }
 0x182   :  { %v2073_v32 = vmul.f32 %v2072_v59, %v2072_v59  ;;  %v2447_v30 = vand.u32 31, %v2445_v31  ;;  %v2133_v28 = vadd.f32 %v2131_v34, %v2128_v9  ;;  %v2446_v2 = vshrl.u32 %v2445_v31, 5 }
 0x183   :  { %v6177_v56 = vshrl.u32 %v2227_v60, 30  ;;  %v2441_v24 = vor.u32 8388608, %v2440_v3  ;;  %vm2168_vm14 = vcmp.lt.s32.totalorder %v6086_v38, 0 }
 0x184   :  { %v2081_v40 = vmul.f32 0.5, %v2073_v32  ;;  %v2087_v63 = vrot.slane %v2073_v32, 5  ;;  %v2448_v22 = vsub.s32 32, %v2447_v30  ;;  %v2450_v27 = vshll.u32 %v7832_v51, %v2447_v30 }
 0x185   :  { %v2229_v37 = vshll.u32 %v6177_v56, 30  ;;  %v2453_v14 = vshll.u32 %v7833_v49, %v2447_v30  ;;  %v2456_v17 = vshll.u32 %v7834_v62, %v2447_v30  ;;  %v2459_v5 = vshll.u32 %v7835_v42, %v2447_v30 }
 0x186   :  { %v2083_v58 = vrot.slane %v2081_v40, 3  ;;  %v2089_v20 = vadd.f32 %v2087_v63, %v2063_v8  ;;  %v2451_v0 = vshrl.u32 %v7833_v49, %v2448_v22  ;;  %v2454_v15 = vshrl.u32 %v7834_v62, %v2448_v22 }
 0x187   :  { %v2230_v10 = vsub.s32 %v2226_v12, %v2229_v37  ;;  %v2457_v36 = vshrl.u32 %v7835_v42, %v2448_v22  ;;  %v2460_v29 = vshrl.u32 %v7836_v53, %v2448_v22  ;;  %v2134_v21 = vmul.f32 0.5, %v2133_v28 }
 0x188   :  { %v2085_v26 = vadd.f32 %v2083_v58, %v2080_v45  ;;  %v2094_v19 = vadd.f32 %v2092_v61, %v2089_v20  ;;  %v2462_v59 = vshll.u32 %v7836_v53, %v2447_v30  ;;  %v2463_v41 = vshrl.u32 %v7837_v1, %v2448_v22 }
 0x189   :  { %v2232_v55 = vsub.s32 0, %v2230_v10  ;;  %v2449_v8 = vshrl.u32 %v7832_v51, %v2448_v22  ;;  %v2452_v54 = vor.u32 %v2451_v0, %v2450_v27  ;;  %v2455_v32 = vor.u32 %v2454_v15, %v2453_v14  ;;  %v6212_v27 = vld [vmem:[%s7650_s0 + $0x28] sm:$0xf] }
 0x18a   :  { %v2096_v48 = vrot.slane %v2085_v26, 6  ;;  %v2099_v52 = vrot.slane %v2094_v19, 4  ;;  %v2458_v9 = vor.u32 %v2457_v36, %v2456_v17  ;;  %v2461_v45 = vor.u32 %v2460_v29, %v2459_v5 }
 0x18b   :  { %v4322_v61 = vmin.u32 %v2232_v55, %v2230_v10  ;;  %vm2465_vm5 = vcmp.lt.s32.totalorder %v2446_v2, 1  ;;  %v2464_v50 = vor.u32 %v2463_v41, %v2462_v59  ;;  %vm2468_vm10 = vcmp.lt.s32.totalorder %v2446_v2, 4 }
 0x18c   :  { %v2101_v43 = vsel %vm6164_vm13, %v2096_v48, %v2099_v52  ;;  %vm2467_vm4 = vcmp.lt.s32.totalorder %v2446_v2, 3  ;;  %v2470_v13 = vsel %vm2468_vm10, %v2458_v9, 2102212464  ;;  %vm2466_vm11 = vcmp.lt.s32.totalorder %v2446_v2, 2 }
 0x18d   :  { %v2127_v18 = vadd.f32 %v2126_v47, %v2101_v43  ;;  %v2234_v63 = vclz %v4322_v61  ;;  %v2473_v12 = vsel %vm2465_vm5, %v2452_v54, %v2455_v32  ;;  %v2481_v31 = vshll.u32 %v2441_v24, 8 }
 0x18e   :  { %v2469_v58 = vsel %vm2465_vm5, %v2449_v8, %v2452_v54  ;;  %v2474_v20 = vsel %vm2468_vm10, %v2461_v45, 920167782  ;;  %v2471_v60 = vsel %vm2467_vm4, %v2455_v32, %v2470_v13  ;;  %v2477_v26 = vsel %vm2465_vm5, %v2455_v32, %v2458_v9  ;;  %v7841_v13 = vld [vmem:[#allocation9_spill] sm:$0xff] }
 0x18f   :  { %v2137_v46 = vrot.slane %v2127_v18, 5  ;;  %v4323_v30 = vadd.s32 4294967294, %v2234_v63  ;;  %v2475_v22 = vsel %vm2467_vm4, %v2458_v9, %v2474_v20  ;;  %v2478_v19 = vsel %vm2468_vm10, %v2464_v50, 1326507024 }
 0x190   :  { %v2222_v28 = vadd.s32 %v6149_v35, %v6147_v25  ;;  %v2476_v47 = vsel %vm2466_vm11, %v2473_v12, %v2475_v22  ;;  %v2479_v3 = vsel %vm2467_vm4, %v2461_v45, %v2478_v19  ;;  %v2472_v35 = vsel %vm2466_vm11, %v2469_v58, %v2471_v60 }
 0x191   :  { %v2139_v34 = vsel %vm2135_vm1, %v2137_v46, %v2134_v21  ;;  %vm4324_vm2 = vcmp.lt.s32.totalorder %v4323_v30, 0  ;;  %v2480_v52 = vsel %vm2466_vm11, %v2477_v26, %v2479_v3  ;;  %v2699_v29 = vand.u32 2139095040, %v6212_v27 }
 0x192   :  { %v2141_v40 = vrot.slane %v2139_v34, 5  ;;  %v2237_v48 = vsel %vm4324_vm2, 0, %v4323_v30  ;;  %v6215_v37 = vmul.u32.u64.low %v2481_v31, %v2476_v47  ;;  %v6216_v14 = vmul.u32.u64.high %v2481_v31, %v2476_v47, %v6215_v37 }
 0x193   :  { %v2238_v0 = vsub.s32 32, %v2237_v48  ;;  %v2239_v15 = vshll.u32 %v2230_v10, %v2237_v48  ;;  %v2242_v25 = vsub.s32 4294967266, %v2237_v48  ;;  %v2488_v18 = vmul.u32 %v2481_v31, %v2472_v35 }
 0x194   :  { %v2144_v7 = vsel %vm7722_vm8, %v2141_v40, 0.0  ;;  %v6220_v17 = vmul.u32.u64.low %v2481_v31, %v2480_v52  ;;  %v6221_v5 = vmul.u32.u64.high %v2481_v31, %v2480_v52, %v6220_v17  ;;  %v2491_v21 = vadd.s32 1, %v6216_v14  ;;  %v7840_v40 = vld [vmem:[#allocation6_spill] sm:$0xff] }
 0x195   :  { %2145 = vadd.xlane.f32.xlu0 %v2144_v7  ;;  %v2240_v43 = vshrl.u32 %v2222_v28, %v2238_v0  ;;  %v2243_v36 = vadd.s32 127, %v2242_v25  ;;  %v2700_v55 = vshrl.u32 %v2699_v29, 23  ;;  %v7721_v45 = vand.u32 2147483647, %v6212_v27 }
 0x196   :  { %vm2490_vm3 = vc.u32 %v6221_v5, %v6215_v37  ;;  %v2161_v63 = vadd.f32 %v6086_v38, %v7840_v40  ;;  %v2163_v12 = vadd.f32 %v6086_v38, %v7841_v13  ;;  %v2165_v7 = vmul.f32 0.5, %v6086_v38 }
 0x197   :  { %v2241_v59 = vor.u32 %v2240_v43, %v2239_v15  ;;  %v2244_v41 = vshll.u32 %v2243_v36, 23  ;;  %v2492_v2 = vsel %vm2490_vm3, %v2491_v21, %v6216_v14  ;;  %v4337_v46 = vadd.s32 4294967169, %v2700_v55 }
 0x198   :  { %v2493_v8 = vadd.s32 %v2492_v2, %v2488_v18  ;;  %v2252_v30 = vsub.s32 4, %v6177_v56  ;;  %v2703_v60 = vand.u32 8388607, %v7721_v45  ;;  %v6241_v19 = vmul.f32 0.14285715, %v2161_v63 }
 0x199   :  { %v2245_v10 = vor.u32 4788187, %v2244_v41  ;;  %v2248_v24 = vcvt.s32.f32 %v2241_v59  ;;  %v2706_v32 = vadd.s32 1, %v4337_v46  ;;  %v6243_v28 = vmul.f32 0.14285715, %v2163_v12 }
 0x19a   :  { %v2494_v61 = vadd.s32 536870912, %v2493_v8  ;;  %vm6247_vm13 = vcmp.le.f32.partialorder %v2166_v4, 0.7853982  ;;  %v2253_v3 = vsel %vm2168_vm14, %v2252_v30, %v6177_v56  ;;  %v6253_v48 = vrot.slane %v2165_v7, %v7803_v44 }
 0x19b   :  { %v2246_v54 = vand.u32 2147483647, %v2245_v10  ;;  %vm2707_vm6 = vcmp.gt.s32.totalorder %v2706_v32, 0  ;;  %v2416_v52 = vrot.slane %v6086_v38, 1  ;;  %v2704_v15 = vor.u32 8388608, %v2703_v60 }
 0x19c   :  { %v6229_v34 = vshrl.u32 %v2494_v61, 30  ;;  %v2708_v50 = vsel %vm2707_vm6, %v2706_v32, 0  ;;  %vm2258_vm11 = vweird.f32 %v6086_v38  ;;  %vm2435_vm2 = vcmp.lt.s32.totalorder %v6136_v6, 0 }
 0x19d   :  { %v2249_v9 = vmul.f32 %v2248_v24, %v2246_v54  ;;  %v2710_v31 = vand.u32 31, %v2708_v50  ;;  %v2709_v56 = vshrl.u32 %v2708_v50, 5  ;;  %v6273_v2 = vshll.u32 %v2704_v15, 8 }
 0x19e   :  { %v2496_v58 = vshll.u32 %v6229_v34, 30 }
 0x19f   :  { %v2250_v20 = vxor.u32 2147483648, %v2249_v9  ;;  %v2711_v26 = vsub.s32 32, %v2710_v31  ;;  %v2716_v25 = vshll.u32 %v7833_v49, %v2710_v31  ;;  %v2722_v35 = vshll.u32 %v7835_v42, %v2710_v31 }
 0x1a0   :  { %v2497_v22 = vsub.s32 %v2493_v8, %v2496_v58  ;;  %v2719_v43 = vshll.u32 %v7834_v62, %v2710_v31  ;;  %v2713_v29 = vshll.u32 %v7832_v51, %v2710_v31  ;;  %v2725_v55 = vshll.u32 %v7836_v53, %v2710_v31 }
 0x1a1   :  { %v2251_v0 = vsel %vm2168_vm14, %v2250_v20, %v2249_v9  ;;  %v2717_v4 = vshrl.u32 %v7834_v62, %v2711_v26  ;;  %v2720_v36 = vshrl.u32 %v7835_v42, %v2711_v26  ;;  %v2714_v18 = vshrl.u32 %v7833_v49, %v2711_v26 }
 0x1a2   :  { %v2499_v14 = vsub.s32 0, %v2497_v22  ;;  %v2723_v21 = vshrl.u32 %v7836_v53, %v2711_v26  ;;  %v2254_v59 = vsel %vm6247_vm13, %v6086_v38, %v2251_v0  ;;  %v2726_v10 = vshrl.u32 %v7837_v1, %v2711_v26 }
 0x1a3   :  { %v2255_v62 = vsel %vm6247_vm13, 0, %v2253_v3  ;;  %v2489_v42 = vadd.s32 %v6215_v37, %v6221_v5  ;;  %v2718_v46 = vor.u32 %v2717_v4, %v2716_v25  ;;  %v2721_v8 = vor.u32 %v2720_v36, %v2719_v43 }
 0x1a4   :  { %v4330_v17 = vmin.u32 %v2499_v14, %v2497_v22  ;;  %v2724_v24 = vor.u32 %v2723_v21, %v2722_v35  ;;  %v2727_v54 = vor.u32 %v2726_v10, %v2725_v55  ;;  %4445 = vcosq.f32 %v2254_v59 }
 0x1a5   :  { %v2715_v32 = vor.u32 %v2714_v18, %v2713_v29  ;;  %vm2728_vm15 = vcmp.lt.s32.totalorder %v2709_v56, 1  ;;  %vm2731_vm0 = vcmp.lt.s32.totalorder %v2709_v56, 4  ;;  %v2712_v53 = vshrl.u32 %v7832_v51, %v2711_v26  ;;  %v7845_v29 = vld [vmem:[#allocation11_spill] sm:$0xff] }
 0x1a6   :  { %v2501_v41 = vclz %v4330_v17  ;;  %vm2730_vm5 = vcmp.lt.s32.totalorder %v2709_v56, 3  ;;  %v2737_v1 = vsel %vm2731_vm0, %v2724_v24, 920167782  ;;  %4447 = vsinq.f32 %v2254_v59 }
 0x1a7   :  { %vm2729_vm10 = vcmp.lt.s32.totalorder %v2709_v56, 2  ;;  %v2741_v37 = vsel %vm2731_vm0, %v2727_v54, 1326507024  ;;  %v2740_v63 = vsel %vm2728_vm15, %v2718_v46, %v2721_v8  ;;  %v2733_v12 = vsel %vm2731_vm0, %v2721_v8, 2102212464 }
 0x1a8   :  { %v4331_v49 = vadd.s32 4294967294, %v2501_v41  ;;  %v2736_v31 = vsel %vm2728_vm15, %v2715_v32, %v2718_v46  ;;  %v2738_v30 = vsel %vm2730_vm5, %v2721_v8, %v2737_v1  ;;  %v2742_v58 = vsel %vm2730_vm5, %v2724_v24, %v2741_v37 }
 0x1a9   :  { %v2381_v51 = vrot.slane %v2165_v7, %v7804_v33  ;;  %v2391_v20 = vrot.slane %v6241_v19, %v7801_v57  ;;  %v2362_v47 = vadd.s32 3, %v2255_v62  ;;  %v2732_v3 = vsel %vm2728_vm15, %v2712_v53, %v2715_v32 }
 0x1aa   :  { %vm4332_vm1 = vcmp.lt.s32.totalorder %v4331_v49, 0  ;;  %v2743_v14 = vsel %vm2729_vm10, %v2740_v63, %v2742_v58  ;;  %v2734_v25 = vsel %vm2730_vm5, %v2718_v46, %v2733_v12  ;;  %v2739_v35 = vsel %vm2729_vm10, %v2736_v31, %v2738_v30  ;;  %v7847_v46 = vld [vmem:[#allocation13_spill] sm:$0xff] }
 0x1ab   :  { %v2504_v61 = vsel %vm4332_vm1, 0, %v4331_v49  ;;  %v2418_v7 = vmul.f32 %v6086_v38, %v2416_v52  ;;  %v2430_v17 = vadd.f32 %v6136_v6, %v7841_v13  ;;  %v6301_v18 = vmul.f32 %v2381_v51, %v7845_v29  ;;  %v7846_v52 = vld [vmem:[#allocation12_spill] sm:$0xff] }
 0x1ac   :  { %v2505_v5 = vsub.s32 32, %v2504_v61  ;;  %v2506_v9 = vshll.u32 %v2497_v22, %v2504_v61  ;;  %v2509_v50 = vsub.s32 4294967266, %v2504_v61  ;;  %v2428_v22 = vadd.f32 %v6136_v6, %v7840_v40  ;;  %v7844_v40 = vld [vmem:[#allocation8_spill] sm:$0xff] }
 0x1ad   :  { %v6293_v4 = vmul.u32.u64.low %v6273_v2, %v2743_v14  ;;  %v6294_v43 = vmul.u32.u64.high %v6273_v2, %v2743_v14, %v6293_v4  ;;  %v6298_v36 = vmul.f32 %v6253_v48, %v7844_v40  ;;  %v6307_v55 = vmul.f32 %v6253_v48, %v7846_v52 }
 0x1ae   :  { %v2507_v60 = vshrl.u32 %v2489_v42, %v2505_v5  ;;  %v2510_v26 = vadd.s32 127, %v2509_v50  ;;  %v4446_v41 = vpop.eup %4445  ;;  %v2735_v13 = vsel %vm2729_vm10, %v2732_v3, %v2734_v25  ;;  %v2259_v24 = vand.u32 3, %v2255_v62 }
 0x1af   :  { %v6311_v10 = vmul.u32.u64.low %v6273_v2, %v2739_v35  ;;  %v6312_v42 = vmul.u32.u64.high %v6273_v2, %v2739_v35, %v6311_v10  ;;  %v2363_v49 = vand.u32 3, %v2362_v47  ;;  %v6316_v8 = vmul.f32 %v2381_v51, %v7847_v46 }
 0x1b0   :  { %v2508_v0 = vor.u32 %v2507_v60, %v2506_v9  ;;  %v2511_v15 = vshll.u32 %v2510_v26, 23  ;;  %v4448_v32 = vpop.eup %4447  ;;  %vm2419_vm4 = vcmp.ge.f32.partialorder %v2418_v7, 0.0  ;;  %v6318_v53 = vmul.f32 0.14285715, %v2428_v22 }
 0x1b1   :  { %v6320_v1 = vmul.f32 0.14285715, %v2430_v17  ;;  %v2432_v48 = vmul.f32 0.5, %v6136_v6  ;;  %v2519_v61 = vsub.s32 4, %v6229_v34  ;;  %v2683_v37 = vrot.slane %v6136_v6, 1 }
 0x1b2   :  { %v2512_v59 = vor.u32 4788187, %v2511_v15  ;;  %v2515_v54 = vcvt.s32.f32 %v2508_v0  ;;  %v2751_v62 = vmul.u32 %v6273_v2, %v2735_v13  ;;  %v2265_v5 = vxor.u32 2147483648, %v4446_v41 }
 0x1b3   :  { %vm2753_vm3 = vc.u32 %v6294_v43, %v6311_v10  ;;  %v2754_v9 = vadd.s32 1, %v6312_v42  ;;  %v2262_v50 = vxor.u32 2147483648, %v4448_v32  ;;  %vm2264_vm6 = vcmp.eq.s32.totalorder %v2259_v24, 2 }
 0x1b4   :  { %v2513_v56 = vand.u32 2147483647, %v2512_v59  ;;  %vm2368_vm14 = vcmp.eq.s32.totalorder %v2363_v49, 2  ;;  %vm2261_vm13 = vcmp.eq.s32.totalorder %v2259_v24, 0  ;;  %vm2365_vm15 = vcmp.eq.s32.totalorder %v2363_v49, 0 }
 0x1b5   :  { %vm6333_vm0 = vcmp.le.f32.partialorder %v2433_v16, 0.7853982  ;;  %v2755_v12 = vsel %vm2753_vm3, %v2754_v9, %v6312_v42  ;;  %v2520_v30 = vsel %vm2435_vm2, %v2519_v61, %v6229_v34  ;;  %v6342_v58 = vmul.f32 %v6136_v6, %v2683_v37 }
 0x1b6   :  { %v2516_v63 = vmul.f32 %v2515_v54, %v2513_v56  ;;  %v2756_v51 = vadd.s32 %v2755_v12, %v2751_v62  ;;  %vm2260_vm1 = vcmp.lt.s32.totalorder %v2259_v24, 2  ;;  %v2266_v60 = vsel %vm2264_vm6, %v2265_v5, %v4448_v32 }
 0x1b7   :  { %vm2364_vm5 = vcmp.lt.s32.totalorder %v2363_v49, 2  ;;  %v2370_v26 = vsel %vm2368_vm14, %v2265_v5, %v4448_v32  ;;  %v2263_v47 = vsel %vm2261_vm13, %v4446_v41, %v2262_v50  ;;  %v2367_v16 = vsel %vm2365_vm15, %v4446_v41, %v2262_v50 }
 0x1b8   :  { %v2517_v31 = vxor.u32 2147483648, %v2516_v63  ;;  %v2757_v3 = vadd.s32 536870912, %v2756_v51  ;;  %v7850_v14 = vmov -1.0   ;;  %v2522_v15 = vsel %vm6333_vm0, 0, %v2520_v30  ;;  %v7853_v30 = vld [vmem:[#allocation14_spill] sm:$0xff] }
 0x1b9   :  { %v6348_v0 = vsel %vm2419_vm4, 1.0, %v7850_v14  ;;  %v2695_v25 = vmul.f32 0.5, %v6212_v27  ;;  %v6356_v35 = vand.u32 2147483647, %v2418_v7  ;;  %v2643_v17 = vrot.slane %v2432_v48, %v7803_v44 }
 0x1ba   :  { %v2518_v22 = vsel %vm2435_vm2, %v2517_v31, %v2516_v63  ;;  %7851 = vst [vmem:[#allocation22_spill] sm:$0xff] %v6348_v0  ;;  %v6359_v4 = vshrl.u32 %v2757_v3, 30  ;;  %v2267_v59 = vsel %vm2260_vm1, %v2263_v47, %v2266_v60  ;;  %v2371_v41 = vsel %vm2364_vm5, %v2367_v16, %v2370_v26 }
 0x1bb   :  { %v2521_v34 = vsel %vm6333_vm0, %v6136_v6, %v2518_v22  ;;  %v2648_v13 = vrot.slane %v2432_v48, %v7804_v33  ;;  %v6365_v42 = vrot.slane %v6348_v0, %v7803_v44  ;;  %v2629_v49 = vadd.s32 3, %v2522_v15 }
 0x1bc   :  { %4449 = vcosq.f32 %v2521_v34  ;;  %vm2686_vm10 = vcmp.ge.f32.partialorder %v6342_v58, 0.0  ;;  %v2759_v7 = vshll.u32 %v6359_v4, 30  ;;  %v6374_v32 = vrot.slane %v2695_v25, %v7801_v57 }
 0x1bd   :  { %4451 = vsinq.f32 %v2521_v34  ;;  %v2946_v48 = vrot.slane %v6212_v27, 1  ;;  %v2268_v56 = vsel %vm2258_vm11, nan, %v2267_v59  ;;  %v2372_v61 = vsel %vm2258_vm11, nan, %v2371_v41 }
 0x1be   :  { %v6381_v37 = vsub.s32 %v2756_v51, %v2759_v7  ;;  %v6384_v62 = vrot.slane %v2695_v25, %v7802_v11  ;;  %vm2525_vm4 = vweird.f32 %v6136_v6  ;;  %v2526_v5 = vand.u32 3, %v2522_v15  ;;  %v7855_v15 = vld [vmem:[#allocation5_spill] sm:$0xff] }
 0x1bf   :  { %v2644_v9 = vmul.f32 %v2643_v17, %v7844_v40  ;;  %v2649_v50 = vmul.f32 %v2648_v13, %v7845_v29  ;;  %v6390_v63 = vsel %vm2686_vm10, 1.0, %v7850_v14  ;;  %v2630_v2 = vand.u32 3, %v2629_v49 }
 0x1c0   :  { %7852 = vst [vmem:[#allocation21_spill] sm:$0xff] %v6390_v63  ;;  %v6393_v12 = vmul.f32 %v2643_v17, %v7846_v52  ;;  %v6396_v38 = vmul.f32 %v2648_v13, %v7847_v46  ;;  %v2762_v31 = vsub.s32 0, %v6381_v37  ;;  %v2386_v51 = vrot.slane %v2268_v56, %v7853_v30 }
 0x1c1   :  { %v2396_v60 = vrot.slane %v2372_v61, %v7853_v30  ;;  %v6403_v47 = vmul.f32 %v6212_v27, %v2946_v48  ;;  %v6407_v16 = vrot.slane %v6390_v63, %v7803_v44  ;;  %v6412_v3 = vmul.f32 %v6374_v32, %v7844_v40 }
 0x1c2   :  { %v4338_v22 = vmin.u32 %v2762_v31, %v6381_v37  ;;  %v6416_v34 = vmul.f32 %v6384_v62, %v7845_v29  ;;  %vm2527_vm11 = vcmp.lt.s32.totalorder %v2526_v5, 2  ;;  %vm2528_vm2 = vcmp.eq.s32.totalorder %v2526_v5, 0 }
 0x1c3   :  { %7854 = vst [vmem:[#allocation23_spill] sm:$0xff] %v6403_v47  ;;  %vm2531_vm3 = vcmp.eq.s32.totalorder %v2526_v5, 2  ;;  %v7856_v25 = vsub.s32 6, %v7855_v15  ;;  %vm2631_vm6 = vcmp.lt.s32.totalorder %v2630_v2, 2  ;;  %vm2632_vm14 = vcmp.eq.s32.totalorder %v2630_v2, 0 }
 0x1c4   :  { %vm2635_vm13 = vcmp.eq.s32.totalorder %v2630_v2, 2  ;;  %v2764_v41 = vclz %v4338_v22  ;;  %v2387_v40 = vmul.f32 %v2386_v51, %v6298_v36  ;;  %v2397_v49 = vmul.f32 %v2396_v60, %v6301_v18 }
 0x1c5   :  { %v6421_v17 = vrot.slane %v6318_v53, %v7856_v25  ;;  %v2399_v29 = vmul.f32 %v2396_v60, %v6298_v36  ;;  %vm2949_vm15 = vcmp.ge.f32.partialorder %v6403_v47, 0.0  ;;  %v2409_v48 = vmul.f32 %v6307_v55, %v2386_v51 }
 0x1c6   :  { %v4450_v59 = vpop.eup %4449  ;;  %v2410_v56 = vmul.f32 %v6316_v8, %v2396_v60  ;;  %v4339_v31 = vadd.s32 4294967294, %v2764_v41  ;;  %v2412_v25 = vmul.f32 %v6316_v8, %v2386_v51  ;;  %v2413_v22 = vmul.f32 %v6307_v55, %v2396_v60 }
 0x1c7   :  { %v4452_v13 = vpop.eup %4451  ;;  %v2532_v7 = vxor.u32 2147483648, %v4450_v59  ;;  %v2752_v24 = vadd.s32 %v6311_v10, %v6294_v43  ;;  %v2405_v54 = vmul.f32 %v2386_v51, %v6301_v18  ;;  %vm2698_vm1 = vcmp.lt.s32.totalorder %v6212_v27, 0 }
 0x1c8   :  { %v2529_v61 = vxor.u32 2147483648, %v4452_v13  ;;  %vm4340_vm0 = vcmp.lt.s32.totalorder %v4339_v31, 0  ;;  %v2392_v8 = vadd.f32 %v2391_v20, %v2387_v40  ;;  %v7857_v2 = vrot.slane %v6243_v28, %v7802_v11 }
 0x1c9   :  { %v2533_v23 = vsel %vm2531_vm3, %v2532_v7, %v4452_v13  ;;  %v2637_v26 = vsel %vm2635_vm13, %v2532_v7, %v4452_v13  ;;  %v2767_v55 = vsel %vm4340_vm0, 0, %v4339_v31  ;;  %v2411_v19 = vadd.f32 %v2410_v56, %v2409_v48 }
 0x1ca   :  { %v2530_v45 = vsel %vm2528_vm2, %v4450_v59, %v2529_v61  ;;  %v2634_v36 = vsel %vm2632_vm14, %v4450_v59, %v2529_v61  ;;  %v2768_v10 = vsub.s32 32, %v2767_v55  ;;  %v2772_v5 = vsub.s32 4294967266, %v2767_v55 }
 0x1cb   :  { %v2534_v21 = vsel %vm2527_vm11, %v2530_v45, %v2533_v23  ;;  %v2638_v41 = vsel %vm2631_vm6, %v2634_v36, %v2637_v26  ;;  %v2769_v45 = vshll.u32 %v6381_v37, %v2767_v55  ;;  %v2404_v51 = vsub.f32 %v7857_v2, %v2399_v29 }
 0x1cc   :  { %v2535_v60 = vsel %vm2525_vm4, nan, %v2534_v21  ;;  %v2639_v43 = vsel %vm2525_vm4, nan, %v2638_v41  ;;  %v2414_v20 = vsub.f32 %v2412_v25, %v2413_v22  ;;  %v2770_v26 = vshrl.u32 %v2752_v24, %v2768_v10 }
 0x1cd   :  { %v2653_v18 = vrot.slane %v2535_v60, %v7853_v30  ;;  %v2663_v23 = vrot.slane %v2639_v43, %v7853_v30  ;;  %v2782_v40 = vsub.s32 4, %v6359_v4  ;;  %v7858_v7 = vsub.s32 7, %v7855_v15 }
 0x1ce   :  { %v6461_v37 = vmul.f32 %v6374_v32, %v7846_v52  ;;  %v6465_v28 = vmul.f32 %v6384_v62, %v7847_v46  ;;  %v7859_v24 = vrot.slane %v6318_v53, %v7801_v57  ;;  %v2771_v15 = vor.u32 %v2770_v26, %v2769_v45 }
 0x1cf   :  { %v2654_v59 = vmul.f32 %v2653_v18, %v2644_v9  ;;  %v2664_v21 = vmul.f32 %v2663_v23, %v2649_v50  ;;  %v2666_v13 = vmul.f32 %v2663_v23, %v2644_v9  ;;  %v2672_v6 = vmul.f32 %v2653_v18, %v2649_v50 }
 0x1d0   :  { %v6457_v30 = vrot.slane %v6320_v1, %v7858_v7  ;;  %v7860_v50 = vrot.slane %v6320_v1, %v7802_v11  ;;  %v2773_v48 = vadd.s32 127, %v2772_v5  ;;  %v6473_v56 = vadd.f32 %v2397_v49, %v2392_v8 }
 0x1d1   :  { %v2659_v9 = vadd.f32 %v7859_v24, %v2654_v59  ;;  %v6475_v61 = vadd.f32 %v2405_v54, %v2404_v51  ;;  %v6478_v52 = vmul.f32 %v6365_v42, %v2411_v19  ;;  %v6483_v46 = vsel %vm2949_vm15, 1.0, %v7850_v14 }
 0x1d2   :  { %v2671_v29 = vsub.f32 %v7860_v50, %v2666_v13  ;;  %7861 = vst [vmem:[#allocation24_spill] sm:$0xff] %v6473_v56  ;;  %7864 = vst [vmem:[#allocation25_spill] sm:$0xff] %v6483_v46  ;;  %v6486_v53 = vmul.f32 %v6365_v42, %v2414_v20  ;;  %v7866_v62 = vand.u32 2147483647, %v6212_v27  ;;  %v2774_v49 = vshll.u32 %v2773_v48, 23 }
 0x1d3   :  { %7862 = vst [vmem:[#allocation34_spill] sm:$0xff] %v6475_v61  ;;  %7863 = vst [vmem:[#allocation35_spill] sm:$0xff] %v6478_v52  ;;  %v6488_v32 = vadd.f32 %v2664_v21, %v2659_v9  ;;  %v2676_v31 = vmul.f32 %v6393_v12, %v2653_v18  ;;  %v2778_v25 = vcvt.s32.f32 %v2771_v15  ;;  %v2783_v14 = vsel %vm2698_vm1, %v2782_v40, %v6359_v4 }
 0x1d4   :  { %7865 = vst [vmem:[#allocation26_spill] sm:$0xff] %v6486_v53  ;;  %v6490_v1 = vadd.f32 %v2672_v6, %v2671_v29  ;;  %vm6494_vm5 = vcmp.le.f32.partialorder %v7866_v62, 0.7853982  ;;  %v6504_v42 = vrot.slane %v6475_v61, %v7801_v57  ;;  %v2775_v22 = vor.u32 4788187, %v2774_v49 }
 0x1d5   :  { %v2967_v41 = vrot.slane %v6488_v32, %v7801_v57  ;;  %v2980_v8 = vrot.slane %v6488_v32, %v7802_v11  ;;  %v2993_v60 = vrot.slane %v6488_v32, %v7803_v44  ;;  %v2677_v51 = vmul.f32 %v6396_v38, %v2663_v23 }
 0x1d6   :  { %7869 = vst [vmem:[#allocation27_spill] sm:$0xff] %v6504_v42  ;;  %v2961_v36 = vrot.slane %v6490_v1, %v7801_v57  ;;  %v2974_v55 = vrot.slane %v6490_v1, %v7802_v11  ;;  %v2987_v4 = vrot.slane %v6490_v1, %v7803_v44  ;;  %v3000_v43 = vrot.slane %v6490_v1, %v7804_v33 }
 0x1d7   :  { %v2776_v10 = vand.u32 2147483647, %v2775_v22  ;;  %v2968_v5 = vsub.f32 %v2967_v41, %v6473_v56  ;;  %v2981_v19 = vsub.f32 %v2980_v8, %v6473_v56  ;;  %v2994_v26 = vsub.f32 %v2993_v60, %v6473_v56 }
 0x1d8   :  { %v2962_v45 = vsub.f32 %v2961_v36, %v6475_v61  ;;  %v2975_v2 = vsub.f32 %v2974_v55, %v6475_v61  ;;  %v2988_v20 = vsub.f32 %v2987_v4, %v6475_v61  ;;  %v2679_v59 = vmul.f32 %v6396_v38, %v2653_v18 }
 0x1d9   :  { %v2680_v21 = vmul.f32 %v6393_v12, %v2663_v23  ;;  %v2779_v13 = vmul.f32 %v2778_v25, %v2776_v10  ;;  %v3001_v6 = vsub.f32 %v3000_v43, %v6475_v61  ;;  %v2969_v7 = vmul.f32 %v2968_v5, %v6486_v53 }
 0x1da   :  { %v2963_v40 = vmul.f32 %v2962_v45, %v6478_v52  ;;  %v2976_v24 = vmul.f32 %v2975_v2, %v6478_v52  ;;  %v2982_v9 = vmul.f32 %v2981_v19, %v6486_v53  ;;  %v2989_v29 = vmul.f32 %v2988_v20, %v6478_v52 }
 0x1db   :  { %v2780_v50 = vxor.u32 2147483648, %v2779_v13  ;;  %v2995_v15 = vmul.f32 %v2994_v26, %v6486_v53  ;;  %v3006_v38 = vrot.slane %v6488_v32, %v7804_v33  ;;  %v6540_v12 = vrot.slane %v6473_v56, %v7801_v57 }
 0x1dc   :  { %v6544_v18 = vrot.slane %v6475_v61, %v7802_v11  ;;  %v6548_v23 = vrot.slane %v6473_v56, %v7802_v11  ;;  %v3333_v48 = vrot.slane %v6473_v56, 7  ;;  %v2785_v49 = vsel %vm6494_vm5, 0, %v2783_v14 }
 0x1dd   :  { %7870 = vst [vmem:[#allocation28_spill] sm:$0xff] %v6540_v12  ;;  %v2781_v62 = vsel %vm2698_vm1, %v2780_v50, %v2779_v13  ;;  %v3007_v25 = vsub.f32 %v3006_v38, %v6473_v56  ;;  %v3337_v22 = vrot.slane %v6475_v61, 7  ;;  %v2678_v36 = vadd.f32 %v2677_v51, %v2676_v31 }
 0x1de   :  { %7871 = vst [vmem:[#allocation29_spill] sm:$0xff] %v6544_v18  ;;  %7872 = vst [vmem:[#allocation30_spill] sm:$0xff] %v6548_v23  ;;  %v2681_v41 = vsub.f32 %v2679_v59, %v2680_v21  ;;  %v2784_v55 = vsel %vm6494_vm5, %v6212_v27, %v2781_v62  ;;  %v6560_v8 = vsub.f32 %v2963_v40, %v2969_v7  ;;  %v6591_v19 = vand.u32 3, %v2785_v49 }
 0x1df   :  { %v6562_v4 = vsub.f32 %v2976_v24, %v2982_v9  ;;  %v6564_v60 = vsub.f32 %v2989_v29, %v2995_v15  ;;  %v3002_v43 = vmul.f32 %v3001_v6, %v6478_v52  ;;  %v3008_v14 = vmul.f32 %v3007_v25, %v6486_v53 }
 0x1e0   :  { %4453 = vcosq.f32 %v2784_v55  ;;  %v6570_v10 = vrot.slane %v6475_v61, %v7803_v44  ;;  %v6574_v31 = vrot.slane %v6473_v56, %v7803_v44  ;;  %v6578_v54 = vrot.slane %v6475_v61, %v7804_v33 }
 0x1e1   :  { %4455 = vsinq.f32 %v2784_v55  ;;  %v6582_v45 = vrot.slane %v6473_v56, %v7804_v33  ;;  %v6585_v5 = vsub.f32 %v6473_v56, %v3333_v48  ;;  %v6588_v2 = vsub.f32 %v6475_v61, %v3337_v22 }
 0x1e2   :  { %7873 = vst [vmem:[#allocation31_spill] sm:$0xff] %v6570_v10  ;;  %7874 = vst [vmem:[#allocation18_spill] sm:$0xff] %v6574_v31  ;;  %v2693_v51 = vmul.f32 %v6407_v16, %v2678_v36  ;;  %v2892_v20 = vadd.s32 3, %v2785_v49  ;;  %v6595_v26 = vsub.f32 %v6560_v8, %v6562_v4  ;;  %v2694_v59 = vmul.f32 %v6407_v16, %v2681_v41 }
 0x1e3   :  { %7875 = vst [vmem:[#allocation32_spill] sm:$0xff] %v6578_v54  ;;  %7876 = vst [vmem:[#allocation33_spill] sm:$0xff] %v6582_v45  ;;  %v6598_v21 = vsub.f32 %v3002_v43, %v3008_v14  ;;  %v3014_v13 = vsub.f32 %v6504_v42, %v6490_v1  ;;  %v6604_v6 = vsub.f32 %v6562_v4, %v6564_v60  ;;  %v3507_v38 = vrot.slane %v6473_v56, 3 }
 0x1e4   :  { %v3020_v40 = vsub.f32 %v6540_v12, %v6488_v32  ;;  %v3027_v7 = vsub.f32 %v6544_v18, %v6490_v1  ;;  %v3033_v24 = vsub.f32 %v6548_v23, %v6488_v32  ;;  %vm3063_vm10 = vcmp.eq.f32.partialorder %v6595_v26, 0.0 }
 0x1e5   :  { %v3040_v16 = vsub.f32 %v6570_v10, %v6490_v1  ;;  %v3046_v9 = vsub.f32 %v6574_v31, %v6488_v32  ;;  %v3064_v50 = vsel %vm3063_vm10, 1.0, %v6595_v26  ;;  %vm3124_vm4 = vcmp.eq.f32.partialorder %v6604_v6, 0.0 }
 0x1e6   :  { %v6621_v29 = vand.u32 3, %v2892_v20  ;;  %v3053_v15 = vsub.f32 %v6578_v54, %v6490_v1  ;;  %4457 = vrcp.f32 %v3064_v50  ;;  %vm2791_vm11 = vcmp.eq.s32.totalorder %v6591_v19, 0 }
 0x1e7   :  { %vm2794_vm2 = vcmp.eq.s32.totalorder %v6591_v19, 2  ;;  %v3015_v48 = vmul.f32 %v3014_v13, %v2693_v51  ;;  %v3125_v62 = vsel %vm3124_vm4, 1.0, %v6604_v6  ;;  %v6633_v49 = vsub.f32 %v6564_v60, %v6598_v21 }
 0x1e8   :  { %v3510_v25 = vrot.slane %v6475_v61, 3  ;;  %v3021_v22 = vmul.f32 %v3020_v40, %v2694_v59  ;;  %v3028_v36 = vmul.f32 %v3027_v7, %v2693_v51  ;;  %v3059_v41 = vsub.f32 %v6582_v45, %v6488_v32 }
 0x1e9   :  { %v6640_v55 = vsub.f32 %v6598_v21, %v6560_v8  ;;  %v3034_v43 = vmul.f32 %v3033_v24, %v2694_v59  ;;  %v3041_v14 = vmul.f32 %v3040_v16, %v2693_v51  ;;  %v3047_v20 = vmul.f32 %v3046_v9, %v2694_v59 }
 0x1ea   :  { %vm3181_vm3 = vcmp.eq.f32.partialorder %v6633_v49, 0.0  ;;  %v4454_v13 = vpop.eup %4453  ;;  %vm2790_vm6 = vcmp.lt.s32.totalorder %v6591_v19, 2  ;;  %v3054_v50 = vmul.f32 %v3053_v15, %v2693_v51  ;;  %4459 = vrcp.f32 %v3125_v62 }
 0x1eb   :  { %v3182_v40 = vsel %vm3181_vm3, 1.0, %v6633_v49  ;;  %vm3238_vm14 = vcmp.eq.f32.partialorder %v6640_v55, 0.0  ;;  %v4456_v7 = vpop.eup %4455  ;;  %vm3068_vm15 = vcmp.lt.f32.partialorder %v6560_v8, 0.0  ;;  %v3091_v24 = vrot.slane %v6488_v32, 7 }
 0x1ec   :  { %4461 = vrcp.f32 %v3182_v40  ;;  %v3239_v16 = vsel %vm3238_vm14, 1.0, %v6640_v55  ;;  %v3060_v51 = vmul.f32 %v3059_v41, %v2694_v59  ;;  %v3095_v9 = vrot.slane %v6490_v1, 7  ;;  %vm3069_vm9 = vmand %vm3063_vm10, %vm3068_vm15 }
 0x1ed   :  { %vm3129_vm0 = vcmp.lt.f32.partialorder %v6562_v4, 0.0  ;;  %4463 = vrcp.f32 %v3239_v16  ;;  %vm2895_vm5 = vcmp.eq.s32.totalorder %v6621_v29, 0  ;;  %vm2898_vm8 = vcmp.eq.s32.totalorder %v6621_v29, 2 }
 0x1ee   :  { %v6660_v15 = vsub.f32 %v6473_v56, %v3507_v38  ;;  %v6663_v62 = vsub.f32 %v6475_v61, %v3510_v25  ;;  %v2792_v40 = vxor.u32 2147483648, %v4456_v7  ;;  %v2795_v47 = vxor.u32 2147483648, %v4454_v13  ;;  %vm3130_vm13 = vmand %vm3124_vm4, %vm3129_vm0 }
 0x1ef   :  { %v6665_v59 = vsub.f32 %v3015_v48, %v3021_v22  ;;  %vm3186_vm7 = vcmp.lt.f32.partialorder %v6564_v60, 0.0  ;;  %v6672_v41 = vsub.f32 %v3028_v36, %v3034_v43  ;;  %v6674_v16 = vsub.f32 %v3041_v14, %v3047_v20 }
 0x1f0   :  { %7877 = vst [vmem:[#allocation17_spill] sm:$0xff] %v6660_v15  ;;  %7878 = vst [vmem:[#allocation19_spill] sm:$0xff] %v6663_v62  ;;  %vm3067_vm1 = vcmp.lt.f32.partialorder %v6595_v26, 0.0  ;;  %vm3243_vm12 = vcmp.lt.f32.partialorder %v6598_v21, 0.0  ;;  %v4458_v38 = vpop.eup %4457  ;;  %v6682_v48 = vsub.f32 %v3054_v50, %v3060_v51  ;;  %vm3072_vm10 = vcmp.gt.f32.partialorder %v6595_v26, 0.0 }
 0x1f1   :  { %v6686_v25 = vsub.f32 %v6488_v32, %v3091_v24  ;;  %v6689_v22 = vsub.f32 %v6490_v1, %v3095_v9  ;;  %v3066_v36 = vmul.f32 %v4458_v38, %v6560_v8  ;;  %v3070_v43 = vsel %vm3069_vm9, 2.0, %v7794_v39  ;;  %vm3187_vm0 = vmand %vm3181_vm3, %vm3186_vm7 }
 0x1f2   :  { %vm3128_vm15 = vcmp.lt.f32.partialorder %v6604_v6, 0.0  ;;  %vm3133_vm4 = vcmp.gt.f32.partialorder %v6604_v6, 0.0  ;;  %v2793_v14 = vsel %vm2791_vm11, %v4454_v13, %v2792_v40  ;;  %v2796_v20 = vsel %vm2794_vm2, %v2795_v47, %v4456_v7  ;;  %vm3244_vm9 = vmand %vm3238_vm14, %vm3243_vm12 }
 0x1f3   :  { %v3131_v50 = vsel %vm3130_vm13, 2.0, %v7794_v39  ;;  %v3265_v8 = vrot.slane %v6488_v32, 3  ;;  %v2897_v24 = vsel %vm2895_vm5, %v4454_v13, %v2792_v40  ;;  %v2900_v51 = vsel %vm2898_vm8, %v2795_v47, %v4456_v7 }
 0x1f4   :  { %vm3185_vm7 = vcmp.lt.f32.partialorder %v6633_v49, 0.0  ;;  %vm3190_vm11 = vcmp.gt.f32.partialorder %v6633_v49, 0.0  ;;  %v4460_v9 = vpop.eup %4459  ;;  %v3071_v38 = vsel %vm3067_vm1, %v3066_v36, %v3070_v43  ;;  %v3073_v45 = vsel %vm3072_vm10, %v3066_v36, 1.0 }
 0x1f5   :  { %v3188_v54 = vsel %vm3187_vm0, 2.0, %v7794_v39  ;;  %vm3242_vm12 = vcmp.lt.f32.partialorder %v6640_v55, 0.0  ;;  %v2797_v13 = vsel %vm2790_vm6, %v2793_v14, %v2796_v20  ;;  %vm7879_vm8 = vcmask 396288  }
 0x1f6   :  { %v4462_v31 = vpop.eup %4461  ;;  %v3074_v47 = vsel %vm7879_vm8, %v3071_v38, -inf  ;;  %vm7880_vm2 = vmmov %vm7879_vm8  ;;  %v3245_v40 = vsel %vm3244_vm9, 2.0, %v7794_v39  ;;  %vm7881_vm3 = vcmp.lt.s32.totalorder %v6621_v29, 2  ;;  %vm3247_vm14 = vcmp.gt.f32.partialorder %v6640_v55, 0.0 }
 0x1f7   :  { %v3082_v7 = vsel %vm7880_vm2, %v3073_v45, inf  ;;  %v4464_v10 = vpop.eup %4463  ;;  %v2901_v43 = vsel %vm7881_vm3, %v2897_v24, %v2900_v51  ;;  %v3075_v26 = vrot.slane %v3074_v47, 4  ;;  %v6728_v0 = vsub.f32 %v6488_v32, %v3265_v8  ;;  %vm7883_vm13 = vmmov %vm7880_vm2 }
 0x1f8   :  { %v3083_v36 = vrot.slane %v3082_v7, 4  ;;  %v3127_v19 = vmul.f32 %v4460_v9, %v6562_v4  ;;  %v3184_v14 = vmul.f32 %v4462_v31, %v6564_v60  ;;  %v3268_v20 = vrot.slane %v6490_v1, 3  ;;  %vm7884_vm1 = vmmov %vm7880_vm2 }
 0x1f9   :  { %v6735_v45 = vsub.f32 %v6665_v59, %v6672_v41  ;;  %vm7882_vm6 = vweird.f32 %v6212_v27  ;;  %v3076_v24 = vmax.f32 %v3074_v47, %v3075_v26  ;;  %v3241_v38 = vmul.f32 %v4464_v10, %v6598_v21  ;;  %vm7885_vm5 = vmmov %vm7884_vm1 }
 0x1fa   :  { %v2798_v29 = vsel %vm7882_vm6, nan, %v2797_v13  ;;  %v3084_v51 = vmin.f32 %v3082_v7, %v3083_v36  ;;  %v3132_v8 = vsel %vm3128_vm15, %v3127_v19, %v3131_v50  ;;  %v3134_v4 = vsel %vm3133_vm4, %v3127_v19, 1.0  ;;  %vm7886_vm10 = vmmov %vm7884_vm1 }
 0x1fb   :  { %v3189_v60 = vsel %vm3185_vm7, %v3184_v14, %v3188_v54  ;;  %v3191_v31 = vsel %vm3190_vm11, %v3184_v14, 1.0  ;;  %v3077_v9 = vrot.slane %v3076_v24, 2  ;;  %v3135_v13 = vsel %vm7883_vm13, %v3132_v8, -inf  ;;  %vm7887_vm15 = vmmov %vm7882_vm6 }
 0x1fc   :  { %v3085_v63 = vrot.slane %v3084_v51, 2  ;;  %v3143_v47 = vsel %vm7884_vm1, %v3134_v4, inf  ;;  %v3136_v7 = vrot.slane %v3135_v13, 4  ;;  %v3192_v21 = vsel %vm7885_vm5, %v3189_v60, -inf  ;;  %vm7888_vm0 = vmmov %vm7884_vm1 }
 0x1fd   :  { %v3144_v10 = vrot.slane %v3143_v47, 4  ;;  %v3200_v50 = vsel %vm7886_vm10, %v3191_v31, inf  ;;  %v3078_v6 = vmax.f32 %v3076_v24, %v3077_v9  ;;  %v3193_v36 = vrot.slane %v3192_v21, 4  ;;  %vm7889_vm9 = vmmov %vm7888_vm0 }
 0x1fe   :  { %v3086_v26 = vmin.f32 %v3084_v51, %v3085_v63  ;;  %v3201_v19 = vrot.slane %v3200_v50, 4  ;;  %v2902_v54 = vsel %vm7887_vm15, nan, %v2901_v43  ;;  %v3137_v49 = vmax.f32 %v3135_v13, %v3136_v7  ;;  %vm7890_vm3 = vmmov %vm7888_vm0 }
 0x1ff   :  { %v3145_v14 = vmin.f32 %v3143_v47, %v3144_v10  ;;  %v6756_v8 = vsub.f32 %v6672_v41, %v6674_v16  ;;  %v3079_v4 = vrot.slane %v3078_v6, 1  ;;  %v3194_v18 = vmax.f32 %v3192_v21, %v3193_v36 }
 0x200   :  { %v3087_v23 = vrot.slane %v3086_v26, 1  ;;  %v3202_v12 = vmin.f32 %v3200_v50, %v3201_v19  ;;  %v3138_v60 = vrot.slane %v3137_v49, 2  ;;  %v3246_v63 = vsel %vm3242_vm12, %v3241_v38, %v3245_v40 }
 0x201   :  { %v3146_v42 = vrot.slane %v3145_v14, 2  ;;  %vm3305_vm4 = vcmp.eq.f32.partialorder %v6735_v45, 0.0  ;;  %v3080_v24 = vmax.f32 %v3078_v6, %v3079_v4  ;;  %v3195_v43 = vrot.slane %v3194_v18, 2 }
 0x202   :  { %v3088_v27 = vmin.f32 %v3086_v26, %v3087_v23  ;;  %v3203_v51 = vrot.slane %v3202_v12, 2  ;;  %v6762_v31 = vrot.slane %v2798_v29, %v7803_v44  ;;  %v3139_v9 = vmax.f32 %v3137_v49, %v3138_v60 }
 0x203   :  { %v3147_v13 = vmin.f32 %v3145_v14, %v3146_v42  ;;  %v3248_v47 = vsel %vm3247_vm14, %v3241_v38, 1.0  ;;  %v6766_v7 = vmax.f32 %v3080_v24, 0.0  ;;  %v3196_v21 = vmax.f32 %v3194_v18, %v3195_v43  ;;  %vm7891_vm14 = vmmov %vm7888_vm0 }
 0x204   :  { %v6768_v10 = vmin.f32 %v3088_v27, 1.0  ;;  %v3306_v40 = vsel %vm3305_vm4, 1.0, %v6735_v45  ;;  %v6774_v23 = vrot.slane %v2902_v54, %v7803_v44  ;;  %v3140_v50 = vrot.slane %v3139_v9, 1 }
 0x205   :  { %v3148_v29 = vrot.slane %v3147_v13, 1  ;;  %v3249_v6 = vsel %vm7888_vm0, %v3246_v63, -inf  ;;  %v3098_v42 = vmul.f32 %v6686_v25, %v6766_v7  ;;  %v3204_v38 = vmin.f32 %v3202_v12, %v3203_v51 }
 0x206   :  { %v3113_v55 = vmul.f32 %v6689_v22, %v6768_v10  ;;  %v3257_v18 = vsel %vm7889_vm9, %v3248_v47, inf  ;;  %vm3310_vm7 = vcmp.lt.f32.partialorder %v6665_v59, 0.0  ;;  %v3141_v26 = vmax.f32 %v3139_v9, %v3140_v50 }
 0x207   :  { %v3149_v36 = vmin.f32 %v3147_v13, %v3148_v29  ;;  %v3197_v19 = vrot.slane %v3196_v21, 1  ;;  %4465 = vrcp.f32 %v3306_v40  ;;  %v3103_v54 = vmul.f32 %v6689_v22, %v6766_v7  ;;  %vm3311_vm8 = vmand %vm3305_vm4, %vm3310_vm7 }
 0x208   :  { %v3108_v49 = vmul.f32 %v6686_v25, %v6768_v10  ;;  %v3250_v14 = vrot.slane %v3249_v6, 4  ;;  %v6788_v4 = vsub.f32 %v6490_v1, %v3268_v20  ;;  %v6790_v60 = vmax.f32 %v3141_v26, 0.0 }
 0x209   :  { %v6792_v12 = vmin.f32 %v3149_v36, 1.0  ;;  %v3198_v63 = vmax.f32 %v3196_v21, %v3197_v19  ;;  %v3258_v24 = vrot.slane %v3257_v18, 4  ;;  %v6796_v27 = vmul.f32 %v6762_v31, %v6412_v3 }
 0x20a   :  { %v3100_v43 = vrot.slane %v3098_v42, 1  ;;  %v3115_v51 = vrot.slane %v3113_v55, 1  ;;  %v3205_v9 = vrot.slane %v3204_v38, 1  ;;  %v3151_v13 = vmul.f32 %v6790_v60, %v6686_v25 }
 0x20b   :  { %v3156_v20 = vmul.f32 %v6790_v60, %v6689_v22  ;;  %v3161_v47 = vmul.f32 %v6792_v12, %v6686_v25  ;;  %v3166_v21 = vmul.f32 %v6792_v12, %v6689_v22  ;;  %vm3309_vm11 = vcmp.lt.f32.partialorder %v6735_v45, 0.0 }
 0x20c   :  { %v6809_v40 = vmul.f32 %v6774_v23, %v6416_v34  ;;  %v3105_v50 = vrot.slane %v3103_v54, 1  ;;  %v3110_v29 = vrot.slane %v3108_v49, 1  ;;  %v6811_v42 = vmax.f32 %v3198_v63, 0.0 }
 0x20d   :  { %vm3314_vm12 = vcmp.gt.f32.partialorder %v6735_v45, 0.0  ;;  %v3153_v55 = vrot.slane %v3151_v13, 1  ;;  %v3158_v26 = vrot.slane %v3156_v20, 1  ;;  %v3251_v36 = vmax.f32 %v3249_v6, %v3250_v14 }
 0x20e   :  { %v3259_v19 = vmin.f32 %v3257_v18, %v3258_v24  ;;  %v6816_v46 = vmul.f32 %v6774_v23, %v6412_v3  ;;  %v3163_v62 = vrot.slane %v3161_v47, 1  ;;  %v3168_v15 = vrot.slane %v3166_v21, 1 }
 0x20f   :  { %v3206_v53 = vmin.f32 %v3204_v38, %v3205_v9  ;;  %v6820_v33 = vmul.f32 %v6762_v31, %v6416_v34  ;;  %v3102_v54 = vadd.f32 %v3100_v43, %v6488_v32  ;;  %v3117_v49 = vadd.f32 %v3115_v51, %v6490_v1 }
 0x210   :  { %v3208_v63 = vmul.f32 %v6811_v42, %v6686_v25  ;;  %v3107_v6 = vadd.f32 %v3105_v50, %v6490_v1  ;;  %v3112_v18 = vadd.f32 %v3110_v29, %v6488_v32  ;;  %v3213_v38 = vmul.f32 %v6811_v42, %v6689_v22 }
 0x211   :  { %v6828_v3 = vmin.f32 %v3206_v53, 1.0  ;;  %v4466_v14 = vpop.eup %4465  ;;  %v3155_v34 = vadd.f32 %v3153_v55, %v6488_v32  ;;  %v3160_v24 = vadd.f32 %v3158_v26, %v6490_v1  ;;  %v3252_v43 = vrot.slane %v3251_v36, 2 }
 0x212   :  { %v3260_v9 = vrot.slane %v3259_v19, 2  ;;  %v3165_v51 = vadd.f32 %v3163_v62, %v6488_v32  ;;  %v3170_v53 = vadd.f32 %v3168_v15, %v6490_v1  ;;  %v3119_v47 = vmul.f32 %v3117_v49, %v3102_v54 }
 0x213   :  { %v3218_v13 = vmul.f32 %v6828_v3, %v6686_v25  ;;  %v3223_v20 = vmul.f32 %v6828_v3, %v6689_v22  ;;  %v3210_v21 = vrot.slane %v3208_v63, 1  ;;  %v3253_v50 = vmax.f32 %v3251_v36, %v3252_v43 }
 0x214   :  { %v3261_v29 = vmin.f32 %v3259_v19, %v3260_v9  ;;  %v3215_v55 = vrot.slane %v3213_v38, 1  ;;  %v3308_v52 = vmul.f32 %v4466_v14, %v6665_v59  ;;  %v3312_v44 = vsel %vm3311_vm8, 2.0, %v7794_v39 }
 0x215   :  { %v3220_v26 = vrot.slane %v3218_v13, 1  ;;  %v3120_v11 = vmul.f32 %v3112_v18, %v3107_v6  ;;  %v3225_v62 = vrot.slane %v3223_v20, 1  ;;  %v3254_v57 = vrot.slane %v3253_v50, 1 }
 0x216   :  { %v3262_v15 = vrot.slane %v3261_v29, 1  ;;  %v3172_v61 = vmul.f32 %v3170_v53, %v3155_v34  ;;  %v3173_v56 = vmul.f32 %v3165_v51, %v3160_v24  ;;  %v3313_v25 = vsel %vm3309_vm11, %v3308_v52, %v3312_v44  ;;  %vm7892_vm11 = vmmov %vm7890_vm3 }
 0x217   :  { %vm3366_vm2 = vcmp.eq.f32.partialorder %v6756_v8, 0.0  ;;  %v3255_v22 = vmax.f32 %v3253_v50, %v3254_v57  ;;  %v3315_v19 = vsel %vm3314_vm12, %v3308_v52, 1.0  ;;  %v3316_v54 = vsel %vm7890_vm3, %v3313_v25, -inf  ;;  %vm7893_vm12 = vmmov %vm7890_vm3 }
 0x218   :  { %v3263_v36 = vmin.f32 %v3261_v29, %v3262_v15  ;;  %v3212_v49 = vadd.f32 %v3210_v21, %v6488_v32  ;;  %v3217_v63 = vadd.f32 %v3215_v55, %v6490_v1  ;;  %v3222_v6 = vadd.f32 %v3220_v26, %v6488_v32 }
 0x219   :  { %v3317_v18 = vrot.slane %v3316_v54, 4  ;;  %v3227_v38 = vadd.f32 %v3225_v62, %v6490_v1  ;;  %v6856_v14 = vmax.f32 %v3255_v22, 0.0  ;;  %v3324_v44 = vsel %vm7891_vm14, %v3315_v19, inf }
 0x21a   :  { %v3367_v57 = vsel %vm3366_vm2, 1.0, %v6756_v8  ;;  %v6862_v52 = vmin.f32 %v3263_v36, 1.0  ;;  %v3325_v34 = vrot.slane %v3324_v44, 4  ;;  %v6866_v24 = vmul.f32 %v6461_v37, %v6762_v31 }
 0x21b   :  { %v3318_v45 = vmax.f32 %v3316_v54, %v3317_v18  ;;  %4467 = vrcp.f32 %v3367_v57  ;;  %v6870_v43 = vmul.f32 %v6465_v28, %v6774_v23  ;;  %v6874_v9 = vmul.f32 %v6465_v28, %v6762_v31 }
 0x21c   :  { %v3121_v51 = vsub.f32 %v3119_v47, %v3120_v11  ;;  %vm3118_vm6 = vcmp.lt.f32.partialorder %v6766_v7, %v6768_v10  ;;  %vm3171_vm13 = vcmp.lt.f32.partialorder %v6790_v60, %v6792_v12  ;;  %v3326_v13 = vmin.f32 %v3324_v44, %v3325_v34 }
 0x21d   :  { %v3319_v53 = vrot.slane %v3318_v45, 2  ;;  %v3174_v20 = vsub.f32 %v3172_v61, %v3173_v56  ;;  %v3229_v21 = vmul.f32 %v3227_v38, %v3212_v49  ;;  %v3230_v50 = vmul.f32 %v3222_v6, %v3217_v63 }
 0x21e   :  { %v3271_v29 = vmul.f32 %v6728_v0, %v6856_v14  ;;  %v3276_v55 = vmul.f32 %v6788_v4, %v6856_v14  ;;  %v3281_v11 = vmul.f32 %v6728_v0, %v6862_v52  ;;  %v3327_v31 = vrot.slane %v3326_v13, 2 }
 0x21f   :  { %v3320_v28 = vmax.f32 %v3318_v45, %v3319_v53  ;;  %v2922_v7 = vadd.f32 %v6421_v17, %v6796_v27  ;;  %v2934_v10 = vsub.f32 %v6457_v30, %v6816_v46  ;;  %v3122_v56 = vsel %vm3118_vm6, %v3121_v51, 0.0 }
 0x220   :  { %v3286_v61 = vmul.f32 %v6788_v4, %v6862_v52  ;;  %vm3228_vm1 = vcmp.lt.f32.partialorder %v6811_v42, %v6828_v3  ;;  %v3328_v26 = vmin.f32 %v3326_v13, %v3327_v31  ;;  %vm3371_vm5 = vcmp.lt.f32.partialorder %v6672_v41, 0.0 }
 0x221   :  { %v3321_v47 = vrot.slane %v3320_v28, 1  ;;  %v3175_v0 = vsel %vm3171_vm13, %v3174_v20, 0.0  ;;  %v3231_v62 = vsub.f32 %v3229_v21, %v3230_v50  ;;  %v3273_v17 = vrot.slane %v3271_v29, 5  ;;  %vm3372_vm10 = vmand %vm3366_vm2, %vm3371_vm5 }
 0x222   :  { %v6902_v30 = vsub.f32 %v6674_v16, %v6682_v48  ;;  %v3278_v46 = vrot.slane %v3276_v55, 5  ;;  %v3283_v4 = vrot.slane %v3281_v11, 5  ;;  %v3329_v15 = vrot.slane %v3328_v26, 1 }
 0x223   :  { %v3322_v27 = vmax.f32 %v3320_v28, %v3321_v47  ;;  %v3288_v25 = vrot.slane %v3286_v61, 5  ;;  %vm3370_vm15 = vcmp.lt.f32.partialorder %v6756_v8, 0.0  ;;  %v6908_v60 = vsub.f32 %v6682_v48, %v6665_v59 }
 0x224   :  { %vm3423_vm4 = vcmp.eq.f32.partialorder %v6902_v30, 0.0  ;;  %v3330_v22 = vmin.f32 %v3328_v26, %v3329_v15  ;;  %v3373_v36 = vsel %vm3372_vm10, 2.0, %v7794_v39  ;;  %vm3375_vm0 = vcmp.gt.f32.partialorder %v6756_v8, 0.0 }
 0x225   :  { %v4468_v12 = vpop.eup %4467  ;;  %v3424_v19 = vsel %vm3423_vm4, 1.0, %v6902_v30  ;;  %v6915_v54 = vmax.f32 %v3322_v27, 0.0  ;;  %vm3480_vm9 = vcmp.eq.f32.partialorder %v6908_v60, 0.0  ;;  %v3177_v63 = vrot.slane %v3175_v0, 1  ;;  %v7898_v27 = vld [vmem:[#allocation24_spill] sm:$0xff] }
 0x226   :  { %v3369_v49 = vmul.f32 %v4468_v12, %v6672_v41  ;;  %4469 = vrcp.f32 %v3424_v19  ;;  %v3232_v59 = vsel %vm3228_vm1, %v3231_v62, 0.0  ;;  %v3280_v6 = vadd.f32 %v3278_v46, %v6490_v1 }
 0x227   :  { %v6923_v18 = vmin.f32 %v3330_v22, 1.0  ;;  %v3285_v38 = vadd.f32 %v3283_v4, %v6488_v32  ;;  %vm3428_vm7 = vcmp.lt.f32.partialorder %v6674_v16, 0.0  ;;  %v6931_v41 = vmul.f32 %v6461_v37, %v6774_v23  ;;  %v7899_v22 = vld [vmem:[#allocation34_spill] sm:$0xff] }
 0x228   :  { %v3374_v44 = vsel %vm3370_vm15, %v3369_v49, %v3373_v36  ;;  %v3376_v57 = vsel %vm3375_vm0, %v3369_v49, 1.0  ;;  %v3275_v45 = vadd.f32 %v3273_v17, %v6488_v32  ;;  %v3290_v42 = vadd.f32 %v3288_v25, %v6490_v1  ;;  %vm3429_vm8 = vmand %vm3423_vm4, %vm3428_vm7 }
 0x229   :  { %v3481_v3 = vsel %vm3480_vm9, 1.0, %v6908_v60  ;;  %v6939_v34 = vadd.f32 %v6809_v40, %v2922_v7  ;;  %v3340_v8 = vmul.f32 %v6585_v5, %v6915_v54  ;;  %v3377_v51 = vsel %vm7892_vm11, %v3374_v44, -inf  ;;  %vm7900_vm15 = vmmov %vm7892_vm11 }
 0x22a   :  { %v3385_v53 = vsel %vm7893_vm12, %v3376_v57, inf  ;;  %v6946_v37 = vadd.f32 %v6820_v33, %v2934_v10  ;;  %v3179_v32 = vadd.f32 %v3177_v63, %v3122_v56  ;;  %v3234_v23 = vrot.slane %v3232_v59, 2  ;;  %vm7901_vm4 = vmmov %vm7892_vm11 }
 0x22b   :  { %v3355_v1 = vmul.f32 %v6588_v2, %v6923_v18  ;;  %v3293_v40 = vmul.f32 %v3285_v38, %v3280_v6  ;;  %v3378_v13 = vrot.slane %v3377_v51, 4  ;;  %v3386_v20 = vrot.slane %v3385_v53, 4  ;;  %vm7903_vm11 = vmmov %vm7901_vm4 }
 0x22c   :  { %4471 = vrcp.f32 %v3481_v3  ;;  %v3292_v21 = vmul.f32 %v3290_v42, %v3275_v45  ;;  %v3345_v50 = vmul.f32 %v6588_v2, %v6915_v54  ;;  %vm3427_vm2 = vcmp.lt.f32.partialorder %v6902_v30, 0.0 }
 0x22d   :  { %vm3432_vm3 = vcmp.gt.f32.partialorder %v6902_v30, 0.0  ;;  %v3342_v33 = vrot.slane %v3340_v8, 1  ;;  %v3379_v29 = vmax.f32 %v3377_v51, %v3378_v13  ;;  %v3387_v55 = vmin.f32 %v3385_v53, %v3386_v20 }
 0x22e   :  { %v3430_v11 = vsel %vm3429_vm8, 2.0, %v7794_v39  ;;  %v3350_v28 = vmul.f32 %v6585_v5, %v6923_v18  ;;  %v3357_v31 = vrot.slane %v3355_v1, 1  ;;  %vm3485_vm14 = vcmp.lt.f32.partialorder %v6682_v48, 0.0 }
 0x22f   :  { %v7894_v7 = vand.u32 2147483647, %v6342_v58  ;;  %v3380_v61 = vrot.slane %v3379_v29, 2  ;;  %v3388_v47 = vrot.slane %v3387_v55, 2  ;;  %vm3555_vm13 = vcmp.gt.f32.partialorder %v6356_v35, 0.0  ;;  %vm3486_vm10 = vmand %vm3480_vm9, %vm3485_vm14 }
 0x230   :  { %v4470_v56 = vpop.eup %4469  ;;  %v6968_v0 = vadd.f32 %v3234_v23, %v3179_v32  ;;  %vm3291_vm1 = vcmp.lt.f32.partialorder %v6856_v14, %v6862_v52  ;;  %v3347_v62 = vrot.slane %v3345_v50, 1  ;;  %v3294_v4 = vsub.f32 %v3292_v21, %v3293_v40  ;;  %vm7902_vm9 = vmmov %vm7901_vm4 }
 0x231   :  { %v6963_v10 = vadd.f32 %v7894_v7, %v6356_v35  ;;  %v7895_v26 = vmov %v7894_v7  ;;  %v3426_v17 = vmul.f32 %v4470_v56, %v6674_v16  ;;  %v3344_v58 = vadd.f32 %v3342_v33, %v7898_v27 }
 0x232   :  { %vm3554_vm6 = vcmp.gt.f32.partialorder %v7895_v26, 0.0  ;;  %v3381_v15 = vmax.f32 %v3379_v29, %v3380_v61  ;;  %v3389_v25 = vmin.f32 %v3387_v55, %v3388_v47  ;;  %v3352_v12 = vrot.slane %v3350_v28, 1 }
 0x233   :  { %vm6975_vm5 = vmand %vm3554_vm6, %vm3555_vm13  ;;  %v3359_v36 = vadd.f32 %v3357_v31, %v7899_v22  ;;  %v3431_v19 = vsel %vm3427_vm2, %v3426_v17, %v3430_v11  ;;  %v3433_v16 = vsel %vm3432_vm3, %v3426_v17, 1.0  ;;  %v3349_v38 = vadd.f32 %v3347_v62, %v7899_v22 }
 0x234   :  { %v3382_v49 = vrot.slane %v3381_v15, 1  ;;  %v3390_v63 = vrot.slane %v3389_v25, 1  ;;  %v3434_v59 = vsel %vm7900_vm15, %v3431_v19, -inf  ;;  %v3442_v6 = vsel %vm7901_vm4, %v3433_v16, inf }
 0x235   :  { %v3435_v44 = vrot.slane %v3434_v59, 4  ;;  %v3443_v57 = vrot.slane %v3442_v6, 4  ;;  %vm3484_vm0 = vcmp.lt.f32.partialorder %v6908_v60, 0.0  ;;  %v3487_v3 = vsel %vm3486_vm10, 2.0, %v7794_v39 }
 0x236   :  { %v4472_v45 = vpop.eup %4471  ;;  %v3383_v30 = vmax.f32 %v3381_v15, %v3382_v49  ;;  %v3391_v42 = vmin.f32 %v3389_v25, %v3390_v63  ;;  %vm3489_vm7 = vcmp.gt.f32.partialorder %v6908_v60, 0.0  ;;  %v3354_v8 = vadd.f32 %v3352_v12, %v7898_v27  ;;  %v7904_v63 = vld [vmem:[#allocation15_spill] sm:$0xff] }
 0x237   :  { %v3436_v51 = vmax.f32 %v3434_v59, %v3435_v44  ;;  %v3444_v53 = vmin.f32 %v3442_v6, %v3443_v57  ;;  %v3483_v32 = vmul.f32 %v4472_v45, %v6682_v48  ;;  %v7000_v23 = vsel %vm3291_vm1, %v3294_v4, 0.0 }
 0x238   :  { %v3361_v1 = vmul.f32 %v3359_v36, %v3344_v58  ;;  %v7002_v40 = vmax.f32 %v3383_v30, 0.0  ;;  %v7004_v13 = vmin.f32 %v3391_v42, 1.0  ;;  %v3362_v55 = vmul.f32 %v3354_v8, %v3349_v38 }
 0x239   :  { %v3437_v20 = vrot.slane %v3436_v51, 2  ;;  %v3445_v21 = vrot.slane %v3444_v53, 2  ;;  %v3488_v50 = vsel %vm3484_vm0, %v3483_v32, %v3487_v3  ;;  %v3490_v33 = vsel %vm3489_vm7, %v3483_v32, 1.0  ;;  %v7905_v3 = vld [vmem:[#allocation16_spill] sm:$0xff] }
 0x23a   :  { %v3393_v29 = vmul.f32 %v7002_v40, %v6585_v5  ;;  %v3398_v48 = vmul.f32 %v7002_v40, %v6588_v2  ;;  %v3403_v14 = vmul.f32 %v7004_v13, %v6585_v5  ;;  %v3408_v52 = vmul.f32 %v7004_v13, %v6588_v2 }
 0x23b   :  { %v3438_v11 = vmax.f32 %v3436_v51, %v3437_v20  ;;  %v3446_v28 = vmin.f32 %v3444_v53, %v3445_v21  ;;  %v3491_v31 = vsel %vm7902_vm9, %v3488_v50, -inf  ;;  %v3499_v17 = vsel %vm7903_vm11, %v3490_v33, inf }
 0x23c   :  { %v3395_v60 = vrot.slane %v3393_v29, 1  ;;  %v3400_v7 = vrot.slane %v3398_v48, 1  ;;  %v3405_v56 = vrot.slane %v3403_v14, 1  ;;  %v3410_v61 = vrot.slane %v3408_v52, 1 }
 0x23d   :  { %v3439_v47 = vrot.slane %v3438_v11, 1  ;;  %v3447_v26 = vrot.slane %v3446_v28, 1  ;;  %v3492_v62 = vrot.slane %v3491_v31, 4  ;;  %v3500_v16 = vrot.slane %v3499_v17, 4 }
 0x23e   :  { %v3397_v4 = vadd.f32 %v3395_v60, %v7898_v27  ;;  %v3402_v58 = vadd.f32 %v3400_v7, %v7899_v22  ;;  %v3407_v15 = vadd.f32 %v3405_v56, %v7898_v27  ;;  %v3412_v25 = vadd.f32 %v3410_v61, %v7899_v22 }
 0x23f   :  { %v3440_v12 = vmax.f32 %v3438_v11, %v3439_v47  ;;  %v3448_v36 = vmin.f32 %v3446_v28, %v3447_v26  ;;  %v3493_v19 = vmax.f32 %v3491_v31, %v3492_v62  ;;  %vm3360_vm12 = vcmp.lt.f32.partialorder %v6915_v54, %v6923_v18  ;;  %v7906_v26 = vld [vmem:[#allocation7_spill] sm:$0xff] }
 0x240   :  { %v3363_v49 = vsub.f32 %v3361_v1, %v3362_v55  ;;  %v3563_v59 = vrot.slane %v6946_v37, %v7904_v63  ;;  %v3569_v6 = vrot.slane %v6939_v34, %v7904_v63  ;;  %v3501_v45 = vmin.f32 %v3499_v17, %v3500_v16 }
 0x241   :  { %v7028_v38 = vmax.f32 %v3440_v12, 0.0  ;;  %v7030_v44 = vmin.f32 %v3448_v36, 1.0  ;;  %v3494_v57 = vrot.slane %v3493_v19, 2  ;;  %v3414_v30 = vmul.f32 %v3412_v25, %v3397_v4  ;;  %v7907_v4 = vld [vmem:[#allocation35_spill] sm:$0xff]  ;;  %v7908_v25 = vld [vmem:[#allocation10_spill] sm:$0xff] }
 0x242   :  { %v3415_v42 = vmul.f32 %v3407_v15, %v3402_v58  ;;  %v3576_v8 = vrot.slane %v6946_v37, %v7905_v3  ;;  %v3582_v51 = vrot.slane %v6939_v34, %v7905_v3  ;;  %v7047_v21 = vsel %vm3360_vm12, %v3363_v49, 0.0  ;;  %v7910_v3 = vld [vmem:[#allocation17_spill] sm:$0xff] }
 0x243   :  { %v3450_v53 = vmul.f32 %v7028_v38, %v6585_v5  ;;  %v3455_v32 = vmul.f32 %v7028_v38, %v6588_v2  ;;  %v3460_v1 = vmul.f32 %v7030_v44, %v6585_v5  ;;  %v3465_v20 = vmul.f32 %v7030_v44, %v6588_v2 }
 0x244   :  { %v3495_v50 = vmax.f32 %v3493_v19, %v3494_v57  ;;  %v3502_v33 = vrot.slane %v3501_v45, 2  ;;  %v3564_v29 = vsub.f32 %v3563_v59, %v7899_v22  ;;  %v3570_v55 = vsub.f32 %v3569_v6, %v7898_v27  ;;  %v7909_v6 = vld [vmem:[#allocation26_spill] sm:$0xff] }
 0x245   :  { %v3452_v48 = vrot.slane %v3450_v53, 1  ;;  %v3457_v14 = vrot.slane %v3455_v32, 1  ;;  %v3462_v52 = vrot.slane %v3460_v1, 1  ;;  %vm3413_vm8 = vcmp.lt.f32.partialorder %v7002_v40, %v7004_v13  ;;  %v7911_v32 = vld [vmem:[#allocation19_spill] sm:$0xff] }
 0x246   :  { %v3467_v11 = vrot.slane %v3465_v20, 1  ;;  %v3496_v28 = vrot.slane %v3495_v50, 1  ;;  %v3503_v31 = vmin.f32 %v3501_v45, %v3502_v33  ;;  %v3416_v60 = vsub.f32 %v3414_v30, %v3415_v42 }
 0x247   :  { %v3454_v54 = vadd.f32 %v3452_v48, %v7898_v27  ;;  %v3459_v18 = vadd.f32 %v3457_v14, %v7899_v22  ;;  %v3464_v7 = vadd.f32 %v3462_v52, %v7898_v27  ;;  %v3589_v62 = vrot.slane %v6946_v37, %v7906_v26 }
 0x248   :  { %v3469_v56 = vadd.f32 %v3467_v11, %v7899_v22  ;;  %v3497_v61 = vmax.f32 %v3495_v50, %v3496_v28  ;;  %v3504_v47 = vrot.slane %v3503_v31, 1  ;;  %v3565_v58 = vmul.f32 %v3564_v29, %v7907_v4 }
 0x249   :  { %v3472_v17 = vmul.f32 %v3464_v7, %v3459_v18  ;;  %v3595_v15 = vrot.slane %v6939_v34, %v7906_v26  ;;  %v3602_v12 = vrot.slane %v6946_v37, %v7908_v25  ;;  %v3608_v49 = vrot.slane %v6939_v34, %v7908_v25 }
 0x24a   :  { %v3471_v36 = vmul.f32 %v3469_v56, %v3454_v54  ;;  %v3498_v19 = vmax.f32 %v3497_v61, 0.0  ;;  %v3505_v16 = vmin.f32 %v3503_v31, %v3504_v47  ;;  %v3417_v59 = vsel %vm3413_vm8, %v3416_v60, 0.0 }
 0x24b   :  { %v3571_v57 = vmul.f32 %v3570_v55, %v7909_v6  ;;  %v3577_v45 = vsub.f32 %v3576_v8, %v7899_v22  ;;  %v3583_v30 = vsub.f32 %v3582_v51, %v7898_v27  ;;  %v3590_v20 = vsub.f32 %v3589_v62, %v7899_v22 }
 0x24c   :  { %v3506_v42 = vmin.f32 %v3505_v16, 1.0  ;;  %v3513_v53 = vmul.f32 %v7910_v3, %v3498_v19  ;;  %v3518_v1 = vmul.f32 %v7911_v32, %v3498_v19  ;;  %vm3470_vm2 = vcmp.lt.f32.partialorder %v7028_v38, %v7030_v44  ;;  %v7912_v38 = vld [vmem:[#allocation25_spill] sm:$0xff] }
 0x24d   :  { %v3473_v50 = vsub.f32 %v3471_v36, %v3472_v17  ;;  %v3596_v40 = vsub.f32 %v3595_v15, %v7898_v27  ;;  %v3603_v13 = vsub.f32 %v3602_v12, %v7899_v22  ;;  %v3609_v51 = vsub.f32 %v3608_v49, %v7898_v27 }
 0x24e   :  { %v3515_v33 = vrot.slane %v3513_v53, 5  ;;  %v3520_v29 = vrot.slane %v3518_v1, 5  ;;  %v3523_v8 = vmul.f32 %v7910_v3, %v3506_v42  ;;  %v3528_v48 = vmul.f32 %v7911_v32, %v3506_v42  ;;  %v7914_v53 = vld [vmem:[#allocation28_spill] sm:$0xff] }
 0x24f   :  { %v7082_v14 = vsub.f32 %v3565_v58, %v3571_v57  ;;  %v3578_v52 = vmul.f32 %v3577_v45, %v7907_v4  ;;  %v3584_v55 = vmul.f32 %v3583_v30, %v7909_v6  ;;  %v3419_v11 = vrot.slane %v3417_v59, 1 }
 0x250   :  { %v3522_v28 = vadd.f32 %v3520_v29, %v7899_v22  ;;  %v3525_v31 = vrot.slane %v3523_v8, 5  ;;  %v3591_v60 = vmul.f32 %v3590_v20, %v7907_v4  ;;  %v3474_v54 = vsel %vm3470_vm2, %v3473_v50, 0.0  ;;  %v7916_v29 = vld [vmem:[#allocation30_spill] sm:$0xff] }
 0x251   :  { %v3517_v18 = vadd.f32 %v3515_v33, %v7898_v27  ;;  %v3530_v7 = vrot.slane %v3528_v48, 5  ;;  %v3597_v56 = vmul.f32 %v3596_v40, %v7909_v6  ;;  %v3297_v61 = vrot.slane %v7000_v23, 3  ;;  %v7915_v40 = vld [vmem:[#allocation29_spill] sm:$0xff] }
 0x252   :  { %v3527_v47 = vadd.f32 %v3525_v31, %v7898_v27  ;;  %v3604_v26 = vmul.f32 %v3603_v13, %v7907_v4  ;;  %v3610_v62 = vmul.f32 %v3609_v51, %v7909_v6  ;;  %v7098_v58 = vsub.f32 %v3578_v52, %v3584_v55  ;;  %v7917_v48 = vld [vmem:[#allocation21_spill] sm:$0xff]  ;;  %v7918_v31 = vld [vmem:[#allocation22_spill] sm:$0xff] }
 0x253   :  { %v3532_v17 = vadd.f32 %v3530_v7, %v7899_v22  ;;  %v2955_v44 = vrot.slane %v7912_v38, %v7904_v63  ;;  %v3421_v15 = vadd.f32 %v3419_v11, %v7047_v21  ;;  %v3476_v25 = vrot.slane %v3474_v54, 2  ;;  %v7919_v54 = vld [vmem:[#allocation31_spill] sm:$0xff] }
 0x254   :  { %v3535_v12 = vmul.f32 %v3527_v47, %v3522_v28  ;;  %v2941_v23 = vadd.f32 %v6870_v43, %v6866_v24  ;;  %v7105_v16 = vsub.f32 %v3591_v60, %v3597_v56  ;;  %v3632_v4 = vsub.f32 %v7082_v14, %v7098_v58 }
 0x255   :  { %v3534_v36 = vmul.f32 %v3532_v17, %v3517_v18  ;;  %v2944_v49 = vsub.f32 %v6874_v9, %v6931_v41  ;;  %v3299_v59 = vadd.f32 %v3297_v61, %v6968_v0  ;;  %vm3533_vm3 = vcmp.lt.f32.partialorder %v3498_v19, %v3506_v42  ;;  %v7913_v19 = vld [vmem:[#allocation27_spill] sm:$0xff] }
 0x256   :  { %v7112_v63 = vsub.f32 %v3604_v26, %v3610_v62  ;;  %vm3633_vm14 = vcmp.eq.f32.partialorder %v3632_v4, 0.0  ;;  %v3478_v6 = vadd.f32 %v3476_v25, %v3421_v15  ;;  %v7115_v24 = vmul.f32 %v2955_v44, %v2941_v23 }
 0x257   :  { %v3536_v21 = vsub.f32 %v3534_v36, %v3535_v12  ;;  %v3634_v57 = vsel %vm3633_vm14, 1.0, %v3632_v4  ;;  %v7119_v45 = vsub.f32 %v7098_v58, %v7105_v16  ;;  %v7121_v30 = vmul.f32 %v2955_v44, %v2944_v49  ;;  %v7922_v12 = vld [vmem:[#allocation18_spill] sm:$0xff] }
 0x258   :  { %4473 = vrcp.f32 %v3634_v57  ;;  %v3301_v9 = vrot.slane %v3299_v59, 6  ;;  %v7125_v0 = vsub.f32 %v7105_v16, %v7112_v63  ;;  %v3612_v42 = vsub.f32 %v7913_v19, %v6946_v37 }
 0x259   :  { %v3537_v43 = vsel %vm3533_vm3, %v3536_v21, 0.0  ;;  %v3614_v1 = vsub.f32 %v7914_v53, %v6939_v34  ;;  %vm3694_vm6 = vcmp.eq.f32.partialorder %v7119_v45, 0.0  ;;  %v7134_v20 = vsub.f32 %v7112_v63, %v7082_v14 }
 0x25a   :  { %v3539_v41 = vrot.slane %v3537_v43, 3  ;;  %v3617_v13 = vsub.f32 %v7915_v40, %v6946_v37  ;;  %v3695_v33 = vsel %vm3694_vm6, 1.0, %v7119_v45  ;;  %vm3751_vm1 = vcmp.eq.f32.partialorder %v7125_v0, 0.0 }
 0x25b   :  { %v3619_v8 = vsub.f32 %v7916_v29, %v6939_v34  ;;  %vm3638_vm10 = vcmp.lt.f32.partialorder %v7082_v14, 0.0  ;;  %4475 = vrcp.f32 %v3695_v33  ;;  %v3752_v51 = vsel %vm3751_vm1, 1.0, %v7125_v0 }
 0x25c   :  { %v3541_v50 = vadd.f32 %v3539_v41, %v3478_v6  ;;  %v3303_v52 = vmul.f32 %v3301_v9, %v7917_v48  ;;  %4477 = vrcp.f32 %v3752_v51  ;;  %v3613_v11 = vmul.f32 %v3612_v42, %v7115_v24  ;;  %vm3639_vm4 = vmand %vm3633_vm14, %vm3638_vm10 }
 0x25d   :  { %v3615_v28 = vmul.f32 %v3614_v1, %v7121_v30  ;;  %vm3808_vm15 = vcmp.eq.f32.partialorder %v7134_v20, 0.0  ;;  %v3622_v18 = vsub.f32 %v7919_v54, %v6946_v37  ;;  %vm3699_vm0 = vcmp.lt.f32.partialorder %v7098_v58, 0.0 }
 0x25e   :  { %v3543_v55 = vrot.slane %v3541_v50, 6  ;;  %v3618_v7 = vmul.f32 %v3617_v13, %v7115_v24  ;;  %v3620_v56 = vmul.f32 %v3619_v8, %v7121_v30  ;;  %vm3756_vm7 = vcmp.lt.f32.partialorder %v7105_v16, 0.0  ;;  %vm7168_vm12 = vmand %vm3694_vm6, %vm3699_vm0 }
 0x25f   :  { %v3809_v47 = vsel %vm3808_vm15, 1.0, %v7134_v20  ;;  %v7163_v62 = vsub.f32 %v3613_v11, %v3615_v28  ;;  %vm3637_vm9 = vcmp.lt.f32.partialorder %v3632_v4, 0.0  ;;  %v3640_v17 = vsel %vm3639_vm4, 2.0, %v7794_v39  ;;  %vm3757_vm8 = vmand %vm3751_vm1, %vm3756_vm7 }
 0x260   :  { %v3545_v60 = vmul.f32 %v3543_v55, %v7918_v31  ;;  %vm3642_vm11 = vcmp.gt.f32.partialorder %v3632_v4, 0.0  ;;  %v3623_v25 = vmul.f32 %v3622_v18, %v7115_v24  ;;  %v3624_v23 = vsub.f32 %v7922_v12, %v6939_v34 }
 0x261   :  { %v7180_v49 = vsub.f32 %v3618_v7, %v3620_v56  ;;  %vm3698_vm2 = vcmp.lt.f32.partialorder %v7119_v45, 0.0  ;;  %vm3703_vm3 = vcmp.gt.f32.partialorder %v7119_v45, 0.0  ;;  %4479 = vrcp.f32 %v3809_v47 }
 0x262   :  { %v3546_v61 = vadd.f32 %v3545_v60, %v3303_v52  ;;  %v4474_v26 = vpop.eup %4473  ;;  %vm3755_vm14 = vcmp.lt.f32.partialorder %v7125_v0, 0.0  ;;  %vm7923_vm6 = vcmask 396288   ;;  %v3701_v43 = vsel %vm7168_vm12, 2.0, %v7794_v39 }
 0x263   :  { %v3636_v36 = vmul.f32 %v4474_v26, %v7082_v14  ;;  %vm7924_vm10 = vmmov %vm7923_vm6  ;;  %v3758_v9 = vsel %vm3757_vm8, 2.0, %v7794_v39  ;;  %v3625_v50 = vmul.f32 %v3624_v23, %v7121_v30  ;;  %vm3760_vm1 = vcmp.gt.f32.partialorder %v7125_v0, 0.0  ;;  %v7931_v26 = vld [vmem:[#allocation32_spill] sm:$0xff]  ;;  %v7932_v23 = vld [vmem:[#allocation33_spill] sm:$0xff] }
 0x264   :  { %v7172_v15 = vmul.f32 0.5, %v3546_v61  ;;  %v7201_v13 = vsub.f32 %v7163_v62, %v7180_v49  ;;  %vm7927_vm7 = vmmov %vm7923_vm6 }
 0x265   :  { %v3641_v59 = vsel %vm3637_vm9, %v3636_v36, %v3640_v17  ;;  %v3643_v21 = vsel %vm3642_vm11, %v3636_v36, 1.0  ;;  %v4476_v6 = vpop.eup %4475  ;;  %vm7928_vm9 = vmmov %vm7923_vm6  ;;  %vm3813_vm11 = vcmp.lt.f32.partialorder %v7112_v63, 0.0  ;;  %v3627_v17 = vsub.f32 %v7931_v26, %v6946_v37 }
 0x266   :  { %v3548_v4 = vmax.f32 %v7172_v15, 0.0  ;;  %v3644_v57 = vsel %vm7923_vm6, %v3641_v59, -inf  ;;  %v3652_v14 = vsel %vm7924_vm10, %v3643_v21, inf  ;;  %v4478_v41 = vpop.eup %4477  ;;  %v3697_v1 = vmul.f32 %v4476_v6, %v7098_v58 }
 0x267   :  { %v3645_v42 = vrot.slane %v3644_v57, 4  ;;  %v3653_v53 = vrot.slane %v3652_v14, 4  ;;  %v3754_v40 = vmul.f32 %v4478_v41, %v7105_v16  ;;  %vm3872_vm12 = vcmp.eq.f32.partialorder %v7201_v13, 0.0 }
 0x268   :  { %v3550_v19 = vsub.f32 %v6963_v10, %v3548_v4  ;;  %v3702_v10 = vsel %vm3698_vm2, %v3697_v1, %v3701_v43  ;;  %v3704_v16 = vsel %vm3703_vm3, %v3697_v1, 1.0  ;;  %vm3814_vm2 = vmand %vm3808_vm15, %vm3813_vm11  ;;  %v7227_v12 = vsub.f32 %v3623_v25, %v3625_v50 }
 0x269   :  { %v3646_v33 = vmax.f32 %v3644_v57, %v3645_v42  ;;  %v3654_v29 = vmin.f32 %v3652_v14, %v3653_v53  ;;  %v3705_v51 = vsel %vm7927_vm7, %v3702_v10, -inf  ;;  %v3759_v48 = vsel %vm3755_vm14, %v3754_v40, %v3758_v9 }
 0x26a   :  { %vm3551_vm4 = vcmp.gt.f32.partialorder %v3550_v19, 0.0  ;;  %v3706_v11 = vrot.slane %v3705_v51, 4  ;;  %v3713_v28 = vsel %vm7928_vm9, %v3704_v16, inf  ;;  %v3761_v46 = vsel %vm3760_vm1, %v3754_v40, 1.0 }
 0x26b   :  { %v3552_v8 = vsel %vm3551_vm4, %v3550_v19, 1.0  ;;  %vm7207_vm0 = vmand %vm6975_vm5, %vm3551_vm4  ;;  %v3647_v52 = vrot.slane %v3646_v33, 2  ;;  %v3655_v55 = vrot.slane %v3654_v29, 2  ;;  %v3714_v18 = vrot.slane %v3713_v28, 4  ;;  %v4480_v7 = vpop.eup %4479  ;;  %v7933_v19 = vld [vmem:[#allocation23_spill] sm:$0xff] }
 0x26c   :  { %4481 = vrcp.f32 %v3552_v8  ;;  %vm7929_vm5 = vmmov %vm7923_vm6  ;;  %v3707_v54 = vmax.f32 %v3705_v51, %v3706_v11  ;;  %v3629_v36 = vsub.f32 %v7932_v23, %v6939_v34  ;;  %v3873_v21 = vsel %vm3872_vm12, 1.0, %v7201_v13 }
 0x26d   :  { %v3762_v60 = vsel %vm7929_vm5, %v3759_v48, -inf  ;;  %v3648_v45 = vmax.f32 %v3646_v33, %v3647_v52  ;;  %v3656_v56 = vmin.f32 %v3654_v29, %v3655_v55  ;;  %vm7930_vm8 = vmmov %vm7929_vm5  ;;  %v3715_v0 = vmin.f32 %v3713_v28, %v3714_v18 }
 0x26e   :  { %v3763_v61 = vrot.slane %v3762_v60, 4  ;;  %v3770_v47 = vsel %vm7930_vm8, %v3761_v46, inf  ;;  %v3708_v44 = vrot.slane %v3707_v54, 2  ;;  %v3811_v43 = vmul.f32 %v4480_v7, %v7112_v63  ;;  %vm7934_vm14 = vmmov %vm7929_vm5 }
 0x26f   :  { %v3771_v59 = vrot.slane %v3770_v47, 4  ;;  %v3649_v6 = vrot.slane %v3648_v45, 1  ;;  %v3716_v14 = vrot.slane %v3715_v0, 2  ;;  %v3657_v9 = vrot.slane %v3656_v56, 1  ;;  %vm7935_vm10 = vmmov %vm7929_vm5 }
 0x270   :  { %v3709_v57 = vmax.f32 %v3707_v54, %v3708_v44  ;;  %v3764_v41 = vmax.f32 %v3762_v60, %v3763_v61  ;;  %vm3812_vm3 = vcmp.lt.f32.partialorder %v7134_v20, 0.0  ;;  %v3815_v25 = vsel %vm3814_vm2, 2.0, %v7794_v39  ;;  %vm7936_vm11 = vmmov %vm7930_vm8 }
 0x271   :  { %v2951_v42 = vand.u32 2147483647, %v7933_v19  ;;  %v3717_v1 = vmin.f32 %v3715_v0, %v3716_v14  ;;  %v3628_v50 = vmul.f32 %v3627_v17, %v7115_v24  ;;  %v3772_v40 = vmin.f32 %v3770_v47, %v3771_v59 }
 0x272   :  { %v3710_v53 = vrot.slane %v3709_v57, 1  ;;  %vm3817_vm15 = vcmp.gt.f32.partialorder %v7134_v20, 0.0  ;;  %4483 = vrcp.f32 %v3873_v21  ;;  %v3630_v29 = vmul.f32 %v3629_v36, %v7121_v30 }
 0x273   :  { %v3650_v63 = vmax.f32 %v3648_v45, %v3649_v6  ;;  %v3816_v10 = vsel %vm3812_vm3, %v3811_v43, %v3815_v25  ;;  %v7243_v8 = vsub.f32 %v7180_v49, %v7227_v12  ;;  %v3658_v51 = vmin.f32 %v3656_v56, %v3657_v9 }
 0x274   :  { %v3718_v48 = vrot.slane %v3717_v1, 1  ;;  %v3765_v52 = vrot.slane %v3764_v41, 2  ;;  %v3661_v24 = vrot.slane %v6939_v34, 7  ;;  %v3665_v20 = vrot.slane %v6946_v37, 7 }
 0x275   :  { %v3711_v55 = vmax.f32 %v3709_v57, %v3710_v53  ;;  %v3818_v11 = vsel %vm3817_vm15, %v3811_v43, 1.0  ;;  %v3773_v46 = vrot.slane %v3772_v40, 2  ;;  %v3819_v60 = vsel %vm7934_vm14, %v3816_v10, -inf }
 0x276   :  { %v4482_v33 = vpop.eup %4481  ;;  %v3719_v28 = vmin.f32 %v3717_v1, %v3718_v48  ;;  %v7254_v45 = vsub.f32 %v3628_v50, %v3630_v29  ;;  %v3835_v15 = vrot.slane %v6939_v34, 3  ;;  %vm3925_vm6 = vcmp.eq.f32.partialorder %v7243_v8, 0.0 }
 0x277   :  { %v3558_v16 = vmul.f32 %v4482_v33, %v3548_v4  ;;  %v3838_v4 = vrot.slane %v6946_v37, 3  ;;  %v7259_v54 = vmax.f32 %v3650_v63, 0.0  ;;  %v7261_v18 = vmin.f32 %v3658_v51, 1.0 }
 0x278   :  { %v3766_v7 = vmax.f32 %v3764_v41, %v3765_v52  ;;  %v3827_v58 = vsel %vm7935_vm10, %v3818_v11, inf  ;;  %v7265_v56 = vsub.f32 %v6939_v34, %v3661_v24  ;;  %v7268_v61 = vsub.f32 %v6946_v37, %v3665_v20 }
 0x279   :  { %v7251_v30 = vsel %vm7207_vm0, %v3558_v16, 0.0  ;;  %v7270_v47 = vmax.f32 %v3711_v55, 0.0  ;;  %v3820_v26 = vrot.slane %v3819_v60, 4  ;;  %v7272_v17 = vmin.f32 %v3719_v28, 1.0 }
 0x27a   :  { %v3774_v44 = vmin.f32 %v3772_v40, %v3773_v46  ;;  %vm3877_vm1 = vcmp.lt.f32.partialorder %v7163_v62, 0.0  ;;  %v3926_v0 = vsel %vm3925_vm6, 1.0, %v7243_v8  ;;  %v3828_v23 = vrot.slane %v3827_v58, 4 }
 0x27b   :  { %v7279_v36 = vsub.f32 %v6939_v34, %v3835_v15  ;;  %v7282_v59 = vsub.f32 %v6946_v37, %v3838_v4  ;;  %vm3930_vm4 = vcmp.lt.f32.partialorder %v7180_v49, 0.0  ;;  %v3668_v6 = vmul.f32 %v7265_v56, %v7259_v54  ;;  %vm3878_vm7 = vmand %vm3872_vm12, %vm3877_vm1 }
 0x27c   :  { %v4484_v21 = vpop.eup %4483  ;;  %v3683_v57 = vmul.f32 %v7268_v61, %v7261_v18  ;;  %v3767_v14 = vrot.slane %v3766_v7, 1  ;;  %vm3876_vm0 = vcmp.lt.f32.partialorder %v7201_v13, 0.0  ;;  %v3721_v43 = vmul.f32 %v7270_v47, %v7265_v56  ;;  %vm3931_vm12 = vmand %vm3925_vm6, %vm3930_vm4 }
 0x27d   :  { %v3726_v9 = vmul.f32 %v7270_v47, %v7268_v61  ;;  %v3821_v41 = vmax.f32 %v3819_v60, %v3820_v26  ;;  %4485 = vrcp.f32 %v3926_v0  ;;  %v3673_v25 = vmul.f32 %v7268_v61, %v7259_v54  ;;  %vm7937_vm6 = vmmov %vm7930_vm8 }
 0x27e   :  { %v3731_v53 = vmul.f32 %v7272_v17, %v7265_v56  ;;  %v3736_v1 = vmul.f32 %v7272_v17, %v7268_v61  ;;  %v3775_v50 = vrot.slane %v3774_v44, 1  ;;  %v3678_v40 = vmul.f32 %v7265_v56, %v7261_v18  ;;  %vm7938_vm10 = vmmov %vm7937_vm6 }
 0x27f   :  { %v3829_v33 = vmin.f32 %v3827_v58, %v3828_v23  ;;  %v3875_v29 = vmul.f32 %v4484_v21, %v7163_v62  ;;  %vm3881_vm9 = vcmp.gt.f32.partialorder %v7201_v13, 0.0  ;;  %v3670_v63 = vrot.slane %v3668_v6, 1 }
 0x280   :  { %v3685_v10 = vrot.slane %v3683_v57, 1  ;;  %v3768_v16 = vmax.f32 %v3766_v7, %v3767_v14  ;;  %v3879_v51 = vsel %vm3878_vm7, 2.0, %v7794_v39  ;;  %v3723_v48 = vrot.slane %v3721_v43, 1 }
 0x281   :  { %v3728_v52 = vrot.slane %v3726_v9, 1  ;;  %v3822_v24 = vrot.slane %v3821_v41, 2  ;;  %v7309_v20 = vsub.f32 %v7227_v12, %v7254_v45  ;;  %v3675_v55 = vrot.slane %v3673_v25, 1 }
 0x282   :  { %v3733_v11 = vrot.slane %v3731_v53, 1  ;;  %v3738_v28 = vrot.slane %v3736_v1, 1  ;;  %v3776_v46 = vmin.f32 %v3774_v44, %v3775_v50  ;;  %vm3929_vm5 = vcmp.lt.f32.partialorder %v7243_v8, 0.0 }
 0x283   :  { %v3680_v60 = vrot.slane %v3678_v40, 1  ;;  %v3830_v15 = vrot.slane %v3829_v33, 2  ;;  %v3880_v4 = vsel %vm3876_vm0, %v3875_v29, %v3879_v51  ;;  %v3882_v7 = vsel %vm3881_vm9, %v3875_v29, 1.0 }
 0x284   :  { %v3672_v58 = vadd.f32 %v3670_v63, %v6939_v34  ;;  %v3687_v26 = vadd.f32 %v3685_v10, %v6946_v37  ;;  %v7318_v0 = vmax.f32 %v3768_v16, 0.0  ;;  %v3883_v23 = vsel %vm7936_vm11, %v3880_v4, -inf  ;;  %vm7941_vm11 = vmmov %vm7937_vm6 }
 0x285   :  { %v3725_v44 = vadd.f32 %v3723_v48, %v6939_v34  ;;  %v3730_v21 = vadd.f32 %v3728_v52, %v6946_v37  ;;  %v3823_v6 = vmax.f32 %v3821_v41, %v3822_v24  ;;  %v3884_v57 = vrot.slane %v3883_v23, 4 }
 0x286   :  { %v3735_v13 = vadd.f32 %v3733_v11, %v6939_v34  ;;  %v3740_v14 = vadd.f32 %v3738_v28, %v6946_v37  ;;  %v7329_v43 = vmin.f32 %v3776_v46, 1.0  ;;  %v3891_v9 = vsel %vm7930_vm8, %v3882_v7, inf }
 0x287   :  { %v4486_v25 = vpop.eup %4485  ;;  %v3677_v53 = vadd.f32 %v3675_v55, %v6946_v37  ;;  %v3682_v1 = vadd.f32 %v3680_v60, %v6939_v34  ;;  %v3831_v41 = vmin.f32 %v3829_v33, %v3830_v15  ;;  %v3885_v50 = vmax.f32 %v3883_v23, %v3884_v57 }
 0x288   :  { %v3778_v40 = vmul.f32 %v7318_v0, %v7265_v56  ;;  %v3783_v29 = vmul.f32 %v7318_v0, %v7268_v61  ;;  %v3932_v63 = vsel %vm3931_vm12, 2.0, %v7794_v39  ;;  %vm3934_vm2 = vcmp.gt.f32.partialorder %v7243_v8, 0.0 }
 0x289   :  { %v3689_v10 = vmul.f32 %v3687_v26, %v3672_v58  ;;  %v3824_v16 = vrot.slane %v3823_v6, 1  ;;  %v3892_v51 = vrot.slane %v3891_v9, 4  ;;  %vm3982_vm3 = vcmp.eq.f32.partialorder %v7309_v20, 0.0 }
 0x28a   :  { %v3742_v48 = vmul.f32 %v3740_v14, %v3725_v44  ;;  %v3743_v52 = vmul.f32 %v3735_v13, %v3730_v21  ;;  %v3788_v33 = vmul.f32 %v7329_v43, %v7265_v56  ;;  %v3793_v24 = vmul.f32 %v7329_v43, %v7268_v61 }
 0x28b   :  { %v3690_v55 = vmul.f32 %v3682_v1, %v3677_v53  ;;  %v3832_v11 = vrot.slane %v3831_v41, 1  ;;  %v3886_v28 = vrot.slane %v3885_v50, 2  ;;  %v3928_v46 = vmul.f32 %v4486_v25, %v7180_v49 }
 0x28c   :  { %vm3741_vm15 = vcmp.lt.f32.partialorder %v7270_v47, %v7272_v17  ;;  %v3780_v60 = vrot.slane %v3778_v40, 1  ;;  %v3785_v15 = vrot.slane %v3783_v29, 1  ;;  %v3893_v4 = vmin.f32 %v3891_v9, %v3892_v51 }
 0x28d   :  { %vm3987_vm14 = vcmp.lt.f32.partialorder %v7227_v12, 0.0  ;;  %v3825_v7 = vmax.f32 %v3823_v6, %v3824_v16  ;;  %v3933_v56 = vsel %vm3929_vm5, %v3928_v46, %v3932_v63  ;;  %v3935_v61 = vsel %vm3934_vm2, %v3928_v46, 1.0 }
 0x28e   :  { %v3983_v58 = vsel %vm3982_vm3, 1.0, %v7309_v20  ;;  %v3744_v49 = vsub.f32 %v3742_v48, %v3743_v52  ;;  %v3790_v26 = vrot.slane %v3788_v33, 1  ;;  %v3795_v23 = vrot.slane %v3793_v24, 1  ;;  %vm3988_vm7 = vmand %vm3982_vm3, %vm3987_vm14 }
 0x28f   :  { %v3936_v44 = vsel %vm7937_vm6, %v3933_v56, -inf  ;;  %v3833_v21 = vmin.f32 %v3831_v41, %v3832_v11  ;;  %v3887_v57 = vmax.f32 %v3885_v50, %v3886_v28  ;;  %v3944_v6 = vsel %vm7938_vm10, %v3935_v61, inf }
 0x290   :  { %v3937_v13 = vrot.slane %v3936_v44, 4  ;;  %vm3688_vm1 = vcmp.lt.f32.partialorder %v7259_v54, %v7261_v18  ;;  %v3894_v14 = vrot.slane %v3893_v4, 2  ;;  %v3945_v8 = vrot.slane %v3944_v6, 4 }
 0x291   :  { %4487 = vrcp.f32 %v3983_v58  ;;  %v3691_v9 = vsub.f32 %v3689_v10, %v3690_v55  ;;  %v3782_v25 = vadd.f32 %v3780_v60, %v6939_v34  ;;  %v7361_v53 = vmax.f32 %v3825_v7, 0.0 }
 0x292   :  { %v3938_v1 = vmax.f32 %v3936_v44, %v3937_v13  ;;  %v7366_v41 = vsel %vm3741_vm15, %v3744_v49, 0.0  ;;  %v3787_v50 = vadd.f32 %v3785_v15, %v6946_v37  ;;  %v3946_v40 = vmin.f32 %v3944_v6, %v3945_v8 }
 0x293   :  { %v7371_v29 = vsub.f32 %v7254_v45, %v7163_v62  ;;  %v3792_v63 = vadd.f32 %v3790_v26, %v6939_v34  ;;  %v3797_v10 = vadd.f32 %v3795_v23, %v6946_v37  ;;  %v7375_v16 = vmin.f32 %v3833_v21, 1.0 }
 0x294   :  { %v3888_v51 = vrot.slane %v3887_v57, 1  ;;  %v3895_v48 = vmin.f32 %v3893_v4, %v3894_v14  ;;  %v3939_v52 = vrot.slane %v3938_v1, 2  ;;  %v3947_v33 = vrot.slane %v3946_v40, 2 }
 0x295   :  { %vm4039_vm4 = vcmp.eq.f32.partialorder %v7371_v29, 0.0  ;;  %v7381_v47 = vsel %vm3688_vm1, %v3691_v9, 0.0  ;;  %v3841_v62 = vmul.f32 %v7279_v36, %v7361_v53  ;;  %v3846_v17 = vmul.f32 %v7282_v59, %v7361_v53  ;;  %vm7946_vm1 = vmmov %vm7938_vm10 }
 0x296   :  { %vm3986_vm0 = vcmp.lt.f32.partialorder %v7309_v20, 0.0  ;;  %v3747_v24 = vrot.slane %v7366_v41, 1  ;;  %v3940_v55 = vmax.f32 %v3938_v1, %v3939_v52  ;;  %v3948_v11 = vmin.f32 %v3946_v40, %v3947_v33 }
 0x297   :  { %v4040_v28 = vsel %vm4039_vm4, 1.0, %v7371_v29  ;;  %v7392_v46 = vmul.f32 %v3797_v10, %v3782_v25  ;;  %v7394_v54 = vmul.f32 %v3792_v63, %v3787_v50  ;;  %v3851_v18 = vmul.f32 %v7279_v36, %v7375_v16 }
 0x298   :  { %v3856_v60 = vmul.f32 %v7282_v59, %v7375_v16  ;;  %v3889_v15 = vmax.f32 %v3887_v57, %v3888_v51  ;;  %v3896_v4 = vrot.slane %v3895_v48, 1  ;;  %v3941_v7 = vrot.slane %v3940_v55, 1 }
 0x299   :  { %v3949_v56 = vrot.slane %v3948_v11, 1  ;;  %v3843_v61 = vrot.slane %v3841_v62, 5  ;;  %v3848_v58 = vrot.slane %v3846_v17, 5  ;;  %4489 = vrcp.f32 %v4040_v28 }
 0x29a   :  { %v4106_v49 = vrot.slane %v6356_v35, 2  ;;  %v3942_v23 = vmax.f32 %v3940_v55, %v3941_v7  ;;  %v3989_v44 = vsel %vm3988_vm7, 2.0, %v7794_v39  ;;  %vm3991_vm9 = vcmp.gt.f32.partialorder %v7309_v20, 0.0 }
 0x29b   :  { %v4488_v26 = vpop.eup %4487  ;;  %v3950_v36 = vmin.f32 %v3948_v11, %v3949_v56  ;;  %v3853_v59 = vrot.slane %v3851_v18, 5  ;;  %v7939_v13 = vmov 0   ;;  %v3858_v14 = vrot.slane %v3856_v60, 5 }
 0x29c   :  { %v3985_v21 = vmul.f32 %v4488_v26, %v7227_v12  ;;  %v7410_v57 = vadd.f32 %v4106_v49, %v2951_v42  ;;  %v4114_v6 = vsel %vm3555_vm13, 1, %v7939_v13  ;;  %v7415_v8 = vmax.f32 %v3889_v15, 0.0  ;;  %vm7940_vm13 = vmmov %vm7937_vm6 }
 0x29d   :  { %v3897_v9 = vmin.f32 %v3895_v48, %v3896_v4  ;;  %v7417_v25 = vmax.f32 %v3942_v23, 0.0  ;;  %vm4044_vm5 = vcmp.lt.f32.partialorder %v7254_v45, 0.0  ;;  %v4115_v12 = vrot.slane %v4114_v6, 2 }
 0x29e   :  { %v3990_v1 = vsel %vm3986_vm0, %v3985_v21, %v3989_v44  ;;  %v3992_v50 = vsel %vm3991_vm9, %v3985_v21, 1.0  ;;  %v3801_v40 = vsub.f32 %v7392_v46, %v7394_v54  ;;  %v7425_v63 = vadd.f32 %v3843_v61, %v6939_v34  ;;  %vm4045_vm8 = vmand %vm4039_vm4, %vm4044_vm5 }
 0x29f   :  { %v7428_v35 = vadd.f32 %v3848_v58, %v6946_v37  ;;  %v7430_v10 = vmin.f32 %v3950_v36, 1.0  ;;  %v7433_v51 = vadd.f32 %v3853_v59, %v6939_v34  ;;  %v3993_v20 = vsel %vm7940_vm13, %v3990_v1, -inf }
 0x2a0   :  { %v4001_v48 = vsel %vm7941_vm11, %v3992_v50, inf  ;;  %vm7439_vm12 = vcmp.gt.f32.partialorder %v2951_v42, 0.0  ;;  %v3860_v33 = vadd.f32 %v3858_v14, %v6946_v37  ;;  %v7444_v62 = vmin.f32 %v3897_v9, 1.0 }
 0x2a1   :  { %v3899_v17 = vmul.f32 %v7415_v8, %v6585_v5  ;;  %v3952_v34 = vmul.f32 %v7417_v25, %v6585_v5  ;;  %v3957_v19 = vmul.f32 %v7417_v25, %v6588_v2  ;;  %v3994_v42 = vrot.slane %v3993_v20, 4 }
 0x2a2   :  { %v4002_v55 = vrot.slane %v4001_v48, 4  ;;  %vm7454_vm2 = vcmp.ne.s32.totalorder %v4115_v12, 0  ;;  %v3904_v37 = vmul.f32 %v7415_v8, %v6588_v2  ;;  %v3962_v28 = vmul.f32 %v7430_v10, %v6585_v5 }
 0x2a3   :  { %v3967_v18 = vmul.f32 %v7430_v10, %v6588_v2  ;;  %vm4043_vm3 = vcmp.lt.f32.partialorder %v7371_v29, 0.0  ;;  %vm4117_vm15 = vmand %vm7439_vm12, %vm7454_vm2  ;;  %v4490_v60 = vpop.eup %4489  ;;  %v3995_v15 = vmax.f32 %v3993_v20, %v3994_v42  ;;  %v4046_v7 = vsel %vm4045_vm8, 2.0, %v7794_v39 }
 0x2a4   :  { %v4003_v4 = vmin.f32 %v4001_v48, %v4002_v55  ;;  %vm4048_vm14 = vcmp.gt.f32.partialorder %v7371_v29, 0.0  ;;  %v3901_v56 = vrot.slane %v3899_v17, 1  ;;  %v3909_v61 = vmul.f32 %v7444_v62, %v6585_v5 }
 0x2a5   :  { %v3914_v58 = vmul.f32 %v7444_v62, %v6588_v2  ;;  %v4042_v49 = vmul.f32 %v4490_v60, %v7254_v45  ;;  %v3954_v26 = vrot.slane %v3952_v34, 1  ;;  %v3959_v23 = vrot.slane %v3957_v19, 1 }
 0x2a6   :  { %v3996_v36 = vrot.slane %v3995_v15, 2  ;;  %v4004_v44 = vrot.slane %v4003_v4, 2  ;;  %v3964_v59 = vrot.slane %v3962_v28, 1  ;;  %v3969_v21 = vrot.slane %v3967_v18, 1 }
 0x2a7   :  { %v4047_v39 = vsel %vm4043_vm3, %v4042_v49, %v4046_v7  ;;  %v4049_v13 = vsel %vm4048_vm14, %v4042_v49, 1.0  ;;  %vm3798_vm6 = vcmp.lt.f32.partialorder %v7318_v0, %v7329_v43  ;;  %v3906_v6 = vrot.slane %v3904_v37, 1 }
 0x2a8   :  { %v3997_v14 = vmax.f32 %v3995_v15, %v3996_v36  ;;  %v4005_v9 = vmin.f32 %v4003_v4, %v4004_v44  ;;  %v4050_v1 = vsel %vm7938_vm10, %v4047_v39, -inf  ;;  %v3911_v50 = vrot.slane %v3909_v61, 1 }
 0x2a9   :  { %v3916_v45 = vrot.slane %v3914_v58, 1  ;;  %v4051_v12 = vrot.slane %v4050_v1, 4  ;;  %v4058_v20 = vsel %vm7946_vm1, %v4049_v13, inf  ;;  %v3956_v48 = vadd.f32 %v3954_v26, %v7898_v27 }
 0x2aa   :  { %v3998_v17 = vrot.slane %v3997_v14, 1  ;;  %v4006_v34 = vrot.slane %v4005_v9, 1  ;;  %v4059_v29 = vrot.slane %v4058_v20, 4  ;;  %v3961_v19 = vadd.f32 %v3959_v23, %v7899_v22 }
 0x2ab   :  { %v3966_v42 = vadd.f32 %v3964_v59, %v7898_v27  ;;  %v3971_v55 = vadd.f32 %v3969_v21, %v7899_v22  ;;  %v4052_v37 = vmax.f32 %v4050_v1, %v4051_v12  ;;  %v3903_v28 = vadd.f32 %v3901_v56, %v7898_v27 }
 0x2ac   :  { %v3999_v18 = vmax.f32 %v3997_v14, %v3998_v17  ;;  %v4007_v60 = vmin.f32 %v4005_v9, %v4006_v34  ;;  %v4060_v15 = vmin.f32 %v4058_v20, %v4059_v29  ;;  %v3908_v4 = vadd.f32 %v3906_v6, %v7899_v22 }
 0x2ad   :  { %v3913_v7 = vadd.f32 %v3911_v50, %v7898_v27  ;;  %v3918_v61 = vadd.f32 %v3916_v45, %v7899_v22  ;;  %v4053_v58 = vrot.slane %v4052_v37, 2  ;;  %v3862_v49 = vmul.f32 %v3860_v33, %v7425_v63 }
 0x2ae   :  { %v4000_v26 = vmax.f32 %v3999_v18, 0.0  ;;  %v4008_v23 = vmin.f32 %v4007_v60, 1.0  ;;  %v4061_v36 = vrot.slane %v4060_v15, 2  ;;  %vm3861_vm4 = vcmp.lt.f32.partialorder %v7361_v53, %v7375_v16  ;;  %v7529_v60 = vld [vmem:[%s7651_s1 + $0x20] sm:$0xff] }
 0x2af   :  { %v3863_v56 = vmul.f32 %v7433_v51, %v7428_v35  ;;  %v3973_v44 = vmul.f32 %v3971_v55, %v3956_v48  ;;  %v3974_v59 = vmul.f32 %v3966_v42, %v3961_v19  ;;  %v4054_v21 = vmax.f32 %v4052_v37, %v4053_v58 }
 0x2b0   :  { %v4009_v39 = vmul.f32 %v4000_v26, %v6585_v5  ;;  %v4014_v13 = vmul.f32 %v4000_v26, %v6588_v2  ;;  %v4019_v6 = vmul.f32 %v4008_v23, %v6585_v5  ;;  %v4024_v63 = vmul.f32 %v4008_v23, %v6588_v2 }
 0x2b1   :  { %v3920_v33 = vmul.f32 %v3918_v61, %v3903_v28  ;;  %v3921_v14 = vmul.f32 %v3913_v7, %v3908_v4  ;;  %v4055_v9 = vrot.slane %v4054_v21, 1  ;;  %v4062_v1 = vmin.f32 %v4060_v15, %v4061_v36  ;;  %v7518_v28 = vld [vmem:[%s7650_s0 + $0x20] sm:$0xff] }
 0x2b2   :  { %v4011_v50 = vrot.slane %v4009_v39, 1  ;;  %v4016_v45 = vrot.slane %v4014_v13, 1  ;;  %v4021_v12 = vrot.slane %v4019_v6, 1  ;;  %v4026_v20 = vrot.slane %v4024_v63, 1 }
 0x2b3   :  { %v3802_v35 = vsel %vm3798_vm6, %v3801_v40, 0.0  ;;  %v3975_v51 = vsub.f32 %v3973_v44, %v3974_v59  ;;  %v4056_v48 = vmax.f32 %v4054_v21, %v4055_v9  ;;  %v4063_v5 = vrot.slane %v4062_v1, 1 }
 0x2b4   :  { %v4013_v2 = vadd.f32 %v4011_v50, %v7898_v27  ;;  %v4018_v17 = vadd.f32 %v4016_v45, %v7899_v22  ;;  %v4023_v34 = vadd.f32 %v4021_v12, %v7898_v27  ;;  %v4028_v29 = vadd.f32 %v4026_v20, %v7899_v22 }
 0x2b5   :  { %v3864_v19 = vsub.f32 %v3862_v49, %v3863_v56  ;;  %vm3972_vm0 = vcmp.lt.f32.partialorder %v7417_v25, %v7430_v10  ;;  %v4057_v46 = vmax.f32 %v4056_v48, 0.0  ;;  %v4064_v54 = vmin.f32 %v4062_v1, %v4063_v5  ;;  %v7524_v25 = vld [vmem:[%s7651_s1 + $0x28] sm:$0xf]  ;;  %v4346_v5 = vld [vmem:[%s7650_s0 + $0x34] sm:$0xff] }
 0x2b6   :  { %vm3919_vm7 = vcmp.lt.f32.partialorder %v7415_v8, %v7444_v62  ;;  %v3922_v0 = vsub.f32 %v3920_v33, %v3921_v14  ;;  %v4030_v43 = vmul.f32 %v4028_v29, %v4013_v2  ;;  %v4031_v40 = vmul.f32 %v4023_v34, %v4018_v17  ;;  %v7543_v56 = vld [vmem:[%s7650_s0 + $0x28] sm:$0xf]  ;;  %v4348_v2 = vld [vmem:[%s7651_s1 + $0x2c] sm:$0xff]  ;;  %v4349_v17 = vld [vmem:[%s7651_s1 + $0x34] sm:$0xff] }
 0x2b7   :  { %v4065_v42 = vmin.f32 %v4064_v54, 1.0  ;;  %v4066_v55 = vmul.f32 %v4057_v46, %v7910_v3  ;;  %v4071_v37 = vmul.f32 %v4057_v46, %v7911_v32  ;;  %4491 = vrsqrt.f32 %v7518_v28 }
 0x2b8   :  { %v3976_v10 = vsel %vm3972_vm0, %v3975_v51, 0.0  ;;  %vm4029_vm9 = vcmp.lt.f32.partialorder %v4000_v26, %v4008_v23  ;;  %v4032_v18 = vsub.f32 %v4030_v43, %v4031_v40  ;;  %4493 = vrsqrt.f32 %v7529_v60  ;;  %v4345_v51 = vld [vmem:[%s7650_s0 + $0x2c] sm:$0xff] }
 0x2b9   :  { %v4068_v15 = vrot.slane %v4066_v55, 5  ;;  %v4073_v4 = vrot.slane %v4071_v37, 5  ;;  %v4076_v7 = vmul.f32 %v4065_v42, %v7910_v3  ;;  %v4081_v61 = vmul.f32 %v4065_v42, %v7911_v32  ;;  %v4350_v55 = vld [vmem:[%s7651_s1 + $0x3c] sm:$0x3] }
 0x2ba   :  { %v3749_v58 = vadd.f32 %v3747_v24, %v7381_v47  ;;  %v3804_v49 = vrot.slane %v3802_v35, 2  ;;  %v3865_v36 = vsel %vm3861_vm4, %v3864_v19, 0.0  ;;  %4495 = vrsqrt.f32 %v7543_v56 }
 0x2bb   :  { %v3978_v44 = vrot.slane %v3976_v10, 1  ;;  %v4075_v3 = vadd.f32 %v4073_v4, %v7899_v22  ;;  %v4078_v32 = vrot.slane %v4076_v7, 5  ;;  %4497 = vrsqrt.f32 %v7524_v25 }
 0x2bc   :  { %v3923_v41 = vsel %vm3919_vm7, %v3922_v0, 0.0  ;;  %v4033_v53 = vsel %vm4029_vm9, %v4032_v18, 0.0  ;;  %v4070_v16 = vadd.f32 %v4068_v15, %v7898_v27  ;;  %v4083_v47 = vrot.slane %v4081_v61, 5 }
 0x2bd   :  { %v4080_v24 = vadd.f32 %v4078_v32, %v7898_v27  ;;  %v3806_v59 = vadd.f32 %v3804_v49, %v3749_v58  ;;  %v3867_v21 = vrot.slane %v3865_v36, 3  ;;  %v3980_v13 = vadd.f32 %v3978_v44, %v3923_v41 }
 0x2be   :  { %v4085_v39 = vadd.f32 %v4083_v47, %v7899_v22  ;;  %v4035_v6 = vrot.slane %v4033_v53, 2  ;;  %vm4086_vm5 = vcmp.lt.f32.partialorder %v4057_v46, %v4065_v42  ;;  %vm4129_vm13 = vcmp.eq.f32.partialorder %v7518_v28, inf  ;;  %v4347_v42 = vld [vmem:[%s7650_s0 + $0x3c] sm:$0x3] }
 0x2bf   :  { %v4088_v63 = vmul.f32 %v4080_v24, %v4075_v3  ;;  %v3869_v8 = vadd.f32 %v3867_v21, %v3806_v59  ;;  %vm4131_vm11 = vcmp.eq.f32.partialorder %v7518_v28, 0.0  ;;  %vm4136_vm8 = vcmp.eq.f32.partialorder %v7529_v60, inf }
 0x2c0   :  { %v4087_v33 = vmul.f32 %v4085_v39, %v4070_v16  ;;  %v4037_v26 = vadd.f32 %v4035_v6, %v3980_v13  ;;  %v4132_v48 = vand.u32 2147483648, %v7518_v28  ;;  %vm4138_vm3 = vcmp.eq.f32.partialorder %v7529_v60, 0.0 }
 0x2c1   :  { %v4492_v14 = vpop.eup %4491  ;;  %v3870_v27 = vmul.f32 %v3869_v8, %v7912_v38  ;;  %vm4158_vm14 = vcmp.eq.f32.partialorder %v7543_v56, inf  ;;  %v4139_v29 = vand.u32 2147483648, %v7529_v60  ;;  %vm4160_vm6 = vcmp.eq.f32.partialorder %v7543_v56, 0.0 }
 0x2c2   :  { %v4494_v9 = vpop.eup %4493  ;;  %v4089_v62 = vsub.f32 %v4087_v33, %v4088_v63  ;;  %v4128_v12 = vmul.f32 %v7518_v28, %v4492_v14  ;;  %vm4165_vm10 = vcmp.eq.f32.partialorder %v7524_v25, inf  ;;  %v4161_v54 = vand.u32 2147483648, %v7543_v56 }
 0x2c3   :  { %v4135_v22 = vmul.f32 %v7529_v60, %v4494_v9  ;;  %v4168_v0 = vand.u32 2147483648, %v7524_v25  ;;  %v4231_v37 = vsub.f32 %v4345_v51, %v4348_v2  ;;  %v4232_v10 = vsub.f32 %v4346_v5, %v4349_v17 }
 0x2c4   :  { %v4496_v23 = vpop.eup %4495  ;;  %v4090_v1 = vsel %vm4086_vm5, %v4089_v62, 0.0  ;;  %v4130_v19 = vsel %vm4129_vm13, %v7518_v28, %v4128_v12  ;;  %vm4167_vm1 = vcmp.eq.f32.partialorder %v7524_v25, 0.0  ;;  %v4233_v58 = vsub.f32 %v4347_v42, %v4350_v55 }
 0x2c5   :  { %v4498_v50 = vpop.eup %4497  ;;  %v4092_v45 = vrot.slane %v4090_v1, 3  ;;  %v4157_v35 = vmul.f32 %v7543_v56, %v4496_v23  ;;  %v4137_v46 = vsel %vm4136_vm8, %v7529_v60, %v4135_v22  ;;  %v4133_v4 = vsel %vm4131_vm11, %v4132_v48, %v4130_v19 }
 0x2c6   :  { %v4164_v38 = vmul.f32 %v4498_v50, %v7524_v25  ;;  %v4140_v7 = vsel %vm4138_vm3, %v4139_v29, %v4137_v46  ;;  %v4234_v44 = vmul.f32 %v4231_v37, %v4231_v37  ;;  %v4235_v3 = vmul.f32 %v4232_v10, %v4232_v10 }
 0x2c7   :  { %v4094_v20 = vadd.f32 %v4092_v45, %v4037_v26  ;;  %v4159_v40 = vsel %vm4158_vm14, %v7543_v56, %v4157_v35  ;;  %v4141_v53 = vsub.f32 %v4133_v4, %v4140_v7  ;;  %v4236_v24 = vmul.f32 %v4233_v58, %v4233_v58 }
 0x2c8   :  { %v4166_v18 = vsel %vm4165_vm10, %v7524_v25, %v4164_v38  ;;  %v4162_v61 = vsel %vm4160_vm6, %v4161_v54, %v4159_v40  ;;  %vm7947_vm4 = vcmask 400384   ;;  %vm7949_vm9 = vcmask 394240  }
 0x2c9   :  { %v4096_v34 = vrot.slane %v4094_v20, 6  ;;  %v4169_v36 = vsel %vm4167_vm1, %v4168_v0, %v4166_v18  ;;  %v4237_v59 = vsel %vm7947_vm4, %v4234_v44, 0.0  ;;  %vm7948_vm0 = vmmov %vm7947_vm4  ;;  %v4142_v6 = vmul.f32 %v4141_v53, %v4141_v53 }
 0x2ca   :  { %v4170_v16 = vsub.f32 %v4162_v61, %v4169_v36  ;;  %v4238_v21 = vsel %vm7948_vm0, %v4235_v3, 0.0  ;;  %v4240_v14 = vsel %vm7949_vm9, %v4236_v24, 0.0  ;;  %v4180_v1 = vsub.f32 %v7543_v56, %v7524_v25 }
 0x2cb   :  { %v4098_v43 = vmul.f32 %v4096_v34, %v7918_v31  ;;  %v4121_v31 = vsub.f32 %v7518_v28, %v7529_v60  ;;  %v4239_v63 = vadd.f32 %v4238_v21, %v4237_v59  ;;  %v4188_v50 = vrot.slane %v7251_v30, 5 }
 0x2cc   :  { %v4171_v33 = vmul.f32 %v4170_v16, %v4170_v16  ;;  %v4181_v22 = vmul.f32 %v4180_v1, %v4180_v1  ;;  %v4249_v3 = vmul.f32 %v7518_v28, %v7518_v28  ;;  %vm4256_vm2 = vcmp.eq.f32.partialorder %v7529_v60, 1.0 }
 0x2cd   :  { %v4100_v15 = vrot.slane %v4098_v43, 2  ;;  %v4122_v41 = vmul.f32 %v4121_v31, %v4121_v31  ;;  %v4241_v26 = vadd.f32 %v4240_v14, %v4239_v63  ;;  %v4190_v20 = vsub.f32 %v7518_v28, %v4188_v50  ;;  %v2146_v14 = vpop.xlane.xlu0 %2145 }
 0x2ce   :  { %v4173_v23 = vrot.slane %v4171_v33, 2  ;;  %v4176_v11 = vrot.slane %v4171_v33, 3  ;;  %v4182_v2 = vmul.f32 5.0, %v4181_v22  ;;  %v4250_v31 = vmul.f32 %v7543_v56, %v7543_v56 }
 0x2cf   :  { %v4102_v49 = vadd.f32 %v4100_v15, %v3870_v27  ;;  %v4124_v13 = vrot.slane %v4122_v41, 1  ;;  %v4147_v27 = vrot.slane %v4142_v6, 3  ;;  %v4242_v52 = vrot.slane %v4241_v26, 4 }
 0x2d0   :  { %v4151_v51 = vmul.f32 5.0, %v4122_v41  ;;  %v4191_v34 = vmul.f32 %v4190_v20, %v4190_v20  ;;  %v4184_v0 = vrot.slane %v4182_v2, 4 }
 0x2d1   :  { %v4103_v32 = vmul.f32 0.5, %v4102_v49  ;;  %v4126_v62 = vadd.f32 %v4124_v13, %v4122_v41  ;;  %v4243_v48 = vadd.f32 %v4242_v52, %v4241_v26 }
 0x2d2   :  { %v4153_v25 = vrot.slane %v4151_v51, 4  ;;  %v4201_v42 = vrot.slane %v4191_v34, 5  ;;  %v4213_v18 = vmul.f32 0.5, %v4191_v34 }
 0x2d3   :  { %v4104_v47 = vmax.f32 %v4103_v32, 0.0  ;;  %v4175_v12 = vadd.f32 %v4173_v23, %v4126_v62  ;;  %v4244_v46 = vrot.slane %v4243_v48, 2  ;;  %v4252_v32 = vrot.slane %v4250_v31, 6 }
 0x2d4   :  { %v4215_v36 = vrot.slane %v4213_v18, 7 }
 0x2d5   :  { %v4109_v39 = vsub.f32 %v7410_v57, %v4104_v47  ;;  %v4144_v57 = vrot.slane %v4142_v6, 2  ;;  %v4178_v5 = vadd.f32 %v4176_v11, %v4175_v12  ;;  %v4245_v15 = vadd.f32 %v4244_v46, %v4243_v48 }
 0x2d6   :  { %v4254_v24 = vadd.f32 %v4252_v32, %v4249_v3 }
 0x2d7   :  { %vm4110_vm7 = vcmp.gt.f32.partialorder %v4109_v39, 0.0  ;;  %v4146_v45 = vadd.f32 %v4144_v57, %v4126_v62  ;;  %v4179_v54 = vmul.f32 5.0, %v4178_v5  ;;  %v4246_v44 = vrot.slane %v4245_v15, 1 }
 0x2d8   :  { %v4111_v9 = vsel %vm4110_vm7, %v4109_v39, 1.0  ;;  %vm7614_vm5 = vmand %vm4117_vm15, %vm4110_vm7  ;;  %v4255_v13 = vmul.f32 0.5, %v4254_v24  ;;  %vm7954_vm15 = vcmask 393216  }
 0x2d9   :  { %4499 = vrcp.f32 %v4111_v9  ;;  %v4149_v35 = vadd.f32 %v4147_v27, %v4146_v45  ;;  %v4186_v4 = vadd.f32 %v4184_v0, %v4179_v54  ;;  %v2147_v9 = vrot.slane %v2146_v14, 4 }
 0x2db   :  { %v4150_v29 = vmul.f32 5.0, %v4149_v35  ;;  %v2148_v8 = vadd.f32 %v2147_v9, %v2146_v14 }
 0x2dd   :  { %v4155_v55 = vadd.f32 %v4153_v25, %v4150_v29  ;;  %v2149_v62 = vrot.slane %v2148_v8, 2 }
 0x2df   :  { %v4203_v61 = vadd.f32 %v4201_v42, %v4155_v55  ;;  %v2150_v57 = vadd.f32 %v2149_v62, %v2148_v8 }
 0x2e1   :  { %v2151_v26 = vrot.slane %v2150_v57, 1 }
 0x2e3   :  { %v4500_v38 = vpop.eup %4499  ;;  %v2152_v23 = vadd.f32 %v2151_v26, %v2150_v57 }
 0x2e4   :  { %v4119_v17 = vmul.f32 %v4500_v38, %v4104_v47  ;;  %v4247_v47 = vadd.f32 %v4246_v44, %v4245_v15 }
 0x2e5   :  { %4363 = vpush %v2152_v23 }
 0x2e6   :  { %v4120_v19 = vsel %vm7614_vm5, %v4119_v17, 0.0 }
 0x2e7   :  { %v4193_v43 = vrot.slane %v4120_v19, 5  ;;  %v4197_v40 = vrot.slane %v4120_v19, 6 }
 0x2e9   :  { %v4195_v37 = vsub.f32 %v7543_v56, %v4193_v43  ;;  %vm7626_vm12 = vcmp.ge.f32.partialorder %v7251_v30, %v4197_v40 }
 0x2eb   :  { %v4196_v7 = vmul.f32 %v4195_v37, %v4195_v37 }
 0x2ed   :  { %v4204_v58 = vmul.f32 0.5, %v4196_v7  ;;  %v4210_v49 = vrot.slane %v4196_v7, 5 }
 0x2ef   :  { %v4206_v30 = vrot.slane %v4204_v58, 3  ;;  %v4212_v41 = vadd.f32 %v4210_v49, %v4186_v4 }
 0x2f1   :  { %v4208_v53 = vadd.f32 %v4206_v30, %v4203_v61  ;;  %v4217_v16 = vadd.f32 %v4215_v36, %v4212_v41 }
 0x2f3   :  { %v4219_v59 = vrot.slane %v4208_v53, 6  ;;  %v4222_v21 = vrot.slane %v4217_v16, 4 }
 0x2f5   :  { %v4224_v56 = vsel %vm7626_vm12, %v4219_v59, %v4222_v21 }
 0x2f6   :  { %v4248_v39 = vadd.f32 %v4247_v47, %v4224_v56 }
 0x2f8   :  { %v4258_v6 = vrot.slane %v4248_v39, 5 }
 0x2fa   :  { %v4260_v63 = vsel %vm4256_vm2, %v4258_v6, %v4255_v13 }
 0x2fb   :  { %v4262_v33 = vrot.slane %v4260_v63, 5 }
 0x2fd   :  { %v4264_v28 = vsel %vm7954_vm15, %v4262_v33, 0.0 }
 0x2fe   :  { %4265 = vadd.xlane.f32.xlu0 %v4264_v28 }
 0x316   :  { %s4364_s0 = spop %4363 }
 0x38b   :  { %v4266_v1 = vpop.xlane.xlu0 %4265 }
 0x38c   :  { %v4267_v50 = vrot.slane %v4266_v1, 4 }
 0x38e   :  { %v4268_v45 = vadd.f32 %v4267_v50, %v4266_v1 }
 0x390   :  { %v4269_v27 = vrot.slane %v4268_v45, 2 }
 0x392   :  { %v4270_v52 = vadd.f32 %v4269_v27, %v4268_v45 }
 0x394   :  { %v4271_v60 = vrot.slane %v4270_v52, 1 }
 0x396   :  { %v4272_v12 = vadd.f32 %v4271_v60, %v4270_v52 }
 0x398   :  { %4377 = vpush %v4272_v12 }
 0x3c9   :  { %s4378_s1 = spop %4377 }
 0x3ca   :  { %s4274_s5 = sadd.f32 %s4378_s1, %s4364_s0 }
 0x3cc   :  { %s4277_s6 = smul.f32 0.16666667, %s4274_s5 }
 0x3ce   :  { %4279 = sst [smem:[#allocation2]] %s4277_s6 }
 0x3cf   :  { %4516 = shalt.err (!%p4513_p2)
}
 0x3d0   :  { %s4528_s14 = smov [#allocation2]  }
 0x3d1   :  { %4287 = dma.smem_to_hbm %s4528_s14, 16, %s7652_s2, [#allocation3]  }
 0x3d2   :  { %4517 = dma.done.wait [#allocation3], 16  }
 0x3d3   :  { %4518 = vsyncadd [#allocation3], 4294967280 }
 0x3d4   :  { %4291 = sfence }
 0x3d5   :  { %4292 = vsyncpa [#allocation3], 1 }

</bundles_post_ra>
